<compile_context>
chip_gen: v7x
topology: tpu7x:2x2x1
jax: 0.10.0
libtpu: 0.0.40
codegen_flags: <defaults>
</compile_context>

<pallas_src>
import functools

import jax
import jax.numpy as jnp
import numpy as np
from jax import lax
from jax.experimental import pallas as pl
from jax.experimental.pallas import tpu as pltpu


# --------------------------------------------------------------------------
# Helpers
# --------------------------------------------------------------------------
def _layernorm(x, gamma, beta, eps=1e-5):
    mean = jnp.mean(x, axis=-1, keepdims=True)
    var = jnp.mean((x - mean) ** 2, axis=-1, keepdims=True)
    return (x - mean) * jax.lax.rsqrt(var + eps) * gamma + beta


# --------------------------------------------------------------------------
# Kernel
# --------------------------------------------------------------------------
def slot_attention_kernel(
    # inputs
    x_ref, slots_init_ref, vec_ref,
    w_kv_ref, w_q_ref, w_gru_ref, w1_ref, w2_ref,
    # outputs (+ optional attns history output)
    slots_out_ref, attn_out_ref, *maybe_attns,
    num_iterations, num_heads, eps, hid_dim, slot_dim, mlp_dim,
    batch_block, num_slots, with_attns):
    if with_attns:
        (attns_out_ref,) = maybe_attns

    D, H, K, Bb = slot_dim, num_heads, num_slots, batch_block
    Dh = D // H
    M = mlp_dim
    bf16, f32 = jnp.bfloat16, jnp.float32

    # ---- hoisted parameter reads (iteration/batch loops are fully unrolled,
    # so in-loop reads would be re-emitted many times) ----
    ni_g = vec_ref[0:1, :hid_dim]
    ni_b = vec_ref[1:2, :hid_dim]
    ns_g = vec_ref[2:3, :D]
    ns_b = vec_ref[3:4, :D]
    nm_g = vec_ref[4:5, :D]
    nm_b = vec_ref[5:6, :D]
    b_k = vec_ref[6:7, :D]
    b_v = vec_ref[7:8, :D]
    b_q = vec_ref[8:9, :D]              # q scale already folded in
    b_ih = vec_ref[9:10, :3 * D]
    b_hh = vec_ref[10:11, :3 * D]
    b1 = vec_ref[11:12, :M]
    b2 = vec_ref[12:13, :D]

    w_k = w_kv_ref[0]                   # (hid, D) bf16
    w_v = w_kv_ref[1]                   # (hid, D) bf16
    w_q = w_q_ref[...]                  # (D, D)   bf16, scale folded in
    w_ih = w_gru_ref[0]                 # (D, 3D)  bf16
    w_hh = w_gru_ref[1]                 # (D, 3D)  bf16
    w1 = w1_ref[...]                    # (D, M)   bf16
    w2 = w2_ref[...]                    # (M, D)   bf16

    # ---- iteration-invariant input projections (two aligned dots, no lane
    # slicing, no explicit transpose) ----
    x = x_ref[...]                      # (Bb, N, hid) f32
    xn = _layernorm(x, ni_g, ni_b)
    k_bf, v_bf = [], []
    for b in range(Bb):
        xb = xn[b].astype(bf16)                                           # (N, hid)
        k_bf.append((jnp.dot(xb, w_k, preferred_element_type=f32) + b_k).astype(bf16))
        v_bf.append((jnp.dot(xb, w_v, preferred_element_type=f32) + b_v).astype(bf16))

    # Stacked slots: (Bb*K, D) so every slot-side matmul fills >= 8 sublanes.
    slots = slots_init_ref[...]

    for it in range(num_iterations):
        slots_prev = slots

        sn = _layernorm(slots, ns_g, ns_b)
        q_bf = (jnp.dot(sn.astype(bf16), w_q, preferred_element_type=f32)
                + b_q).astype(bf16)                                       # (Bb*K, D)

        upd_rows = []
        for b in range(Bb):
            head_upd = []
            for h in range(H):
                qbh = q_bf[b * K:(b + 1) * K, h * Dh:(h + 1) * Dh]        # (K, Dh)
                kbh = k_bf[b][:, h * Dh:(h + 1) * Dh]                     # (N, Dh)
                vbh = v_bf[b][:, h * Dh:(h + 1) * Dh]                     # (N, Dh)

                # logits (K, N): contract head dims directly ("NT" matmul).
                logits = lax.dot_general(
                    qbh, kbh, (((1,), (1,)), ((), ())),
                    preferred_element_type=f32)
                # Softmax over the slot (sublane) axis; exact division here,
                # approx reciprocal only for the token normalisation below.
                logits = logits - jnp.max(logits, axis=0, keepdims=True)
                e = jnp.exp(logits)
                attn = e / jnp.sum(e, axis=0, keepdims=True) + eps        # (K, N)
                if with_attns:
                    attns_out_ref[b, it, h, :, :] = attn.astype(attns_out_ref.dtype)
                attn_n = attn * pl.reciprocal(
                    jnp.sum(attn, axis=-1, keepdims=True), approx=True)
                if it == num_iterations - 1:
                    attn_out_ref[b, h, :, :] = attn_n
                head_upd.append(jnp.dot(attn_n.astype(bf16), vbh,
                                        preferred_element_type=f32))      # (K, Dh)
            upd_rows.append(head_upd[0] if H == 1
                            else jnp.concatenate(head_upd, axis=1))       # (K, D)
        updates = (upd_rows[0] if Bb == 1
                   else jnp.concatenate(upd_rows, axis=0))                # (Bb*K, D)

        # GRUCell(updates, slots_prev) -- PyTorch gate order [r, z, n]
        gi = jnp.dot(updates.astype(bf16), w_ih, preferred_element_type=f32) + b_ih
        gh = jnp.dot(slots_prev.astype(bf16), w_hh, preferred_element_type=f32) + b_hh
        r = jax.nn.sigmoid(gi[:, :D] + gh[:, :D])
        z = jax.nn.sigmoid(gi[:, D:2 * D] + gh[:, D:2 * D])
        n = jnp.tanh(gi[:, 2 * D:] + r * gh[:, 2 * D:])
        slots = (1.0 - z) * n + z * slots_prev

        # residual MLP:  slots += Linear(ReLU(Linear(LN(slots))))
        mn = _layernorm(slots, nm_g, nm_b)
        h1 = jnp.maximum(
            jnp.dot(mn.astype(bf16), w1, preferred_element_type=f32) + b1, 0.0)
        slots = slots + jnp.dot(h1.astype(bf16), w2, preferred_element_type=f32) + b2

    # Unstack batches back into the (Bb, K, D) output block.
    for b in range(Bb):
        slots_out_ref[b] = slots[b * K:(b + 1) * K, :]


# --------------------------------------------------------------------------
# Wrapper
# --------------------------------------------------------------------------
def slot_attention_forward(inputs, params, *, num_slots, num_iterations,
                           num_heads, eps=1e-8, return_attns=True,
                           batch_block=None, attns_dtype=jnp.float32,
                           vmem_limit_bytes=None):
    B, N_in, D_in = inputs.shape
    D = params["wq"].shape[0]
    M = params["w1"].shape[0]
    K, H, I = num_slots, num_iterations and num_slots and num_heads, num_iterations
    K, H, I = num_slots, num_heads, num_iterations
    assert D % H == 0, "slot_dim must be divisible by num_heads"
    scale = float((num_slots // num_heads) ** (-0.5))  # module scales by slots-per-head

    f32, bf16 = jnp.float32, jnp.bfloat16

    # Batch stacking: pack Bb batches per grid step so the slot-side matmuls
    # present Bb*K rows (>= 8 fills the f32 sublane tile).
    if batch_block is None:
        target = min(B, max(1, -(-8 // K)))   # ceil(8 / K), capped at B
        batch_block = 1
        for cand in range(target, 0, -1):
            if B % cand == 0:
                batch_block = cand
                break
    assert B % batch_block == 0, "batch_block must divide the batch size"
    Bb = batch_block

    if vmem_limit_bytes is None:
        kind = ""
        try:
            kind = jax.devices()[0].device_kind.lower()
        except Exception:
            pass
        # v7x: 64 MiB physical VMEM per TC -> stay ~40 MiB; v5e/v6e: 128 MiB.
        vmem_limit_bytes = (40 if "v7" in kind else 64) * 1024 * 1024

    # Slot init already stacked across the Bb batches of a grid step.
    slots_init = jnp.broadcast_to(params["slots"].reshape(1, D),
                                  (Bb * K, D)).astype(f32)

    # Pre-transposed bf16 matmul weights; q-scale folded into wq/bq.
    w_kv = jnp.stack([params["wk"].T, params["wv"].T]).astype(bf16)     # (2, hid, D)
    w_q = (params["wq"].T * scale).astype(bf16)                         # (D, D)
    w_gru = jnp.stack([params["w_ih"].T, params["w_hh"].T]).astype(bf16)  # (2, D, 3D)
    w1 = params["w1"].T.astype(bf16)                                    # (D, M)
    w2 = params["w2"].T.astype(bf16)                                    # (M, D)

    # Pack all layernorm params and biases into one small f32 buffer.
    W = max(D_in, D, 3 * D, M)

    def _row(v):
        v = jnp.asarray(v, f32).reshape(-1)
        return jnp.pad(v, (0, W - v.shape[0]))

    vec_pack = jnp.stack([
        _row(params["ni_g"]), _row(params["ni_b"]),
        _row(params["ns_g"]), _row(params["ns_b"]),
        _row(params["nm_g"]), _row(params["nm_b"]),
        _row(params["bk"]), _row(params["bv"]),
        _row(params["bq"].reshape(-1) * scale),
        _row(params["b_ih"]), _row(params["b_hh"]),
        _row(params["b1"]), _row(params["b2"]),
    ])                                                                  # (13, W)

    kernel = functools.partial(
        slot_attention_kernel,
        num_iterations=I, num_heads=H, eps=eps, hid_dim=D_in,
        slot_dim=D, mlp_dim=M, batch_block=Bb, num_slots=K,
        with_attns=return_attns)

    out_shape = [
        jax.ShapeDtypeStruct((B, K, D), f32),
        jax.ShapeDtypeStruct((B, H, K, N_in), f32),   # lane-dense (N last)
    ]
    out_specs = [
        pl.BlockSpec((Bb, K, D), lambda b: (b, 0, 0)),
        pl.BlockSpec((Bb, H, K, N_in), lambda b: (b, 0, 0, 0)),
    ]
    if return_attns:
        # attns is the dominant HBM writeback -> bf16 in-kernel, widen outside.
        out_shape.append(jax.ShapeDtypeStruct((B, I, H, K, N_in), bf16))
        out_specs.append(pl.BlockSpec((Bb, I, H, K, N_in),
                                      lambda b: (b, 0, 0, 0, 0)))

    def _call(single_buffer_invariants):
        pm = ({"pipeline_mode": pl.Buffered(buffer_count=1)}
              if single_buffer_invariants else {})

        def _const_spec(arr):
            nd = arr.ndim
            return pl.BlockSpec(arr.shape, lambda b, _nd=nd: (0,) * _nd, **pm)

        in_specs = [
            pl.BlockSpec((Bb, N_in, D_in), lambda b: (b, 0, 0)),   # inputs
            _const_spec(slots_init),
            _const_spec(vec_pack),
            _const_spec(w_kv),
            _const_spec(w_q),
            _const_spec(w_gru),
            _const_spec(w1),
            _const_spec(w2),
        ]
        return pl.pallas_call(
            kernel,
            out_shape=tuple(out_shape),
            grid=(B // Bb,),
            in_specs=in_specs,
            out_specs=tuple(out_specs),
            compiler_params=pltpu.CompilerParams(
                dimension_semantics=("parallel",),       # v7x: shard over 2 TCs
                vmem_limit_bytes=vmem_limit_bytes),
        )(inputs, slots_init, vec_pack, w_kv, w_q, w_gru, w1, w2)

    try:
        outs = _call(single_buffer_invariants=True)
    except Exception:
        # pipeline_mode=pl.Buffered(1) unsupported on this jax build -> fall
        # back to default double-buffering for the invariant operands.
        outs = _call(single_buffer_invariants=False)

    if return_attns:
        slots, attn_kn, attns_kn = outs
    else:
        slots, attn_kn = outs
        attns_kn = None

    # Back to the module's (..., N, K) layout (cheap XLA transpose outside).
    result = {"slots": slots, "attn": jnp.swapaxes(attn_kn, -1, -2)}
    if return_attns:
        result["attns"] = jnp.swapaxes(attns_kn, -1, -2).astype(attns_dtype)
    return result


# --------------------------------------------------------------------------
# Pure-JAX f32 reference (mirrors the PyTorch forward exactly)
# --------------------------------------------------------------------------
def slot_attention_reference(inputs, params, *, num_slots, num_iterations,
                             num_heads, eps=1e-8):
    B, N, D_in = inputs.shape
    D = params["wq"].shape[0]
    K, H = num_slots, num_heads
    Dh = D // H
    scale = float((num_slots // num_heads) ** (-0.5))

    slots = jnp.broadcast_to(params["slots"].reshape(1, 1, D), (B, K, D))
    xn = _layernorm(inputs, params["ni_g"], params["ni_b"])
    k = (xn @ params["wk"].T + params["bk"]).reshape(B, N, H, Dh).transpose(0, 2, 1, 3)
    v = (xn @ params["wv"].T + params["bv"]).reshape(B, N, H, Dh).transpose(0, 2, 1, 3)

    attns = []
    for _ in range(num_iterations):
        slots_prev = slots
        sn = _layernorm(slots, params["ns_g"], params["ns_b"])
        q = (sn @ params["wq"].T + params["bq"]).reshape(B, K, H, Dh).transpose(0, 2, 1, 3)
        logits = jnp.einsum("bhid,bhjd->bhij", k, q) * scale
        attn = jax.nn.softmax(logits, axis=-1) + eps
        attns.append(attn)
        attn = attn / jnp.sum(attn, axis=-2, keepdims=True)
        updates = jnp.einsum("bhij,bhid->bhjd", attn, v)
        updates = updates.transpose(0, 2, 1, 3).reshape(B, K, D)
        gi = updates @ params["w_ih"].T + params["b_ih"]
        gh = slots_prev @ params["w_hh"].T + params["b_hh"]
        r = jax.nn.sigmoid(gi[..., :D] + gh[..., :D])
        z = jax.nn.sigmoid(gi[..., D:2 * D] + gh[..., D:2 * D])
        n = jnp.tanh(gi[..., 2 * D:] + r * gh[..., 2 * D:])
        slots = (1.0 - z) * n + z * slots_prev
        mn = _layernorm(slots, params["nm_g"], params["nm_b"])
        slots = slots + jnp.maximum(mn @ params["w1"].T + params["b1"], 0.0) @ params["w2"].T + params["b2"]

    return {"slots": slots, "attn": attn, "attns": jnp.stack(attns, axis=1)}


# --------------------------------------------------------------------------
# Main
# --------------------------------------------------------------------------
if __name__ == "__main__":
    # Small config consistent with the module: slot_dim == hid_dim, mlp_hid = 2*slot_dim.
    # B=4 so the batch-stacked kernel (Bb=2) still gets 2 grid steps.
    B, N_in = 4, 16
    hid_dim = slot_dim = 32
    mlp_hid_dim = 64
    num_slots, num_iterations, num_heads = 4, 3, 1
    eps = 1e-8

    key = jax.random.PRNGKey(0)
    ks = jax.random.split(key, 20)

    def lin(kk, out_d, in_d, s=0.05):
        kw, kb = jax.random.split(kk)
        return (jax.random.normal(kw, (out_d, in_d), jnp.float32) * s,
                jax.random.normal(kb, (1, out_d), jnp.float32) * s)

    wk, bk = lin(ks[0], slot_dim, hid_dim)
    wv, bv = lin(ks[1], slot_dim, hid_dim)
    wq, bq = lin(ks[2], slot_dim, slot_dim)
    w_ih, b_ih = lin(ks[3], 3 * slot_dim, slot_dim)
    w_hh, b_hh = lin(ks[4], 3 * slot_dim, slot_dim)
    w1, b1 = lin(ks[5], mlp_hid_dim, slot_dim)
    w2, b2 = lin(ks[6], slot_dim, mlp_hid_dim)

    params = {
        "slots": jax.random.uniform(ks[7], (1, 1, slot_dim), jnp.float32),  # torch.rand
        "ni_g": jnp.ones((1, hid_dim), jnp.float32),
        "ni_b": jnp.zeros((1, hid_dim), jnp.float32),
        "ns_g": jnp.ones((1, slot_dim), jnp.float32),
        "ns_b": jnp.zeros((1, slot_dim), jnp.float32),
        "nm_g": jnp.ones((1, slot_dim), jnp.float32),
        "nm_b": jnp.zeros((1, slot_dim), jnp.float32),
        "wk": wk, "bk": bk, "wv": wv, "bv": bv, "wq": wq, "bq": bq,
        "w_ih": w_ih, "w_hh": w_hh, "b_ih": b_ih, "b_hh": b_hh,
        "w1": w1, "b1": b1, "w2": w2, "b2": b2,
    }

    inputs = jax.random.normal(ks[8], (B, N_in, hid_dim), jnp.float32)

    out = slot_attention_forward(
        inputs, params, num_slots=num_slots, num_iterations=num_iterations,
        num_heads=num_heads, eps=eps, return_attns=True)
    jax.block_until_ready(out)

    ref = slot_attention_reference(
        inputs, params, num_slots=num_slots, num_iterations=num_iterations,
        num_heads=num_heads, eps=eps)

    # bf16 MXU operands / bf16 attns storage / approx token-norm reciprocal ->
    # looser tolerances vs. the f32 reference.
    np.testing.assert_allclose(np.asarray(out["slots"]), np.asarray(ref["slots"]),
                               rtol=2e-2, atol=2e-2)
    np.testing.assert_allclose(np.asarray(out["attn"]), np.asarray(ref["attn"]),
                               rtol=2e-2, atol=2e-2)
    np.testing.assert_allclose(np.asarray(out["attns"]), np.asarray(ref["attns"]),
                               rtol=2e-2, atol=2e-2)

    print("KERNEL_OK")
</pallas_src>

<mosaic_0001>
module attributes {stable_mosaic.version = 11 : i64} {
  func.func @slot_attention_kernel(%arg0: i32, %arg1: memref<2x16x32xf32, #tpu.memory_space<vmem>>, %arg2: memref<8x32xf32, #tpu.memory_space<vmem>>, %arg3: memref<13x96xf32, #tpu.memory_space<vmem>>, %arg4: memref<2x32x32xbf16, #tpu.memory_space<vmem>>, %arg5: memref<32x32xbf16, #tpu.memory_space<vmem>>, %arg6: memref<2x32x96xbf16, #tpu.memory_space<vmem>>, %arg7: memref<32x64xbf16, #tpu.memory_space<vmem>>, %arg8: memref<64x32xbf16, #tpu.memory_space<vmem>>, %arg9: memref<2x4x32xf32, #tpu.memory_space<vmem>>, %arg10: memref<2x1x4x16xf32, #tpu.memory_space<vmem>>, %arg11: memref<2x3x1x4x16xbf16, #tpu.memory_space<vmem>>) attributes {dimension_semantics = [#tpu.dimension_semantics<parallel>], iteration_bounds = array<i64: 2>, scalar_prefetch = 0 : i64, scratch_operands = 0 : i64, tpu.core_type = #tpu.core_type<tc>, window_params = [{transform_indices = @transform_0, window_bounds = array<i64: 2, 16, 32>}, {pipeline_mode = #tpu.pipeline_mode<synchronous>, transform_indices = @transform_1, window_bounds = array<i64: 8, 32>}, {pipeline_mode = #tpu.pipeline_mode<synchronous>, transform_indices = @transform_2, window_bounds = array<i64: 13, 96>}, {pipeline_mode = #tpu.pipeline_mode<synchronous>, transform_indices = @transform_3, window_bounds = array<i64: 2, 32, 32>}, {pipeline_mode = #tpu.pipeline_mode<synchronous>, transform_indices = @transform_4, window_bounds = array<i64: 32, 32>}, {pipeline_mode = #tpu.pipeline_mode<synchronous>, transform_indices = @transform_5, window_bounds = array<i64: 2, 32, 96>}, {pipeline_mode = #tpu.pipeline_mode<synchronous>, transform_indices = @transform_6, window_bounds = array<i64: 32, 64>}, {pipeline_mode = #tpu.pipeline_mode<synchronous>, transform_indices = @transform_7, window_bounds = array<i64: 64, 32>}, {transform_indices = @transform_8, window_bounds = array<i64: 2, 4, 32>}, {transform_indices = @transform_9, window_bounds = array<i64: 2, 1, 4, 16>}, {transform_indices = @transform_10, window_bounds = array<i64: 2, 3, 1, 4, 16>}]} {
    %c0 = arith.constant 0 : index
    %c0_0 = arith.constant 0 : index
    %0 = vector.load %arg3[%c0, %c0_0] : memref<13x96xf32, #tpu.memory_space<vmem>>, vector<1x32xf32>
    %c1 = arith.constant 1 : index
    %c0_1 = arith.constant 0 : index
    %1 = vector.load %arg3[%c1, %c0_1] : memref<13x96xf32, #tpu.memory_space<vmem>>, vector<1x32xf32>
    %c2 = arith.constant 2 : index
    %c0_2 = arith.constant 0 : index
    %2 = vector.load %arg3[%c2, %c0_2] : memref<13x96xf32, #tpu.memory_space<vmem>>, vector<1x32xf32>
    %c3 = arith.constant 3 : index
    %c0_3 = arith.constant 0 : index
    %3 = vector.load %arg3[%c3, %c0_3] : memref<13x96xf32, #tpu.memory_space<vmem>>, vector<1x32xf32>
    %c4 = arith.constant 4 : index
    %c0_4 = arith.constant 0 : index
    %4 = vector.load %arg3[%c4, %c0_4] : memref<13x96xf32, #tpu.memory_space<vmem>>, vector<1x32xf32>
    %c5 = arith.constant 5 : index
    %c0_5 = arith.constant 0 : index
    %5 = vector.load %arg3[%c5, %c0_5] : memref<13x96xf32, #tpu.memory_space<vmem>>, vector<1x32xf32>
    %c6 = arith.constant 6 : index
    %c0_6 = arith.constant 0 : index
    %6 = vector.load %arg3[%c6, %c0_6] : memref<13x96xf32, #tpu.memory_space<vmem>>, vector<1x32xf32>
    %c7 = arith.constant 7 : index
    %c0_7 = arith.constant 0 : index
    %7 = vector.load %arg3[%c7, %c0_7] : memref<13x96xf32, #tpu.memory_space<vmem>>, vector<1x32xf32>
    %c8 = arith.constant 8 : index
    %c0_8 = arith.constant 0 : index
    %8 = vector.load %arg3[%c8, %c0_8] : memref<13x96xf32, #tpu.memory_space<vmem>>, vector<1x32xf32>
    %c9 = arith.constant 9 : index
    %c0_9 = arith.constant 0 : index
    %9 = vector.load %arg3[%c9, %c0_9] : memref<13x96xf32, #tpu.memory_space<vmem>>, vector<1x96xf32>
    %c10 = arith.constant 10 : index
    %c0_10 = arith.constant 0 : index
    %10 = vector.load %arg3[%c10, %c0_10] : memref<13x96xf32, #tpu.memory_space<vmem>>, vector<1x96xf32>
    %c11 = arith.constant 11 : index
    %c0_11 = arith.constant 0 : index
    %11 = vector.load %arg3[%c11, %c0_11] : memref<13x96xf32, #tpu.memory_space<vmem>>, vector<1x64xf32>
    %c12 = arith.constant 12 : index
    %c0_12 = arith.constant 0 : index
    %12 = vector.load %arg3[%c12, %c0_12] : memref<13x96xf32, #tpu.memory_space<vmem>>, vector<1x32xf32>
    %c0_13 = arith.constant 0 : index
    %c0_14 = arith.constant 0 : index
    %c0_15 = arith.constant 0 : index
    %13 = vector.load %arg4[%c0_13, %c0_14, %c0_15] : memref<2x32x32xbf16, #tpu.memory_space<vmem>>, vector<1x32x32xbf16>
    %14 = vector.shape_cast %13 : vector<1x32x32xbf16> to vector<32x32xbf16>
    %c1_16 = arith.constant 1 : index
    %c0_17 = arith.constant 0 : index
    %c0_18 = arith.constant 0 : index
    %15 = vector.load %arg4[%c1_16, %c0_17, %c0_18] : memref<2x32x32xbf16, #tpu.memory_space<vmem>>, vector<1x32x32xbf16>
    %16 = vector.shape_cast %15 : vector<1x32x32xbf16> to vector<32x32xbf16>
    %c0_19 = arith.constant 0 : index
    %c0_20 = arith.constant 0 : index
    %17 = vector.load %arg5[%c0_19, %c0_20] : memref<32x32xbf16, #tpu.memory_space<vmem>>, vector<32x32xbf16>
    %c0_21 = arith.constant 0 : index
    %c0_22 = arith.constant 0 : index
    %c0_23 = arith.constant 0 : index
    %18 = vector.load %arg6[%c0_21, %c0_22, %c0_23] : memref<2x32x96xbf16, #tpu.memory_space<vmem>>, vector<1x32x96xbf16>
    %19 = vector.shape_cast %18 : vector<1x32x96xbf16> to vector<32x96xbf16>
    %c1_24 = arith.constant 1 : index
    %c0_25 = arith.constant 0 : index
    %c0_26 = arith.constant 0 : index
    %20 = vector.load %arg6[%c1_24, %c0_25, %c0_26] : memref<2x32x96xbf16, #tpu.memory_space<vmem>>, vector<1x32x96xbf16>
    %21 = vector.shape_cast %20 : vector<1x32x96xbf16> to vector<32x96xbf16>
    %c0_27 = arith.constant 0 : index
    %c0_28 = arith.constant 0 : index
    %22 = vector.load %arg7[%c0_27, %c0_28] : memref<32x64xbf16, #tpu.memory_space<vmem>>, vector<32x64xbf16>
    %c0_29 = arith.constant 0 : index
    %c0_30 = arith.constant 0 : index
    %23 = vector.load %arg8[%c0_29, %c0_30] : memref<64x32xbf16, #tpu.memory_space<vmem>>, vector<64x32xbf16>
    %c0_31 = arith.constant 0 : index
    %c0_32 = arith.constant 0 : index
    %c0_33 = arith.constant 0 : index
    %24 = vector.load %arg1[%c0_31, %c0_32, %c0_33] : memref<2x16x32xf32, #tpu.memory_space<vmem>>, vector<2x16x32xf32>
    %cst = arith.constant dense<0.000000e+00> : vector<2x16xf32>
    %25 = vector.multi_reduction <add>, %24, %cst [2] : vector<2x16x32xf32> to vector<2x16xf32>
    %26 = vector.shape_cast %25 : vector<2x16xf32> to vector<2x16x1xf32>
    %cst_34 = arith.constant 3.200000e+01 : f32
    %27 = vector.broadcast %cst_34 : f32 to vector<2x16x1xf32>
    %28 = arith.divf %26, %27 : vector<2x16x1xf32>
    %29 = vector.broadcast %28 : vector<2x16x1xf32> to vector<2x16x32xf32>
    %30 = arith.subf %24, %29 : vector<2x16x32xf32>
    %31 = arith.mulf %30, %30 : vector<2x16x32xf32>
    %cst_35 = arith.constant dense<0.000000e+00> : vector<2x16xf32>
    %32 = vector.multi_reduction <add>, %31, %cst_35 [2] : vector<2x16x32xf32> to vector<2x16xf32>
    %33 = vector.shape_cast %32 : vector<2x16xf32> to vector<2x16x1xf32>
    %cst_36 = arith.constant 3.200000e+01 : f32
    %34 = vector.broadcast %cst_36 : f32 to vector<2x16x1xf32>
    %35 = arith.divf %33, %34 : vector<2x16x1xf32>
    %36 = vector.broadcast %28 : vector<2x16x1xf32> to vector<2x16x32xf32>
    %37 = arith.subf %24, %36 : vector<2x16x32xf32>
    %cst_37 = arith.constant 9.99999974E-6 : f32
    %38 = vector.broadcast %cst_37 : f32 to vector<2x16x1xf32>
    %39 = arith.addf %35, %38 : vector<2x16x1xf32>
    %40 = math.rsqrt %39 : vector<2x16x1xf32>
    %41 = vector.broadcast %40 : vector<2x16x1xf32> to vector<2x16x32xf32>
    %42 = arith.mulf %37, %41 : vector<2x16x32xf32>
    %43 = vector.shape_cast %0 : vector<1x32xf32> to vector<1x1x32xf32>
    %44 = vector.broadcast %43 : vector<1x1x32xf32> to vector<2x16x32xf32>
    %45 = arith.mulf %42, %44 : vector<2x16x32xf32>
    %46 = vector.shape_cast %1 : vector<1x32xf32> to vector<1x1x32xf32>
    %47 = vector.broadcast %46 : vector<1x1x32xf32> to vector<2x16x32xf32>
    %48 = arith.addf %45, %47 : vector<2x16x32xf32>
    %49 = vector.extract_strided_slice %48 {offsets = [0, 0, 0], sizes = [1, 16, 32], strides = [1, 1, 1]} : vector<2x16x32xf32> to vector<1x16x32xf32>
    %50 = vector.shape_cast %49 : vector<1x16x32xf32> to vector<16x32xf32>
    %51 = arith.truncf %50 : vector<16x32xf32> to vector<16x32xbf16>
    %cst_38 = arith.constant dense<0.000000e+00> : vector<16x32xf32>
    %52 = tpu.matmul %51, %14, %cst_38 {dimension_numbers = #tpu.dot_dimension_numbers<[1], [0], [0], [1], [0, 0, 1, 1], [], []>} : vector<16x32xbf16>, vector<32x32xbf16>, vector<16x32xf32> -> vector<16x32xf32>
    %53 = vector.broadcast %6 : vector<1x32xf32> to vector<16x32xf32>
    %54 = arith.addf %52, %53 : vector<16x32xf32>
    %55 = arith.truncf %54 : vector<16x32xf32> to vector<16x32xbf16>
    %cst_39 = arith.constant dense<0.000000e+00> : vector<16x32xf32>
    %56 = tpu.matmul %51, %16, %cst_39 {dimension_numbers = #tpu.dot_dimension_numbers<[1], [0], [0], [1], [0, 0, 1, 1], [], []>} : vector<16x32xbf16>, vector<32x32xbf16>, vector<16x32xf32> -> vector<16x32xf32>
    %57 = vector.broadcast %7 : vector<1x32xf32> to vector<16x32xf32>
    %58 = arith.addf %56, %57 : vector<16x32xf32>
    %59 = arith.truncf %58 : vector<16x32xf32> to vector<16x32xbf16>
    %60 = vector.extract_strided_slice %48 {offsets = [1, 0, 0], sizes = [1, 16, 32], strides = [1, 1, 1]} : vector<2x16x32xf32> to vector<1x16x32xf32>
    %61 = vector.shape_cast %60 : vector<1x16x32xf32> to vector<16x32xf32>
    %62 = arith.truncf %61 : vector<16x32xf32> to vector<16x32xbf16>
    %cst_40 = arith.constant dense<0.000000e+00> : vector<16x32xf32>
    %63 = tpu.matmul %62, %14, %cst_40 {dimension_numbers = #tpu.dot_dimension_numbers<[1], [0], [0], [1], [0, 0, 1, 1], [], []>} : vector<16x32xbf16>, vector<32x32xbf16>, vector<16x32xf32> -> vector<16x32xf32>
    %64 = vector.broadcast %6 : vector<1x32xf32> to vector<16x32xf32>
    %65 = arith.addf %63, %64 : vector<16x32xf32>
    %66 = arith.truncf %65 : vector<16x32xf32> to vector<16x32xbf16>
    %cst_41 = arith.constant dense<0.000000e+00> : vector<16x32xf32>
    %67 = tpu.matmul %62, %16, %cst_41 {dimension_numbers = #tpu.dot_dimension_numbers<[1], [0], [0], [1], [0, 0, 1, 1], [], []>} : vector<16x32xbf16>, vector<32x32xbf16>, vector<16x32xf32> -> vector<16x32xf32>
    %68 = vector.broadcast %7 : vector<1x32xf32> to vector<16x32xf32>
    %69 = arith.addf %67, %68 : vector<16x32xf32>
    %70 = arith.truncf %69 : vector<16x32xf32> to vector<16x32xbf16>
    %c0_42 = arith.constant 0 : index
    %c0_43 = arith.constant 0 : index
    %71 = vector.load %arg2[%c0_42, %c0_43] : memref<8x32xf32, #tpu.memory_space<vmem>>, vector<8x32xf32>
    %cst_44 = arith.constant dense<0.000000e+00> : vector<8xf32>
    %72 = vector.multi_reduction <add>, %71, %cst_44 [1] : vector<8x32xf32> to vector<8xf32>
    %73 = vector.shape_cast %72 : vector<8xf32> to vector<8x1xf32>
    %cst_45 = arith.constant 3.200000e+01 : f32
    %74 = vector.broadcast %cst_45 : f32 to vector<8x1xf32>
    %75 = arith.divf %73, %74 : vector<8x1xf32>
    %76 = vector.broadcast %75 : vector<8x1xf32> to vector<8x32xf32>
    %77 = arith.subf %71, %76 : vector<8x32xf32>
    %78 = arith.mulf %77, %77 : vector<8x32xf32>
    %cst_46 = arith.constant dense<0.000000e+00> : vector<8xf32>
    %79 = vector.multi_reduction <add>, %78, %cst_46 [1] : vector<8x32xf32> to vector<8xf32>
    %80 = vector.shape_cast %79 : vector<8xf32> to vector<8x1xf32>
    %cst_47 = arith.constant 3.200000e+01 : f32
    %81 = vector.broadcast %cst_47 : f32 to vector<8x1xf32>
    %82 = arith.divf %80, %81 : vector<8x1xf32>
    %83 = vector.broadcast %75 : vector<8x1xf32> to vector<8x32xf32>
    %84 = arith.subf %71, %83 : vector<8x32xf32>
    %cst_48 = arith.constant 9.99999974E-6 : f32
    %85 = vector.broadcast %cst_48 : f32 to vector<8x1xf32>
    %86 = arith.addf %82, %85 : vector<8x1xf32>
    %87 = math.rsqrt %86 : vector<8x1xf32>
    %88 = vector.broadcast %87 : vector<8x1xf32> to vector<8x32xf32>
    %89 = arith.mulf %84, %88 : vector<8x32xf32>
    %90 = vector.broadcast %2 : vector<1x32xf32> to vector<8x32xf32>
    %91 = arith.mulf %89, %90 : vector<8x32xf32>
    %92 = vector.broadcast %3 : vector<1x32xf32> to vector<8x32xf32>
    %93 = arith.addf %91, %92 : vector<8x32xf32>
    %94 = arith.truncf %93 : vector<8x32xf32> to vector<8x32xbf16>
    %cst_49 = arith.constant dense<0.000000e+00> : vector<8x32xf32>
    %95 = tpu.matmul %94, %17, %cst_49 {dimension_numbers = #tpu.dot_dimension_numbers<[1], [0], [0], [1], [0, 0, 1, 1], [], []>} : vector<8x32xbf16>, vector<32x32xbf16>, vector<8x32xf32> -> vector<8x32xf32>
    %96 = vector.broadcast %8 : vector<1x32xf32> to vector<8x32xf32>
    %97 = arith.addf %95, %96 : vector<8x32xf32>
    %98 = arith.truncf %97 : vector<8x32xf32> to vector<8x32xbf16>
    %99 = vector.extract_strided_slice %98 {offsets = [0, 0], sizes = [4, 32], strides = [1, 1]} : vector<8x32xbf16> to vector<4x32xbf16>
    %cst_50 = arith.constant dense<0.000000e+00> : vector<4x16xf32>
    %100 = tpu.matmul %99, %55, %cst_50 {dimension_numbers = #tpu.dot_dimension_numbers<[1], [1], [0], [0], [0, 0, 1, 0], [], []>} : vector<4x32xbf16>, vector<16x32xbf16>, vector<4x16xf32> -> vector<4x16xf32>
    %cst_51 = arith.constant dense<0xFF800000> : vector<16xf32>
    %101 = vector.multi_reduction <maximumf>, %100, %cst_51 [0] : vector<4x16xf32> to vector<16xf32>
    %102 = vector.shape_cast %101 : vector<16xf32> to vector<1x16xf32>
    %103 = vector.broadcast %102 : vector<1x16xf32> to vector<4x16xf32>
    %104 = arith.subf %100, %103 : vector<4x16xf32>
    %105 = math.exp %104 : vector<4x16xf32>
    %cst_52 = arith.constant dense<0.000000e+00> : vector<16xf32>
    %106 = vector.multi_reduction <add>, %105, %cst_52 [0] : vector<4x16xf32> to vector<16xf32>
    %107 = vector.shape_cast %106 : vector<16xf32> to vector<1x16xf32>
    %108 = vector.broadcast %107 : vector<1x16xf32> to vector<4x16xf32>
    %109 = arith.divf %105, %108 : vector<4x16xf32>
    %cst_53 = arith.constant 9.99999993E-9 : f32
    %110 = vector.broadcast %cst_53 : f32 to vector<4x16xf32>
    %111 = arith.addf %109, %110 : vector<4x16xf32>
    %112 = arith.truncf %111 : vector<4x16xf32> to vector<4x16xbf16>
    %c0_54 = arith.constant 0 : index
    %c0_55 = arith.constant 0 : index
    %c0_56 = arith.constant 0 : index
    %c0_57 = arith.constant 0 : index
    %c0_58 = arith.constant 0 : index
    %113 = vector.load %arg11[%c0_54, %c0_55, %c0_56, %c0_57, %c0_58] : memref<2x3x1x4x16xbf16, #tpu.memory_space<vmem>>, vector<1x1x1x4x16xbf16>
    %114 = vector.shape_cast %113 : vector<1x1x1x4x16xbf16> to vector<4x16xbf16>
    %115 = vector.shape_cast %112 : vector<4x16xbf16> to vector<1x1x1x4x16xbf16>
    tpu.vector_store %arg11[%c0_54, %c0_55, %c0_56, %c0_57, %c0_58], %115 {strides = array<i32>} : memref<2x3x1x4x16xbf16, #tpu.memory_space<vmem>>, vector<1x1x1x4x16xbf16>,
    %cst_59 = arith.constant dense<0.000000e+00> : vector<4xf32>
    %116 = vector.multi_reduction <add>, %111, %cst_59 [1] : vector<4x16xf32> to vector<4xf32>
    %117 = vector.shape_cast %116 : vector<4xf32> to vector<4x1xf32>
    %118 = tpu.reciprocal %117 {approx = true} : vector<4x1xf32> -> vector<4x1xf32>
    %119 = vector.broadcast %118 : vector<4x1xf32> to vector<4x16xf32>
    %120 = arith.mulf %111, %119 : vector<4x16xf32>
    %121 = arith.truncf %120 : vector<4x16xf32> to vector<4x16xbf16>
    %cst_60 = arith.constant dense<0.000000e+00> : vector<4x32xf32>
    %122 = tpu.matmul %121, %59, %cst_60 {dimension_numbers = #tpu.dot_dimension_numbers<[1], [0], [0], [1], [0, 0, 1, 1], [], []>} : vector<4x16xbf16>, vector<16x32xbf16>, vector<4x32xf32> -> vector<4x32xf32>
    %123 = vector.extract_strided_slice %98 {offsets = [4, 0], sizes = [4, 32], strides = [1, 1]} : vector<8x32xbf16> to vector<4x32xbf16>
    %cst_61 = arith.constant dense<0.000000e+00> : vector<4x16xf32>
    %124 = tpu.matmul %123, %66, %cst_61 {dimension_numbers = #tpu.dot_dimension_numbers<[1], [1], [0], [0], [0, 0, 1, 0], [], []>} : vector<4x32xbf16>, vector<16x32xbf16>, vector<4x16xf32> -> vector<4x16xf32>
    %cst_62 = arith.constant dense<0xFF800000> : vector<16xf32>
    %125 = vector.multi_reduction <maximumf>, %124, %cst_62 [0] : vector<4x16xf32> to vector<16xf32>
    %126 = vector.shape_cast %125 : vector<16xf32> to vector<1x16xf32>
    %127 = vector.broadcast %126 : vector<1x16xf32> to vector<4x16xf32>
    %128 = arith.subf %124, %127 : vector<4x16xf32>
    %129 = math.exp %128 : vector<4x16xf32>
    %cst_63 = arith.constant dense<0.000000e+00> : vector<16xf32>
    %130 = vector.multi_reduction <add>, %129, %cst_63 [0] : vector<4x16xf32> to vector<16xf32>
    %131 = vector.shape_cast %130 : vector<16xf32> to vector<1x16xf32>
    %132 = vector.broadcast %131 : vector<1x16xf32> to vector<4x16xf32>
    %133 = arith.divf %129, %132 : vector<4x16xf32>
    %cst_64 = arith.constant 9.99999993E-9 : f32
    %134 = vector.broadcast %cst_64 : f32 to vector<4x16xf32>
    %135 = arith.addf %133, %134 : vector<4x16xf32>
    %136 = arith.truncf %135 : vector<4x16xf32> to vector<4x16xbf16>
    %c1_65 = arith.constant 1 : index
    %c0_66 = arith.constant 0 : index
    %c0_67 = arith.constant 0 : index
    %c0_68 = arith.constant 0 : index
    %c0_69 = arith.constant 0 : index
    %137 = vector.load %arg11[%c1_65, %c0_66, %c0_67, %c0_68, %c0_69] : memref<2x3x1x4x16xbf16, #tpu.memory_space<vmem>>, vector<1x1x1x4x16xbf16>
    %138 = vector.shape_cast %137 : vector<1x1x1x4x16xbf16> to vector<4x16xbf16>
    %139 = vector.shape_cast %136 : vector<4x16xbf16> to vector<1x1x1x4x16xbf16>
    tpu.vector_store %arg11[%c1_65, %c0_66, %c0_67, %c0_68, %c0_69], %139 {strides = array<i32>} : memref<2x3x1x4x16xbf16, #tpu.memory_space<vmem>>, vector<1x1x1x4x16xbf16>,
    %cst_70 = arith.constant dense<0.000000e+00> : vector<4xf32>
    %140 = vector.multi_reduction <add>, %135, %cst_70 [1] : vector<4x16xf32> to vector<4xf32>
    %141 = vector.shape_cast %140 : vector<4xf32> to vector<4x1xf32>
    %142 = tpu.reciprocal %141 {approx = true} : vector<4x1xf32> -> vector<4x1xf32>
    %143 = vector.broadcast %142 : vector<4x1xf32> to vector<4x16xf32>
    %144 = arith.mulf %135, %143 : vector<4x16xf32>
    %145 = arith.truncf %144 : vector<4x16xf32> to vector<4x16xbf16>
    %cst_71 = arith.constant dense<0.000000e+00> : vector<4x32xf32>
    %146 = tpu.matmul %145, %70, %cst_71 {dimension_numbers = #tpu.dot_dimension_numbers<[1], [0], [0], [1], [0, 0, 1, 1], [], []>} : vector<4x16xbf16>, vector<16x32xbf16>, vector<4x32xf32> -> vector<4x32xf32>
    %147 = tpu.concatenate %122, %146 in 0 : vector<4x32xf32>, vector<4x32xf32> -> vector<8x32xf32>
    %148 = arith.truncf %147 : vector<8x32xf32> to vector<8x32xbf16>
    %cst_72 = arith.constant dense<0.000000e+00> : vector<8x96xf32>
    %149 = tpu.matmul %148, %19, %cst_72 {dimension_numbers = #tpu.dot_dimension_numbers<[1], [0], [0], [1], [0, 0, 1, 1], [], []>} : vector<8x32xbf16>, vector<32x96xbf16>, vector<8x96xf32> -> vector<8x96xf32>
    %150 = vector.broadcast %9 : vector<1x96xf32> to vector<8x96xf32>
    %151 = arith.addf %149, %150 : vector<8x96xf32>
    %152 = arith.truncf %71 : vector<8x32xf32> to vector<8x32xbf16>
    %cst_73 = arith.constant dense<0.000000e+00> : vector<8x96xf32>
    %153 = tpu.matmul %152, %21, %cst_73 {dimension_numbers = #tpu.dot_dimension_numbers<[1], [0], [0], [1], [0, 0, 1, 1], [], []>} : vector<8x32xbf16>, vector<32x96xbf16>, vector<8x96xf32> -> vector<8x96xf32>
    %154 = vector.broadcast %10 : vector<1x96xf32> to vector<8x96xf32>
    %155 = arith.addf %153, %154 : vector<8x96xf32>
    %156 = vector.extract_strided_slice %151 {offsets = [0, 0], sizes = [8, 32], strides = [1, 1]} : vector<8x96xf32> to vector<8x32xf32>
    %157 = vector.extract_strided_slice %155 {offsets = [0, 0], sizes = [8, 32], strides = [1, 1]} : vector<8x96xf32> to vector<8x32xf32>
    %158 = arith.addf %156, %157 : vector<8x32xf32>
    %159 = arith.negf %158 : vector<8x32xf32>
    %160 = math.exp %159 : vector<8x32xf32>
    %cst_74 = arith.constant 1.000000e+00 : f32
    %161 = vector.broadcast %cst_74 : f32 to vector<8x32xf32>
    %162 = arith.addf %161, %160 : vector<8x32xf32>
    %163 = arith.divf %161, %162 : vector<8x32xf32>
    %164 = vector.extract_strided_slice %151 {offsets = [0, 32], sizes = [8, 32], strides = [1, 1]} : vector<8x96xf32> to vector<8x32xf32>
    %165 = vector.extract_strided_slice %155 {offsets = [0, 32], sizes = [8, 32], strides = [1, 1]} : vector<8x96xf32> to vector<8x32xf32>
    %166 = arith.addf %164, %165 : vector<8x32xf32>
    %167 = arith.negf %166 : vector<8x32xf32>
    %168 = math.exp %167 : vector<8x32xf32>
    %cst_75 = arith.constant 1.000000e+00 : f32
    %169 = vector.broadcast %cst_75 : f32 to vector<8x32xf32>
    %170 = arith.addf %169, %168 : vector<8x32xf32>
    %171 = arith.divf %169, %170 : vector<8x32xf32>
    %172 = vector.extract_strided_slice %151 {offsets = [0, 64], sizes = [8, 32], strides = [1, 1]} : vector<8x96xf32> to vector<8x32xf32>
    %173 = vector.extract_strided_slice %155 {offsets = [0, 64], sizes = [8, 32], strides = [1, 1]} : vector<8x96xf32> to vector<8x32xf32>
    %174 = arith.mulf %163, %173 : vector<8x32xf32>
    %175 = arith.addf %172, %174 : vector<8x32xf32>
    %176 = math.tanh %175 : vector<8x32xf32>
    %cst_76 = arith.constant 1.000000e+00 : f32
    %177 = vector.broadcast %cst_76 : f32 to vector<8x32xf32>
    %178 = arith.subf %177, %171 : vector<8x32xf32>
    %179 = arith.mulf %178, %176 : vector<8x32xf32>
    %180 = arith.mulf %171, %71 : vector<8x32xf32>
    %181 = arith.addf %179, %180 : vector<8x32xf32>
    %cst_77 = arith.constant dense<0.000000e+00> : vector<8xf32>
    %182 = vector.multi_reduction <add>, %181, %cst_77 [1] : vector<8x32xf32> to vector<8xf32>
    %183 = vector.shape_cast %182 : vector<8xf32> to vector<8x1xf32>
    %cst_78 = arith.constant 3.200000e+01 : f32
    %184 = vector.broadcast %cst_78 : f32 to vector<8x1xf32>
    %185 = arith.divf %183, %184 : vector<8x1xf32>
    %186 = vector.broadcast %185 : vector<8x1xf32> to vector<8x32xf32>
    %187 = arith.subf %181, %186 : vector<8x32xf32>
    %188 = arith.mulf %187, %187 : vector<8x32xf32>
    %cst_79 = arith.constant dense<0.000000e+00> : vector<8xf32>
    %189 = vector.multi_reduction <add>, %188, %cst_79 [1] : vector<8x32xf32> to vector<8xf32>
    %190 = vector.shape_cast %189 : vector<8xf32> to vector<8x1xf32>
    %cst_80 = arith.constant 3.200000e+01 : f32
    %191 = vector.broadcast %cst_80 : f32 to vector<8x1xf32>
    %192 = arith.divf %190, %191 : vector<8x1xf32>
    %193 = vector.broadcast %185 : vector<8x1xf32> to vector<8x32xf32>
    %194 = arith.subf %181, %193 : vector<8x32xf32>
    %cst_81 = arith.constant 9.99999974E-6 : f32
    %195 = vector.broadcast %cst_81 : f32 to vector<8x1xf32>
    %196 = arith.addf %192, %195 : vector<8x1xf32>
    %197 = math.rsqrt %196 : vector<8x1xf32>
    %198 = vector.broadcast %197 : vector<8x1xf32> to vector<8x32xf32>
    %199 = arith.mulf %194, %198 : vector<8x32xf32>
    %200 = vector.broadcast %4 : vector<1x32xf32> to vector<8x32xf32>
    %201 = arith.mulf %199, %200 : vector<8x32xf32>
    %202 = vector.broadcast %5 : vector<1x32xf32> to vector<8x32xf32>
    %203 = arith.addf %201, %202 : vector<8x32xf32>
    %204 = arith.truncf %203 : vector<8x32xf32> to vector<8x32xbf16>
    %cst_82 = arith.constant dense<0.000000e+00> : vector<8x64xf32>
    %205 = tpu.matmul %204, %22, %cst_82 {dimension_numbers = #tpu.dot_dimension_numbers<[1], [0], [0], [1], [0, 0, 1, 1], [], []>} : vector<8x32xbf16>, vector<32x64xbf16>, vector<8x64xf32> -> vector<8x64xf32>
    %206 = vector.broadcast %11 : vector<1x64xf32> to vector<8x64xf32>
    %207 = arith.addf %205, %206 : vector<8x64xf32>
    %cst_83 = arith.constant 0.000000e+00 : f32
    %208 = vector.broadcast %cst_83 : f32 to vector<8x64xf32>
    %209 = arith.maximumf %207, %208 : vector<8x64xf32>
    %210 = arith.truncf %209 : vector<8x64xf32> to vector<8x64xbf16>
    %cst_84 = arith.constant dense<0.000000e+00> : vector<8x32xf32>
    %211 = tpu.matmul %210, %23, %cst_84 {dimension_numbers = #tpu.dot_dimension_numbers<[1], [0], [0], [1], [0, 0, 1, 1], [], []>} : vector<8x64xbf16>, vector<64x32xbf16>, vector<8x32xf32> -> vector<8x32xf32>
    %212 = arith.addf %181, %211 : vector<8x32xf32>
    %213 = vector.broadcast %12 : vector<1x32xf32> to vector<8x32xf32>
    %214 = arith.addf %212, %213 : vector<8x32xf32>
    %cst_85 = arith.constant dense<0.000000e+00> : vector<8xf32>
    %215 = vector.multi_reduction <add>, %214, %cst_85 [1] : vector<8x32xf32> to vector<8xf32>
    %216 = vector.shape_cast %215 : vector<8xf32> to vector<8x1xf32>
    %cst_86 = arith.constant 3.200000e+01 : f32
    %217 = vector.broadcast %cst_86 : f32 to vector<8x1xf32>
    %218 = arith.divf %216, %217 : vector<8x1xf32>
    %219 = vector.broadcast %218 : vector<8x1xf32> to vector<8x32xf32>
    %220 = arith.subf %214, %219 : vector<8x32xf32>
    %221 = arith.mulf %220, %220 : vector<8x32xf32>
    %cst_87 = arith.constant dense<0.000000e+00> : vector<8xf32>
    %222 = vector.multi_reduction <add>, %221, %cst_87 [1] : vector<8x32xf32> to vector<8xf32>
    %223 = vector.shape_cast %222 : vector<8xf32> to vector<8x1xf32>
    %cst_88 = arith.constant 3.200000e+01 : f32
    %224 = vector.broadcast %cst_88 : f32 to vector<8x1xf32>
    %225 = arith.divf %223, %224 : vector<8x1xf32>
    %226 = vector.broadcast %218 : vector<8x1xf32> to vector<8x32xf32>
    %227 = arith.subf %214, %226 : vector<8x32xf32>
    %cst_89 = arith.constant 9.99999974E-6 : f32
    %228 = vector.broadcast %cst_89 : f32 to vector<8x1xf32>
    %229 = arith.addf %225, %228 : vector<8x1xf32>
    %230 = math.rsqrt %229 : vector<8x1xf32>
    %231 = vector.broadcast %230 : vector<8x1xf32> to vector<8x32xf32>
    %232 = arith.mulf %227, %231 : vector<8x32xf32>
    %233 = vector.broadcast %2 : vector<1x32xf32> to vector<8x32xf32>
    %234 = arith.mulf %232, %233 : vector<8x32xf32>
    %235 = vector.broadcast %3 : vector<1x32xf32> to vector<8x32xf32>
    %236 = arith.addf %234, %235 : vector<8x32xf32>
    %237 = arith.truncf %236 : vector<8x32xf32> to vector<8x32xbf16>
    %cst_90 = arith.constant dense<0.000000e+00> : vector<8x32xf32>
    %238 = tpu.matmul %237, %17, %cst_90 {dimension_numbers = #tpu.dot_dimension_numbers<[1], [0], [0], [1], [0, 0, 1, 1], [], []>} : vector<8x32xbf16>, vector<32x32xbf16>, vector<8x32xf32> -> vector<8x32xf32>
    %239 = vector.broadcast %8 : vector<1x32xf32> to vector<8x32xf32>
    %240 = arith.addf %238, %239 : vector<8x32xf32>
    %241 = arith.truncf %240 : vector<8x32xf32> to vector<8x32xbf16>
    %242 = vector.extract_strided_slice %241 {offsets = [0, 0], sizes = [4, 32], strides = [1, 1]} : vector<8x32xbf16> to vector<4x32xbf16>
    %cst_91 = arith.constant dense<0.000000e+00> : vector<4x16xf32>
    %243 = tpu.matmul %242, %55, %cst_91 {dimension_numbers = #tpu.dot_dimension_numbers<[1], [1], [0], [0], [0, 0, 1, 0], [], []>} : vector<4x32xbf16>, vector<16x32xbf16>, vector<4x16xf32> -> vector<4x16xf32>
    %cst_92 = arith.constant dense<0xFF800000> : vector<16xf32>
    %244 = vector.multi_reduction <maximumf>, %243, %cst_92 [0] : vector<4x16xf32> to vector<16xf32>
    %245 = vector.shape_cast %244 : vector<16xf32> to vector<1x16xf32>
    %246 = vector.broadcast %245 : vector<1x16xf32> to vector<4x16xf32>
    %247 = arith.subf %243, %246 : vector<4x16xf32>
    %248 = math.exp %247 : vector<4x16xf32>
    %cst_93 = arith.constant dense<0.000000e+00> : vector<16xf32>
    %249 = vector.multi_reduction <add>, %248, %cst_93 [0] : vector<4x16xf32> to vector<16xf32>
    %250 = vector.shape_cast %249 : vector<16xf32> to vector<1x16xf32>
    %251 = vector.broadcast %250 : vector<1x16xf32> to vector<4x16xf32>
    %252 = arith.divf %248, %251 : vector<4x16xf32>
    %cst_94 = arith.constant 9.99999993E-9 : f32
    %253 = vector.broadcast %cst_94 : f32 to vector<4x16xf32>
    %254 = arith.addf %252, %253 : vector<4x16xf32>
    %255 = arith.truncf %254 : vector<4x16xf32> to vector<4x16xbf16>
    %c0_95 = arith.constant 0 : index
    %c1_96 = arith.constant 1 : index
    %c0_97 = arith.constant 0 : index
    %c0_98 = arith.constant 0 : index
    %c0_99 = arith.constant 0 : index
    %256 = vector.load %arg11[%c0_95, %c1_96, %c0_97, %c0_98, %c0_99] : memref<2x3x1x4x16xbf16, #tpu.memory_space<vmem>>, vector<1x1x1x4x16xbf16>
    %257 = vector.shape_cast %256 : vector<1x1x1x4x16xbf16> to vector<4x16xbf16>
    %258 = vector.shape_cast %255 : vector<4x16xbf16> to vector<1x1x1x4x16xbf16>
    tpu.vector_store %arg11[%c0_95, %c1_96, %c0_97, %c0_98, %c0_99], %258 {strides = array<i32>} : memref<2x3x1x4x16xbf16, #tpu.memory_space<vmem>>, vector<1x1x1x4x16xbf16>,
    %cst_100 = arith.constant dense<0.000000e+00> : vector<4xf32>
    %259 = vector.multi_reduction <add>, %254, %cst_100 [1] : vector<4x16xf32> to vector<4xf32>
    %260 = vector.shape_cast %259 : vector<4xf32> to vector<4x1xf32>
    %261 = tpu.reciprocal %260 {approx = true} : vector<4x1xf32> -> vector<4x1xf32>
    %262 = vector.broadcast %261 : vector<4x1xf32> to vector<4x16xf32>
    %263 = arith.mulf %254, %262 : vector<4x16xf32>
    %264 = arith.truncf %263 : vector<4x16xf32> to vector<4x16xbf16>
    %cst_101 = arith.constant dense<0.000000e+00> : vector<4x32xf32>
    %265 = tpu.matmul %264, %59, %cst_101 {dimension_numbers = #tpu.dot_dimension_numbers<[1], [0], [0], [1], [0, 0, 1, 1], [], []>} : vector<4x16xbf16>, vector<16x32xbf16>, vector<4x32xf32> -> vector<4x32xf32>
    %266 = vector.extract_strided_slice %241 {offsets = [4, 0], sizes = [4, 32], strides = [1, 1]} : vector<8x32xbf16> to vector<4x32xbf16>
    %cst_102 = arith.constant dense<0.000000e+00> : vector<4x16xf32>
    %267 = tpu.matmul %266, %66, %cst_102 {dimension_numbers = #tpu.dot_dimension_numbers<[1], [1], [0], [0], [0, 0, 1, 0], [], []>} : vector<4x32xbf16>, vector<16x32xbf16>, vector<4x16xf32> -> vector<4x16xf32>
    %cst_103 = arith.constant dense<0xFF800000> : vector<16xf32>
    %268 = vector.multi_reduction <maximumf>, %267, %cst_103 [0] : vector<4x16xf32> to vector<16xf32>
    %269 = vector.shape_cast %268 : vector<16xf32> to vector<1x16xf32>
    %270 = vector.broadcast %269 : vector<1x16xf32> to vector<4x16xf32>
    %271 = arith.subf %267, %270 : vector<4x16xf32>
    %272 = math.exp %271 : vector<4x16xf32>
    %cst_104 = arith.constant dense<0.000000e+00> : vector<16xf32>
    %273 = vector.multi_reduction <add>, %272, %cst_104 [0] : vector<4x16xf32> to vector<16xf32>
    %274 = vector.shape_cast %273 : vector<16xf32> to vector<1x16xf32>
    %275 = vector.broadcast %274 : vector<1x16xf32> to vector<4x16xf32>
    %276 = arith.divf %272, %275 : vector<4x16xf32>
    %cst_105 = arith.constant 9.99999993E-9 : f32
    %277 = vector.broadcast %cst_105 : f32 to vector<4x16xf32>
    %278 = arith.addf %276, %277 : vector<4x16xf32>
    %279 = arith.truncf %278 : vector<4x16xf32> to vector<4x16xbf16>
    %c1_106 = arith.constant 1 : index
    %c1_107 = arith.constant 1 : index
    %c0_108 = arith.constant 0 : index
    %c0_109 = arith.constant 0 : index
    %c0_110 = arith.constant 0 : index
    %280 = vector.load %arg11[%c1_106, %c1_107, %c0_108, %c0_109, %c0_110] : memref<2x3x1x4x16xbf16, #tpu.memory_space<vmem>>, vector<1x1x1x4x16xbf16>
    %281 = vector.shape_cast %280 : vector<1x1x1x4x16xbf16> to vector<4x16xbf16>
    %282 = vector.shape_cast %279 : vector<4x16xbf16> to vector<1x1x1x4x16xbf16>
    tpu.vector_store %arg11[%c1_106, %c1_107, %c0_108, %c0_109, %c0_110], %282 {strides = array<i32>} : memref<2x3x1x4x16xbf16, #tpu.memory_space<vmem>>, vector<1x1x1x4x16xbf16>,
    %cst_111 = arith.constant dense<0.000000e+00> : vector<4xf32>
    %283 = vector.multi_reduction <add>, %278, %cst_111 [1] : vector<4x16xf32> to vector<4xf32>
    %284 = vector.shape_cast %283 : vector<4xf32> to vector<4x1xf32>
    %285 = tpu.reciprocal %284 {approx = true} : vector<4x1xf32> -> vector<4x1xf32>
    %286 = vector.broadcast %285 : vector<4x1xf32> to vector<4x16xf32>
    %287 = arith.mulf %278, %286 : vector<4x16xf32>
    %288 = arith.truncf %287 : vector<4x16xf32> to vector<4x16xbf16>
    %cst_112 = arith.constant dense<0.000000e+00> : vector<4x32xf32>
    %289 = tpu.matmul %288, %70, %cst_112 {dimension_numbers = #tpu.dot_dimension_numbers<[1], [0], [0], [1], [0, 0, 1, 1], [], []>} : vector<4x16xbf16>, vector<16x32xbf16>, vector<4x32xf32> -> vector<4x32xf32>
    %290 = tpu.concatenate %265, %289 in 0 : vector<4x32xf32>, vector<4x32xf32> -> vector<8x32xf32>
    %291 = arith.truncf %290 : vector<8x32xf32> to vector<8x32xbf16>
    %cst_113 = arith.constant dense<0.000000e+00> : vector<8x96xf32>
    %292 = tpu.matmul %291, %19, %cst_113 {dimension_numbers = #tpu.dot_dimension_numbers<[1], [0], [0], [1], [0, 0, 1, 1], [], []>} : vector<8x32xbf16>, vector<32x96xbf16>, vector<8x96xf32> -> vector<8x96xf32>
    %293 = vector.broadcast %9 : vector<1x96xf32> to vector<8x96xf32>
    %294 = arith.addf %292, %293 : vector<8x96xf32>
    %295 = arith.truncf %214 : vector<8x32xf32> to vector<8x32xbf16>
    %cst_114 = arith.constant dense<0.000000e+00> : vector<8x96xf32>
    %296 = tpu.matmul %295, %21, %cst_114 {dimension_numbers = #tpu.dot_dimension_numbers<[1], [0], [0], [1], [0, 0, 1, 1], [], []>} : vector<8x32xbf16>, vector<32x96xbf16>, vector<8x96xf32> -> vector<8x96xf32>
    %297 = vector.broadcast %10 : vector<1x96xf32> to vector<8x96xf32>
    %298 = arith.addf %296, %297 : vector<8x96xf32>
    %299 = vector.extract_strided_slice %294 {offsets = [0, 0], sizes = [8, 32], strides = [1, 1]} : vector<8x96xf32> to vector<8x32xf32>
    %300 = vector.extract_strided_slice %298 {offsets = [0, 0], sizes = [8, 32], strides = [1, 1]} : vector<8x96xf32> to vector<8x32xf32>
    %301 = arith.addf %299, %300 : vector<8x32xf32>
    %302 = arith.negf %301 : vector<8x32xf32>
    %303 = math.exp %302 : vector<8x32xf32>
    %cst_115 = arith.constant 1.000000e+00 : f32
    %304 = vector.broadcast %cst_115 : f32 to vector<8x32xf32>
    %305 = arith.addf %304, %303 : vector<8x32xf32>
    %306 = arith.divf %304, %305 : vector<8x32xf32>
    %307 = vector.extract_strided_slice %294 {offsets = [0, 32], sizes = [8, 32], strides = [1, 1]} : vector<8x96xf32> to vector<8x32xf32>
    %308 = vector.extract_strided_slice %298 {offsets = [0, 32], sizes = [8, 32], strides = [1, 1]} : vector<8x96xf32> to vector<8x32xf32>
    %309 = arith.addf %307, %308 : vector<8x32xf32>
    %310 = arith.negf %309 : vector<8x32xf32>
    %311 = math.exp %310 : vector<8x32xf32>
    %cst_116 = arith.constant 1.000000e+00 : f32
    %312 = vector.broadcast %cst_116 : f32 to vector<8x32xf32>
    %313 = arith.addf %312, %311 : vector<8x32xf32>
    %314 = arith.divf %312, %313 : vector<8x32xf32>
    %315 = vector.extract_strided_slice %294 {offsets = [0, 64], sizes = [8, 32], strides = [1, 1]} : vector<8x96xf32> to vector<8x32xf32>
    %316 = vector.extract_strided_slice %298 {offsets = [0, 64], sizes = [8, 32], strides = [1, 1]} : vector<8x96xf32> to vector<8x32xf32>
    %317 = arith.mulf %306, %316 : vector<8x32xf32>
    %318 = arith.addf %315, %317 : vector<8x32xf32>
    %319 = math.tanh %318 : vector<8x32xf32>
    %cst_117 = arith.constant 1.000000e+00 : f32
    %320 = vector.broadcast %cst_117 : f32 to vector<8x32xf32>
    %321 = arith.subf %320, %314 : vector<8x32xf32>
    %322 = arith.mulf %321, %319 : vector<8x32xf32>
    %323 = arith.mulf %314, %214 : vector<8x32xf32>
    %324 = arith.addf %322, %323 : vector<8x32xf32>
    %cst_118 = arith.constant dense<0.000000e+00> : vector<8xf32>
    %325 = vector.multi_reduction <add>, %324, %cst_118 [1] : vector<8x32xf32> to vector<8xf32>
    %326 = vector.shape_cast %325 : vector<8xf32> to vector<8x1xf32>
    %cst_119 = arith.constant 3.200000e+01 : f32
    %327 = vector.broadcast %cst_119 : f32 to vector<8x1xf32>
    %328 = arith.divf %326, %327 : vector<8x1xf32>
    %329 = vector.broadcast %328 : vector<8x1xf32> to vector<8x32xf32>
    %330 = arith.subf %324, %329 : vector<8x32xf32>
    %331 = arith.mulf %330, %330 : vector<8x32xf32>
    %cst_120 = arith.constant dense<0.000000e+00> : vector<8xf32>
    %332 = vector.multi_reduction <add>, %331, %cst_120 [1] : vector<8x32xf32> to vector<8xf32>
    %333 = vector.shape_cast %332 : vector<8xf32> to vector<8x1xf32>
    %cst_121 = arith.constant 3.200000e+01 : f32
    %334 = vector.broadcast %cst_121 : f32 to vector<8x1xf32>
    %335 = arith.divf %333, %334 : vector<8x1xf32>
    %336 = vector.broadcast %328 : vector<8x1xf32> to vector<8x32xf32>
    %337 = arith.subf %324, %336 : vector<8x32xf32>
    %cst_122 = arith.constant 9.99999974E-6 : f32
    %338 = vector.broadcast %cst_122 : f32 to vector<8x1xf32>
    %339 = arith.addf %335, %338 : vector<8x1xf32>
    %340 = math.rsqrt %339 : vector<8x1xf32>
    %341 = vector.broadcast %340 : vector<8x1xf32> to vector<8x32xf32>
    %342 = arith.mulf %337, %341 : vector<8x32xf32>
    %343 = vector.broadcast %4 : vector<1x32xf32> to vector<8x32xf32>
    %344 = arith.mulf %342, %343 : vector<8x32xf32>
    %345 = vector.broadcast %5 : vector<1x32xf32> to vector<8x32xf32>
    %346 = arith.addf %344, %345 : vector<8x32xf32>
    %347 = arith.truncf %346 : vector<8x32xf32> to vector<8x32xbf16>
    %cst_123 = arith.constant dense<0.000000e+00> : vector<8x64xf32>
    %348 = tpu.matmul %347, %22, %cst_123 {dimension_numbers = #tpu.dot_dimension_numbers<[1], [0], [0], [1], [0, 0, 1, 1], [], []>} : vector<8x32xbf16>, vector<32x64xbf16>, vector<8x64xf32> -> vector<8x64xf32>
    %349 = vector.broadcast %11 : vector<1x64xf32> to vector<8x64xf32>
    %350 = arith.addf %348, %349 : vector<8x64xf32>
    %cst_124 = arith.constant 0.000000e+00 : f32
    %351 = vector.broadcast %cst_124 : f32 to vector<8x64xf32>
    %352 = arith.maximumf %350, %351 : vector<8x64xf32>
    %353 = arith.truncf %352 : vector<8x64xf32> to vector<8x64xbf16>
    %cst_125 = arith.constant dense<0.000000e+00> : vector<8x32xf32>
    %354 = tpu.matmul %353, %23, %cst_125 {dimension_numbers = #tpu.dot_dimension_numbers<[1], [0], [0], [1], [0, 0, 1, 1], [], []>} : vector<8x64xbf16>, vector<64x32xbf16>, vector<8x32xf32> -> vector<8x32xf32>
    %355 = arith.addf %324, %354 : vector<8x32xf32>
    %356 = vector.broadcast %12 : vector<1x32xf32> to vector<8x32xf32>
    %357 = arith.addf %355, %356 : vector<8x32xf32>
    %cst_126 = arith.constant dense<0.000000e+00> : vector<8xf32>
    %358 = vector.multi_reduction <add>, %357, %cst_126 [1] : vector<8x32xf32> to vector<8xf32>
    %359 = vector.shape_cast %358 : vector<8xf32> to vector<8x1xf32>
    %cst_127 = arith.constant 3.200000e+01 : f32
    %360 = vector.broadcast %cst_127 : f32 to vector<8x1xf32>
    %361 = arith.divf %359, %360 : vector<8x1xf32>
    %362 = vector.broadcast %361 : vector<8x1xf32> to vector<8x32xf32>
    %363 = arith.subf %357, %362 : vector<8x32xf32>
    %364 = arith.mulf %363, %363 : vector<8x32xf32>
    %cst_128 = arith.constant dense<0.000000e+00> : vector<8xf32>
    %365 = vector.multi_reduction <add>, %364, %cst_128 [1] : vector<8x32xf32> to vector<8xf32>
    %366 = vector.shape_cast %365 : vector<8xf32> to vector<8x1xf32>
    %cst_129 = arith.constant 3.200000e+01 : f32
    %367 = vector.broadcast %cst_129 : f32 to vector<8x1xf32>
    %368 = arith.divf %366, %367 : vector<8x1xf32>
    %369 = vector.broadcast %361 : vector<8x1xf32> to vector<8x32xf32>
    %370 = arith.subf %357, %369 : vector<8x32xf32>
    %cst_130 = arith.constant 9.99999974E-6 : f32
    %371 = vector.broadcast %cst_130 : f32 to vector<8x1xf32>
    %372 = arith.addf %368, %371 : vector<8x1xf32>
    %373 = math.rsqrt %372 : vector<8x1xf32>
    %374 = vector.broadcast %373 : vector<8x1xf32> to vector<8x32xf32>
    %375 = arith.mulf %370, %374 : vector<8x32xf32>
    %376 = vector.broadcast %2 : vector<1x32xf32> to vector<8x32xf32>
    %377 = arith.mulf %375, %376 : vector<8x32xf32>
    %378 = vector.broadcast %3 : vector<1x32xf32> to vector<8x32xf32>
    %379 = arith.addf %377, %378 : vector<8x32xf32>
    %380 = arith.truncf %379 : vector<8x32xf32> to vector<8x32xbf16>
    %cst_131 = arith.constant dense<0.000000e+00> : vector<8x32xf32>
    %381 = tpu.matmul %380, %17, %cst_131 {dimension_numbers = #tpu.dot_dimension_numbers<[1], [0], [0], [1], [0, 0, 1, 1], [], []>} : vector<8x32xbf16>, vector<32x32xbf16>, vector<8x32xf32> -> vector<8x32xf32>
    %382 = vector.broadcast %8 : vector<1x32xf32> to vector<8x32xf32>
    %383 = arith.addf %381, %382 : vector<8x32xf32>
    %384 = arith.truncf %383 : vector<8x32xf32> to vector<8x32xbf16>
    %385 = vector.extract_strided_slice %384 {offsets = [0, 0], sizes = [4, 32], strides = [1, 1]} : vector<8x32xbf16> to vector<4x32xbf16>
    %cst_132 = arith.constant dense<0.000000e+00> : vector<4x16xf32>
    %386 = tpu.matmul %385, %55, %cst_132 {dimension_numbers = #tpu.dot_dimension_numbers<[1], [1], [0], [0], [0, 0, 1, 0], [], []>} : vector<4x32xbf16>, vector<16x32xbf16>, vector<4x16xf32> -> vector<4x16xf32>
    %cst_133 = arith.constant dense<0xFF800000> : vector<16xf32>
    %387 = vector.multi_reduction <maximumf>, %386, %cst_133 [0] : vector<4x16xf32> to vector<16xf32>
    %388 = vector.shape_cast %387 : vector<16xf32> to vector<1x16xf32>
    %389 = vector.broadcast %388 : vector<1x16xf32> to vector<4x16xf32>
    %390 = arith.subf %386, %389 : vector<4x16xf32>
    %391 = math.exp %390 : vector<4x16xf32>
    %cst_134 = arith.constant dense<0.000000e+00> : vector<16xf32>
    %392 = vector.multi_reduction <add>, %391, %cst_134 [0] : vector<4x16xf32> to vector<16xf32>
    %393 = vector.shape_cast %392 : vector<16xf32> to vector<1x16xf32>
    %394 = vector.broadcast %393 : vector<1x16xf32> to vector<4x16xf32>
    %395 = arith.divf %391, %394 : vector<4x16xf32>
    %cst_135 = arith.constant 9.99999993E-9 : f32
    %396 = vector.broadcast %cst_135 : f32 to vector<4x16xf32>
    %397 = arith.addf %395, %396 : vector<4x16xf32>
    %398 = arith.truncf %397 : vector<4x16xf32> to vector<4x16xbf16>
    %c0_136 = arith.constant 0 : index
    %c2_137 = arith.constant 2 : index
    %c0_138 = arith.constant 0 : index
    %c0_139 = arith.constant 0 : index
    %c0_140 = arith.constant 0 : index
    %399 = vector.load %arg11[%c0_136, %c2_137, %c0_138, %c0_139, %c0_140] : memref<2x3x1x4x16xbf16, #tpu.memory_space<vmem>>, vector<1x1x1x4x16xbf16>
    %400 = vector.shape_cast %399 : vector<1x1x1x4x16xbf16> to vector<4x16xbf16>
    %401 = vector.shape_cast %398 : vector<4x16xbf16> to vector<1x1x1x4x16xbf16>
    tpu.vector_store %arg11[%c0_136, %c2_137, %c0_138, %c0_139, %c0_140], %401 {strides = array<i32>} : memref<2x3x1x4x16xbf16, #tpu.memory_space<vmem>>, vector<1x1x1x4x16xbf16>,
    %cst_141 = arith.constant dense<0.000000e+00> : vector<4xf32>
    %402 = vector.multi_reduction <add>, %397, %cst_141 [1] : vector<4x16xf32> to vector<4xf32>
    %403 = vector.shape_cast %402 : vector<4xf32> to vector<4x1xf32>
    %404 = tpu.reciprocal %403 {approx = true} : vector<4x1xf32> -> vector<4x1xf32>
    %405 = vector.broadcast %404 : vector<4x1xf32> to vector<4x16xf32>
    %406 = arith.mulf %397, %405 : vector<4x16xf32>
    %c0_142 = arith.constant 0 : index
    %c0_143 = arith.constant 0 : index
    %c0_144 = arith.constant 0 : index
    %c0_145 = arith.constant 0 : index
    %407 = vector.load %arg10[%c0_142, %c0_143, %c0_144, %c0_145] : memref<2x1x4x16xf32, #tpu.memory_space<vmem>>, vector<1x1x4x16xf32>
    %408 = vector.shape_cast %407 : vector<1x1x4x16xf32> to vector<4x16xf32>
    %409 = vector.shape_cast %406 : vector<4x16xf32> to vector<1x1x4x16xf32>
    tpu.vector_store %arg10[%c0_142, %c0_143, %c0_144, %c0_145], %409 {strides = array<i32>} : memref<2x1x4x16xf32, #tpu.memory_space<vmem>>, vector<1x1x4x16xf32>,
    %410 = arith.truncf %406 : vector<4x16xf32> to vector<4x16xbf16>
    %cst_146 = arith.constant dense<0.000000e+00> : vector<4x32xf32>
    %411 = tpu.matmul %410, %59, %cst_146 {dimension_numbers = #tpu.dot_dimension_numbers<[1], [0], [0], [1], [0, 0, 1, 1], [], []>} : vector<4x16xbf16>, vector<16x32xbf16>, vector<4x32xf32> -> vector<4x32xf32>
    %412 = vector.extract_strided_slice %384 {offsets = [4, 0], sizes = [4, 32], strides = [1, 1]} : vector<8x32xbf16> to vector<4x32xbf16>
    %cst_147 = arith.constant dense<0.000000e+00> : vector<4x16xf32>
    %413 = tpu.matmul %412, %66, %cst_147 {dimension_numbers = #tpu.dot_dimension_numbers<[1], [1], [0], [0], [0, 0, 1, 0], [], []>} : vector<4x32xbf16>, vector<16x32xbf16>, vector<4x16xf32> -> vector<4x16xf32>
    %cst_148 = arith.constant dense<0xFF800000> : vector<16xf32>
    %414 = vector.multi_reduction <maximumf>, %413, %cst_148 [0] : vector<4x16xf32> to vector<16xf32>
    %415 = vector.shape_cast %414 : vector<16xf32> to vector<1x16xf32>
    %416 = vector.broadcast %415 : vector<1x16xf32> to vector<4x16xf32>
    %417 = arith.subf %413, %416 : vector<4x16xf32>
    %418 = math.exp %417 : vector<4x16xf32>
    %cst_149 = arith.constant dense<0.000000e+00> : vector<16xf32>
    %419 = vector.multi_reduction <add>, %418, %cst_149 [0] : vector<4x16xf32> to vector<16xf32>
    %420 = vector.shape_cast %419 : vector<16xf32> to vector<1x16xf32>
    %421 = vector.broadcast %420 : vector<1x16xf32> to vector<4x16xf32>
    %422 = arith.divf %418, %421 : vector<4x16xf32>
    %cst_150 = arith.constant 9.99999993E-9 : f32
    %423 = vector.broadcast %cst_150 : f32 to vector<4x16xf32>
    %424 = arith.addf %422, %423 : vector<4x16xf32>
    %425 = arith.truncf %424 : vector<4x16xf32> to vector<4x16xbf16>
    %c1_151 = arith.constant 1 : index
    %c2_152 = arith.constant 2 : index
    %c0_153 = arith.constant 0 : index
    %c0_154 = arith.constant 0 : index
    %c0_155 = arith.constant 0 : index
    %426 = vector.load %arg11[%c1_151, %c2_152, %c0_153, %c0_154, %c0_155] : memref<2x3x1x4x16xbf16, #tpu.memory_space<vmem>>, vector<1x1x1x4x16xbf16>
    %427 = vector.shape_cast %426 : vector<1x1x1x4x16xbf16> to vector<4x16xbf16>
    %428 = vector.shape_cast %425 : vector<4x16xbf16> to vector<1x1x1x4x16xbf16>
    tpu.vector_store %arg11[%c1_151, %c2_152, %c0_153, %c0_154, %c0_155], %428 {strides = array<i32>} : memref<2x3x1x4x16xbf16, #tpu.memory_space<vmem>>, vector<1x1x1x4x16xbf16>,
    %cst_156 = arith.constant dense<0.000000e+00> : vector<4xf32>
    %429 = vector.multi_reduction <add>, %424, %cst_156 [1] : vector<4x16xf32> to vector<4xf32>
    %430 = vector.shape_cast %429 : vector<4xf32> to vector<4x1xf32>
    %431 = tpu.reciprocal %430 {approx = true} : vector<4x1xf32> -> vector<4x1xf32>
    %432 = vector.broadcast %431 : vector<4x1xf32> to vector<4x16xf32>
    %433 = arith.mulf %424, %432 : vector<4x16xf32>
    %c1_157 = arith.constant 1 : index
    %c0_158 = arith.constant 0 : index
    %c0_159 = arith.constant 0 : index
    %c0_160 = arith.constant 0 : index
    %434 = vector.load %arg10[%c1_157, %c0_158, %c0_159, %c0_160] : memref<2x1x4x16xf32, #tpu.memory_space<vmem>>, vector<1x1x4x16xf32>
    %435 = vector.shape_cast %434 : vector<1x1x4x16xf32> to vector<4x16xf32>
    %436 = vector.shape_cast %433 : vector<4x16xf32> to vector<1x1x4x16xf32>
    tpu.vector_store %arg10[%c1_157, %c0_158, %c0_159, %c0_160], %436 {strides = array<i32>} : memref<2x1x4x16xf32, #tpu.memory_space<vmem>>, vector<1x1x4x16xf32>,
    %437 = arith.truncf %433 : vector<4x16xf32> to vector<4x16xbf16>
    %cst_161 = arith.constant dense<0.000000e+00> : vector<4x32xf32>
    %438 = tpu.matmul %437, %70, %cst_161 {dimension_numbers = #tpu.dot_dimension_numbers<[1], [0], [0], [1], [0, 0, 1, 1], [], []>} : vector<4x16xbf16>, vector<16x32xbf16>, vector<4x32xf32> -> vector<4x32xf32>
    %439 = tpu.concatenate %411, %438 in 0 : vector<4x32xf32>, vector<4x32xf32> -> vector<8x32xf32>
    %440 = arith.truncf %439 : vector<8x32xf32> to vector<8x32xbf16>
    %cst_162 = arith.constant dense<0.000000e+00> : vector<8x96xf32>
    %441 = tpu.matmul %440, %19, %cst_162 {dimension_numbers = #tpu.dot_dimension_numbers<[1], [0], [0], [1], [0, 0, 1, 1], [], []>} : vector<8x32xbf16>, vector<32x96xbf16>, vector<8x96xf32> -> vector<8x96xf32>
    %442 = vector.broadcast %9 : vector<1x96xf32> to vector<8x96xf32>
    %443 = arith.addf %441, %442 : vector<8x96xf32>
    %444 = arith.truncf %357 : vector<8x32xf32> to vector<8x32xbf16>
    %cst_163 = arith.constant dense<0.000000e+00> : vector<8x96xf32>
    %445 = tpu.matmul %444, %21, %cst_163 {dimension_numbers = #tpu.dot_dimension_numbers<[1], [0], [0], [1], [0, 0, 1, 1], [], []>} : vector<8x32xbf16>, vector<32x96xbf16>, vector<8x96xf32> -> vector<8x96xf32>
    %446 = vector.broadcast %10 : vector<1x96xf32> to vector<8x96xf32>
    %447 = arith.addf %445, %446 : vector<8x96xf32>
    %448 = vector.extract_strided_slice %443 {offsets = [0, 0], sizes = [8, 32], strides = [1, 1]} : vector<8x96xf32> to vector<8x32xf32>
    %449 = vector.extract_strided_slice %447 {offsets = [0, 0], sizes = [8, 32], strides = [1, 1]} : vector<8x96xf32> to vector<8x32xf32>
    %450 = arith.addf %448, %449 : vector<8x32xf32>
    %451 = arith.negf %450 : vector<8x32xf32>
    %452 = math.exp %451 : vector<8x32xf32>
    %cst_164 = arith.constant 1.000000e+00 : f32
    %453 = vector.broadcast %cst_164 : f32 to vector<8x32xf32>
    %454 = arith.addf %453, %452 : vector<8x32xf32>
    %455 = arith.divf %453, %454 : vector<8x32xf32>
    %456 = vector.extract_strided_slice %443 {offsets = [0, 32], sizes = [8, 32], strides = [1, 1]} : vector<8x96xf32> to vector<8x32xf32>
    %457 = vector.extract_strided_slice %447 {offsets = [0, 32], sizes = [8, 32], strides = [1, 1]} : vector<8x96xf32> to vector<8x32xf32>
    %458 = arith.addf %456, %457 : vector<8x32xf32>
    %459 = arith.negf %458 : vector<8x32xf32>
    %460 = math.exp %459 : vector<8x32xf32>
    %cst_165 = arith.constant 1.000000e+00 : f32
    %461 = vector.broadcast %cst_165 : f32 to vector<8x32xf32>
    %462 = arith.addf %461, %460 : vector<8x32xf32>
    %463 = arith.divf %461, %462 : vector<8x32xf32>
    %464 = vector.extract_strided_slice %443 {offsets = [0, 64], sizes = [8, 32], strides = [1, 1]} : vector<8x96xf32> to vector<8x32xf32>
    %465 = vector.extract_strided_slice %447 {offsets = [0, 64], sizes = [8, 32], strides = [1, 1]} : vector<8x96xf32> to vector<8x32xf32>
    %466 = arith.mulf %455, %465 : vector<8x32xf32>
    %467 = arith.addf %464, %466 : vector<8x32xf32>
    %468 = math.tanh %467 : vector<8x32xf32>
    %cst_166 = arith.constant 1.000000e+00 : f32
    %469 = vector.broadcast %cst_166 : f32 to vector<8x32xf32>
    %470 = arith.subf %469, %463 : vector<8x32xf32>
    %471 = arith.mulf %470, %468 : vector<8x32xf32>
    %472 = arith.mulf %463, %357 : vector<8x32xf32>
    %473 = arith.addf %471, %472 : vector<8x32xf32>
    %cst_167 = arith.constant dense<0.000000e+00> : vector<8xf32>
    %474 = vector.multi_reduction <add>, %473, %cst_167 [1] : vector<8x32xf32> to vector<8xf32>
    %475 = vector.shape_cast %474 : vector<8xf32> to vector<8x1xf32>
    %cst_168 = arith.constant 3.200000e+01 : f32
    %476 = vector.broadcast %cst_168 : f32 to vector<8x1xf32>
    %477 = arith.divf %475, %476 : vector<8x1xf32>
    %478 = vector.broadcast %477 : vector<8x1xf32> to vector<8x32xf32>
    %479 = arith.subf %473, %478 : vector<8x32xf32>
    %480 = arith.mulf %479, %479 : vector<8x32xf32>
    %cst_169 = arith.constant dense<0.000000e+00> : vector<8xf32>
    %481 = vector.multi_reduction <add>, %480, %cst_169 [1] : vector<8x32xf32> to vector<8xf32>
    %482 = vector.shape_cast %481 : vector<8xf32> to vector<8x1xf32>
    %cst_170 = arith.constant 3.200000e+01 : f32
    %483 = vector.broadcast %cst_170 : f32 to vector<8x1xf32>
    %484 = arith.divf %482, %483 : vector<8x1xf32>
    %485 = vector.broadcast %477 : vector<8x1xf32> to vector<8x32xf32>
    %486 = arith.subf %473, %485 : vector<8x32xf32>
    %cst_171 = arith.constant 9.99999974E-6 : f32
    %487 = vector.broadcast %cst_171 : f32 to vector<8x1xf32>
    %488 = arith.addf %484, %487 : vector<8x1xf32>
    %489 = math.rsqrt %488 : vector<8x1xf32>
    %490 = vector.broadcast %489 : vector<8x1xf32> to vector<8x32xf32>
    %491 = arith.mulf %486, %490 : vector<8x32xf32>
    %492 = vector.broadcast %4 : vector<1x32xf32> to vector<8x32xf32>
    %493 = arith.mulf %491, %492 : vector<8x32xf32>
    %494 = vector.broadcast %5 : vector<1x32xf32> to vector<8x32xf32>
    %495 = arith.addf %493, %494 : vector<8x32xf32>
    %496 = arith.truncf %495 : vector<8x32xf32> to vector<8x32xbf16>
    %cst_172 = arith.constant dense<0.000000e+00> : vector<8x64xf32>
    %497 = tpu.matmul %496, %22, %cst_172 {dimension_numbers = #tpu.dot_dimension_numbers<[1], [0], [0], [1], [0, 0, 1, 1], [], []>} : vector<8x32xbf16>, vector<32x64xbf16>, vector<8x64xf32> -> vector<8x64xf32>
    %498 = vector.broadcast %11 : vector<1x64xf32> to vector<8x64xf32>
    %499 = arith.addf %497, %498 : vector<8x64xf32>
    %cst_173 = arith.constant 0.000000e+00 : f32
    %500 = vector.broadcast %cst_173 : f32 to vector<8x64xf32>
    %501 = arith.maximumf %499, %500 : vector<8x64xf32>
    %502 = arith.truncf %501 : vector<8x64xf32> to vector<8x64xbf16>
    %cst_174 = arith.constant dense<0.000000e+00> : vector<8x32xf32>
    %503 = tpu.matmul %502, %23, %cst_174 {dimension_numbers = #tpu.dot_dimension_numbers<[1], [0], [0], [1], [0, 0, 1, 1], [], []>} : vector<8x64xbf16>, vector<64x32xbf16>, vector<8x32xf32> -> vector<8x32xf32>
    %504 = arith.addf %473, %503 : vector<8x32xf32>
    %505 = vector.broadcast %12 : vector<1x32xf32> to vector<8x32xf32>
    %506 = arith.addf %504, %505 : vector<8x32xf32>
    %507 = vector.extract_strided_slice %506 {offsets = [0, 0], sizes = [4, 32], strides = [1, 1]} : vector<8x32xf32> to vector<4x32xf32>
    %c0_175 = arith.constant 0 : index
    %c0_176 = arith.constant 0 : index
    %c0_177 = arith.constant 0 : index
    %508 = vector.load %arg9[%c0_175, %c0_176, %c0_177] : memref<2x4x32xf32, #tpu.memory_space<vmem>>, vector<1x4x32xf32>
    %509 = vector.shape_cast %508 : vector<1x4x32xf32> to vector<4x32xf32>
    %510 = vector.shape_cast %507 : vector<4x32xf32> to vector<1x4x32xf32>
    tpu.vector_store %arg9[%c0_175, %c0_176, %c0_177], %510 {strides = array<i32>} : memref<2x4x32xf32, #tpu.memory_space<vmem>>, vector<1x4x32xf32>,
    %511 = vector.extract_strided_slice %506 {offsets = [4, 0], sizes = [4, 32], strides = [1, 1]} : vector<8x32xf32> to vector<4x32xf32>
    %c1_178 = arith.constant 1 : index
    %c0_179 = arith.constant 0 : index
    %c0_180 = arith.constant 0 : index
    %512 = vector.load %arg9[%c1_178, %c0_179, %c0_180] : memref<2x4x32xf32, #tpu.memory_space<vmem>>, vector<1x4x32xf32>
    %513 = vector.shape_cast %512 : vector<1x4x32xf32> to vector<4x32xf32>
    %514 = vector.shape_cast %511 : vector<4x32xf32> to vector<1x4x32xf32>
    tpu.vector_store %arg9[%c1_178, %c0_179, %c0_180], %514 {strides = array<i32>} : memref<2x4x32xf32, #tpu.memory_space<vmem>>, vector<1x4x32xf32>,
    return
  }
  func.func @transform_0(%arg0: i32) -> (i32, i32, i32) {
    %c0_i32 = arith.constant 0 : i32
    %c0_i32_0 = arith.constant 0 : i32
    %c0_i32_1 = arith.constant 0 : i32
    return %arg0, %c0_i32, %c0_i32_0 : i32, i32, i32
  }
  func.func @transform_1(%arg0: i32) -> (i32, i32) {
    %c0_i32 = arith.constant 0 : i32
    %c0_i32_0 = arith.constant 0 : i32
    %c0_i32_1 = arith.constant 0 : i32
    return %c0_i32, %c0_i32_0 : i32, i32
  }
  func.func @transform_2(%arg0: i32) -> (i32, i32) {
    %c0_i32 = arith.constant 0 : i32
    %c0_i32_0 = arith.constant 0 : i32
    %c0_i32_1 = arith.constant 0 : i32
    return %c0_i32, %c0_i32_0 : i32, i32
  }
  func.func @transform_3(%arg0: i32) -> (i32, i32, i32) {
    %c0_i32 = arith.constant 0 : i32
    %c0_i32_0 = arith.constant 0 : i32
    %c0_i32_1 = arith.constant 0 : i32
    %c0_i32_2 = arith.constant 0 : i32
    return %c0_i32, %c0_i32_0, %c0_i32_1 : i32, i32, i32
  }
  func.func @transform_4(%arg0: i32) -> (i32, i32) {
    %c0_i32 = arith.constant 0 : i32
    %c0_i32_0 = arith.constant 0 : i32
    %c0_i32_1 = arith.constant 0 : i32
    return %c0_i32, %c0_i32_0 : i32, i32
  }
  func.func @transform_5(%arg0: i32) -> (i32, i32, i32) {
    %c0_i32 = arith.constant 0 : i32
    %c0_i32_0 = arith.constant 0 : i32
    %c0_i32_1 = arith.constant 0 : i32
    %c0_i32_2 = arith.constant 0 : i32
    return %c0_i32, %c0_i32_0, %c0_i32_1 : i32, i32, i32
  }
  func.func @transform_6(%arg0: i32) -> (i32, i32) {
    %c0_i32 = arith.constant 0 : i32
    %c0_i32_0 = arith.constant 0 : i32
    %c0_i32_1 = arith.constant 0 : i32
    return %c0_i32, %c0_i32_0 : i32, i32
  }
  func.func @transform_7(%arg0: i32) -> (i32, i32) {
    %c0_i32 = arith.constant 0 : i32
    %c0_i32_0 = arith.constant 0 : i32
    %c0_i32_1 = arith.constant 0 : i32
    return %c0_i32, %c0_i32_0 : i32, i32
  }
  func.func @transform_8(%arg0: i32) -> (i32, i32, i32) {
    %c0_i32 = arith.constant 0 : i32
    %c0_i32_0 = arith.constant 0 : i32
    %c0_i32_1 = arith.constant 0 : i32
    return %arg0, %c0_i32, %c0_i32_0 : i32, i32, i32
  }
  func.func @transform_9(%arg0: i32) -> (i32, i32, i32, i32) {
    %c0_i32 = arith.constant 0 : i32
    %c0_i32_0 = arith.constant 0 : i32
    %c0_i32_1 = arith.constant 0 : i32
    %c0_i32_2 = arith.constant 0 : i32
    return %arg0, %c0_i32, %c0_i32_0, %c0_i32_1 : i32, i32, i32, i32
  }
  func.func @transform_10(%arg0: i32) -> (i32, i32, i32, i32, i32) {
    %c0_i32 = arith.constant 0 : i32
    %c0_i32_0 = arith.constant 0 : i32
    %c0_i32_1 = arith.constant 0 : i32
    %c0_i32_2 = arith.constant 0 : i32
    %c0_i32_3 = arith.constant 0 : i32
    return %arg0, %c0_i32, %c0_i32_0, %c0_i32_1, %c0_i32_2 : i32, i32, i32, i32, i32
  }
}

module attributes {stable_mosaic.version = 11 : i64} {
  func.func @slot_attention_kernel(%arg0: i32, %arg1: memref<2x16x32xf32, #tpu.memory_space<vmem>>, %arg2: memref<8x32xf32, #tpu.memory_space<vmem>>, %arg3: memref<13x96xf32, #tpu.memory_space<vmem>>, %arg4: memref<2x32x32xbf16, #tpu.memory_space<vmem>>, %arg5: memref<32x32xbf16, #tpu.memory_space<vmem>>, %arg6: memref<2x32x96xbf16, #tpu.memory_space<vmem>>, %arg7: memref<32x64xbf16, #tpu.memory_space<vmem>>, %arg8: memref<64x32xbf16, #tpu.memory_space<vmem>>, %arg9: memref<2x4x32xf32, #tpu.memory_space<vmem>>, %arg10: memref<2x1x4x16xf32, #tpu.memory_space<vmem>>, %arg11: memref<2x3x1x4x16xbf16, #tpu.memory_space<vmem>>) attributes {dimension_semantics = [#tpu.dimension_semantics<parallel>], iteration_bounds = array<i64: 2>, scalar_prefetch = 0 : i64, scratch_operands = 0 : i64, tpu.core_type = #tpu.core_type<tc>, window_params = [{transform_indices = @transform_0, window_bounds = array<i64: 2, 16, 32>}, {pipeline_mode = #tpu.pipeline_mode<synchronous>, transform_indices = @transform_1, window_bounds = array<i64: 8, 32>}, {pipeline_mode = #tpu.pipeline_mode<synchronous>, transform_indices = @transform_2, window_bounds = array<i64: 13, 96>}, {pipeline_mode = #tpu.pipeline_mode<synchronous>, transform_indices = @transform_3, window_bounds = array<i64: 2, 32, 32>}, {pipeline_mode = #tpu.pipeline_mode<synchronous>, transform_indices = @transform_4, window_bounds = array<i64: 32, 32>}, {pipeline_mode = #tpu.pipeline_mode<synchronous>, transform_indices = @transform_5, window_bounds = array<i64: 2, 32, 96>}, {pipeline_mode = #tpu.pipeline_mode<synchronous>, transform_indices = @transform_6, window_bounds = array<i64: 32, 64>}, {pipeline_mode = #tpu.pipeline_mode<synchronous>, transform_indices = @transform_7, window_bounds = array<i64: 64, 32>}, {transform_indices = @transform_8, window_bounds = array<i64: 2, 4, 32>}, {transform_indices = @transform_9, window_bounds = array<i64: 2, 1, 4, 16>}, {transform_indices = @transform_10, window_bounds = array<i64: 2, 3, 1, 4, 16>}]} {
    %c0 = arith.constant 0 : index
    %c0_0 = arith.constant 0 : index
    %0 = vector.load %arg3[%c0, %c0_0] : memref<13x96xf32, #tpu.memory_space<vmem>>, vector<1x32xf32>
    %c1 = arith.constant 1 : index
    %c0_1 = arith.constant 0 : index
    %1 = vector.load %arg3[%c1, %c0_1] : memref<13x96xf32, #tpu.memory_space<vmem>>, vector<1x32xf32>
    %c2 = arith.constant 2 : index
    %c0_2 = arith.constant 0 : index
    %2 = vector.load %arg3[%c2, %c0_2] : memref<13x96xf32, #tpu.memory_space<vmem>>, vector<1x32xf32>
    %c3 = arith.constant 3 : index
    %c0_3 = arith.constant 0 : index
    %3 = vector.load %arg3[%c3, %c0_3] : memref<13x96xf32, #tpu.memory_space<vmem>>, vector<1x32xf32>
    %c4 = arith.constant 4 : index
    %c0_4 = arith.constant 0 : index
    %4 = vector.load %arg3[%c4, %c0_4] : memref<13x96xf32, #tpu.memory_space<vmem>>, vector<1x32xf32>
    %c5 = arith.constant 5 : index
    %c0_5 = arith.constant 0 : index
    %5 = vector.load %arg3[%c5, %c0_5] : memref<13x96xf32, #tpu.memory_space<vmem>>, vector<1x32xf32>
    %c6 = arith.constant 6 : index
    %c0_6 = arith.constant 0 : index
    %6 = vector.load %arg3[%c6, %c0_6] : memref<13x96xf32, #tpu.memory_space<vmem>>, vector<1x32xf32>
    %c7 = arith.constant 7 : index
    %c0_7 = arith.constant 0 : index
    %7 = vector.load %arg3[%c7, %c0_7] : memref<13x96xf32, #tpu.memory_space<vmem>>, vector<1x32xf32>
    %c8 = arith.constant 8 : index
    %c0_8 = arith.constant 0 : index
    %8 = vector.load %arg3[%c8, %c0_8] : memref<13x96xf32, #tpu.memory_space<vmem>>, vector<1x32xf32>
    %c9 = arith.constant 9 : index
    %c0_9 = arith.constant 0 : index
    %9 = vector.load %arg3[%c9, %c0_9] : memref<13x96xf32, #tpu.memory_space<vmem>>, vector<1x96xf32>
    %c10 = arith.constant 10 : index
    %c0_10 = arith.constant 0 : index
    %10 = vector.load %arg3[%c10, %c0_10] : memref<13x96xf32, #tpu.memory_space<vmem>>, vector<1x96xf32>
    %c11 = arith.constant 11 : index
    %c0_11 = arith.constant 0 : index
    %11 = vector.load %arg3[%c11, %c0_11] : memref<13x96xf32, #tpu.memory_space<vmem>>, vector<1x64xf32>
    %c12 = arith.constant 12 : index
    %c0_12 = arith.constant 0 : index
    %12 = vector.load %arg3[%c12, %c0_12] : memref<13x96xf32, #tpu.memory_space<vmem>>, vector<1x32xf32>
    %c0_13 = arith.constant 0 : index
    %c0_14 = arith.constant 0 : index
    %c0_15 = arith.constant 0 : index
    %13 = vector.load %arg4[%c0_13, %c0_14, %c0_15] : memref<2x32x32xbf16, #tpu.memory_space<vmem>>, vector<1x32x32xbf16>
    %14 = vector.shape_cast %13 : vector<1x32x32xbf16> to vector<32x32xbf16>
    %c1_16 = arith.constant 1 : index
    %c0_17 = arith.constant 0 : index
    %c0_18 = arith.constant 0 : index
    %15 = vector.load %arg4[%c1_16, %c0_17, %c0_18] : memref<2x32x32xbf16, #tpu.memory_space<vmem>>, vector<1x32x32xbf16>
    %16 = vector.shape_cast %15 : vector<1x32x32xbf16> to vector<32x32xbf16>
    %c0_19 = arith.constant 0 : index
    %c0_20 = arith.constant 0 : index
    %17 = vector.load %arg5[%c0_19, %c0_20] : memref<32x32xbf16, #tpu.memory_space<vmem>>, vector<32x32xbf16>
    %c0_21 = arith.constant 0 : index
    %c0_22 = arith.constant 0 : index
    %c0_23 = arith.constant 0 : index
    %18 = vector.load %arg6[%c0_21, %c0_22, %c0_23] : memref<2x32x96xbf16, #tpu.memory_space<vmem>>, vector<1x32x96xbf16>
    %19 = vector.shape_cast %18 : vector<1x32x96xbf16> to vector<32x96xbf16>
    %c1_24 = arith.constant 1 : index
    %c0_25 = arith.constant 0 : index
    %c0_26 = arith.constant 0 : index
    %20 = vector.load %arg6[%c1_24, %c0_25, %c0_26] : memref<2x32x96xbf16, #tpu.memory_space<vmem>>, vector<1x32x96xbf16>
    %21 = vector.shape_cast %20 : vector<1x32x96xbf16> to vector<32x96xbf16>
    %c0_27 = arith.constant 0 : index
    %c0_28 = arith.constant 0 : index
    %22 = vector.load %arg7[%c0_27, %c0_28] : memref<32x64xbf16, #tpu.memory_space<vmem>>, vector<32x64xbf16>
    %c0_29 = arith.constant 0 : index
    %c0_30 = arith.constant 0 : index
    %23 = vector.load %arg8[%c0_29, %c0_30] : memref<64x32xbf16, #tpu.memory_space<vmem>>, vector<64x32xbf16>
    %c0_31 = arith.constant 0 : index
    %c0_32 = arith.constant 0 : index
    %c0_33 = arith.constant 0 : index
    %24 = vector.load %arg1[%c0_31, %c0_32, %c0_33] : memref<2x16x32xf32, #tpu.memory_space<vmem>>, vector<2x16x32xf32>
    %cst = arith.constant dense<0.000000e+00> : vector<2x16xf32>
    %25 = vector.multi_reduction <add>, %24, %cst [2] : vector<2x16x32xf32> to vector<2x16xf32>
    %26 = vector.shape_cast %25 : vector<2x16xf32> to vector<2x16x1xf32>
    %cst_34 = arith.constant 3.200000e+01 : f32
    %27 = vector.broadcast %cst_34 : f32 to vector<2x16x1xf32>
    %28 = arith.divf %26, %27 : vector<2x16x1xf32>
    %29 = vector.broadcast %28 : vector<2x16x1xf32> to vector<2x16x32xf32>
    %30 = arith.subf %24, %29 : vector<2x16x32xf32>
    %31 = arith.mulf %30, %30 : vector<2x16x32xf32>
    %cst_35 = arith.constant dense<0.000000e+00> : vector<2x16xf32>
    %32 = vector.multi_reduction <add>, %31, %cst_35 [2] : vector<2x16x32xf32> to vector<2x16xf32>
    %33 = vector.shape_cast %32 : vector<2x16xf32> to vector<2x16x1xf32>
    %cst_36 = arith.constant 3.200000e+01 : f32
    %34 = vector.broadcast %cst_36 : f32 to vector<2x16x1xf32>
    %35 = arith.divf %33, %34 : vector<2x16x1xf32>
    %36 = vector.broadcast %28 : vector<2x16x1xf32> to vector<2x16x32xf32>
    %37 = arith.subf %24, %36 : vector<2x16x32xf32>
    %cst_37 = arith.constant 9.99999974E-6 : f32
    %38 = vector.broadcast %cst_37 : f32 to vector<2x16x1xf32>
    %39 = arith.addf %35, %38 : vector<2x16x1xf32>
    %40 = math.rsqrt %39 : vector<2x16x1xf32>
    %41 = vector.broadcast %40 : vector<2x16x1xf32> to vector<2x16x32xf32>
    %42 = arith.mulf %37, %41 : vector<2x16x32xf32>
    %43 = vector.shape_cast %0 : vector<1x32xf32> to vector<1x1x32xf32>
    %44 = vector.broadcast %43 : vector<1x1x32xf32> to vector<2x16x32xf32>
    %45 = arith.mulf %42, %44 : vector<2x16x32xf32>
    %46 = vector.shape_cast %1 : vector<1x32xf32> to vector<1x1x32xf32>
    %47 = vector.broadcast %46 : vector<1x1x32xf32> to vector<2x16x32xf32>
    %48 = arith.addf %45, %47 : vector<2x16x32xf32>
    %49 = vector.extract_strided_slice %48 {offsets = [0, 0, 0], sizes = [1, 16, 32], strides = [1, 1, 1]} : vector<2x16x32xf32> to vector<1x16x32xf32>
    %50 = vector.shape_cast %49 : vector<1x16x32xf32> to vector<16x32xf32>
    %51 = arith.truncf %50 : vector<16x32xf32> to vector<16x32xbf16>
    %cst_38 = arith.constant dense<0.000000e+00> : vector<16x32xf32>
    %52 = tpu.matmul %51, %14, %cst_38 {dimension_numbers = #tpu.dot_dimension_numbers<[1], [0], [0], [1], [0, 0, 1, 1], [], []>} : vector<16x32xbf16>, vector<32x32xbf16>, vector<16x32xf32> -> vector<16x32xf32>
    %53 = vector.broadcast %6 : vector<1x32xf32> to vector<16x32xf32>
    %54 = arith.addf %52, %53 : vector<16x32xf32>
    %55 = arith.truncf %54 : vector<16x32xf32> to vector<16x32xbf16>
    %cst_39 = arith.constant dense<0.000000e+00> : vector<16x32xf32>
    %56 = tpu.matmul %51, %16, %cst_39 {dimension_numbers = #tpu.dot_dimension_numbers<[1], [0], [0], [1], [0, 0, 1, 1], [], []>} : vector<16x32xbf16>, vector<32x32xbf16>, vector<16x32xf32> -> vector<16x32xf32>
    %57 = vector.broadcast %7 : vector<1x32xf32> to vector<16x32xf32>
    %58 = arith.addf %56, %57 : vector<16x32xf32>
    %59 = arith.truncf %58 : vector<16x32xf32> to vector<16x32xbf16>
    %60 = vector.extract_strided_slice %48 {offsets = [1, 0, 0], sizes = [1, 16, 32], strides = [1, 1, 1]} : vector<2x16x32xf32> to vector<1x16x32xf32>
    %61 = vector.shape_cast %60 : vector<1x16x32xf32> to vector<16x32xf32>
    %62 = arith.truncf %61 : vector<16x32xf32> to vector<16x32xbf16>
    %cst_40 = arith.constant dense<0.000000e+00> : vector<16x32xf32>
    %63 = tpu.matmul %62, %14, %cst_40 {dimension_numbers = #tpu.dot_dimension_numbers<[1], [0], [0], [1], [0, 0, 1, 1], [], []>} : vector<16x32xbf16>, vector<32x32xbf16>, vector<16x32xf32> -> vector<16x32xf32>
    %64 = vector.broadcast %6 : vector<1x32xf32> to vector<16x32xf32>
    %65 = arith.addf %63, %64 : vector<16x32xf32>
    %66 = arith.truncf %65 : vector<16x32xf32> to vector<16x32xbf16>
    %cst_41 = arith.constant dense<0.000000e+00> : vector<16x32xf32>
    %67 = tpu.matmul %62, %16, %cst_41 {dimension_numbers = #tpu.dot_dimension_numbers<[1], [0], [0], [1], [0, 0, 1, 1], [], []>} : vector<16x32xbf16>, vector<32x32xbf16>, vector<16x32xf32> -> vector<16x32xf32>
    %68 = vector.broadcast %7 : vector<1x32xf32> to vector<16x32xf32>
    %69 = arith.addf %67, %68 : vector<16x32xf32>
    %70 = arith.truncf %69 : vector<16x32xf32> to vector<16x32xbf16>
    %c0_42 = arith.constant 0 : index
    %c0_43 = arith.constant 0 : index
    %71 = vector.load %arg2[%c0_42, %c0_43] : memref<8x32xf32, #tpu.memory_space<vmem>>, vector<8x32xf32>
    %cst_44 = arith.constant dense<0.000000e+00> : vector<8xf32>
    %72 = vector.multi_reduction <add>, %71, %cst_44 [1] : vector<8x32xf32> to vector<8xf32>
    %73 = vector.shape_cast %72 : vector<8xf32> to vector<8x1xf32>
    %cst_45 = arith.constant 3.200000e+01 : f32
    %74 = vector.broadcast %cst_45 : f32 to vector<8x1xf32>
    %75 = arith.divf %73, %74 : vector<8x1xf32>
    %76 = vector.broadcast %75 : vector<8x1xf32> to vector<8x32xf32>
    %77 = arith.subf %71, %76 : vector<8x32xf32>
    %78 = arith.mulf %77, %77 : vector<8x32xf32>
    %cst_46 = arith.constant dense<0.000000e+00> : vector<8xf32>
    %79 = vector.multi_reduction <add>, %78, %cst_46 [1] : vector<8x32xf32> to vector<8xf32>
    %80 = vector.shape_cast %79 : vector<8xf32> to vector<8x1xf32>
    %cst_47 = arith.constant 3.200000e+01 : f32
    %81 = vector.broadcast %cst_47 : f32 to vector<8x1xf32>
    %82 = arith.divf %80, %81 : vector<8x1xf32>
    %83 = vector.broadcast %75 : vector<8x1xf32> to vector<8x32xf32>
    %84 = arith.subf %71, %83 : vector<8x32xf32>
    %cst_48 = arith.constant 9.99999974E-6 : f32
    %85 = vector.broadcast %cst_48 : f32 to vector<8x1xf32>
    %86 = arith.addf %82, %85 : vector<8x1xf32>
    %87 = math.rsqrt %86 : vector<8x1xf32>
    %88 = vector.broadcast %87 : vector<8x1xf32> to vector<8x32xf32>
    %89 = arith.mulf %84, %88 : vector<8x32xf32>
    %90 = vector.broadcast %2 : vector<1x32xf32> to vector<8x32xf32>
    %91 = arith.mulf %89, %90 : vector<8x32xf32>
    %92 = vector.broadcast %3 : vector<1x32xf32> to vector<8x32xf32>
    %93 = arith.addf %91, %92 : vector<8x32xf32>
    %94 = arith.truncf %93 : vector<8x32xf32> to vector<8x32xbf16>
    %cst_49 = arith.constant dense<0.000000e+00> : vector<8x32xf32>
    %95 = tpu.matmul %94, %17, %cst_49 {dimension_numbers = #tpu.dot_dimension_numbers<[1], [0], [0], [1], [0, 0, 1, 1], [], []>} : vector<8x32xbf16>, vector<32x32xbf16>, vector<8x32xf32> -> vector<8x32xf32>
    %96 = vector.broadcast %8 : vector<1x32xf32> to vector<8x32xf32>
    %97 = arith.addf %95, %96 : vector<8x32xf32>
    %98 = arith.truncf %97 : vector<8x32xf32> to vector<8x32xbf16>
    %99 = vector.extract_strided_slice %98 {offsets = [0, 0], sizes = [4, 32], strides = [1, 1]} : vector<8x32xbf16> to vector<4x32xbf16>
    %cst_50 = arith.constant dense<0.000000e+00> : vector<4x16xf32>
    %100 = tpu.matmul %99, %55, %cst_50 {dimension_numbers = #tpu.dot_dimension_numbers<[1], [1], [0], [0], [0, 0, 1, 0], [], []>} : vector<4x32xbf16>, vector<16x32xbf16>, vector<4x16xf32> -> vector<4x16xf32>
    %cst_51 = arith.constant dense<0xFF800000> : vector<16xf32>
    %101 = vector.multi_reduction <maximumf>, %100, %cst_51 [0] : vector<4x16xf32> to vector<16xf32>
    %102 = vector.shape_cast %101 : vector<16xf32> to vector<1x16xf32>
    %103 = vector.broadcast %102 : vector<1x16xf32> to vector<4x16xf32>
    %104 = arith.subf %100, %103 : vector<4x16xf32>
    %105 = math.exp %104 : vector<4x16xf32>
    %cst_52 = arith.constant dense<0.000000e+00> : vector<16xf32>
    %106 = vector.multi_reduction <add>, %105, %cst_52 [0] : vector<4x16xf32> to vector<16xf32>
    %107 = vector.shape_cast %106 : vector<16xf32> to vector<1x16xf32>
    %108 = vector.broadcast %107 : vector<1x16xf32> to vector<4x16xf32>
    %109 = arith.divf %105, %108 : vector<4x16xf32>
    %cst_53 = arith.constant 9.99999993E-9 : f32
    %110 = vector.broadcast %cst_53 : f32 to vector<4x16xf32>
    %111 = arith.addf %109, %110 : vector<4x16xf32>
    %112 = arith.truncf %111 : vector<4x16xf32> to vector<4x16xbf16>
    %c0_54 = arith.constant 0 : index
    %c0_55 = arith.constant 0 : index
    %c0_56 = arith.constant 0 : index
    %c0_57 = arith.constant 0 : index
    %c0_58 = arith.constant 0 : index
    %113 = vector.load %arg11[%c0_54, %c0_55, %c0_56, %c0_57, %c0_58] : memref<2x3x1x4x16xbf16, #tpu.memory_space<vmem>>, vector<1x1x1x4x16xbf16>
    %114 = vector.shape_cast %113 : vector<1x1x1x4x16xbf16> to vector<4x16xbf16>
    %115 = vector.shape_cast %112 : vector<4x16xbf16> to vector<1x1x1x4x16xbf16>
    tpu.vector_store %arg11[%c0_54, %c0_55, %c0_56, %c0_57, %c0_58], %115 {strides = array<i32>} : memref<2x3x1x4x16xbf16, #tpu.memory_space<vmem>>, vector<1x1x1x4x16xbf16>,
    %cst_59 = arith.constant dense<0.000000e+00> : vector<4xf32>
    %116 = vector.multi_reduction <add>, %111, %cst_59 [1] : vector<4x16xf32> to vector<4xf32>
    %117 = vector.shape_cast %116 : vector<4xf32> to vector<4x1xf32>
    %118 = tpu.reciprocal %117 {approx = true} : vector<4x1xf32> -> vector<4x1xf32>
    %119 = vector.broadcast %118 : vector<4x1xf32> to vector<4x16xf32>
    %120 = arith.mulf %111, %119 : vector<4x16xf32>
    %121 = arith.truncf %120 : vector<4x16xf32> to vector<4x16xbf16>
    %cst_60 = arith.constant dense<0.000000e+00> : vector<4x32xf32>
    %122 = tpu.matmul %121, %59, %cst_60 {dimension_numbers = #tpu.dot_dimension_numbers<[1], [0], [0], [1], [0, 0, 1, 1], [], []>} : vector<4x16xbf16>, vector<16x32xbf16>, vector<4x32xf32> -> vector<4x32xf32>
    %123 = vector.extract_strided_slice %98 {offsets = [4, 0], sizes = [4, 32], strides = [1, 1]} : vector<8x32xbf16> to vector<4x32xbf16>
    %cst_61 = arith.constant dense<0.000000e+00> : vector<4x16xf32>
    %124 = tpu.matmul %123, %66, %cst_61 {dimension_numbers = #tpu.dot_dimension_numbers<[1], [1], [0], [0], [0, 0, 1, 0], [], []>} : vector<4x32xbf16>, vector<16x32xbf16>, vector<4x16xf32> -> vector<4x16xf32>
    %cst_62 = arith.constant dense<0xFF800000> : vector<16xf32>
    %125 = vector.multi_reduction <maximumf>, %124, %cst_62 [0] : vector<4x16xf32> to vector<16xf32>
    %126 = vector.shape_cast %125 : vector<16xf32> to vector<1x16xf32>
    %127 = vector.broadcast %126 : vector<1x16xf32> to vector<4x16xf32>
    %128 = arith.subf %124, %127 : vector<4x16xf32>
    %129 = math.exp %128 : vector<4x16xf32>
    %cst_63 = arith.constant dense<0.000000e+00> : vector<16xf32>
    %130 = vector.multi_reduction <add>, %129, %cst_63 [0] : vector<4x16xf32> to vector<16xf32>
    %131 = vector.shape_cast %130 : vector<16xf32> to vector<1x16xf32>
    %132 = vector.broadcast %131 : vector<1x16xf32> to vector<4x16xf32>
    %133 = arith.divf %129, %132 : vector<4x16xf32>
    %cst_64 = arith.constant 9.99999993E-9 : f32
    %134 = vector.broadcast %cst_64 : f32 to vector<4x16xf32>
    %135 = arith.addf %133, %134 : vector<4x16xf32>
    %136 = arith.truncf %135 : vector<4x16xf32> to vector<4x16xbf16>
    %c1_65 = arith.constant 1 : index
    %c0_66 = arith.constant 0 : index
    %c0_67 = arith.constant 0 : index
    %c0_68 = arith.constant 0 : index
    %c0_69 = arith.constant 0 : index
    %137 = vector.load %arg11[%c1_65, %c0_66, %c0_67, %c0_68, %c0_69] : memref<2x3x1x4x16xbf16, #tpu.memory_space<vmem>>, vector<1x1x1x4x16xbf16>
    %138 = vector.shape_cast %137 : vector<1x1x1x4x16xbf16> to vector<4x16xbf16>
    %139 = vector.shape_cast %136 : vector<4x16xbf16> to vector<1x1x1x4x16xbf16>
    tpu.vector_store %arg11[%c1_65, %c0_66, %c0_67, %c0_68, %c0_69], %139 {strides = array<i32>} : memref<2x3x1x4x16xbf16, #tpu.memory_space<vmem>>, vector<1x1x1x4x16xbf16>,
    %cst_70 = arith.constant dense<0.000000e+00> : vector<4xf32>
    %140 = vector.multi_reduction <add>, %135, %cst_70 [1] : vector<4x16xf32> to vector<4xf32>
    %141 = vector.shape_cast %140 : vector<4xf32> to vector<4x1xf32>
    %142 = tpu.reciprocal %141 {approx = true} : vector<4x1xf32> -> vector<4x1xf32>
    %143 = vector.broadcast %142 : vector<4x1xf32> to vector<4x16xf32>
    %144 = arith.mulf %135, %143 : vector<4x16xf32>
    %145 = arith.truncf %144 : vector<4x16xf32> to vector<4x16xbf16>
    %cst_71 = arith.constant dense<0.000000e+00> : vector<4x32xf32>
    %146 = tpu.matmul %145, %70, %cst_71 {dimension_numbers = #tpu.dot_dimension_numbers<[1], [0], [0], [1], [0, 0, 1, 1], [], []>} : vector<4x16xbf16>, vector<16x32xbf16>, vector<4x32xf32> -> vector<4x32xf32>
    %147 = tpu.concatenate %122, %146 in 0 : vector<4x32xf32>, vector<4x32xf32> -> vector<8x32xf32>
    %148 = arith.truncf %147 : vector<8x32xf32> to vector<8x32xbf16>
    %cst_72 = arith.constant dense<0.000000e+00> : vector<8x96xf32>
    %149 = tpu.matmul %148, %19, %cst_72 {dimension_numbers = #tpu.dot_dimension_numbers<[1], [0], [0], [1], [0, 0, 1, 1], [], []>} : vector<8x32xbf16>, vector<32x96xbf16>, vector<8x96xf32> -> vector<8x96xf32>
    %150 = vector.broadcast %9 : vector<1x96xf32> to vector<8x96xf32>
    %151 = arith.addf %149, %150 : vector<8x96xf32>
    %152 = arith.truncf %71 : vector<8x32xf32> to vector<8x32xbf16>
    %cst_73 = arith.constant dense<0.000000e+00> : vector<8x96xf32>
    %153 = tpu.matmul %152, %21, %cst_73 {dimension_numbers = #tpu.dot_dimension_numbers<[1], [0], [0], [1], [0, 0, 1, 1], [], []>} : vector<8x32xbf16>, vector<32x96xbf16>, vector<8x96xf32> -> vector<8x96xf32>
    %154 = vector.broadcast %10 : vector<1x96xf32> to vector<8x96xf32>
    %155 = arith.addf %153, %154 : vector<8x96xf32>
    %156 = vector.extract_strided_slice %151 {offsets = [0, 0], sizes = [8, 32], strides = [1, 1]} : vector<8x96xf32> to vector<8x32xf32>
    %157 = vector.extract_strided_slice %155 {offsets = [0, 0], sizes = [8, 32], strides = [1, 1]} : vector<8x96xf32> to vector<8x32xf32>
    %158 = arith.addf %156, %157 : vector<8x32xf32>
    %159 = arith.negf %158 : vector<8x32xf32>
    %160 = math.exp %159 : vector<8x32xf32>
    %cst_74 = arith.constant 1.000000e+00 : f32
    %161 = vector.broadcast %cst_74 : f32 to vector<8x32xf32>
    %162 = arith.addf %161, %160 : vector<8x32xf32>
    %163 = arith.divf %161, %162 : vector<8x32xf32>
    %164 = vector.extract_strided_slice %151 {offsets = [0, 32], sizes = [8, 32], strides = [1, 1]} : vector<8x96xf32> to vector<8x32xf32>
    %165 = vector.extract_strided_slice %155 {offsets = [0, 32], sizes = [8, 32], strides = [1, 1]} : vector<8x96xf32> to vector<8x32xf32>
    %166 = arith.addf %164, %165 : vector<8x32xf32>
    %167 = arith.negf %166 : vector<8x32xf32>
    %168 = math.exp %167 : vector<8x32xf32>
    %cst_75 = arith.constant 1.000000e+00 : f32
    %169 = vector.broadcast %cst_75 : f32 to vector<8x32xf32>
    %170 = arith.addf %169, %168 : vector<8x32xf32>
    %171 = arith.divf %169, %170 : vector<8x32xf32>
    %172 = vector.extract_strided_slice %151 {offsets = [0, 64], sizes = [8, 32], strides = [1, 1]} : vector<8x96xf32> to vector<8x32xf32>
    %173 = vector.extract_strided_slice %155 {offsets = [0, 64], sizes = [8, 32], strides = [1, 1]} : vector<8x96xf32> to vector<8x32xf32>
    %174 = arith.mulf %163, %173 : vector<8x32xf32>
    %175 = arith.addf %172, %174 : vector<8x32xf32>
    %176 = math.tanh %175 : vector<8x32xf32>
    %cst_76 = arith.constant 1.000000e+00 : f32
    %177 = vector.broadcast %cst_76 : f32 to vector<8x32xf32>
    %178 = arith.subf %177, %171 : vector<8x32xf32>
    %179 = arith.mulf %178, %176 : vector<8x32xf32>
    %180 = arith.mulf %171, %71 : vector<8x32xf32>
    %181 = arith.addf %179, %180 : vector<8x32xf32>
    %cst_77 = arith.constant dense<0.000000e+00> : vector<8xf32>
    %182 = vector.multi_reduction <add>, %181, %cst_77 [1] : vector<8x32xf32> to vector<8xf32>
    %183 = vector.shape_cast %182 : vector<8xf32> to vector<8x1xf32>
    %cst_78 = arith.constant 3.200000e+01 : f32
    %184 = vector.broadcast %cst_78 : f32 to vector<8x1xf32>
    %185 = arith.divf %183, %184 : vector<8x1xf32>
    %186 = vector.broadcast %185 : vector<8x1xf32> to vector<8x32xf32>
    %187 = arith.subf %181, %186 : vector<8x32xf32>
    %188 = arith.mulf %187, %187 : vector<8x32xf32>
    %cst_79 = arith.constant dense<0.000000e+00> : vector<8xf32>
    %189 = vector.multi_reduction <add>, %188, %cst_79 [1] : vector<8x32xf32> to vector<8xf32>
    %190 = vector.shape_cast %189 : vector<8xf32> to vector<8x1xf32>
    %cst_80 = arith.constant 3.200000e+01 : f32
    %191 = vector.broadcast %cst_80 : f32 to vector<8x1xf32>
    %192 = arith.divf %190, %191 : vector<8x1xf32>
    %193 = vector.broadcast %185 : vector<8x1xf32> to vector<8x32xf32>
    %194 = arith.subf %181, %193 : vector<8x32xf32>
    %cst_81 = arith.constant 9.99999974E-6 : f32
    %195 = vector.broadcast %cst_81 : f32 to vector<8x1xf32>
    %196 = arith.addf %192, %195 : vector<8x1xf32>
    %197 = math.rsqrt %196 : vector<8x1xf32>
    %198 = vector.broadcast %197 : vector<8x1xf32> to vector<8x32xf32>
    %199 = arith.mulf %194, %198 : vector<8x32xf32>
    %200 = vector.broadcast %4 : vector<1x32xf32> to vector<8x32xf32>
    %201 = arith.mulf %199, %200 : vector<8x32xf32>
    %202 = vector.broadcast %5 : vector<1x32xf32> to vector<8x32xf32>
    %203 = arith.addf %201, %202 : vector<8x32xf32>
    %204 = arith.truncf %203 : vector<8x32xf32> to vector<8x32xbf16>
    %cst_82 = arith.constant dense<0.000000e+00> : vector<8x64xf32>
    %205 = tpu.matmul %204, %22, %cst_82 {dimension_numbers = #tpu.dot_dimension_numbers<[1], [0], [0], [1], [0, 0, 1, 1], [], []>} : vector<8x32xbf16>, vector<32x64xbf16>, vector<8x64xf32> -> vector<8x64xf32>
    %206 = vector.broadcast %11 : vector<1x64xf32> to vector<8x64xf32>
    %207 = arith.addf %205, %206 : vector<8x64xf32>
    %cst_83 = arith.constant 0.000000e+00 : f32
    %208 = vector.broadcast %cst_83 : f32 to vector<8x64xf32>
    %209 = arith.maximumf %207, %208 : vector<8x64xf32>
    %210 = arith.truncf %209 : vector<8x64xf32> to vector<8x64xbf16>
    %cst_84 = arith.constant dense<0.000000e+00> : vector<8x32xf32>
    %211 = tpu.matmul %210, %23, %cst_84 {dimension_numbers = #tpu.dot_dimension_numbers<[1], [0], [0], [1], [0, 0, 1, 1], [], []>} : vector<8x64xbf16>, vector<64x32xbf16>, vector<8x32xf32> -> vector<8x32xf32>
    %212 = arith.addf %181, %211 : vector<8x32xf32>
    %213 = vector.broadcast %12 : vector<1x32xf32> to vector<8x32xf32>
    %214 = arith.addf %212, %213 : vector<8x32xf32>
    %cst_85 = arith.constant dense<0.000000e+00> : vector<8xf32>
    %215 = vector.multi_reduction <add>, %214, %cst_85 [1] : vector<8x32xf32> to vector<8xf32>
    %216 = vector.shape_cast %215 : vector<8xf32> to vector<8x1xf32>
    %cst_86 = arith.constant 3.200000e+01 : f32
    %217 = vector.broadcast %cst_86 : f32 to vector<8x1xf32>
    %218 = arith.divf %216, %217 : vector<8x1xf32>
    %219 = vector.broadcast %218 : vector<8x1xf32> to vector<8x32xf32>
    %220 = arith.subf %214, %219 : vector<8x32xf32>
    %221 = arith.mulf %220, %220 : vector<8x32xf32>
    %cst_87 = arith.constant dense<0.000000e+00> : vector<8xf32>
    %222 = vector.multi_reduction <add>, %221, %cst_87 [1] : vector<8x32xf32> to vector<8xf32>
    %223 = vector.shape_cast %222 : vector<8xf32> to vector<8x1xf32>
    %cst_88 = arith.constant 3.200000e+01 : f32
    %224 = vector.broadcast %cst_88 : f32 to vector<8x1xf32>
    %225 = arith.divf %223, %224 : vector<8x1xf32>
    %226 = vector.broadcast %218 : vector<8x1xf32> to vector<8x32xf32>
    %227 = arith.subf %214, %226 : vector<8x32xf32>
    %cst_89 = arith.constant 9.99999974E-6 : f32
    %228 = vector.broadcast %cst_89 : f32 to vector<8x1xf32>
    %229 = arith.addf %225, %228 : vector<8x1xf32>
    %230 = math.rsqrt %229 : vector<8x1xf32>
    %231 = vector.broadcast %230 : vector<8x1xf32> to vector<8x32xf32>
    %232 = arith.mulf %227, %231 : vector<8x32xf32>
    %233 = vector.broadcast %2 : vector<1x32xf32> to vector<8x32xf32>
    %234 = arith.mulf %232, %233 : vector<8x32xf32>
    %235 = vector.broadcast %3 : vector<1x32xf32> to vector<8x32xf32>
    %236 = arith.addf %234, %235 : vector<8x32xf32>
    %237 = arith.truncf %236 : vector<8x32xf32> to vector<8x32xbf16>
    %cst_90 = arith.constant dense<0.000000e+00> : vector<8x32xf32>
    %238 = tpu.matmul %237, %17, %cst_90 {dimension_numbers = #tpu.dot_dimension_numbers<[1], [0], [0], [1], [0, 0, 1, 1], [], []>} : vector<8x32xbf16>, vector<32x32xbf16>, vector<8x32xf32> -> vector<8x32xf32>
    %239 = vector.broadcast %8 : vector<1x32xf32> to vector<8x32xf32>
    %240 = arith.addf %238, %239 : vector<8x32xf32>
    %241 = arith.truncf %240 : vector<8x32xf32> to vector<8x32xbf16>
    %242 = vector.extract_strided_slice %241 {offsets = [0, 0], sizes = [4, 32], strides = [1, 1]} : vector<8x32xbf16> to vector<4x32xbf16>
    %cst_91 = arith.constant dense<0.000000e+00> : vector<4x16xf32>
    %243 = tpu.matmul %242, %55, %cst_91 {dimension_numbers = #tpu.dot_dimension_numbers<[1], [1], [0], [0], [0, 0, 1, 0], [], []>} : vector<4x32xbf16>, vector<16x32xbf16>, vector<4x16xf32> -> vector<4x16xf32>
    %cst_92 = arith.constant dense<0xFF800000> : vector<16xf32>
    %244 = vector.multi_reduction <maximumf>, %243, %cst_92 [0] : vector<4x16xf32> to vector<16xf32>
    %245 = vector.shape_cast %244 : vector<16xf32> to vector<1x16xf32>
    %246 = vector.broadcast %245 : vector<1x16xf32> to vector<4x16xf32>
    %247 = arith.subf %243, %246 : vector<4x16xf32>
    %248 = math.exp %247 : vector<4x16xf32>
    %cst_93 = arith.constant dense<0.000000e+00> : vector<16xf32>
    %249 = vector.multi_reduction <add>, %248, %cst_93 [0] : vector<4x16xf32> to vector<16xf32>
    %250 = vector.shape_cast %249 : vector<16xf32> to vector<1x16xf32>
    %251 = vector.broadcast %250 : vector<1x16xf32> to vector<4x16xf32>
    %252 = arith.divf %248, %251 : vector<4x16xf32>
    %cst_94 = arith.constant 9.99999993E-9 : f32
    %253 = vector.broadcast %cst_94 : f32 to vector<4x16xf32>
    %254 = arith.addf %252, %253 : vector<4x16xf32>
    %255 = arith.truncf %254 : vector<4x16xf32> to vector<4x16xbf16>
    %c0_95 = arith.constant 0 : index
    %c1_96 = arith.constant 1 : index
    %c0_97 = arith.constant 0 : index
    %c0_98 = arith.constant 0 : index
    %c0_99 = arith.constant 0 : index
    %256 = vector.load %arg11[%c0_95, %c1_96, %c0_97, %c0_98, %c0_99] : memref<2x3x1x4x16xbf16, #tpu.memory_space<vmem>>, vector<1x1x1x4x16xbf16>
    %257 = vector.shape_cast %256 : vector<1x1x1x4x16xbf16> to vector<4x16xbf16>
    %258 = vector.shape_cast %255 : vector<4x16xbf16> to vector<1x1x1x4x16xbf16>
    tpu.vector_store %arg11[%c0_95, %c1_96, %c0_97, %c0_98, %c0_99], %258 {strides = array<i32>} : memref<2x3x1x4x16xbf16, #tpu.memory_space<vmem>>, vector<1x1x1x4x16xbf16>,
    %cst_100 = arith.constant dense<0.000000e+00> : vector<4xf32>
    %259 = vector.multi_reduction <add>, %254, %cst_100 [1] : vector<4x16xf32> to vector<4xf32>
    %260 = vector.shape_cast %259 : vector<4xf32> to vector<4x1xf32>
    %261 = tpu.reciprocal %260 {approx = true} : vector<4x1xf32> -> vector<4x1xf32>
    %262 = vector.broadcast %261 : vector<4x1xf32> to vector<4x16xf32>
    %263 = arith.mulf %254, %262 : vector<4x16xf32>
    %264 = arith.truncf %263 : vector<4x16xf32> to vector<4x16xbf16>
    %cst_101 = arith.constant dense<0.000000e+00> : vector<4x32xf32>
    %265 = tpu.matmul %264, %59, %cst_101 {dimension_numbers = #tpu.dot_dimension_numbers<[1], [0], [0], [1], [0, 0, 1, 1], [], []>} : vector<4x16xbf16>, vector<16x32xbf16>, vector<4x32xf32> -> vector<4x32xf32>
    %266 = vector.extract_strided_slice %241 {offsets = [4, 0], sizes = [4, 32], strides = [1, 1]} : vector<8x32xbf16> to vector<4x32xbf16>
    %cst_102 = arith.constant dense<0.000000e+00> : vector<4x16xf32>
    %267 = tpu.matmul %266, %66, %cst_102 {dimension_numbers = #tpu.dot_dimension_numbers<[1], [1], [0], [0], [0, 0, 1, 0], [], []>} : vector<4x32xbf16>, vector<16x32xbf16>, vector<4x16xf32> -> vector<4x16xf32>
    %cst_103 = arith.constant dense<0xFF800000> : vector<16xf32>
    %268 = vector.multi_reduction <maximumf>, %267, %cst_103 [0] : vector<4x16xf32> to vector<16xf32>
    %269 = vector.shape_cast %268 : vector<16xf32> to vector<1x16xf32>
    %270 = vector.broadcast %269 : vector<1x16xf32> to vector<4x16xf32>
    %271 = arith.subf %267, %270 : vector<4x16xf32>
    %272 = math.exp %271 : vector<4x16xf32>
    %cst_104 = arith.constant dense<0.000000e+00> : vector<16xf32>
    %273 = vector.multi_reduction <add>, %272, %cst_104 [0] : vector<4x16xf32> to vector<16xf32>
    %274 = vector.shape_cast %273 : vector<16xf32> to vector<1x16xf32>
    %275 = vector.broadcast %274 : vector<1x16xf32> to vector<4x16xf32>
    %276 = arith.divf %272, %275 : vector<4x16xf32>
    %cst_105 = arith.constant 9.99999993E-9 : f32
    %277 = vector.broadcast %cst_105 : f32 to vector<4x16xf32>
    %278 = arith.addf %276, %277 : vector<4x16xf32>
    %279 = arith.truncf %278 : vector<4x16xf32> to vector<4x16xbf16>
    %c1_106 = arith.constant 1 : index
    %c1_107 = arith.constant 1 : index
    %c0_108 = arith.constant 0 : index
    %c0_109 = arith.constant 0 : index
    %c0_110 = arith.constant 0 : index
    %280 = vector.load %arg11[%c1_106, %c1_107, %c0_108, %c0_109, %c0_110] : memref<2x3x1x4x16xbf16, #tpu.memory_space<vmem>>, vector<1x1x1x4x16xbf16>
    %281 = vector.shape_cast %280 : vector<1x1x1x4x16xbf16> to vector<4x16xbf16>
    %282 = vector.shape_cast %279 : vector<4x16xbf16> to vector<1x1x1x4x16xbf16>
    tpu.vector_store %arg11[%c1_106, %c1_107, %c0_108, %c0_109, %c0_110], %282 {strides = array<i32>} : memref<2x3x1x4x16xbf16, #tpu.memory_space<vmem>>, vector<1x1x1x4x16xbf16>,
    %cst_111 = arith.constant dense<0.000000e+00> : vector<4xf32>
    %283 = vector.multi_reduction <add>, %278, %cst_111 [1] : vector<4x16xf32> to vector<4xf32>
    %284 = vector.shape_cast %283 : vector<4xf32> to vector<4x1xf32>
    %285 = tpu.reciprocal %284 {approx = true} : vector<4x1xf32> -> vector<4x1xf32>
    %286 = vector.broadcast %285 : vector<4x1xf32> to vector<4x16xf32>
    %287 = arith.mulf %278, %286 : vector<4x16xf32>
    %288 = arith.truncf %287 : vector<4x16xf32> to vector<4x16xbf16>
    %cst_112 = arith.constant dense<0.000000e+00> : vector<4x32xf32>
    %289 = tpu.matmul %288, %70, %cst_112 {dimension_numbers = #tpu.dot_dimension_numbers<[1], [0], [0], [1], [0, 0, 1, 1], [], []>} : vector<4x16xbf16>, vector<16x32xbf16>, vector<4x32xf32> -> vector<4x32xf32>
    %290 = tpu.concatenate %265, %289 in 0 : vector<4x32xf32>, vector<4x32xf32> -> vector<8x32xf32>
    %291 = arith.truncf %290 : vector<8x32xf32> to vector<8x32xbf16>
    %cst_113 = arith.constant dense<0.000000e+00> : vector<8x96xf32>
    %292 = tpu.matmul %291, %19, %cst_113 {dimension_numbers = #tpu.dot_dimension_numbers<[1], [0], [0], [1], [0, 0, 1, 1], [], []>} : vector<8x32xbf16>, vector<32x96xbf16>, vector<8x96xf32> -> vector<8x96xf32>
    %293 = vector.broadcast %9 : vector<1x96xf32> to vector<8x96xf32>
    %294 = arith.addf %292, %293 : vector<8x96xf32>
    %295 = arith.truncf %214 : vector<8x32xf32> to vector<8x32xbf16>
    %cst_114 = arith.constant dense<0.000000e+00> : vector<8x96xf32>
    %296 = tpu.matmul %295, %21, %cst_114 {dimension_numbers = #tpu.dot_dimension_numbers<[1], [0], [0], [1], [0, 0, 1, 1], [], []>} : vector<8x32xbf16>, vector<32x96xbf16>, vector<8x96xf32> -> vector<8x96xf32>
    %297 = vector.broadcast %10 : vector<1x96xf32> to vector<8x96xf32>
    %298 = arith.addf %296, %297 : vector<8x96xf32>
    %299 = vector.extract_strided_slice %294 {offsets = [0, 0], sizes = [8, 32], strides = [1, 1]} : vector<8x96xf32> to vector<8x32xf32>
    %300 = vector.extract_strided_slice %298 {offsets = [0, 0], sizes = [8, 32], strides = [1, 1]} : vector<8x96xf32> to vector<8x32xf32>
    %301 = arith.addf %299, %300 : vector<8x32xf32>
    %302 = arith.negf %301 : vector<8x32xf32>
    %303 = math.exp %302 : vector<8x32xf32>
    %cst_115 = arith.constant 1.000000e+00 : f32
    %304 = vector.broadcast %cst_115 : f32 to vector<8x32xf32>
    %305 = arith.addf %304, %303 : vector<8x32xf32>
    %306 = arith.divf %304, %305 : vector<8x32xf32>
    %307 = vector.extract_strided_slice %294 {offsets = [0, 32], sizes = [8, 32], strides = [1, 1]} : vector<8x96xf32> to vector<8x32xf32>
    %308 = vector.extract_strided_slice %298 {offsets = [0, 32], sizes = [8, 32], strides = [1, 1]} : vector<8x96xf32> to vector<8x32xf32>
    %309 = arith.addf %307, %308 : vector<8x32xf32>
    %310 = arith.negf %309 : vector<8x32xf32>
    %311 = math.exp %310 : vector<8x32xf32>
    %cst_116 = arith.constant 1.000000e+00 : f32
    %312 = vector.broadcast %cst_116 : f32 to vector<8x32xf32>
    %313 = arith.addf %312, %311 : vector<8x32xf32>
    %314 = arith.divf %312, %313 : vector<8x32xf32>
    %315 = vector.extract_strided_slice %294 {offsets = [0, 64], sizes = [8, 32], strides = [1, 1]} : vector<8x96xf32> to vector<8x32xf32>
    %316 = vector.extract_strided_slice %298 {offsets = [0, 64], sizes = [8, 32], strides = [1, 1]} : vector<8x96xf32> to vector<8x32xf32>
    %317 = arith.mulf %306, %316 : vector<8x32xf32>
    %318 = arith.addf %315, %317 : vector<8x32xf32>
    %319 = math.tanh %318 : vector<8x32xf32>
    %cst_117 = arith.constant 1.000000e+00 : f32
    %320 = vector.broadcast %cst_117 : f32 to vector<8x32xf32>
    %321 = arith.subf %320, %314 : vector<8x32xf32>
    %322 = arith.mulf %321, %319 : vector<8x32xf32>
    %323 = arith.mulf %314, %214 : vector<8x32xf32>
    %324 = arith.addf %322, %323 : vector<8x32xf32>
    %cst_118 = arith.constant dense<0.000000e+00> : vector<8xf32>
    %325 = vector.multi_reduction <add>, %324, %cst_118 [1] : vector<8x32xf32> to vector<8xf32>
    %326 = vector.shape_cast %325 : vector<8xf32> to vector<8x1xf32>
    %cst_119 = arith.constant 3.200000e+01 : f32
    %327 = vector.broadcast %cst_119 : f32 to vector<8x1xf32>
    %328 = arith.divf %326, %327 : vector<8x1xf32>
    %329 = vector.broadcast %328 : vector<8x1xf32> to vector<8x32xf32>
    %330 = arith.subf %324, %329 : vector<8x32xf32>
    %331 = arith.mulf %330, %330 : vector<8x32xf32>
    %cst_120 = arith.constant dense<0.000000e+00> : vector<8xf32>
    %332 = vector.multi_reduction <add>, %331, %cst_120 [1] : vector<8x32xf32> to vector<8xf32>
    %333 = vector.shape_cast %332 : vector<8xf32> to vector<8x1xf32>
    %cst_121 = arith.constant 3.200000e+01 : f32
    %334 = vector.broadcast %cst_121 : f32 to vector<8x1xf32>
    %335 = arith.divf %333, %334 : vector<8x1xf32>
    %336 = vector.broadcast %328 : vector<8x1xf32> to vector<8x32xf32>
    %337 = arith.subf %324, %336 : vector<8x32xf32>
    %cst_122 = arith.constant 9.99999974E-6 : f32
    %338 = vector.broadcast %cst_122 : f32 to vector<8x1xf32>
    %339 = arith.addf %335, %338 : vector<8x1xf32>
    %340 = math.rsqrt %339 : vector<8x1xf32>
    %341 = vector.broadcast %340 : vector<8x1xf32> to vector<8x32xf32>
    %342 = arith.mulf %337, %341 : vector<8x32xf32>
    %343 = vector.broadcast %4 : vector<1x32xf32> to vector<8x32xf32>
    %344 = arith.mulf %342, %343 : vector<8x32xf32>
    %345 = vector.broadcast %5 : vector<1x32xf32> to vector<8x32xf32>
    %346 = arith.addf %344, %345 : vector<8x32xf32>
    %347 = arith.truncf %346 : vector<8x32xf32> to vector<8x32xbf16>
    %cst_123 = arith.constant dense<0.000000e+00> : vector<8x64xf32>
    %348 = tpu.matmul %347, %22, %cst_123 {dimension_numbers = #tpu.dot_dimension_numbers<[1], [0], [0], [1], [0, 0, 1, 1], [], []>} : vector<8x32xbf16>, vector<32x64xbf16>, vector<8x64xf32> -> vector<8x64xf32>
    %349 = vector.broadcast %11 : vector<1x64xf32> to vector<8x64xf32>
    %350 = arith.addf %348, %349 : vector<8x64xf32>
    %cst_124 = arith.constant 0.000000e+00 : f32
    %351 = vector.broadcast %cst_124 : f32 to vector<8x64xf32>
    %352 = arith.maximumf %350, %351 : vector<8x64xf32>
    %353 = arith.truncf %352 : vector<8x64xf32> to vector<8x64xbf16>
    %cst_125 = arith.constant dense<0.000000e+00> : vector<8x32xf32>
    %354 = tpu.matmul %353, %23, %cst_125 {dimension_numbers = #tpu.dot_dimension_numbers<[1], [0], [0], [1], [0, 0, 1, 1], [], []>} : vector<8x64xbf16>, vector<64x32xbf16>, vector<8x32xf32> -> vector<8x32xf32>
    %355 = arith.addf %324, %354 : vector<8x32xf32>
    %356 = vector.broadcast %12 : vector<1x32xf32> to vector<8x32xf32>
    %357 = arith.addf %355, %356 : vector<8x32xf32>
    %cst_126 = arith.constant dense<0.000000e+00> : vector<8xf32>
    %358 = vector.multi_reduction <add>, %357, %cst_126 [1] : vector<8x32xf32> to vector<8xf32>
    %359 = vector.shape_cast %358 : vector<8xf32> to vector<8x1xf32>
    %cst_127 = arith.constant 3.200000e+01 : f32
    %360 = vector.broadcast %cst_127 : f32 to vector<8x1xf32>
    %361 = arith.divf %359, %360 : vector<8x1xf32>
    %362 = vector.broadcast %361 : vector<8x1xf32> to vector<8x32xf32>
    %363 = arith.subf %357, %362 : vector<8x32xf32>
    %364 = arith.mulf %363, %363 : vector<8x32xf32>
    %cst_128 = arith.constant dense<0.000000e+00> : vector<8xf32>
    %365 = vector.multi_reduction <add>, %364, %cst_128 [1] : vector<8x32xf32> to vector<8xf32>
    %366 = vector.shape_cast %365 : vector<8xf32> to vector<8x1xf32>
    %cst_129 = arith.constant 3.200000e+01 : f32
    %367 = vector.broadcast %cst_129 : f32 to vector<8x1xf32>
    %368 = arith.divf %366, %367 : vector<8x1xf32>
    %369 = vector.broadcast %361 : vector<8x1xf32> to vector<8x32xf32>
    %370 = arith.subf %357, %369 : vector<8x32xf32>
    %cst_130 = arith.constant 9.99999974E-6 : f32
    %371 = vector.broadcast %cst_130 : f32 to vector<8x1xf32>
    %372 = arith.addf %368, %371 : vector<8x1xf32>
    %373 = math.rsqrt %372 : vector<8x1xf32>
    %374 = vector.broadcast %373 : vector<8x1xf32> to vector<8x32xf32>
    %375 = arith.mulf %370, %374 : vector<8x32xf32>
    %376 = vector.broadcast %2 : vector<1x32xf32> to vector<8x32xf32>
    %377 = arith.mulf %375, %376 : vector<8x32xf32>
    %378 = vector.broadcast %3 : vector<1x32xf32> to vector<8x32xf32>
    %379 = arith.addf %377, %378 : vector<8x32xf32>
    %380 = arith.truncf %379 : vector<8x32xf32> to vector<8x32xbf16>
    %cst_131 = arith.constant dense<0.000000e+00> : vector<8x32xf32>
    %381 = tpu.matmul %380, %17, %cst_131 {dimension_numbers = #tpu.dot_dimension_numbers<[1], [0], [0], [1], [0, 0, 1, 1], [], []>} : vector<8x32xbf16>, vector<32x32xbf16>, vector<8x32xf32> -> vector<8x32xf32>
    %382 = vector.broadcast %8 : vector<1x32xf32> to vector<8x32xf32>
    %383 = arith.addf %381, %382 : vector<8x32xf32>
    %384 = arith.truncf %383 : vector<8x32xf32> to vector<8x32xbf16>
    %385 = vector.extract_strided_slice %384 {offsets = [0, 0], sizes = [4, 32], strides = [1, 1]} : vector<8x32xbf16> to vector<4x32xbf16>
    %cst_132 = arith.constant dense<0.000000e+00> : vector<4x16xf32>
    %386 = tpu.matmul %385, %55, %cst_132 {dimension_numbers = #tpu.dot_dimension_numbers<[1], [1], [0], [0], [0, 0, 1, 0], [], []>} : vector<4x32xbf16>, vector<16x32xbf16>, vector<4x16xf32> -> vector<4x16xf32>
    %cst_133 = arith.constant dense<0xFF800000> : vector<16xf32>
    %387 = vector.multi_reduction <maximumf>, %386, %cst_133 [0] : vector<4x16xf32> to vector<16xf32>
    %388 = vector.shape_cast %387 : vector<16xf32> to vector<1x16xf32>
    %389 = vector.broadcast %388 : vector<1x16xf32> to vector<4x16xf32>
    %390 = arith.subf %386, %389 : vector<4x16xf32>
    %391 = math.exp %390 : vector<4x16xf32>
    %cst_134 = arith.constant dense<0.000000e+00> : vector<16xf32>
    %392 = vector.multi_reduction <add>, %391, %cst_134 [0] : vector<4x16xf32> to vector<16xf32>
    %393 = vector.shape_cast %392 : vector<16xf32> to vector<1x16xf32>
    %394 = vector.broadcast %393 : vector<1x16xf32> to vector<4x16xf32>
    %395 = arith.divf %391, %394 : vector<4x16xf32>
    %cst_135 = arith.constant 9.99999993E-9 : f32
    %396 = vector.broadcast %cst_135 : f32 to vector<4x16xf32>
    %397 = arith.addf %395, %396 : vector<4x16xf32>
    %398 = arith.truncf %397 : vector<4x16xf32> to vector<4x16xbf16>
    %c0_136 = arith.constant 0 : index
    %c2_137 = arith.constant 2 : index
    %c0_138 = arith.constant 0 : index
    %c0_139 = arith.constant 0 : index
    %c0_140 = arith.constant 0 : index
    %399 = vector.load %arg11[%c0_136, %c2_137, %c0_138, %c0_139, %c0_140] : memref<2x3x1x4x16xbf16, #tpu.memory_space<vmem>>, vector<1x1x1x4x16xbf16>
    %400 = vector.shape_cast %399 : vector<1x1x1x4x16xbf16> to vector<4x16xbf16>
    %401 = vector.shape_cast %398 : vector<4x16xbf16> to vector<1x1x1x4x16xbf16>
    tpu.vector_store %arg11[%c0_136, %c2_137, %c0_138, %c0_139, %c0_140], %401 {strides = array<i32>} : memref<2x3x1x4x16xbf16, #tpu.memory_space<vmem>>, vector<1x1x1x4x16xbf16>,
    %cst_141 = arith.constant dense<0.000000e+00> : vector<4xf32>
    %402 = vector.multi_reduction <add>, %397, %cst_141 [1] : vector<4x16xf32> to vector<4xf32>
    %403 = vector.shape_cast %402 : vector<4xf32> to vector<4x1xf32>
    %404 = tpu.reciprocal %403 {approx = true} : vector<4x1xf32> -> vector<4x1xf32>
    %405 = vector.broadcast %404 : vector<4x1xf32> to vector<4x16xf32>
    %406 = arith.mulf %397, %405 : vector<4x16xf32>
    %c0_142 = arith.constant 0 : index
    %c0_143 = arith.constant 0 : index
    %c0_144 = arith.constant 0 : index
    %c0_145 = arith.constant 0 : index
    %407 = vector.load %arg10[%c0_142, %c0_143, %c0_144, %c0_145] : memref<2x1x4x16xf32, #tpu.memory_space<vmem>>, vector<1x1x4x16xf32>
    %408 = vector.shape_cast %407 : vector<1x1x4x16xf32> to vector<4x16xf32>
    %409 = vector.shape_cast %406 : vector<4x16xf32> to vector<1x1x4x16xf32>
    tpu.vector_store %arg10[%c0_142, %c0_143, %c0_144, %c0_145], %409 {strides = array<i32>} : memref<2x1x4x16xf32, #tpu.memory_space<vmem>>, vector<1x1x4x16xf32>,
    %410 = arith.truncf %406 : vector<4x16xf32> to vector<4x16xbf16>
    %cst_146 = arith.constant dense<0.000000e+00> : vector<4x32xf32>
    %411 = tpu.matmul %410, %59, %cst_146 {dimension_numbers = #tpu.dot_dimension_numbers<[1], [0], [0], [1], [0, 0, 1, 1], [], []>} : vector<4x16xbf16>, vector<16x32xbf16>, vector<4x32xf32> -> vector<4x32xf32>
    %412 = vector.extract_strided_slice %384 {offsets = [4, 0], sizes = [4, 32], strides = [1, 1]} : vector<8x32xbf16> to vector<4x32xbf16>
    %cst_147 = arith.constant dense<0.000000e+00> : vector<4x16xf32>
    %413 = tpu.matmul %412, %66, %cst_147 {dimension_numbers = #tpu.dot_dimension_numbers<[1], [1], [0], [0], [0, 0, 1, 0], [], []>} : vector<4x32xbf16>, vector<16x32xbf16>, vector<4x16xf32> -> vector<4x16xf32>
    %cst_148 = arith.constant dense<0xFF800000> : vector<16xf32>
    %414 = vector.multi_reduction <maximumf>, %413, %cst_148 [0] : vector<4x16xf32> to vector<16xf32>
    %415 = vector.shape_cast %414 : vector<16xf32> to vector<1x16xf32>
    %416 = vector.broadcast %415 : vector<1x16xf32> to vector<4x16xf32>
    %417 = arith.subf %413, %416 : vector<4x16xf32>
    %418 = math.exp %417 : vector<4x16xf32>
    %cst_149 = arith.constant dense<0.000000e+00> : vector<16xf32>
    %419 = vector.multi_reduction <add>, %418, %cst_149 [0] : vector<4x16xf32> to vector<16xf32>
    %420 = vector.shape_cast %419 : vector<16xf32> to vector<1x16xf32>
    %421 = vector.broadcast %420 : vector<1x16xf32> to vector<4x16xf32>
    %422 = arith.divf %418, %421 : vector<4x16xf32>
    %cst_150 = arith.constant 9.99999993E-9 : f32
    %423 = vector.broadcast %cst_150 : f32 to vector<4x16xf32>
    %424 = arith.addf %422, %423 : vector<4x16xf32>
    %425 = arith.truncf %424 : vector<4x16xf32> to vector<4x16xbf16>
    %c1_151 = arith.constant 1 : index
    %c2_152 = arith.constant 2 : index
    %c0_153 = arith.constant 0 : index
    %c0_154 = arith.constant 0 : index
    %c0_155 = arith.constant 0 : index
    %426 = vector.load %arg11[%c1_151, %c2_152, %c0_153, %c0_154, %c0_155] : memref<2x3x1x4x16xbf16, #tpu.memory_space<vmem>>, vector<1x1x1x4x16xbf16>
    %427 = vector.shape_cast %426 : vector<1x1x1x4x16xbf16> to vector<4x16xbf16>
    %428 = vector.shape_cast %425 : vector<4x16xbf16> to vector<1x1x1x4x16xbf16>
    tpu.vector_store %arg11[%c1_151, %c2_152, %c0_153, %c0_154, %c0_155], %428 {strides = array<i32>} : memref<2x3x1x4x16xbf16, #tpu.memory_space<vmem>>, vector<1x1x1x4x16xbf16>,
    %cst_156 = arith.constant dense<0.000000e+00> : vector<4xf32>
    %429 = vector.multi_reduction <add>, %424, %cst_156 [1] : vector<4x16xf32> to vector<4xf32>
    %430 = vector.shape_cast %429 : vector<4xf32> to vector<4x1xf32>
    %431 = tpu.reciprocal %430 {approx = true} : vector<4x1xf32> -> vector<4x1xf32>
    %432 = vector.broadcast %431 : vector<4x1xf32> to vector<4x16xf32>
    %433 = arith.mulf %424, %432 : vector<4x16xf32>
    %c1_157 = arith.constant 1 : index
    %c0_158 = arith.constant 0 : index
    %c0_159 = arith.constant 0 : index
    %c0_160 = arith.constant 0 : index
    %434 = vector.load %arg10[%c1_157, %c0_158, %c0_159, %c0_160] : memref<2x1x4x16xf32, #tpu.memory_space<vmem>>, vector<1x1x4x16xf32>
    %435 = vector.shape_cast %434 : vector<1x1x4x16xf32> to vector<4x16xf32>
    %436 = vector.shape_cast %433 : vector<4x16xf32> to vector<1x1x4x16xf32>
    tpu.vector_store %arg10[%c1_157, %c0_158, %c0_159, %c0_160], %436 {strides = array<i32>} : memref<2x1x4x16xf32, #tpu.memory_space<vmem>>, vector<1x1x4x16xf32>,
    %437 = arith.truncf %433 : vector<4x16xf32> to vector<4x16xbf16>
    %cst_161 = arith.constant dense<0.000000e+00> : vector<4x32xf32>
    %438 = tpu.matmul %437, %70, %cst_161 {dimension_numbers = #tpu.dot_dimension_numbers<[1], [0], [0], [1], [0, 0, 1, 1], [], []>} : vector<4x16xbf16>, vector<16x32xbf16>, vector<4x32xf32> -> vector<4x32xf32>
    %439 = tpu.concatenate %411, %438 in 0 : vector<4x32xf32>, vector<4x32xf32> -> vector<8x32xf32>
    %440 = arith.truncf %439 : vector<8x32xf32> to vector<8x32xbf16>
    %cst_162 = arith.constant dense<0.000000e+00> : vector<8x96xf32>
    %441 = tpu.matmul %440, %19, %cst_162 {dimension_numbers = #tpu.dot_dimension_numbers<[1], [0], [0], [1], [0, 0, 1, 1], [], []>} : vector<8x32xbf16>, vector<32x96xbf16>, vector<8x96xf32> -> vector<8x96xf32>
    %442 = vector.broadcast %9 : vector<1x96xf32> to vector<8x96xf32>
    %443 = arith.addf %441, %442 : vector<8x96xf32>
    %444 = arith.truncf %357 : vector<8x32xf32> to vector<8x32xbf16>
    %cst_163 = arith.constant dense<0.000000e+00> : vector<8x96xf32>
    %445 = tpu.matmul %444, %21, %cst_163 {dimension_numbers = #tpu.dot_dimension_numbers<[1], [0], [0], [1], [0, 0, 1, 1], [], []>} : vector<8x32xbf16>, vector<32x96xbf16>, vector<8x96xf32> -> vector<8x96xf32>
    %446 = vector.broadcast %10 : vector<1x96xf32> to vector<8x96xf32>
    %447 = arith.addf %445, %446 : vector<8x96xf32>
    %448 = vector.extract_strided_slice %443 {offsets = [0, 0], sizes = [8, 32], strides = [1, 1]} : vector<8x96xf32> to vector<8x32xf32>
    %449 = vector.extract_strided_slice %447 {offsets = [0, 0], sizes = [8, 32], strides = [1, 1]} : vector<8x96xf32> to vector<8x32xf32>
    %450 = arith.addf %448, %449 : vector<8x32xf32>
    %451 = arith.negf %450 : vector<8x32xf32>
    %452 = math.exp %451 : vector<8x32xf32>
    %cst_164 = arith.constant 1.000000e+00 : f32
    %453 = vector.broadcast %cst_164 : f32 to vector<8x32xf32>
    %454 = arith.addf %453, %452 : vector<8x32xf32>
    %455 = arith.divf %453, %454 : vector<8x32xf32>
    %456 = vector.extract_strided_slice %443 {offsets = [0, 32], sizes = [8, 32], strides = [1, 1]} : vector<8x96xf32> to vector<8x32xf32>
    %457 = vector.extract_strided_slice %447 {offsets = [0, 32], sizes = [8, 32], strides = [1, 1]} : vector<8x96xf32> to vector<8x32xf32>
    %458 = arith.addf %456, %457 : vector<8x32xf32>
    %459 = arith.negf %458 : vector<8x32xf32>
    %460 = math.exp %459 : vector<8x32xf32>
    %cst_165 = arith.constant 1.000000e+00 : f32
    %461 = vector.broadcast %cst_165 : f32 to vector<8x32xf32>
    %462 = arith.addf %461, %460 : vector<8x32xf32>
    %463 = arith.divf %461, %462 : vector<8x32xf32>
    %464 = vector.extract_strided_slice %443 {offsets = [0, 64], sizes = [8, 32], strides = [1, 1]} : vector<8x96xf32> to vector<8x32xf32>
    %465 = vector.extract_strided_slice %447 {offsets = [0, 64], sizes = [8, 32], strides = [1, 1]} : vector<8x96xf32> to vector<8x32xf32>
    %466 = arith.mulf %455, %465 : vector<8x32xf32>
    %467 = arith.addf %464, %466 : vector<8x32xf32>
    %468 = math.tanh %467 : vector<8x32xf32>
    %cst_166 = arith.constant 1.000000e+00 : f32
    %469 = vector.broadcast %cst_166 : f32 to vector<8x32xf32>
    %470 = arith.subf %469, %463 : vector<8x32xf32>
    %471 = arith.mulf %470, %468 : vector<8x32xf32>
    %472 = arith.mulf %463, %357 : vector<8x32xf32>
    %473 = arith.addf %471, %472 : vector<8x32xf32>
    %cst_167 = arith.constant dense<0.000000e+00> : vector<8xf32>
    %474 = vector.multi_reduction <add>, %473, %cst_167 [1] : vector<8x32xf32> to vector<8xf32>
    %475 = vector.shape_cast %474 : vector<8xf32> to vector<8x1xf32>
    %cst_168 = arith.constant 3.200000e+01 : f32
    %476 = vector.broadcast %cst_168 : f32 to vector<8x1xf32>
    %477 = arith.divf %475, %476 : vector<8x1xf32>
    %478 = vector.broadcast %477 : vector<8x1xf32> to vector<8x32xf32>
    %479 = arith.subf %473, %478 : vector<8x32xf32>
    %480 = arith.mulf %479, %479 : vector<8x32xf32>
    %cst_169 = arith.constant dense<0.000000e+00> : vector<8xf32>
    %481 = vector.multi_reduction <add>, %480, %cst_169 [1] : vector<8x32xf32> to vector<8xf32>
    %482 = vector.shape_cast %481 : vector<8xf32> to vector<8x1xf32>
    %cst_170 = arith.constant 3.200000e+01 : f32
    %483 = vector.broadcast %cst_170 : f32 to vector<8x1xf32>
    %484 = arith.divf %482, %483 : vector<8x1xf32>
    %485 = vector.broadcast %477 : vector<8x1xf32> to vector<8x32xf32>
    %486 = arith.subf %473, %485 : vector<8x32xf32>
    %cst_171 = arith.constant 9.99999974E-6 : f32
    %487 = vector.broadcast %cst_171 : f32 to vector<8x1xf32>
    %488 = arith.addf %484, %487 : vector<8x1xf32>
    %489 = math.rsqrt %488 : vector<8x1xf32>
    %490 = vector.broadcast %489 : vector<8x1xf32> to vector<8x32xf32>
    %491 = arith.mulf %486, %490 : vector<8x32xf32>
    %492 = vector.broadcast %4 : vector<1x32xf32> to vector<8x32xf32>
    %493 = arith.mulf %491, %492 : vector<8x32xf32>
    %494 = vector.broadcast %5 : vector<1x32xf32> to vector<8x32xf32>
    %495 = arith.addf %493, %494 : vector<8x32xf32>
    %496 = arith.truncf %495 : vector<8x32xf32> to vector<8x32xbf16>
    %cst_172 = arith.constant dense<0.000000e+00> : vector<8x64xf32>
    %497 = tpu.matmul %496, %22, %cst_172 {dimension_numbers = #tpu.dot_dimension_numbers<[1], [0], [0], [1], [0, 0, 1, 1], [], []>} : vector<8x32xbf16>, vector<32x64xbf16>, vector<8x64xf32> -> vector<8x64xf32>
    %498 = vector.broadcast %11 : vector<1x64xf32> to vector<8x64xf32>
    %499 = arith.addf %497, %498 : vector<8x64xf32>
    %cst_173 = arith.constant 0.000000e+00 : f32
    %500 = vector.broadcast %cst_173 : f32 to vector<8x64xf32>
    %501 = arith.maximumf %499, %500 : vector<8x64xf32>
    %502 = arith.truncf %501 : vector<8x64xf32> to vector<8x64xbf16>
    %cst_174 = arith.constant dense<0.000000e+00> : vector<8x32xf32>
    %503 = tpu.matmul %502, %23, %cst_174 {dimension_numbers = #tpu.dot_dimension_numbers<[1], [0], [0], [1], [0, 0, 1, 1], [], []>} : vector<8x64xbf16>, vector<64x32xbf16>, vector<8x32xf32> -> vector<8x32xf32>
    %504 = arith.addf %473, %503 : vector<8x32xf32>
    %505 = vector.broadcast %12 : vector<1x32xf32> to vector<8x32xf32>
    %506 = arith.addf %504, %505 : vector<8x32xf32>
    %507 = vector.extract_strided_slice %506 {offsets = [0, 0], sizes = [4, 32], strides = [1, 1]} : vector<8x32xf32> to vector<4x32xf32>
    %c0_175 = arith.constant 0 : index
    %c0_176 = arith.constant 0 : index
    %c0_177 = arith.constant 0 : index
    %508 = vector.load %arg9[%c0_175, %c0_176, %c0_177] : memref<2x4x32xf32, #tpu.memory_space<vmem>>, vector<1x4x32xf32>
    %509 = vector.shape_cast %508 : vector<1x4x32xf32> to vector<4x32xf32>
    %510 = vector.shape_cast %507 : vector<4x32xf32> to vector<1x4x32xf32>
    tpu.vector_store %arg9[%c0_175, %c0_176, %c0_177], %510 {strides = array<i32>} : memref<2x4x32xf32, #tpu.memory_space<vmem>>, vector<1x4x32xf32>,
    %511 = vector.extract_strided_slice %506 {offsets = [4, 0], sizes = [4, 32], strides = [1, 1]} : vector<8x32xf32> to vector<4x32xf32>
    %c1_178 = arith.constant 1 : index
    %c0_179 = arith.constant 0 : index
    %c0_180 = arith.constant 0 : index
    %512 = vector.load %arg9[%c1_178, %c0_179, %c0_180] : memref<2x4x32xf32, #tpu.memory_space<vmem>>, vector<1x4x32xf32>
    %513 = vector.shape_cast %512 : vector<1x4x32xf32> to vector<4x32xf32>
    %514 = vector.shape_cast %511 : vector<4x32xf32> to vector<1x4x32xf32>
    tpu.vector_store %arg9[%c1_178, %c0_179, %c0_180], %514 {strides = array<i32>} : memref<2x4x32xf32, #tpu.memory_space<vmem>>, vector<1x4x32xf32>,
    return
  }
  func.func @transform_0(%arg0: i32) -> (i32, i32, i32) {
    %c0_i32 = arith.constant 0 : i32
    %c0_i32_0 = arith.constant 0 : i32
    %c0_i32_1 = arith.constant 0 : i32
    return %arg0, %c0_i32, %c0_i32_0 : i32, i32, i32
  }
  func.func @transform_1(%arg0: i32) -> (i32, i32) {
    %c0_i32 = arith.constant 0 : i32
    %c0_i32_0 = arith.constant 0 : i32
    %c0_i32_1 = arith.constant 0 : i32
    return %c0_i32, %c0_i32_0 : i32, i32
  }
  func.func @transform_2(%arg0: i32) -> (i32, i32) {
    %c0_i32 = arith.constant 0 : i32
    %c0_i32_0 = arith.constant 0 : i32
    %c0_i32_1 = arith.constant 0 : i32
    return %c0_i32, %c0_i32_0 : i32, i32
  }
  func.func @transform_3(%arg0: i32) -> (i32, i32, i32) {
    %c0_i32 = arith.constant 0 : i32
    %c0_i32_0 = arith.constant 0 : i32
    %c0_i32_1 = arith.constant 0 : i32
    %c0_i32_2 = arith.constant 0 : i32
    return %c0_i32, %c0_i32_0, %c0_i32_1 : i32, i32, i32
  }
  func.func @transform_4(%arg0: i32) -> (i32, i32) {
    %c0_i32 = arith.constant 0 : i32
    %c0_i32_0 = arith.constant 0 : i32
    %c0_i32_1 = arith.constant 0 : i32
    return %c0_i32, %c0_i32_0 : i32, i32
  }
  func.func @transform_5(%arg0: i32) -> (i32, i32, i32) {
    %c0_i32 = arith.constant 0 : i32
    %c0_i32_0 = arith.constant 0 : i32
    %c0_i32_1 = arith.constant 0 : i32
    %c0_i32_2 = arith.constant 0 : i32
    return %c0_i32, %c0_i32_0, %c0_i32_1 : i32, i32, i32
  }
  func.func @transform_6(%arg0: i32) -> (i32, i32) {
    %c0_i32 = arith.constant 0 : i32
    %c0_i32_0 = arith.constant 0 : i32
    %c0_i32_1 = arith.constant 0 : i32
    return %c0_i32, %c0_i32_0 : i32, i32
  }
  func.func @transform_7(%arg0: i32) -> (i32, i32) {
    %c0_i32 = arith.constant 0 : i32
    %c0_i32_0 = arith.constant 0 : i32
    %c0_i32_1 = arith.constant 0 : i32
    return %c0_i32, %c0_i32_0 : i32, i32
  }
  func.func @transform_8(%arg0: i32) -> (i32, i32, i32) {
    %c0_i32 = arith.constant 0 : i32
    %c0_i32_0 = arith.constant 0 : i32
    %c0_i32_1 = arith.constant 0 : i32
    return %arg0, %c0_i32, %c0_i32_0 : i32, i32, i32
  }
  func.func @transform_9(%arg0: i32) -> (i32, i32, i32, i32) {
    %c0_i32 = arith.constant 0 : i32
    %c0_i32_0 = arith.constant 0 : i32
    %c0_i32_1 = arith.constant 0 : i32
    %c0_i32_2 = arith.constant 0 : i32
    return %arg0, %c0_i32, %c0_i32_0, %c0_i32_1 : i32, i32, i32, i32
  }
  func.func @transform_10(%arg0: i32) -> (i32, i32, i32, i32, i32) {
    %c0_i32 = arith.constant 0 : i32
    %c0_i32_0 = arith.constant 0 : i32
    %c0_i32_1 = arith.constant 0 : i32
    %c0_i32_2 = arith.constant 0 : i32
    %c0_i32_3 = arith.constant 0 : i32
    return %arg0, %c0_i32, %c0_i32_0, %c0_i32_1, %c0_i32_2 : i32, i32, i32, i32, i32
  }
}

</mosaic_0001>

<bundles_post_ra>
// kernel: tpu_custom_call.1
= control target key start
LH: loop header
LB: loop body
LE: loop exit
PB: predicated region body
PF: predicated region fallthrough
CT: control target
= control target key end

     0   :  { %s4848_s0 = inlined_call_operand.hbm [shape: f32[4,16,32], index: 0, kind: input, shape index: {}]   ;;  %s4849_s1 = inlined_call_operand.hbm [shape: f32[8,32], index: 1, kind: input, shape index: {}]   ;;  %s4850_s2 = inlined_call_operand.hbm [shape: f32[13,96], index: 2, kind: input, shape index: {}]   ;;  %s4851_s3 = inlined_call_operand.hbm [shape: bf16[2,32,32], index: 3, kind: input, shape index: {}]   ;;  %s4852_s4 = inlined_call_operand.hbm [shape: bf16[32,32], index: 4, kind: input, shape index: {}]   ;;  %s4853_s5 = inlined_call_operand.hbm [shape: bf16[2,32,96], index: 5, kind: input, shape index: {}]   ;;  %s4854_s6 = inlined_call_operand.hbm [shape: bf16[32,64], index: 6, kind: input, shape index: {}]   ;;  %s4855_s7 = inlined_call_operand.hbm [shape: bf16[64,32], index: 7, kind: input, shape index: {}]   ;;  %s4856_s8 = inlined_call_operand.hbm [shape: f32[4,4,32], index: 8, kind: output, shape index: {0}]   ;;  %s4857_s9 = inlined_call_operand.hbm [shape: f32[4,1,4,16], index: 9, kind: output, shape index: {1}]   ;;  %s4858_s10 = inlined_call_operand.hbm [shape: bf16[4,3,1,4,16], index: 10, kind: output, shape index: {2}]  }
   0x1   :  { %4875 = sst [smem:[#allocation27_spill]] %s4848_s0 }
   0x2   :  { %4876 = sst [smem:[#allocation28_spill]] %s4849_s1 }
   0x3   :  { %4877 = sst [smem:[#allocation29_spill]] %s4850_s2 }
   0x4   :  { %4878 = sst [smem:[#allocation30_spill]] %s4851_s3 }
   0x5   :  { %16 = vsyncpa [#allocation3], 0 }
   0x6   :  { %18 = vsyncpa [#allocation3 + $0x1], 0 }
   0x7   :  { %19 = vsyncpa [#allocation6], 0 }
   0x8   :  { %20 = vsyncpa [#allocation9], 0 }
   0x9   :  { %21 = vsyncpa [#allocation12], 0 }
   0xa   :  { %22 = vsyncpa [#allocation15], 0 }
   0xb   :  { %23 = vsyncpa [#allocation4], 0 }
   0xc   :  { %25 = vsyncpa [#allocation4 + $0x1], 0 }
   0xd   :  { %26 = vsyncpa [#allocation18], 0 }
   0xe   :  { %28 = vsyncpa [#allocation18 + $0x1], 0  ;;  %s3977_s13 = smov 0   ;;  %s3979_s14 = smov 0  }
   0xf   :  { %s3981_s15 = smov 0   ;;  %s3983_s16 = smov 0  }
  0x10 LB: > { %s3900_s17 = smov [#allocation5]   ;;  %s3998_s19 = sadd.s32 4294967295, %s3898_s16   ;;  %s3898_s16 = sphi %s3983_s16, %s4916_s16   ;;  %s3894_s15 = sphi %s3981_s15, %s4915_s15   ;;  %s3890_s14 = sphi %s3979_s14, %s4914_s14   ;;  %s3886_s13 = sphi %s3977_s13, %s4913_s13  }
  0x11   : > { %s303_s18 = sshll.u32 %s3900_s17, 4  ;;  %p2866_p0 = scmp.ge.s32.totalorder %s3898_s16, 1  ;;  %s304_s18 = int_to_ptr.vmem [resolvable:$true] %s303_s18 }
  0x12   : > { %p4859_p1 = scmp.eq.s32.totalorder %s3998_s19, 0  ;;  %p290_p2 = scmp.lt.s32.totalorder %s3898_s16, 3 }
  0x13   : > { %s3901_s21 = smov [#allocation8]   ;;  %s3902_s24 = smov [#allocation11]  }
  0x14   : > { %p4003_p3 = pnand %p2866_p0, %p290_p2  ;;  %s326_s22 = sshll.u32 %s3901_s21, 4  ;;  %s4010_s22 = int_to_ptr.vmem [resolvable:$true] %s326_s22 }
  0x15   : > { %s352_s25 = sshll.u32 %s3902_s24, 4  ;;  %s4881_s1 = sld [smem:[#allocation28_spill]]  ;;  %s4018_s25 = int_to_ptr.vmem [resolvable:$true] %s352_s25 }
  0x16   : > { %s4879_s20 = scalar_select %p4003_p3, 1, 0 }
  0x17   : > { %p3336_p5 = pneg %p4003_p3 }
  0x19   : > { %p4014_p6 = pnand %p3336_p5, %p4859_p1 }
  0x1b   : > { %s3530_s28 = scalar_lea.hbm %s4881_s1, 128  ;;  %p4028_p8 = pneg %p4014_p6 }
  0x1c   : > { %p3531_p7 = scmp.ne.s32.totalorder %s4881_s1, %s3530_s28  ;;  %p3537_p11 = scmp.lt.u32.totalorder %s3530_s28, %s4881_s1 }
  0x1e   : > { %p3533_p9 = pnand %p4028_p8, %p3531_p7 }
  0x20   : > { %p3534_p10 = pneg %p3533_p9 }
  0x22   : > { %p3539_p12 = pnand %p3537_p11, %p3534_p10 }
  0x24   : > { %3542 = shalt.err (!%p3539_p12)
}
  0x25   : > { %s3543_s21 = scalar_lea.vmem %s304_s18, 128  ;;  %p3551_p5 = scmp.lt.s32.totalorder %s304_s18, %s304_s18 }
  0x26   : > { %p3544_p13 = scmp.ne.s32.totalorder %s304_s18, %s3543_s21  ;;  %p3552_p4 = scmp.lt.s32.totalorder %s3543_s21, %s3543_s21 }
  0x28   : > { %p3546_p0 = pnand %p3544_p13, %p4028_p8  ;;  %p3553_p1 = por %p3552_p4, %p3551_p5 }
  0x2a   : > { %p3547_p2 = pneg %p3546_p0 }
  0x2c   : > { %p3554_p3 = pnand %p3553_p1, %p3547_p2 }
  0x2e   : > { %3557 = shalt.err (!%p3554_p3)
}
  0x2f   : > { %3339 = dma.hbm_to_vmem [thread:$0]  (!%p4014_p6), %s4881_s1, 128, %s304_s18, [#allocation6]  }
  0x30   : > { %s4883_s3 = sld [smem:[#allocation30_spill]] }
  0x36   : > { %s3558_s29 = scalar_lea.hbm %s4883_s3, 512 }
  0x37   : > { %p3559_p7 = scmp.ne.s32.totalorder %s4883_s3, %s3558_s29  ;;  %p3565_p1 = scmp.lt.u32.totalorder %s3558_s29, %s4883_s3 }
  0x39   : > { %p3561_p9 = pnand %p3559_p7, %p4028_p8 }
  0x3b   : > { %p3562_p4 = pneg %p3561_p9 }
  0x3d   : > { %p3567_p3 = pnand %p3565_p1, %p3562_p4 }
  0x3f   : > { %3570 = shalt.err (!%p3567_p3)
}
  0x40   : > { %s3571_s18 = scalar_lea.vmem %s4010_s22, 512  ;;  %p3579_p13 = scmp.lt.s32.totalorder %s4010_s22, %s4010_s22 }
  0x41   : > { %p3572_p10 = scmp.ne.s32.totalorder %s4010_s22, %s3571_s18  ;;  %p3580_p0 = scmp.lt.s32.totalorder %s3571_s18, %s3571_s18 }
  0x43   : > { %p3574_p11 = pnand %p3572_p10, %p4028_p8  ;;  %p3581_p2 = por %p3580_p0, %p3579_p13 }
  0x45   : > { %p3575_p12 = pneg %p3574_p11 }
  0x47   : > { %p3582_p5 = pnand %p3581_p2, %p3575_p12 }
  0x49   : > { %3585 = shalt.err (!%p3582_p5)
}
  0x4a   : > { %s4861_s24 = smov 64   ;;  %s4863_s26 = smov 4  }
  0x4b   : > { %3345 = dma.hbm_to_vmem [thread:$0]  (!%p4014_p6), %s4883_s3, 512, %s4010_s22, [#allocation9], %s4861_s24, %s4861_s24, %s4863_s26  }
  0x4c   : > { %s3586_s12 = scalar_lea.hbm %s4853_s5, 512 }
  0x4d   : > { %p3587_p7 = scmp.ne.s32.totalorder %s4853_s5, %s3586_s12  ;;  %p3593_p1 = scmp.lt.u32.totalorder %s3586_s12, %s4853_s5 }
  0x4f   : > { %p3589_p9 = pnand %p3587_p7, %p4028_p8 }
  0x51   : > { %p3590_p4 = pneg %p3589_p9 }
  0x53   : > { %p3595_p3 = pnand %p3593_p1, %p3590_p4 }
  0x55   : > { %3598 = shalt.err (!%p3595_p3)
}
  0x56   : > { %s3599_s22 = scalar_lea.vmem %s4018_s25, 512  ;;  %p3607_p13 = scmp.lt.s32.totalorder %s4018_s25, %s4018_s25 }
  0x57   : > { %p3600_p10 = scmp.ne.s32.totalorder %s4018_s25, %s3599_s22  ;;  %p3608_p0 = scmp.lt.s32.totalorder %s3599_s22, %s3599_s22 }
  0x59   : > { %p3602_p11 = pnand %p3600_p10, %p4028_p8  ;;  %p3609_p2 = por %p3608_p0, %p3607_p13 }
  0x5b   : > { %p3603_p12 = pneg %p3602_p11 }
  0x5d   : > { %p3610_p5 = pnand %p3609_p2, %p3603_p12 }
  0x5f   : > { %3613 = shalt.err (!%p3610_p5)
}
  0x60   : > { %3351 = dma.hbm_to_vmem [thread:$0]  (!%p4014_p6), %s4853_s5, 512, %s4018_s25, [#allocation12], %s4861_s24, %s4861_s24, %s4863_s26  }
  0x61   : > { %s3905_s28 = smov [#allocation7]   ;;  %s4884_s2 = sld [smem:[#allocation29_spill]] }
  0x62   : > { %s313_s29 = sshll.u32 %s3905_s28, 4  ;;  %s314_s29 = int_to_ptr.vmem [resolvable:$true] %s313_s29 }
  0x67   : > { %s3614_s17 = scalar_lea.hbm %s4884_s2, 256 }
  0x68   : > { %p3615_p7 = scmp.ne.s32.totalorder %s4884_s2, %s3614_s17  ;;  %p3621_p1 = scmp.lt.u32.totalorder %s3614_s17, %s4884_s2 }
  0x6a   : > { %p3617_p9 = pnand %p3615_p7, %p4028_p8 }
  0x6c   : > { %p3618_p4 = pneg %p3617_p9 }
  0x6e   : > { %p3623_p3 = pnand %p3621_p1, %p3618_p4 }
  0x70   : > { %3626 = shalt.err (!%p3623_p3)
}
  0x71   : > { %s3627_s25 = scalar_lea.vmem %s314_s29, 256  ;;  %p3635_p13 = scmp.lt.s32.totalorder %s314_s29, %s314_s29 }
  0x72   : > { %p3628_p10 = scmp.ne.s32.totalorder %s314_s29, %s3627_s25  ;;  %p3636_p0 = scmp.lt.s32.totalorder %s3627_s25, %s3627_s25 }
  0x74   : > { %p3630_p11 = pnand %p3628_p10, %p4028_p8  ;;  %p3637_p2 = por %p3636_p0, %p3635_p13 }
  0x76   : > { %p3631_p12 = pneg %p3630_p11 }
  0x78   : > { %p3638_p5 = pnand %p3637_p2, %p3631_p12 }
  0x7a   : > { %3641 = shalt.err (!%p3638_p5)
}
  0x7b   : > { %s4865_s1 = smov 128   ;;  %s4866_s27 = smov 8  }
  0x7c   : > { %3342 = dma.hbm_to_vmem [thread:$0]  (!%p4014_p6), %s4884_s2, 256, %s314_s29, [#allocation6], %s4865_s1, %s4865_s1, %s4866_s27  }
  0x7d   : > { %s3908_s30 = smov [#allocation10]   ;;  %s3909_s17 = smov [#allocation13]  }
  0x7e   : > { %s339_s12 = sshll.u32 %s3908_s30, 4  ;;  %s365_s21 = sshll.u32 %s3909_s17, 4  ;;  %s340_s12 = int_to_ptr.vmem [resolvable:$true] %s339_s12  ;;  %s4117_s21 = int_to_ptr.vmem [resolvable:$true] %s365_s21 }
  0x7f   : > { %s3642_s25 = scalar_lea.hbm %s4852_s4, 256 }
  0x80   : > { %p3643_p7 = scmp.ne.s32.totalorder %s4852_s4, %s3642_s25  ;;  %p3649_p1 = scmp.lt.u32.totalorder %s3642_s25, %s4852_s4 }
  0x82   : > { %p3645_p9 = pnand %p3643_p7, %p4028_p8 }
  0x84   : > { %p3646_p4 = pneg %p3645_p9 }
  0x86   : > { %p3651_p3 = pnand %p3649_p1, %p3646_p4 }
  0x88   : > { %3654 = shalt.err (!%p3651_p3)
}
  0x89   : > { %s3655_s28 = scalar_lea.vmem %s340_s12, 256  ;;  %p3663_p13 = scmp.lt.s32.totalorder %s340_s12, %s340_s12 }
  0x8a   : > { %p3656_p10 = scmp.ne.s32.totalorder %s340_s12, %s3655_s28  ;;  %p3664_p0 = scmp.lt.s32.totalorder %s3655_s28, %s3655_s28 }
  0x8c   : > { %p3658_p11 = pnand %p3656_p10, %p4028_p8  ;;  %p3665_p2 = por %p3664_p0, %p3663_p13 }
  0x8e   : > { %p3659_p12 = pneg %p3658_p11 }
  0x90   : > { %p3666_p5 = pnand %p3665_p2, %p3659_p12 }
  0x92   : > { %3669 = shalt.err (!%p3666_p5)
}
  0x93   : > { %s4885_s24 = smov 4   ;;  %s4886_s26 = smov 64  }
  0x94   : > { %3348 = dma.hbm_to_vmem [thread:$0]  (!%p4014_p6), %s4852_s4, 256, %s340_s12, [#allocation9], %s4886_s26, %s4886_s26, %s4885_s24  }
  0x95   : > { %s3670_s25 = scalar_lea.hbm %s4854_s6, 256 }
  0x96   : > { %p3671_p7 = scmp.ne.s32.totalorder %s4854_s6, %s3670_s25  ;;  %p3677_p1 = scmp.lt.u32.totalorder %s3670_s25, %s4854_s6 }
  0x98   : > { %p3673_p9 = pnand %p3671_p7, %p4028_p8 }
  0x9a   : > { %p3674_p4 = pneg %p3673_p9 }
  0x9c   : > { %p3679_p3 = pnand %p3677_p1, %p3674_p4 }
  0x9e   : > { %3682 = shalt.err (!%p3679_p3)
}
  0x9f   : > { %s3683_s12 = scalar_lea.vmem %s4117_s21, 256  ;;  %p3691_p13 = scmp.lt.s32.totalorder %s4117_s21, %s4117_s21 }
  0xa0   : > { %p3684_p10 = scmp.ne.s32.totalorder %s4117_s21, %s3683_s12  ;;  %p3692_p0 = scmp.lt.s32.totalorder %s3683_s12, %s3683_s12 }
  0xa2   : > { %p3686_p11 = pnand %p3684_p10, %p4028_p8  ;;  %p3693_p2 = por %p3692_p0, %p3691_p13 }
  0xa4   : > { %p3687_p12 = pneg %p3686_p11 }
  0xa6   : > { %p3694_p5 = pnand %p3693_p2, %p3687_p12 }
  0xa8   : > { %3697 = shalt.err (!%p3694_p5)
}
  0xa9   : > { %3354 = dma.hbm_to_vmem [thread:$0]  (!%p4014_p6), %s4854_s6, 256, %s4117_s21, [#allocation12], %s4886_s26, %s4886_s26, %s4885_s24  }
  0xaa   : > { %s3910_s17 = smov [#allocation14]   ;;  %s3698_s3 = scalar_lea.hbm %s4855_s7, 512 }
  0xab   : > { %s378_s18 = sshll.u32 %s3910_s17, 4  ;;  %p3699_p7 = scmp.ne.s32.totalorder %s4855_s7, %s3698_s3  ;;  %s379_s18 = int_to_ptr.vmem [resolvable:$true] %s378_s18 }
  0xac   : > { %p3705_p1 = scmp.lt.u32.totalorder %s3698_s3, %s4855_s7 }
  0xad   : > { %p3701_p9 = pnand %p3699_p7, %p4028_p8 }
  0xaf   : > { %p3702_p4 = pneg %p3701_p9 }
  0xb1   : > { %p3707_p3 = pnand %p3705_p1, %p3702_p4 }
  0xb3   : > { %3710 = shalt.err (!%p3707_p3)
}
  0xb4   : > { %s3711_s21 = scalar_lea.vmem %s379_s18, 512  ;;  %p3719_p13 = scmp.lt.s32.totalorder %s379_s18, %s379_s18 }
  0xb5   : > { %p3712_p10 = scmp.ne.s32.totalorder %s379_s18, %s3711_s21  ;;  %p3720_p0 = scmp.lt.s32.totalorder %s3711_s21, %s3711_s21 }
  0xb7   : > { %p3714_p11 = pnand %p3712_p10, %p4028_p8  ;;  %p3721_p2 = por %p3720_p0, %p3719_p13 }
  0xb9   : > { %p3715_p12 = pneg %p3714_p11 }
  0xbb   : > { %p3722_p5 = pnand %p3721_p2, %p3715_p12 }
  0xbd   : > { %3725 = shalt.err (!%p3722_p5)
}
  0xbe   : > { %3357 = dma.hbm_to_vmem [thread:$0]  (!%p4014_p6), %s4855_s7, 512, %s379_s18, [#allocation15], %s4886_s26, %s4886_s26, %s4885_s24  }
  0xbf   : > { %s4867_s23 = sadd.s32 4294967294, %s3898_s16   ;;  %s4189_s11 = sadd.s32 1, %s3898_s16  }
  0xc0   : > { %s41_s30 = sadd.s32 1, %s3894_s15  ;;  %s38_s17 = ssub.s32 %s3898_s16, %s4189_s11 }
  0xc1   : > { %p48_p8 = scmp.ne.s32.totalorder %s3894_s15, %s3890_s14  ;;  %p39_p7 = scmp.eq.s32.totalorder %s38_s17, 0 }
  0xc2   : > { %p49_p9 = scmp.eq.s32.totalorder %s3898_s16, 0  ;;  %p54_p4 = scmp.ne.s32.totalorder %s3890_s14, %s3886_s13 }
  0xc3   : > { %p225_p1 = scmp.eq.s32.totalorder %s3998_s19, 1  ;;  %p4887_p10 = scmp.eq.s32.totalorder %s3998_s19, 0 }
  0xc4   : > { %s4201_s22 = scalar_select %p39_p7, %s3894_s15, %s41_s30  }
  0xc5   : > { %p50_p3 = por %p49_p9, %p48_p8  ;;  %p4205_p11 = por %p4887_p10, %p54_p4 }
  0xc6   : > { %p4209_p6 = por %p225_p1, %p48_p8  ;;  %p231_p12 = scmp.eq.s32.totalorder %s4867_s23, 1 }
  0xc7   : > { %p3379_p13 = scmp.lt.s32.totalorder %s3898_s16, 2  ;;  %s392_s26 = sand.u32 1, %s3894_s15  }
  0xc8   : > { %s4889_s24 = scalar_select %p4209_p6, 1, 0 }
  0xc9   : > { %p4217_p0 = por %p231_p12, %p54_p4  ;;  %s2875_s3 = sshll.u32 %s392_s26, 5 }
  0xca   : > { %s2972_s29 = sshll.u32 %s3898_s16, 9  ;;  %s4891_s0 = sld [smem:[#allocation27_spill]] }
  0xcb   : > { %s4890_s18 = scalar_select %p4217_p0, 1, 0 }
  0xcc   : > { %s396_s27 = scalar_lea.vmem [#allocation2], %s2875_s3  ;;  %p4227_p2 = pnand %p3379_p13, %p50_p3 }
  0xcd   : > { %s404_s1 = sshll.u32 %s396_s27, 4  ;;  %s4233_s17 = scalar_lea.sflag [#allocation3], %s392_s26  ;;  %s4231_s1 = int_to_ptr.vmem [resolvable:$true] %s404_s1 }
  0xce   : > { %p3728_p8 = pneg %p4227_p2 }
  0xd0   : > { %s4225_s21 = scalar_lea.hbm %s4891_s0, %s2972_s29  ;;  %s3731_s28 = scalar_lea.hbm %s4891_s0, 1024 }
  0xd1   : > { %s3726_s23 = scalar_lea.hbm %s4225_s21, 512  ;;  %p3732_p4 = scmp.lt.u32.totalorder %s4225_s21, %s4891_s0 }
  0xd2   : > { %p3727_p5 = scmp.ne.s32.totalorder %s4225_s21, %s3726_s23  ;;  %p3733_p1 = scmp.lt.u32.totalorder %s3731_s28, %s3726_s23 }
  0xd3   : > { %p3735_p10 = scmp.lt.u32.totalorder %s3726_s23, %s4225_s21 }
  0xd4   : > { %p3729_p7 = pnand %p3728_p8, %p3727_p5  ;;  %p3734_p3 = por %p3733_p1, %p3732_p4 }
  0xd6   : > { %p3730_p9 = pneg %p3729_p7  ;;  %p3736_p12 = por %p3735_p10, %p3734_p3 }
  0xd8   : > { %p3737_p13 = pnand %p3736_p12, %p3730_p9 }
  0xda   : > { %3740 = shalt.err (!%p3737_p13)
}
  0xdb   : > { %s3741_s26 = scalar_lea.vmem %s4231_s1, 512  ;;  %s3911_s3 = smov [#allocation2]  }
  0xdc   : > { %p3742_p5 = scmp.ne.s32.totalorder %s4231_s1, %s3741_s26  ;;  %s3746_s29 = sshll.u32 %s3911_s3, 4  ;;  %s3747_s29 = int_to_ptr.vmem [resolvable:$false] %s3746_s29 }
  0xdd   : > { %s3748_s12 = scalar_lea.vmem %s3747_s29, 1024  ;;  %p3749_p6 = scmp.lt.s32.totalorder %s4231_s1, %s3747_s29 }
  0xde   : > { %p3744_p7 = pnand %p3742_p5, %p3728_p8  ;;  %p3750_p4 = scmp.lt.s32.totalorder %s3748_s12, %s3741_s26 }
  0xe0   : > { %p3745_p0 = pneg %p3744_p7  ;;  %p3751_p1 = por %p3750_p4, %p3749_p6 }
  0xe2   : > { %p3752_p3 = pnand %p3751_p1, %p3745_p0 }
  0xe4   : > { %3755 = shalt.err (!%p3752_p3)
}
  0xe5   : > { %s4893_s23 = smov 8   ;;  %s4894_s28 = smov 128  }
  0xe6   : > { %3361 = dma.hbm_to_vmem [thread:$0]  (!%p4227_p2), %s4225_s21, 512, %s4231_s1, %s4233_s17, %s4894_s28, %s4894_s28, %s4893_s23  }
  0xe7   : > { %p4895_p8 = scmp.ne.s32.totalorder %s4879_s20, 0 }
  0xe8   : > { %s4267_s27 = sand.u32 (!%p4895_p8), 1, %s3890_s14  }
  0xe9   : > { %416 = sbr.rel (%p4895_p8) target bundleno = 9742 (0x260e), region = 52  ;;  %s2880_s26 = sshll.u32 (!%p4895_p8), %s4267_s27, 5 }
  0xea   : > { %s419_s3 = scalar_lea.sflag (!%p4895_p8), [#allocation3], %s4267_s27  ;;  %s422_s29 = scalar_lea.vmem (!%p4895_p8), [#allocation2], %s2880_s26 }
  0xf0   : > { %3857 = dma.done.wait (%p4205_p11), %s419_s3, 512  }
  0xf1   : > { %3859 = vsyncadd (%p4205_p11), %s419_s3, 4294966784  ;;  %p4896_p6 = scmp.eq.s32.totalorder %s3998_s19, 0 }
  0xf3   : > { %3861 = dma.done.wait (%p4896_p6), [#allocation6], 384   ;;  %p4897_p0 = pmov %p4896_p6 }
  0xf5   : > { %3863 = vsyncadd (%p4897_p0), [#allocation6], 4294966912  ;;  %p4898_p2 = pmov %p4897_p0 }
  0xf6   : > { %p4899_p9 = pmov %p4897_p0 }
  0xf7   : > { %3865 = dma.done.wait (%p4898_p2), [#allocation9], 768  }
  0xf8   : > { %3867 = vsyncadd (%p4899_p9), [#allocation9], 4294966528  ;;  %p4900_p10 = pmov %p4897_p0 }
  0xf9   : > { %p4901_p12 = pmov %p4897_p0 }
  0xfa   : > { %3869 = dma.done.wait (%p4900_p10), [#allocation12], 768  }
  0xfb   : > { %3871 = vsyncadd (%p4901_p12), [#allocation12], 4294966528  ;;  %p4902_p11 = pmov %p4897_p0 }
  0xfc   : > { %p4903_p13 = pmov %p4897_p0 }
  0xfd   : > { %3873 = dma.done.wait (%p4902_p11), [#allocation15], 512  }
  0xfe   : > { %3875 = vsyncadd (%p4903_p13), [#allocation15], 4294966784  ;;  %vm553_vm0 = vcmask 261120   ;;  %v549_v0 = vld [vmem:[%s422_s29] sm:$0xff]  ;;  %v551_v1 = vld [vmem:[%s422_s29 + $0x10] sm:$0xff]  ;;  %v3912_v36 = vmov 0.0  }
  0xff   : > { %v550_v2 = vld [vmem:[%s422_s29 + $0x8] sm:$0xff]  ;;  %v554_v3 = vsel %vm553_vm0, %v549_v0, 0.0  ;;  %v560_v4 = vsel %vm553_vm0, %v551_v1, 0.0  ;;  %v552_v6 = vld [vmem:[%s422_s29 + $0x18] sm:$0xff]  ;;  %v4294_v7 = vld [vmem:[#allocation5] sm:$0xff]  ;;  %3062 = vmatprep.subr.bf16.mxu1 %v3912_v36  ;;  %3078 = vmatprep.subr.bf16.mxu0 %v3912_v36  ;;  %vm3913_vm1 = vmmov 0  }
 0x100   : > { %v557_v5 = vsel %vm553_vm0, %v550_v2, 0.0  ;;  %555 = vadd.xlane.f32.xlu0 %v554_v3  ;;  %561 = vadd.xlane.f32.xlu1 %v560_v4  ;;  %v563_v8 = vsel %vm553_vm0, %v552_v6, 0.0  ;;  %v832_v9 = vsel %vm553_vm0, %v4294_v7, 0.0  ;;  %v3438_v35 = vld [vmem:[#allocation8] sm:$0xff]   ;;  %v3439_v37 = vld [vmem:[#allocation8 + $0x8] sm:$0xff]   ;;  %vm962_vm2 = vcmask 125952  }
 0x101   : > { %3063 = vmatpush3.bf16.msra.mxu1 %v3438_v35  ;;  %3079 = vmatpush3.bf16.msra.mxu0 %v3438_v35  ;;  %v2890_v55 = vld [vmem:[#allocation7] ss:$0 sm:$0xff]  ;;  %v2891_v61 = vld [vmem:[#allocation7 + $0x1] ss:$0 sm:$0xff]  ;;  %s3298_s20 = smul.u32 12, %s4267_s27  ;;  %vm984_vm3 = vcmask 123904  }
 0x102   : > { %3064 = vmatprep.subr.bf16.mxu1 %v3912_v36  ;;  %3080 = vmatprep.subr.bf16.mxu0 %v3912_v36  ;;  %vm992_vm4 = vcmask 130048   ;;  %vm1159_vm5 = vcmask 1043456   ;;  %s4872_s21 = smov 64   ;;  %s4870_s1 = smov 96   ;;  %vm1439_vm6 = vcmask 523264  }
 0x103   : > { %3066 = vmatprep.mubr.msk.bf16.mxu1 %vm3913_vm1, %v3912_v36  ;;  %3082 = vmatprep.mubr.msk.bf16.mxu0 %vm3913_vm1, %v3912_v36  ;;  %s4394_s25 = scalar_lea.vmem [#allocation19], %s3298_s20  ;;  %s4871_s30 = smov 32  }
 0x104   : > { %558 = vadd.xlane.f32.xlu0 %v557_v5  ;;  %564 = vadd.xlane.f32.xlu1 %v563_v8  ;;  %v3440_v5 = vld [vmem:[#allocation8 + $0x10] sm:$0xff]   ;;  %s4869_s17 = sshll.u32 %s4267_s27, 3  ;;  %s2612_s28 = sand.u32 1, %s3998_s19  }
 0x105   : > { %3065 = vmatpush3.bf16.msra.mxu1 %v3439_v37  ;;  %3081 = vmatpush3.bf16.msra.mxu0 %v3439_v37  ;;  %v2896_v37 = vld [vmem:[#allocation7 + $0x7] ss:$0 sm:$0xff]  ;;  %s4659_s12 = scalar_lea.vmem [#allocation17], %s4869_s17  ;;  %s4874_s26 = sshll.u32 %s3998_s19, 7 }
 0x106   : > { %3070 = vmatprep.subr.bf16.mxu1 %v3912_v36  ;;  %3094 = vmatprep.subr.bf16.mxu0 %v3912_v36  ;;  %s2647_s23 = sshll.u32 %s4659_s12, 4  ;;  %s4725_s20 = scalar_lea.hbm %s4857_s9, %s4874_s26  ;;  %s4716_s23 = int_to_ptr.vmem [resolvable:$true] %s2647_s23 }
 0x107   : > { %s4727_s17 = scalar_lea.sflag [#allocation18], %s2612_s28  ;;  %p4904_p7 = scmp.ne.s32.totalorder %s4889_s24, 0 }
 0x108   : > { %833 = vadd.xlane.f32.xlu0 %v832_v9 }
 0x18d   : > { %v556_v10 = vpop.xlane.xlu0 %555  ;;  %v562_v11 = vpop.xlane.xlu1 %561 }
 0x18e   : > { %v567_v12 = vmul.f32 0.03125, %v556_v10  ;;  %v569_v13 = vmul.f32 0.03125, %v562_v11  ;;  %v4330_v10 = vld [vmem:[#allocation7 + $0x2] ss:$0 sm:$0xff] }
 0x190   : > { %v4299_v14 = vsub.f32 %v549_v0, %v567_v12  ;;  %v4301_v15 = vsub.f32 %v551_v1, %v569_v13  ;;  %v4333_v13 = vld [vmem:[#allocation10] sm:$0xff]  }
 0x191   : > { %v559_v16 = vpop.xlane.xlu0 %558  ;;  %v565_v17 = vpop.xlane.xlu1 %564 }
 0x192   : > { %v568_v18 = vmul.f32 0.03125, %v559_v16  ;;  %v570_v19 = vmul.f32 0.03125, %v565_v17  ;;  %v575_v20 = vmul.f32 %v4299_v14, %v4299_v14  ;;  %v577_v21 = vmul.f32 %v4301_v15, %v4301_v15  ;;  %v4339_v17 = vld [vmem:[#allocation7 + $0x3] ss:$0 sm:$0xff] }
 0x194   : > { %v572_v22 = vsub.f32 %v550_v2, %v568_v18  ;;  %v4307_v23 = vsub.f32 %v552_v6, %v570_v19  ;;  %v579_v24 = vsel %vm553_vm0, %v575_v20, 0.0  ;;  %v585_v27 = vsel %vm553_vm0, %v577_v21, 0.0  ;;  %v4343_v18 = vld [vmem:[#allocation10 + $0x8] sm:$0xff]   ;;  %v2892_v21 = vld [vmem:[#allocation7 + $0x6] ss:$0 sm:$0xff] }
 0x195   : > { %580 = vadd.xlane.f32.xlu1 %v579_v24  ;;  %v834_v25 = vpop.xlane.xlu0 %833 }
 0x196   : > { %v835_v26 = vmul.f32 0.03125, %v834_v25  ;;  %v576_v28 = vmul.f32 %v572_v22, %v572_v22  ;;  %v578_v29 = vmul.f32 %v4307_v23, %v4307_v23 }
 0x198   : > { %v836_v30 = vsub.f32 %v4294_v7, %v835_v26  ;;  %v582_v31 = vsel %vm553_vm0, %v576_v28, 0.0  ;;  %v588_v32 = vsel %vm553_vm0, %v578_v29, 0.0 }
 0x199   : > { %586 = vadd.xlane.f32.xlu1 %v585_v27  ;;  %583 = vadd.xlane.f32.xlu0 %v582_v31 }
 0x19a   : > { %v837_v33 = vmul.f32 %v836_v30, %v836_v30 }
 0x19c   : > { %v838_v34 = vsel %vm553_vm0, %v837_v33, 0.0 }
 0x19d   : > { %589 = vadd.xlane.f32.xlu0 %v588_v32  ;;  %839 = vadd.xlane.f32.xlu1 %v838_v34 }
 0x222   : > { %v581_v38 = vpop.xlane.xlu1 %580 }
 0x223   : > { %v591_v39 = vmul.f32 0.03125, %v581_v38 }
 0x225   : > { %v595_v40 = vadd.f32 1e-05, %v591_v39 }
 0x226   : > { %v587_v41 = vpop.xlane.xlu1 %586  ;;  %v584_v42 = vpop.xlane.xlu0 %583 }
 0x227   : > { %3454 = vrsqrt.f32 %v595_v40  ;;  %v593_v43 = vmul.f32 0.03125, %v587_v41  ;;  %v592_v44 = vmul.f32 0.03125, %v584_v42  ;;  %v4368_v42 = vld [vmem:[#allocation7 + $0x8] ss:$0 sm:$0xff] }
 0x229   : > { %v597_v45 = vadd.f32 1e-05, %v593_v43  ;;  %v596_v46 = vadd.f32 1e-05, %v592_v44 }
 0x22a   : > { %v840_v47 = vpop.xlane.xlu1 %839  ;;  %v590_v48 = vpop.xlane.xlu0 %589 }
 0x22b   : > { %3456 = vrsqrt.f32 %v597_v45  ;;  %v841_v49 = vmul.f32 0.03125, %v840_v47  ;;  %v594_v50 = vmul.f32 0.03125, %v590_v48 }
 0x22c   : > { %3458 = vrsqrt.f32 %v596_v46 }
 0x22d   : > { %v842_v51 = vadd.f32 1e-05, %v841_v49  ;;  %v598_v52 = vadd.f32 1e-05, %v594_v50 }
 0x22f   : > { %3460 = vrsqrt.f32 %v842_v51 }
 0x230   : > { %3462 = vrsqrt.f32 %v598_v52 }
 0x231   : > { %v3455_v53 = vpop.eup %3454 }
 0x232   : > { %v603_v54 = vmul.f32 %v3455_v53, %v4299_v14  ;;  %v3442_v14 = vld [vmem:[#allocation8 + $0x18] sm:$0xff]  }
 0x234   : > { %v611_v60 = vmul.f32 %v2890_v55, %v603_v54 }
 0x235   : > { %v3457_v56 = vpop.eup %3456 }
 0x236   : > { %v3459_v57 = vpop.eup %3458  ;;  %v605_v58 = vmul.f32 %v3457_v56, %v4301_v15  ;;  %v619_v2 = vadd.f32 %v2891_v61, %v611_v60 }
 0x237   : > { %v604_v59 = vmul.f32 %v3459_v57, %v572_v22 }
 0x238   : > { %v613_v4 = vmul.f32 %v2890_v55, %v605_v58 }
 0x239   : > { %v3461_v62 = vpop.eup %3460  ;;  %v612_v63 = vmul.f32 %v2890_v55, %v604_v59 }
 0x23a   : > { %v3463_v0 = vpop.eup %3462  ;;  %v844_v6 = vmul.f32 %v3461_v62, %v836_v30  ;;  %v621_v11 = vadd.f32 %v2891_v61, %v613_v4 }
 0x23b   : > { %v606_v1 = vmul.f32 %v3463_v0, %v4307_v23  ;;  %v620_v3 = vadd.f32 %v2891_v61, %v612_v63 }
 0x23c   : > { %v849_v16 = vmul.f32 %v4330_v10, %v844_v6 }
 0x23d   : > { %v623_v8 = vpack.c.bf16 %v620_v3, %v619_v2  ;;  %v614_v9 = vmul.f32 %v2890_v55, %v606_v1 }
 0x23e   : > { %v854_v19 = vadd.f32 %v4339_v17, %v849_v16 }
 0x23f   : > { %3067 = vmatmul.mubr.msk.bf16.vlgmr.msra.gmra.mrb[0].mxu1 %vm553_vm0, %v623_v8  ;;  %v622_v12 = vadd.f32 %v2891_v61, %v614_v9 }
 0x240   : > { %3071 = vmatpush3.bf16.msra.mxu1 %v3440_v5  ;;  %3074 = vmatprep.mubr.msk.bf16.mxu1 %vm3913_vm1, %v3912_v36  ;;  %v855_v20 = vpack.c.bf16 %v854_v19, %v854_v19 }
 0x241   : > { %3072 = vmatprep.subr.bf16.mxu1 %v3912_v36  ;;  %v743_v15 = vpack.c.bf16 %v622_v12, %v621_v11 }
 0x243   : > { %3083 = vmatmul.mubr.msk.bf16.vlgmr.msra.gmra.mrb[0].mxu0 %vm553_vm0, %v743_v15 }
 0x244   : > { %3095 = vmatpush3.bf16.msra.mxu0 %v4333_v13  ;;  %3073 = vmatpush3.bf16.msra.mxu1 %v3442_v14 }
 0x245   : > { %3096 = vmatprep.subr.bf16.mxu0 %v3912_v36  ;;  %3086 = vmatprep.subr.bf16.mxu1 %v3912_v36 }
 0x246   : > { %3098 = vmatprep.mubr.msk.bf16.mxu0 %vm3913_vm1, %v3912_v36 }
 0x247   : > { %3075 = vmatmul.mubr.msk.bf16.vlgmr.msra.gmra.mrb[4].mxu1 %vm553_vm0, %v623_v8 }
 0x248   : > { %3097 = vmatpush3.bf16.msra.mxu0 %v4343_v18  ;;  %3087 = vmatpush3.bf16.msra.mxu1 %v3440_v5 }
 0x249   : > { %3088 = vmatprep.subr.bf16.mxu1 %v3912_v36  ;;  %3090 = vmatprep.mubr.msk.bf16.mxu1 %vm3913_vm1, %v3912_v36 }
 0x24a   : > { %3108 = vmatprep.subr.bf16.mxu0 %v3912_v36 }
 0x24b   : > { %3099 = vmatmul.mubr.msk.bf16.vlgmr.msra.gmra.mrb[4].mxu0 %vm553_vm0, %v855_v20 }
 0x24c   : > { %3089 = vmatpush3.bf16.msra.mxu1 %v3442_v14  ;;  %3110 = vmatprep.mubr.msk.bf16.mxu0 %vm3913_vm1, %v3912_v36 }
 0x24d   : > { %3102 = vmatprep.subr.bf16.mxu1 %v3912_v36 }
 0x24f   : > { %3091 = vmatmul.mubr.msk.bf16.vlgmr.msra.gmra.mrb[8].mxu1 %vm553_vm0, %v743_v15 }
 0x250   : > { %3104 = vmatprep.mubr.msk.bf16.mxu1 %vm3913_vm1, %v3912_v36 }
 0x312   : > { %v677_v22 = vpop.f32.mrb[0].mxu1 }
 0x313   : > { %v3068_v23 = vpop.f32.mrb[1].mxu1  ;;  %v678_v25 = vadd.f32 %v2892_v21, %v677_v22 }
 0x314   : > { %v680_v24 = vpop.f32.mrb[2].mxu1 }
 0x315   : > { %v681_v26 = vadd.f32 %v2892_v21, %v680_v24  ;;  %v3069_v27 = vpop.f32.mrb[3].mxu1 }
 0x316   : > { %v781_v28 = vpop.f32.mrb[0].mxu0 }
 0x317   : > { %v684_v29 = vpack.c.bf16 %v681_v26, %v678_v25  ;;  %v3084_v30 = vpop.f32.mrb[1].mxu0  ;;  %v782_v32 = vadd.f32 %v2892_v21, %v781_v28 }
 0x318   : > { %v784_v31 = vpop.f32.mrb[2].mxu0 }
 0x319   : > { %v785_v33 = vadd.f32 %v2892_v21, %v784_v31  ;;  %v3085_v34 = vpop.f32.mrb[3].mxu0  ;;  %v4364_v35 = vsel %vm553_vm0, %v684_v29, 0 }
 0x31a   : > { %v735_v38 = vpop.f32.mrb[4].mxu1  ;;  %3103 = vmatpush3.bf16.xpose.msra.mxu1 %v4364_v35 }
 0x31b   : > { %v788_v39 = vpack.c.bf16 %v785_v33, %v782_v32  ;;  %v3076_v40 = vpop.f32.mrb[5].mxu1  ;;  %3114 = vmatprep.subr.bf16.mxu1 %v3912_v36  ;;  %v736_v43 = vadd.f32 %v2896_v37, %v735_v38 }
 0x31c   : > { %v738_v41 = vpop.f32.mrb[6].mxu1 }
 0x31d   : > { %v739_v44 = vadd.f32 %v2896_v37, %v738_v41  ;;  %v3077_v45 = vpop.f32.mrb[7].mxu1  ;;  %v4377_v56 = vsel %vm553_vm0, %v788_v39, 0 }
 0x31e   : > { %v909_v46 = vpop.f32.mrb[4].mxu0 }
 0x31f   : > { %v4370_v47 = vpack.c.bf16 %v739_v44, %v736_v43  ;;  %v910_v48 = vadd.f32 %v4368_v42, %v909_v46  ;;  %v3100_v49 = vpop.f32.mrb[5].mxu0 }
 0x320   : > { %v912_v50 = vpop.f32.mrb[6].mxu0 }
 0x321   : > { %v915_v51 = vpack.c.bf16 %v910_v48, %v910_v48  ;;  %v3101_v52 = vpop.f32.mrb[7].mxu0  ;;  %3109 = vmatpush3.bf16.msra.mxu0 %v4370_v47 }
 0x322   : > { %v823_v53 = vpop.f32.mrb[8].mxu1  ;;  %3120 = vmatprep.subr.bf16.mxu0 %v3912_v36 }
 0x323   : > { %v824_v54 = vadd.f32 %v2896_v37, %v823_v53  ;;  %v3092_v55 = vpop.f32.mrb[9].mxu1  ;;  %3105 = vmatmul.mubr.msk.bf16.vlgmr.msra.gmra.mrb[12].mxu1 %vm553_vm0, %v915_v51  ;;  %v1037_v61 = vrot.slane %v915_v51, 2 }
 0x324   : > { %3115 = vmatpush3.bf16.xpose.msra.mxu1 %v4377_v56  ;;  %v826_v57 = vpop.f32.mrb[10].mxu1  ;;  %3116 = vmatprep.mubr.msk.bf16.mxu1 %vm3913_vm1, %v3912_v36 }
 0x325   : > { %v827_v58 = vadd.f32 %v2896_v37, %v826_v57  ;;  %v3093_v59 = vpop.f32.mrb[11].mxu1  ;;  %3126 = vmatprep.subr.bf16.mxu1 %v3912_v36 }
 0x327   : > { %v4383_v60 = vpack.c.bf16 %v827_v58, %v824_v54 }
 0x32b   : > { %3117 = vmatmul.mubr.msk.bf16.vlgmr.msra.gmra.mrb[16].mxu1 %vm553_vm0, %v1037_v61 }
 0x32c   : > { %3130 = vmatprep.mubr.msk.bf16.mxu1 %vm3913_vm1, %v3912_v36 }
 0x3f6   : > { %v956_v62 = vpop.f32.mrb[12].mxu1 }
 0x3f7   : > { %v963_v63 = vsel %vm962_vm2, %v956_v62, -inf  ;;  %v3106_v0 = vpop.f32.mrb[13].mxu1 }
 0x3f8   : > { %v964_v1 = vrot.slane %v963_v63, 4  ;;  %v959_v2 = vpop.f32.mrb[14].mxu1 }
 0x3f9   : > { %v3107_v3 = vpop.f32.mrb[15].mxu1 }
 0x3fa   : > { %v965_v4 = vmax.f32 %v963_v63, %v964_v1 }
 0x3fc   : > { %v966_v5 = vrot.slane %v965_v4, 2 }
 0x3fe   : > { %v967_v6 = vmax.f32 %v965_v4, %v966_v5  ;;  %v1078_v8 = vpop.f32.mrb[16].mxu1  ;;  %v4406_v4 = vld [vmem:[#allocation11 + $0x10] sm:$0xff]  }
 0x3ff   : > { %v1084_v9 = vsel %vm962_vm2, %v1078_v8, -inf  ;;  %v3118_v11 = vpop.f32.mrb[17].mxu1 }
 0x400   : > { %v968_v12 = vrot.slane %v967_v6, 1  ;;  %v1085_v14 = vrot.slane %v1084_v9, 4  ;;  %v1081_v15 = vpop.f32.mrb[18].mxu1  ;;  %v4426_v11 = vld [vmem:[#allocation11 + $0x8] sm:$0xff]  }
 0x401   : > { %v3119_v16 = vpop.f32.mrb[19].mxu1 }
 0x402   : > { %v969_v19 = vmax.f32 %v967_v6, %v968_v12  ;;  %v1086_v20 = vmax.f32 %v1084_v9, %v1085_v14  ;;  %v4410_v6 = vld [vmem:[#allocation11 + $0x18] sm:$0xff]   ;;  %v4422_v9 = vld [vmem:[#allocation11] sm:$0xff]  }
 0x403   : > { %3127 = vmatpush3.bf16.msra.mxu1 %v4422_v9 }
 0x404   : > { %v970_v21 = vsub.f32 %v956_v62, %v969_v19  ;;  %v1087_v22 = vrot.slane %v1086_v20, 2  ;;  %3128 = vmatprep.subr.bf16.mxu1 %v3912_v36 }
 0x406   : > { %v971_v23 = vmul.f32 1.442695, %v970_v21  ;;  %v1088_v24 = vmax.f32 %v1086_v20, %v1087_v22 }
 0x407   : > { %3129 = vmatpush3.bf16.msra.mxu1 %v4426_v11 }
 0x408   : > { %3464 = vpow2.f32 %v971_v23  ;;  %v1089_v25 = vrot.slane %v1088_v24, 1  ;;  %3142 = vmatprep.subr.bf16.mxu1 %v3912_v36 }
 0x40a   : > { %v1090_v26 = vmax.f32 %v1088_v24, %v1089_v25 }
 0x40c   : > { %v1091_v27 = vsub.f32 %v1078_v8, %v1090_v26  ;;  %v1221_v8 = vpack.c.bf16 %v4294_v7, %v4294_v7  ;;  %v4432_v26 = vld [vmem:[#allocation7 + $0xa] ss:$0 sm:$0xff] }
 0x40e   : > { %v1092_v28 = vmul.f32 1.442695, %v1091_v27 }
 0x410   : > { %3466 = vpow2.f32 %v1092_v28 }
 0x412   : > { %v3465_v29 = vpop.eup %3464 }
 0x413   : > { %v973_v30 = vsel %vm962_vm2, %v3465_v29, 0.0 }
 0x414   : > { %v974_v31 = vrot.slane %v973_v30, 4 }
 0x416   : > { %v975_v32 = vadd.f32 %v974_v31, %v973_v30 }
 0x418   : > { %v976_v33 = vrot.slane %v975_v32, 2 }
 0x41a   : > { %v3467_v34 = vpop.eup %3466  ;;  %v977_v37 = vadd.f32 %v976_v33, %v975_v32  ;;  %v4438_v32 = vld [vmem:[#allocation7 + $0x9] ss:$0 sm:$0xff] }
 0x41b   : > { %v1094_v38 = vsel %vm962_vm2, %v3467_v34, 0.0 }
 0x41c   : > { %v978_v39 = vrot.slane %v977_v37, 1  ;;  %v1095_v40 = vrot.slane %v1094_v38, 4 }
 0x41e   : > { %v1096_v41 = vadd.f32 %v1095_v40, %v1094_v38  ;;  %v979_v43 = vadd.f32 %v978_v39, %v977_v37 }
 0x420   : > { %v1097_v44 = vrot.slane %v1096_v41, 2  ;;  %3468 = vrcp.f32 %v979_v43 }
 0x422   : > { %v1098_v45 = vadd.f32 %v1097_v44, %v1096_v41 }
 0x424   : > { %v1099_v46 = vrot.slane %v1098_v45, 1 }
 0x426   : > { %v1100_v48 = vadd.f32 %v1099_v46, %v1098_v45 }
 0x428   : > { %3470 = vrcp.f32 %v1100_v48 }
 0x42a   : > { %v3469_v49 = vpop.eup %3468 }
 0x42b   : > { %v981_v50 = vmul.f32 %v3469_v49, %v3465_v29 }
 0x42d   : > { %v982_v51 = vadd.f32 1e-08, %v981_v50 }
 0x42f   : > { %v986_v52 = vsel %vm962_vm2, %v982_v51, 0.0  ;;  %v983_v53 = vpack.c.bf16 %v982_v51, %v982_v51 }
 0x430   : > { %987 = vadd.xlane.f32.xlu0 %v986_v52 }
 0x431   : > { %985 = vst.msk [vmem:[%s4394_s25] sm:$0x3] %vm984_vm3, %v983_v53 }
 0x432   : > { %v3471_v54 = vpop.eup %3470 }
 0x433   : > { %v1102_v55 = vmul.f32 %v3471_v54, %v3467_v34 }
 0x435   : > { %v1103_v57 = vadd.f32 1e-08, %v1102_v55 }
 0x437   : > { %v1107_v58 = vsel %vm962_vm2, %v1103_v57, 0.0  ;;  %v1104_v59 = vpack.c.bf16 %v1103_v57, %v1103_v57 }
 0x438   : > { %1108 = vadd.xlane.f32.xlu1 %v1107_v58 }
 0x439   : > { %2911 = vst.msk [vmem:[%s4394_s25 + $0x6] sm:$0x3] %vm984_vm3, %v1104_v59 }
 0x4bd   : > { %v988_v61 = vpop.xlane.xlu0 %987 }
 0x4be   : > { %3472 = vrcp.f32 %v988_v61 }
 0x4c5   : > { %v1109_v62 = vpop.xlane.xlu1 %1108 }
 0x4c6   : > { %3474 = vrcp.f32 %v1109_v62 }
 0x4c8   : > { %v3473_v63 = vpop.eup %3472 }
 0x4c9   : > { %v990_v0 = vmul.f32 %v3473_v63, %v982_v51 }
 0x4cb   : > { %v991_v1 = vpack.c.bf16 %v990_v0, %v990_v0 }
 0x4cd   : > { %3111 = vmatmul.mubr.msk.bf16.vlgmr.msra.gmra.mrb[8].mxu0 %vm992_vm4, %v991_v1 }
 0x4ce   : > { %3121 = vmatpush3.bf16.msra.mxu0 %v4383_v60  ;;  %3122 = vmatprep.mubr.msk.bf16.mxu0 %vm3913_vm1, %v3912_v36 }
 0x4cf   : > { %3134 = vmatprep.subr.bf16.mxu0 %v3912_v36 }
 0x4d0   : > { %v3475_v2 = vpop.eup %3474 }
 0x4d1   : > { %v1111_v3 = vmul.f32 %v3475_v2, %v1103_v57 }
 0x4d3   : > { %v1112_v5 = vpack.c.bf16 %v1111_v3, %v1111_v3 }
 0x4d5   : > { %3123 = vmatmul.mubr.msk.bf16.vlgmr.msra.gmra.mrb[12].mxu0 %vm992_vm4, %v1112_v5  ;;  %v2922_v5 = vld [vmem:[#allocation7 + $0x4] ss:$0 sm:$0xff] }
 0x4d6   : > { %3135 = vmatpush3.bf16.msra.mxu0 %v4406_v4  ;;  %3138 = vmatprep.mubr.msk.bf16.mxu0 %vm3913_vm1, %v3912_v36 }
 0x4d7   : > { %3136 = vmatprep.subr.bf16.mxu0 %v3912_v36 }
 0x4da   : > { %3137 = vmatpush3.bf16.msra.mxu0 %v4410_v6 }
 0x4db   : > { %3150 = vmatprep.subr.bf16.mxu0 %v3912_v36 }
 0x4dd   : > { %3139 = vmatmul.mubr.msk.bf16.vlgmr.msra.gmra.mrb[16].mxu0 %vm553_vm0, %v1221_v8  ;;  %v4455_v8 = vld [vmem:[#allocation13] sm:$0xff]  }
 0x4de   : > { %3158 = vmatprep.mubr.msk.bf16.mxu0 %vm3913_vm1, %v3912_v36 }
 0x5a0   : > { %v1030_v12 = vpop.f32.mrb[8].mxu0 }
 0x5a1   : > { %v3112_v14 = vpop.f32.mrb[9].mxu0 }
 0x5a2   : > { %v1033_v15 = vpop.f32.mrb[10].mxu0 }
 0x5a3   : > { %v3113_v16 = vpop.f32.mrb[11].mxu0 }
 0x5a8   : > { %v1150_v19 = vpop.f32.mrb[12].mxu0 }
 0x5a9   : > { %v1157_v20 = vrot.slane %v1150_v19, 4  ;;  %v3124_v21 = vpop.f32.mrb[13].mxu0  ;;  %v4463_v19 = vld [vmem:[#allocation14] sm:$0xff]  }
 0x5aa   : > { %v1153_v22 = vpop.f32.mrb[14].mxu0  ;;  %3151 = vmatpush3.bf16.msra.mxu0 %v4463_v19 }
 0x5ab   : > { %v1160_v23 = vsel %vm1159_vm5, %v1030_v12, %v1157_v20  ;;  %v3125_v24 = vpop.f32.mrb[15].mxu0  ;;  %v4458_v12 = vld [vmem:[#allocation13 + $0x8] sm:$0xff]   ;;  %v4466_v20 = vld [vmem:[#allocation14 + $0x8] sm:$0xff]   ;;  %3152 = vmatprep.subr.bf16.mxu0 %v3912_v36 }
 0x5ac   : > { %v1161_v25 = vpack.c.bf16 %v1160_v23, %v1160_v23 }
 0x5ae   : > { %3131 = vmatmul.mubr.msk.bf16.vlgmr.msra.gmra.mrb[20].mxu1 %vm553_vm0, %v1161_v25  ;;  %3153 = vmatpush3.bf16.msra.mxu0 %v4466_v20  ;;  %v4474_v25 = vld [vmem:[#allocation14 + $0x10] sm:$0xff]  }
 0x5af   : > { %3146 = vmatprep.mubr.msk.bf16.mxu1 %vm3913_vm1, %v3912_v36  ;;  %3143 = vmatpush3.bf16.msra.mxu1 %v4455_v8 }
 0x5b0   : > { %v1275_v27 = vpop.f32.mrb[16].mxu0  ;;  %3144 = vmatprep.subr.bf16.mxu1 %v3912_v36  ;;  %3154 = vmatprep.subr.bf16.mxu0 %v3912_v36 }
 0x5b1   : > { %v1276_v28 = vadd.f32 %v4432_v26, %v1275_v27  ;;  %v3140_v29 = vpop.f32.mrb[17].mxu0 }
 0x5b2   : > { %v1278_v30 = vpop.f32.mrb[18].mxu0  ;;  %3155 = vmatpush3.bf16.msra.mxu0 %v4474_v25 }
 0x5b3   : > { %v3141_v31 = vpop.f32.mrb[19].mxu0  ;;  %1289 = vrot.lane.b32.xlu0 %v1276_v28, %s4872_s21  ;;  %3145 = vmatpush3.bf16.msra.mxu1 %v4458_v12 }
 0x5b4   : > { %3162 = vmatprep.subr.bf16.mxu1 %v3912_v36  ;;  %3156 = vmatprep.subr.bf16.mxu0 %v3912_v36  ;;  %v4489_v31 = vld [vmem:[#allocation14 + $0x18] sm:$0xff]  }
 0x5b6   : > { %3157 = vmatpush3.bf16.msra.mxu0 %v4489_v31 }
 0x5b7   : > { %3176 = vmatprep.subr.bf16.mxu0 %v3912_v36 }
 0x625   : > { %v1290_v45 = vpop.permute.xlu0 %1289 }
 0x681   : > { %v1215_v33 = vpop.f32.mrb[20].mxu1 }
 0x682   : > { %v1216_v34 = vadd.f32 %v4438_v32, %v1215_v33  ;;  %v3132_v37 = vpop.f32.mrb[21].mxu1  ;;  %v4493_v33 = vld [vmem:[#allocation7 + $0xb] ss:$0 sm:$0xff] }
 0x683   : > { %v1218_v38 = vpop.f32.mrb[22].mxu1 }
 0x684   : > { %v1281_v39 = vadd.f32 %v1276_v28, %v1216_v34  ;;  %v3133_v40 = vpop.f32.mrb[23].mxu1 }
 0x686   : > { %v2921_v41 = vmul.f32 -1.442695, %v1281_v39 }
 0x688   : > { %3476 = vpow2.f32 %v2921_v41 }
 0x692   : > { %v3477_v43 = vpop.eup %3476 }
 0x693   : > { %v1285_v44 = vadd.f32 1.0, %v3477_v43  ;;  %v2933_v43 = vld [vmem:[#allocation7 + $0xc] ss:$0 sm:$0xff] }
 0x695   : > { %3478 = vrcp.f32 %v1285_v44 }
 0x69f   : > { %v3479_v46 = vpop.eup %3478 }
 0x6a0   : > { %v1292_v48 = vmul.f32 %v3479_v46, %v1290_v45  ;;  %v1299_v53 = vsub.f32 1.0, %v3479_v46 }
 0x6a2   : > { %1294 = vrot.lane.b32.xlu1 %v1292_v48, %s4872_s21 }
 0x714   : > { %v1295_v49 = vpop.permute.xlu1 %1294 }
 0x715   : > { %v1297_v50 = vadd.f32 %v1295_v49, %v1216_v34 }
 0x717   : > { %3480 = vtanh.f32 %v1297_v50 }
 0x721   : > { %v3481_v51 = vpop.eup %3480 }
 0x722   : > { %1301 = vrot.lane.b32.xlu1 %v3481_v51, %s4870_s1 }
 0x726   : > { %1306 = vrot.lane.b32.xlu1 %v4294_v7, %s4871_s30  ;;  %v2923_v7 = vld [vmem:[#allocation7 + $0x5] ss:$0 sm:$0xff] }
 0x794   : > { %v1302_v52 = vpop.permute.xlu1 %1301 }
 0x795   : > { %v1304_v55 = vmul.f32 %v1302_v52, %v1299_v53 }
 0x798   : > { %v1307_v54 = vpop.permute.xlu1 %1306 }
 0x799   : > { %v1309_v57 = vmul.f32 %v3479_v46, %v1307_v54 }
 0x79b   : > { %v4445_v58 = vadd.f32 %v1309_v57, %v1304_v55 }
 0x79d   : > { %1312 = vrot.lane.b32.xlu0 %v4445_v58, %s4870_s1 }
 0x80f   : > { %v1313_v59 = vpop.permute.xlu0 %1312 }
 0x810   : > { %v1315_v61 = vsel %vm553_vm0, %v1313_v59, 0.0 }
 0x811   : > { %1316 = vadd.xlane.f32.xlu1 %v1315_v61 }
 0x822   : > { %1346 = vrot.lane.b32.xlu1 %v2923_v7, %s4871_s30 }
 0x89e   : > { %v1317_v62 = vpop.xlane.xlu1 %1316 }
 0x89f   : > { %v1318_v63 = vmul.f32 0.03125, %v1317_v62 }
 0x8a1   : > { %v1319_v0 = vsub.f32 %v4445_v58, %v1318_v63 }
 0x8a2   : > { %v4471_v24 = vpop.permute.xlu1 %1346 }
 0x8a3   : > { %v1320_v1 = vmul.f32 %v1319_v0, %v1319_v0 }
 0x8a5   : > { %1322 = vrot.lane.b32.xlu0 %v1320_v1, %s4870_s1 }
 0x917   : > { %v1323_v2 = vpop.permute.xlu0 %1322 }
 0x918   : > { %v1325_v3 = vsel %vm553_vm0, %v1323_v2, 0.0 }
 0x919   : > { %1326 = vadd.xlane.f32.xlu0 %v1325_v3 }
 0x92f   : > { %1337 = vrot.lane.b32.xlu0 %v2922_v5, %s4871_s30 }
 0x933   : > { %1493 = vrot.lane.b32.xlu0 %v2933_v43, %s4871_s30 }
 0x9a6   : > { %v1327_v14 = vpop.xlane.xlu0 %1326 }
 0x9a7   : > { %v1328_v15 = vmul.f32 0.03125, %v1327_v14 }
 0x9a9   : > { %v1329_v16 = vadd.f32 1e-05, %v1328_v15 }
 0x9aa   : > { %v4469_v22 = vpop.permute.xlu0 %1337 }
 0x9ab   : > { %3482 = vrsqrt.f32 %v1329_v16 }
 0x9ae   : > { %v4503_v50 = vpop.permute.xlu0 %1493 }
 0x9b5   : > { %v3483_v21 = vpop.eup %3482 }
 0x9b6   : > { %v1331_v23 = vmul.f32 %v3483_v21, %v1319_v0 }
 0x9b8   : > { %v1340_v27 = vmul.f32 %v4469_v22, %v1331_v23 }
 0x9ba   : > { %v1349_v28 = vadd.f32 %v4471_v24, %v1340_v27 }
 0x9bc   : > { %v1350_v29 = vpack.c.bf16 %v1349_v28, %v1349_v28 }
 0x9be   : > { %1356 = vrot.lane.b32.xlu1 %v1350_v29, %s4870_s1 }
 0xa30   : > { %v1357_v30 = vpop.permute.xlu1 %1356 }
 0xa31   : > { %3147 = vmatmul.mubr.msk.bf16.vlgmr.msra.gmra.mrb[24].mxu1 %vm553_vm0, %v1357_v30 }
 0xa32   : > { %3163 = vmatpush3.bf16.msra.mxu1 %v4333_v13  ;;  %3166 = vmatprep.mubr.msk.bf16.mxu1 %vm3913_vm1, %v3912_v36 }
 0xa33   : > { %3164 = vmatprep.subr.bf16.mxu1 %v3912_v36 }
 0xa36   : > { %3165 = vmatpush3.bf16.msra.mxu1 %v4343_v18 }
 0xa37   : > { %3170 = vmatprep.subr.bf16.mxu1 %v3912_v36 }
 0xb04   : > { %v1407_v34 = vpop.f32.mrb[24].mxu1 }
 0xb05   : > { %v1408_v13 = vadd.f32 %v4493_v33, %v1407_v34  ;;  %v3148_v37 = vpop.f32.mrb[25].mxu1 }
 0xb06   : > { %v1410_v38 = vpop.f32.mrb[26].mxu1 }
 0xb07   : > { %v1413_v39 = vmax.f32 %v1408_v13, 0.0  ;;  %v3149_v40 = vpop.f32.mrb[27].mxu1 }
 0xb09   : > { %v1414_v41 = vpack.c.bf16 %v1413_v39, %v1413_v39 }
 0xb0b   : > { %3159 = vmatmul.mubr.msk.bf16.vlgmr.msra.gmra.mrb[20].mxu0 %vm1439_vm6, %v1414_v41 }
 0xb0c   : > { %3177 = vmatpush3.bf16.msra.mxu0 %v4370_v47  ;;  %3178 = vmatprep.mubr.msk.bf16.mxu0 %vm3913_vm1, %v3912_v36 }
 0xb0d   : > { %3188 = vmatprep.subr.bf16.mxu0 %v3912_v36 }
 0xbde   : > { %v1477_v44 = vpop.f32.mrb[20].mxu0 }
 0xbdf   : > { %1484 = vrot.lane.b32.xlu1 %v1477_v44, %s4871_s30  ;;  %v3160_v45 = vpop.f32.mrb[21].mxu0 }
 0xbe0   : > { %v1480_v46 = vpop.f32.mrb[22].mxu0 }
 0xbe1   : > { %v3161_v48 = vpop.f32.mrb[23].mxu0 }
 0xc51   : > { %v1485_v49 = vpop.permute.xlu1 %1484 }
 0xc52   : > { %v1487_v51 = vadd.f32 %v1485_v49, %v4445_v58 }
 0xc54   : > { %v4507_v52 = vadd.f32 %v4503_v50, %v1487_v51 }
 0xc56   : > { %1498 = vrot.lane.b32.xlu1 %v4507_v52, %s4870_s1 }
 0xcc8   : > { %v1499_v53 = vpop.permute.xlu1 %1498 }
 0xcc9   : > { %v1501_v54 = vsel %vm553_vm0, %v1499_v53, 0.0 }
 0xcca   : > { %1502 = vadd.xlane.f32.xlu0 %v1501_v54 }
 0xce0   : > { %1519 = vrot.lane.b32.xlu0 %v4330_v10, %s4871_s30 }
 0xd57   : > { %v1503_v55 = vpop.xlane.xlu0 %1502 }
 0xd58   : > { %v1504_v57 = vmul.f32 0.03125, %v1503_v55 }
 0xd5a   : > { %v1505_v59 = vsub.f32 %v4507_v52, %v1504_v57 }
 0xd5b   : > { %v4519_v10 = vpop.permute.xlu0 %1519 }
 0xd5c   : > { %v1506_v61 = vmul.f32 %v1505_v59, %v1505_v59 }
 0xd5e   : > { %1508 = vrot.lane.b32.xlu1 %v1506_v61, %s4870_s1 }
 0xdd0   : > { %v1509_v58 = vpop.permute.xlu1 %1508 }
 0xdd1   : > { %v1511_v62 = vsel %vm553_vm0, %v1509_v58, 0.0 }
 0xdd2   : > { %1512 = vadd.xlane.f32.xlu1 %v1511_v62 }
 0xde3   : > { %1524 = vrot.lane.b32.xlu1 %v4339_v17, %s4871_s30 }
 0xe5f   : > { %v1513_v63 = vpop.xlane.xlu1 %1512 }
 0xe60   : > { %v1514_v0 = vmul.f32 0.03125, %v1513_v63 }
 0xe62   : > { %v1515_v1 = vadd.f32 1e-05, %v1514_v0 }
 0xe63   : > { %v4521_v3 = vpop.permute.xlu1 %1524 }
 0xe64   : > { %3484 = vrsqrt.f32 %v1515_v1 }
 0xe6e   : > { %v3485_v7 = vpop.eup %3484 }
 0xe6f   : > { %v1517_v2 = vmul.f32 %v3485_v7, %v1505_v59 }
 0xe71   : > { %v1522_v5 = vmul.f32 %v4519_v10, %v1517_v2 }
 0xe73   : > { %v1527_v14 = vadd.f32 %v4521_v3, %v1522_v5 }
 0xe75   : > { %v1528_v15 = vpack.c.bf16 %v1527_v14, %v1527_v14 }
 0xe77   : > { %1530 = vrot.lane.b32.xlu0 %v1528_v15, %s4870_s1 }
 0xee9   : > { %v1531_v16 = vpop.permute.xlu0 %1530 }
 0xeea   : > { %3167 = vmatmul.mubr.msk.bf16.vlgmr.msra.gmra.mrb[28].mxu1 %vm553_vm0, %v1531_v16 }
 0xeeb   : > { %3171 = vmatpush3.bf16.xpose.msra.mxu1 %v4364_v35  ;;  %3172 = vmatprep.mubr.msk.bf16.mxu1 %vm3913_vm1, %v3912_v36 }
 0xeec   : > { %3182 = vmatprep.subr.bf16.mxu1 %v3912_v36 }
 0xfbd   : > { %v1569_v17 = vpop.f32.mrb[28].mxu1 }
 0xfbe   : > { %v1570_v21 = vadd.f32 %v4368_v42, %v1569_v17  ;;  %v3168_v23 = vpop.f32.mrb[29].mxu1 }
 0xfbf   : > { %v1572_v27 = vpop.f32.mrb[30].mxu1 }
 0xfc0   : > { %v1575_v28 = vpack.c.bf16 %v1570_v21, %v1570_v21  ;;  %v3169_v29 = vpop.f32.mrb[31].mxu1 }
 0xfc2   : > { %3173 = vmatmul.mubr.msk.bf16.vlgmr.msra.gmra.mrb[32].mxu1 %vm553_vm0, %v1575_v28  ;;  %v1692_v30 = vrot.slane %v1575_v28, 2 }
 0xfc3   : > { %3183 = vmatpush3.bf16.xpose.msra.mxu1 %v4377_v56  ;;  %3184 = vmatprep.mubr.msk.bf16.mxu1 %vm3913_vm1, %v3912_v36 }
 0xfc4   : > { %3194 = vmatprep.subr.bf16.mxu1 %v3912_v36 }
 0xfca   : > { %3185 = vmatmul.mubr.msk.bf16.vlgmr.msra.gmra.mrb[36].mxu1 %vm553_vm0, %v1692_v30 }
 0xfcb   : > { %3195 = vmatpush3.bf16.msra.mxu1 %v4422_v9  ;;  %3198 = vmatprep.mubr.msk.bf16.mxu1 %vm3913_vm1, %v3912_v36 }
 0xfcc   : > { %3196 = vmatprep.subr.bf16.mxu1 %v3912_v36 }
 0xfcf   : > { %3197 = vmatpush3.bf16.msra.mxu1 %v4426_v11 }
 0xfd0   : > { %3210 = vmatprep.subr.bf16.mxu1 %v3912_v36 }
0x1095   : > { %v1613_v42 = vpop.f32.mrb[32].mxu1 }
0x1096   : > { %v1619_v34 = vsel %vm962_vm2, %v1613_v42, -inf  ;;  %v3174_v13 = vpop.f32.mrb[33].mxu1 }
0x1097   : > { %v1620_v37 = vrot.slane %v1619_v34, 4  ;;  %v1616_v38 = vpop.f32.mrb[34].mxu1 }
0x1098   : > { %v3175_v39 = vpop.f32.mrb[35].mxu1 }
0x1099   : > { %v1621_v40 = vmax.f32 %v1619_v34, %v1620_v37 }
0x109b   : > { %v1622_v41 = vrot.slane %v1621_v40, 2 }
0x109d   : > { %v1623_v43 = vmax.f32 %v1621_v40, %v1622_v41  ;;  %v1730_v44 = vpop.f32.mrb[36].mxu1 }
0x109e   : > { %v1736_v45 = vsel %vm962_vm2, %v1730_v44, -inf  ;;  %v3186_v46 = vpop.f32.mrb[37].mxu1 }
0x109f   : > { %v1624_v48 = vrot.slane %v1623_v43, 1  ;;  %v1737_v49 = vrot.slane %v1736_v45, 4  ;;  %v1733_v51 = vpop.f32.mrb[38].mxu1 }
0x10a0   : > { %v3187_v53 = vpop.f32.mrb[39].mxu1 }
0x10a1   : > { %v1625_v54 = vmax.f32 %v1623_v43, %v1624_v48  ;;  %v1738_v55 = vmax.f32 %v1736_v45, %v1737_v49  ;;  %v1856_v49 = vpack.c.bf16 %v4507_v52, %v4507_v52 }
0x10a3   : > { %v1626_v57 = vsub.f32 %v1613_v42, %v1625_v54  ;;  %v1739_v59 = vrot.slane %v1738_v55, 2 }
0x10a5   : > { %v1627_v61 = vmul.f32 1.442695, %v1626_v57  ;;  %v1740_v58 = vmax.f32 %v1738_v55, %v1739_v59 }
0x10a7   : > { %3486 = vpow2.f32 %v1627_v61  ;;  %v1741_v62 = vrot.slane %v1740_v58, 1 }
0x10a9   : > { %v1742_v63 = vmax.f32 %v1740_v58, %v1741_v62 }
0x10ab   : > { %v1743_v0 = vsub.f32 %v1730_v44, %v1742_v63 }
0x10ad   : > { %v1744_v1 = vmul.f32 1.442695, %v1743_v0 }
0x10af   : > { %3488 = vpow2.f32 %v1744_v1 }
0x10b1   : > { %v3487_v7 = vpop.eup %3486 }
0x10b2   : > { %v1629_v2 = vsel %vm962_vm2, %v3487_v7, 0.0 }
0x10b3   : > { %v1630_v5 = vrot.slane %v1629_v2, 4 }
0x10b5   : > { %v1631_v14 = vadd.f32 %v1630_v5, %v1629_v2 }
0x10b7   : > { %v1632_v15 = vrot.slane %v1631_v14, 2 }
0x10b9   : > { %v3489_v16 = vpop.eup %3488  ;;  %v1633_v17 = vadd.f32 %v1632_v15, %v1631_v14 }
0x10ba   : > { %v1746_v21 = vsel %vm962_vm2, %v3489_v16, 0.0 }
0x10bb   : > { %v1634_v23 = vrot.slane %v1633_v17, 1  ;;  %v1747_v27 = vrot.slane %v1746_v21, 4 }
0x10bd   : > { %v1748_v28 = vadd.f32 %v1747_v27, %v1746_v21  ;;  %v1635_v29 = vadd.f32 %v1634_v23, %v1633_v17 }
0x10bf   : > { %v1749_v30 = vrot.slane %v1748_v28, 2  ;;  %3490 = vrcp.f32 %v1635_v29 }
0x10c1   : > { %v1750_v42 = vadd.f32 %v1749_v30, %v1748_v28 }
0x10c3   : > { %v1751_v34 = vrot.slane %v1750_v42, 1 }
0x10c5   : > { %v1752_v13 = vadd.f32 %v1751_v34, %v1750_v42 }
0x10c7   : > { %3492 = vrcp.f32 %v1752_v13 }
0x10c9   : > { %v3491_v37 = vpop.eup %3490 }
0x10ca   : > { %v1637_v38 = vmul.f32 %v3491_v37, %v3487_v7 }
0x10cc   : > { %v1638_v39 = vadd.f32 1e-08, %v1637_v38 }
0x10ce   : > { %v1642_v40 = vsel %vm962_vm2, %v1638_v39, 0.0  ;;  %v1639_v41 = vpack.c.bf16 %v1638_v39, %v1638_v39 }
0x10cf   : > { %1643 = vadd.xlane.f32.xlu0 %v1642_v40 }
0x10d0   : > { %2936 = vst.msk [vmem:[%s4394_s25 + $0x2] sm:$0x3] %vm984_vm3, %v1639_v41 }
0x10d1   : > { %v3493_v43 = vpop.eup %3492 }
0x10d2   : > { %v1754_v44 = vmul.f32 %v3493_v43, %v3489_v16 }
0x10d4   : > { %v1755_v45 = vadd.f32 1e-08, %v1754_v44 }
0x10d6   : > { %v1759_v46 = vsel %vm962_vm2, %v1755_v45, 0.0  ;;  %v1756_v48 = vpack.c.bf16 %v1755_v45, %v1755_v45 }
0x10d7   : > { %1760 = vadd.xlane.f32.xlu1 %v1759_v46 }
0x10d8   : > { %2939 = vst.msk [vmem:[%s4394_s25 + $0x8] sm:$0x3] %vm984_vm3, %v1756_v48 }
0x10e5   : > { %1858 = vrot.lane.b32.xlu0 %v1856_v49, %s4870_s1 }
0x115c   : > { %v1644_v51 = vpop.xlane.xlu0 %1643 }
0x115d   : > { %3494 = vrcp.f32 %v1644_v51 }
0x1160   : > { %v1859_v62 = vpop.permute.xlu0 %1858 }
0x1164   : > { %v1761_v53 = vpop.xlane.xlu1 %1760 }
0x1165   : > { %3496 = vrcp.f32 %v1761_v53 }
0x1167   : > { %v3495_v54 = vpop.eup %3494 }
0x1168   : > { %v1646_v55 = vmul.f32 %v3495_v54, %v1638_v39 }
0x116a   : > { %v1647_v57 = vpack.c.bf16 %v1646_v55, %v1646_v55 }
0x116c   : > { %3179 = vmatmul.mubr.msk.bf16.vlgmr.msra.gmra.mrb[24].mxu0 %vm992_vm4, %v1647_v57 }
0x116d   : > { %3189 = vmatpush3.bf16.msra.mxu0 %v4383_v60  ;;  %3190 = vmatprep.mubr.msk.bf16.mxu0 %vm3913_vm1, %v3912_v36 }
0x116e   : > { %3202 = vmatprep.subr.bf16.mxu0 %v3912_v36 }
0x116f   : > { %v3497_v59 = vpop.eup %3496 }
0x1170   : > { %v1763_v61 = vmul.f32 %v3497_v59, %v1755_v45 }
0x1172   : > { %v1764_v58 = vpack.c.bf16 %v1763_v61, %v1763_v61 }
0x1174   : > { %3191 = vmatmul.mubr.msk.bf16.vlgmr.msra.gmra.mrb[28].mxu0 %vm992_vm4, %v1764_v58 }
0x1175   : > { %3203 = vmatpush3.bf16.msra.mxu0 %v4406_v4  ;;  %3206 = vmatprep.mubr.msk.bf16.mxu0 %vm3913_vm1, %v3912_v36 }
0x1176   : > { %3204 = vmatprep.subr.bf16.mxu0 %v3912_v36 }
0x1179   : > { %3205 = vmatpush3.bf16.msra.mxu0 %v4410_v6 }
0x117a   : > { %3218 = vmatprep.subr.bf16.mxu0 %v3912_v36 }
0x117c   : > { %3207 = vmatmul.mubr.msk.bf16.vlgmr.msra.gmra.mrb[32].mxu0 %vm553_vm0, %v1859_v62 }
0x117d   : > { %3219 = vmatpush3.bf16.msra.mxu0 %v4463_v19  ;;  %3226 = vmatprep.mubr.msk.bf16.mxu0 %vm3913_vm1, %v3912_v36 }
0x117e   : > { %3220 = vmatprep.subr.bf16.mxu0 %v3912_v36 }
0x1181   : > { %3221 = vmatpush3.bf16.msra.mxu0 %v4466_v20 }
0x1182   : > { %3222 = vmatprep.subr.bf16.mxu0 %v3912_v36 }
0x1185   : > { %3223 = vmatpush3.bf16.msra.mxu0 %v4474_v25 }
0x1186   : > { %3224 = vmatprep.subr.bf16.mxu0 %v3912_v36 }
0x1189   : > { %3225 = vmatpush3.bf16.msra.mxu0 %v4489_v31 }
0x118a   : > { %3244 = vmatprep.subr.bf16.mxu0 %v3912_v36 }
0x123f   : > { %v1685_v63 = vpop.f32.mrb[24].mxu0 }
0x1240   : > { %v3180_v0 = vpop.f32.mrb[25].mxu0 }
0x1241   : > { %v1688_v1 = vpop.f32.mrb[26].mxu0 }
0x1242   : > { %v3181_v7 = vpop.f32.mrb[27].mxu0 }
0x1247   : > { %v1802_v2 = vpop.f32.mrb[28].mxu0 }
0x1248   : > { %v1809_v5 = vrot.slane %v1802_v2, 4  ;;  %v3192_v14 = vpop.f32.mrb[29].mxu0 }
0x1249   : > { %v1805_v15 = vpop.f32.mrb[30].mxu0 }
0x124a   : > { %v1811_v16 = vsel %vm1159_vm5, %v1685_v63, %v1809_v5  ;;  %v3193_v17 = vpop.f32.mrb[31].mxu0 }
0x124b   : > { %v1812_v21 = vpack.c.bf16 %v1811_v16, %v1811_v16 }
0x124d   : > { %3199 = vmatmul.mubr.msk.bf16.vlgmr.msra.gmra.mrb[40].mxu1 %vm553_vm0, %v1812_v21 }
0x124e   : > { %3211 = vmatpush3.bf16.msra.mxu1 %v4455_v8  ;;  %3214 = vmatprep.mubr.msk.bf16.mxu1 %vm3913_vm1, %v3912_v36 }
0x124f   : > { %v1897_v23 = vpop.f32.mrb[32].mxu0  ;;  %3212 = vmatprep.subr.bf16.mxu1 %v3912_v36 }
0x1250   : > { %v1898_v27 = vadd.f32 %v4432_v26, %v1897_v23  ;;  %v3208_v28 = vpop.f32.mrb[33].mxu0 }
0x1251   : > { %v1900_v29 = vpop.f32.mrb[34].mxu0  ;;  %v3528_v28 = vld [vmem:[#allocation10] sm:$0xff]  }
0x1252   : > { %1911 = vrot.lane.b32.xlu1 %v1898_v27, %s4872_s21  ;;  %v3209_v30 = vpop.f32.mrb[35].mxu0  ;;  %3213 = vmatpush3.bf16.msra.mxu1 %v4458_v12 }
0x1253   : > { %3230 = vmatprep.subr.bf16.mxu1 %v3912_v36 }
0x12c4   : > { %v1912_v45 = vpop.permute.xlu1 %1911 }
0x1320   : > { %v1850_v42 = vpop.f32.mrb[40].mxu1 }
0x1321   : > { %v1851_v34 = vadd.f32 %v4438_v32, %v1850_v42  ;;  %v3200_v13 = vpop.f32.mrb[41].mxu1 }
0x1322   : > { %v1853_v37 = vpop.f32.mrb[42].mxu1 }
0x1323   : > { %v1903_v38 = vadd.f32 %v1898_v27, %v1851_v34  ;;  %v3201_v39 = vpop.f32.mrb[43].mxu1 }
0x1325   : > { %v2943_v40 = vmul.f32 -1.442695, %v1903_v38 }
0x1327   : > { %3498 = vpow2.f32 %v2943_v40 }
0x1331   : > { %v3499_v41 = vpop.eup %3498 }
0x1332   : > { %v1907_v43 = vadd.f32 1.0, %v3499_v41 }
0x1334   : > { %3500 = vrcp.f32 %v1907_v43 }
0x133e   : > { %v3501_v44 = vpop.eup %3500 }
0x133f   : > { %v1914_v46 = vmul.f32 %v3501_v44, %v1912_v45  ;;  %v1921_v53 = vsub.f32 1.0, %v3501_v44  ;;  %v1927_v55 = vmul.f32 %v3501_v44, %v4507_v52 }
0x1341   : > { %1916 = vrot.lane.b32.xlu0 %v1914_v46, %s4872_s21 }
0x13b3   : > { %v1917_v48 = vpop.permute.xlu0 %1916 }
0x13b4   : > { %v1919_v49 = vadd.f32 %v1917_v48, %v1851_v34 }
0x13b6   : > { %3502 = vtanh.f32 %v1919_v49 }
0x13c0   : > { %v3503_v51 = vpop.eup %3502 }
0x13c1   : > { %1923 = vrot.lane.b32.xlu1 %v3503_v51, %s4870_s1 }
0x1433   : > { %v1924_v54 = vpop.permute.xlu1 %1923 }
0x1434   : > { %v1926_v57 = vmul.f32 %v1924_v54, %v1921_v53 }
0x1436   : > { %v1928_v59 = vadd.f32 %v1927_v55, %v1926_v57 }
0x1438   : > { %1930 = vrot.lane.b32.xlu0 %v1928_v59, %s4870_s1 }
0x14aa   : > { %v1931_v61 = vpop.permute.xlu0 %1930 }
0x14ab   : > { %v1933_v58 = vsel %vm553_vm0, %v1931_v61, 0.0 }
0x14ac   : > { %1934 = vadd.xlane.f32.xlu1 %v1933_v58 }
0x1539   : > { %v1935_v62 = vpop.xlane.xlu1 %1934 }
0x153a   : > { %v1936_v63 = vmul.f32 0.03125, %v1935_v62 }
0x153c   : > { %v1937_v0 = vsub.f32 %v1928_v59, %v1936_v63 }
0x153e   : > { %v1938_v1 = vmul.f32 %v1937_v0, %v1937_v0 }
0x1540   : > { %1940 = vrot.lane.b32.xlu0 %v1938_v1, %s4870_s1 }
0x15b2   : > { %v1941_v7 = vpop.permute.xlu0 %1940 }
0x15b3   : > { %v1943_v2 = vsel %vm553_vm0, %v1941_v7, 0.0 }
0x15b4   : > { %1944 = vadd.xlane.f32.xlu0 %v1943_v2 }
0x1641   : > { %v1945_v5 = vpop.xlane.xlu0 %1944 }
0x1642   : > { %v1946_v52 = vmul.f32 0.03125, %v1945_v5  ;;  %v3529_v5 = vld [vmem:[#allocation7 + $0x8] ss:$0 sm:$0xff] }
0x1644   : > { %v1947_v14 = vadd.f32 1e-05, %v1946_v52 }
0x1646   : > { %3504 = vrsqrt.f32 %v1947_v14 }
0x1650   : > { %v3505_v15 = vpop.eup %3504 }
0x1651   : > { %v1949_v16 = vmul.f32 %v3505_v15, %v1937_v0 }
0x1653   : > { %v1950_v17 = vmul.f32 %v1949_v16, %v4469_v22 }
0x1655   : > { %v1951_v21 = vadd.f32 %v1950_v17, %v4471_v24 }
0x1657   : > { %v1952_v23 = vpack.c.bf16 %v1951_v21, %v1951_v21 }
0x1659   : > { %1954 = vrot.lane.b32.xlu0 %v1952_v23, %s4870_s1 }
0x16cb   : > { %v1955_v27 = vpop.permute.xlu0 %1954 }
0x16cc   : > { %3215 = vmatmul.mubr.msk.bf16.vlgmr.msra.gmra.mrb[44].mxu1 %vm553_vm0, %v1955_v27 }
0x16cd   : > { %3231 = vmatpush3.bf16.msra.mxu1 %v3528_v28  ;;  %3234 = vmatprep.mubr.msk.bf16.mxu1 %vm3913_vm1, %v3912_v36 }
0x16ce   : > { %3232 = vmatprep.subr.bf16.mxu1 %v3912_v36 }
0x16d1   : > { %3233 = vmatpush3.bf16.msra.mxu1 %v4343_v18 }
0x16d2   : > { %3238 = vmatprep.subr.bf16.mxu1 %v3912_v36 }
0x179f   : > { %v1993_v29 = vpop.f32.mrb[44].mxu1 }
0x17a0   : > { %v1994_v30 = vadd.f32 %v4493_v33, %v1993_v29  ;;  %v3216_v42 = vpop.f32.mrb[45].mxu1 }
0x17a1   : > { %v1996_v34 = vpop.f32.mrb[46].mxu1 }
0x17a2   : > { %v1999_v13 = vmax.f32 %v1994_v30, 0.0  ;;  %v3217_v37 = vpop.f32.mrb[47].mxu1 }
0x17a4   : > { %v2000_v38 = vpack.c.bf16 %v1999_v13, %v1999_v13 }
0x17a6   : > { %3227 = vmatmul.mubr.msk.bf16.vlgmr.msra.gmra.mrb[36].mxu0 %vm1439_vm6, %v2000_v38 }
0x17a7   : > { %3245 = vmatpush3.bf16.msra.mxu0 %v4370_v47  ;;  %3246 = vmatprep.mubr.msk.bf16.mxu0 %vm3913_vm1, %v3912_v36 }
0x17a8   : > { %3256 = vmatprep.subr.bf16.mxu0 %v3912_v36 }
0x1879   : > { %v2038_v18 = vpop.f32.mrb[36].mxu0 }
0x187a   : > { %2045 = vrot.lane.b32.xlu1 %v2038_v18, %s4871_s30  ;;  %v3228_v39 = vpop.f32.mrb[37].mxu0 }
0x187b   : > { %v2041_v40 = vpop.f32.mrb[38].mxu0 }
0x187c   : > { %v3229_v41 = vpop.f32.mrb[39].mxu0 }
0x18ec   : > { %v2046_v43 = vpop.permute.xlu1 %2045 }
0x18ed   : > { %v2048_v44 = vadd.f32 %v2046_v43, %v1928_v59 }
0x18ef   : > { %v4615_v45 = vadd.f32 %v2048_v44, %v4503_v50 }
0x18f1   : > { %2051 = vrot.lane.b32.xlu1 %v4615_v45, %s4870_s1 }
0x1963   : > { %v2052_v47 = vpop.permute.xlu1 %2051 }
0x1964   : > { %v2054_v46 = vsel %vm553_vm0, %v2052_v47, 0.0 }
0x1965   : > { %2055 = vadd.xlane.f32.xlu1 %v2054_v46 }
0x19f2   : > { %v2056_v48 = vpop.xlane.xlu1 %2055 }
0x19f3   : > { %v2057_v49 = vmul.f32 0.03125, %v2056_v48 }
0x19f5   : > { %v2058_v51 = vsub.f32 %v4615_v45, %v2057_v49 }
0x19f7   : > { %v2059_v53 = vmul.f32 %v2058_v51, %v2058_v51 }
0x19f9   : > { %2061 = vrot.lane.b32.xlu0 %v2059_v53, %s4870_s1 }
0x1a6b   : > { %v2062_v54 = vpop.permute.xlu0 %2061 }
0x1a6c   : > { %v2064_v55 = vsel %vm553_vm0, %v2062_v54, 0.0 }
0x1a6d   : > { %2065 = vadd.xlane.f32.xlu0 %v2064_v55 }
0x1afa   : > { %v2066_v57 = vpop.xlane.xlu0 %2065 }
0x1afb   : > { %v2067_v59 = vmul.f32 0.03125, %v2066_v57 }
0x1afd   : > { %v2068_v61 = vadd.f32 1e-05, %v2067_v59 }
0x1aff   : > { %3506 = vrsqrt.f32 %v2068_v61 }
0x1b09   : > { %v3507_v58 = vpop.eup %3506 }
0x1b0a   : > { %v2070_v62 = vmul.f32 %v3507_v58, %v2058_v51 }
0x1b0c   : > { %v2071_v63 = vmul.f32 %v2070_v62, %v4519_v10 }
0x1b0e   : > { %v2072_v0 = vadd.f32 %v2071_v63, %v4521_v3 }
0x1b10   : > { %v2073_v1 = vpack.c.bf16 %v2072_v0, %v2072_v0 }
0x1b12   : > { %2075 = vrot.lane.b32.xlu0 %v2073_v1, %s4870_s1 }
0x1b84   : > { %v2076_v7 = vpop.permute.xlu0 %2075 }
0x1b85   : > { %3235 = vmatmul.mubr.msk.bf16.vlgmr.msra.gmra.mrb[48].mxu1 %vm553_vm0, %v2076_v7 }
0x1b86   : > { %3239 = vmatpush3.bf16.xpose.msra.mxu1 %v4364_v35  ;;  %3240 = vmatprep.mubr.msk.bf16.mxu1 %vm3913_vm1, %v3912_v36 }
0x1b87   : > { %3250 = vmatprep.subr.bf16.mxu1 %v3912_v36 }
0x1c58   : > { %v2114_v2 = vpop.f32.mrb[48].mxu1 }
0x1c59   : > { %v2115_v52 = vadd.f32 %v3529_v5, %v2114_v2  ;;  %v3236_v14 = vpop.f32.mrb[49].mxu1 }
0x1c5a   : > { %v2117_v10 = vpop.f32.mrb[50].mxu1 }
0x1c5b   : > { %v2120_v15 = vpack.c.bf16 %v2115_v52, %v2115_v52  ;;  %v3237_v3 = vpop.f32.mrb[51].mxu1 }
0x1c5d   : > { %3241 = vmatmul.mubr.msk.bf16.vlgmr.msra.gmra.mrb[52].mxu1 %vm553_vm0, %v2120_v15  ;;  %v2238_v35 = vrot.slane %v2120_v15, 2 }
0x1c5e   : > { %3251 = vmatpush3.bf16.xpose.msra.mxu1 %v4377_v56  ;;  %3252 = vmatprep.mubr.msk.bf16.mxu1 %vm3913_vm1, %v3912_v36 }
0x1c5f   : > { %3262 = vmatprep.subr.bf16.mxu1 %v3912_v36 }
0x1c65   : > { %3253 = vmatmul.mubr.msk.bf16.vlgmr.msra.gmra.mrb[56].mxu1 %vm553_vm0, %v2238_v35 }
0x1c66   : > { %3263 = vmatpush3.bf16.msra.mxu1 %v4422_v9  ;;  %3266 = vmatprep.mubr.msk.bf16.mxu1 %vm3913_vm1, %v3912_v36 }
0x1c67   : > { %3264 = vmatprep.subr.bf16.mxu1 %v3912_v36 }
0x1c6a   : > { %3265 = vmatpush3.bf16.msra.mxu1 %v4426_v11 }
0x1c6b   : > { %3278 = vmatprep.subr.bf16.mxu1 %v3912_v36 }
0x1d30   : > { %v2158_v56 = vpop.f32.mrb[52].mxu1 }
0x1d31   : > { %v2164_v16 = vsel %vm962_vm2, %v2158_v56, -inf  ;;  %v3242_v17 = vpop.f32.mrb[53].mxu1 }
0x1d32   : > { %v2165_v21 = vrot.slane %v2164_v16, 4  ;;  %v2161_v23 = vpop.f32.mrb[54].mxu1 }
0x1d33   : > { %v3243_v27 = vpop.f32.mrb[55].mxu1 }
0x1d34   : > { %v2166_v28 = vmax.f32 %v2164_v16, %v2165_v21  ;;  %v2404_v27 = vpack.c.bf16 %v4615_v45, %v4615_v45 }
0x1d36   : > { %v2167_v29 = vrot.slane %v2166_v28, 2 }
0x1d38   : > { %v2168_v30 = vmax.f32 %v2166_v28, %v2167_v29  ;;  %v2276_v9 = vpop.f32.mrb[56].mxu1 }
0x1d39   : > { %v2282_v42 = vsel %vm962_vm2, %v2276_v9, -inf  ;;  %v3254_v34 = vpop.f32.mrb[57].mxu1 }
0x1d3a   : > { %v2169_v13 = vrot.slane %v2168_v30, 1  ;;  %v2283_v37 = vrot.slane %v2282_v42, 4  ;;  %v2279_v38 = vpop.f32.mrb[58].mxu1 }
0x1d3b   : > { %v3255_v11 = vpop.f32.mrb[59].mxu1 }
0x1d3c   : > { %v2170_v18 = vmax.f32 %v2168_v30, %v2169_v13  ;;  %v2284_v39 = vmax.f32 %v2282_v42, %v2283_v37 }
0x1d3e   : > { %v2171_v40 = vsub.f32 %v2158_v56, %v2170_v18  ;;  %v2285_v41 = vrot.slane %v2284_v39, 2 }
0x1d40   : > { %v2172_v43 = vmul.f32 1.442695, %v2171_v40  ;;  %v2286_v44 = vmax.f32 %v2284_v39, %v2285_v41 }
0x1d42   : > { %3508 = vpow2.f32 %v2172_v43  ;;  %v2287_v47 = vrot.slane %v2286_v44, 1 }
0x1d44   : > { %v2288_v46 = vmax.f32 %v2286_v44, %v2287_v47 }
0x1d46   : > { %v2289_v48 = vsub.f32 %v2276_v9, %v2288_v46 }
0x1d48   : > { %v2290_v49 = vmul.f32 1.442695, %v2289_v48 }
0x1d4a   : > { %3510 = vpow2.f32 %v2290_v49 }
0x1d4c   : > { %v3509_v51 = vpop.eup %3508 }
0x1d4d   : > { %v2174_v53 = vsel %vm962_vm2, %v3509_v51, 0.0 }
0x1d4e   : > { %v2175_v54 = vrot.slane %v2174_v53, 4 }
0x1d50   : > { %v2176_v55 = vadd.f32 %v2175_v54, %v2174_v53 }
0x1d52   : > { %v2177_v57 = vrot.slane %v2176_v55, 2 }
0x1d54   : > { %v3511_v59 = vpop.eup %3510  ;;  %v2178_v61 = vadd.f32 %v2177_v57, %v2176_v55 }
0x1d55   : > { %v2292_v58 = vsel %vm962_vm2, %v3511_v59, 0.0 }
0x1d56   : > { %v2179_v62 = vrot.slane %v2178_v61, 1  ;;  %v2293_v63 = vrot.slane %v2292_v58, 4 }
0x1d58   : > { %v2294_v0 = vadd.f32 %v2293_v63, %v2292_v58  ;;  %v2180_v1 = vadd.f32 %v2179_v62, %v2178_v61 }
0x1d5a   : > { %v2295_v7 = vrot.slane %v2294_v0, 2  ;;  %3512 = vrcp.f32 %v2180_v1 }
0x1d5c   : > { %v2296_v2 = vadd.f32 %v2295_v7, %v2294_v0 }
0x1d5e   : > { %v2297_v5 = vrot.slane %v2296_v2, 1 }
0x1d60   : > { %v2298_v52 = vadd.f32 %v2297_v5, %v2296_v2 }
0x1d62   : > { %3514 = vrcp.f32 %v2298_v52 }
0x1d64   : > { %v3513_v14 = vpop.eup %3512 }
0x1d65   : > { %v2182_v10 = vmul.f32 %v3513_v14, %v3509_v51 }
0x1d67   : > { %v2183_v15 = vadd.f32 1e-08, %v2182_v10 }
0x1d69   : > { %v2187_v3 = vsel %vm962_vm2, %v2183_v15, 0.0  ;;  %v2184_v35 = vpack.c.bf16 %v2183_v15, %v2183_v15 }
0x1d6a   : > { %2188 = vadd.xlane.f32.xlu1 %v2187_v3 }
0x1d6b   : > { %2948 = vst.msk [vmem:[%s4394_s25 + $0x4] sm:$0x3] %vm984_vm3, %v2184_v35 }
0x1d6c   : > { %v3515_v56 = vpop.eup %3514 }
0x1d6d   : > { %v2300_v16 = vmul.f32 %v3515_v56, %v3511_v59 }
0x1d6f   : > { %v2301_v17 = vadd.f32 1e-08, %v2300_v16 }
0x1d71   : > { %v2305_v21 = vsel %vm962_vm2, %v2301_v17, 0.0  ;;  %v2302_v23 = vpack.c.bf16 %v2301_v17, %v2301_v17 }
0x1d72   : > { %2306 = vadd.xlane.f32.xlu1 %v2305_v21 }
0x1d73   : > { %2951 = vst.msk [vmem:[%s4394_s25 + $0xa] sm:$0x3] %vm984_vm3, %v2302_v23 }
0x1d83   : > { %2406 = vrot.lane.b32.xlu1 %v2404_v27, %s4870_s1 }
0x1df7   : > { %v2189_v28 = vpop.xlane.xlu1 %2188 }
0x1df8   : > { %3516 = vrcp.f32 %v2189_v28 }
0x1dff   : > { %v2307_v29 = vpop.xlane.xlu1 %2306 }
0x1e00   : > { %3518 = vrcp.f32 %v2307_v29 }
0x1e02   : > { %v3517_v30 = vpop.eup %3516 }
0x1e03   : > { %v2191_v9 = vmul.f32 %v3517_v30, %v2183_v15 }
0x1e05   : > { %v2193_v42 = vpack.c.bf16 %v2191_v9, %v2191_v9  ;;  %2192 = vst.msk [vmem:[%s4659_s12] sm:$0xf] %vm962_vm2, %v2191_v9 }
0x1e07   : > { %3247 = vmatmul.mubr.msk.bf16.vlgmr.msra.gmra.mrb[40].mxu0 %vm992_vm4, %v2193_v42 }
0x1e08   : > { %3257 = vmatpush3.bf16.msra.mxu0 %v4383_v60  ;;  %3258 = vmatprep.mubr.msk.bf16.mxu0 %vm3913_vm1, %v3912_v36  ;;  %v2407_v60 = vpop.permute.xlu1 %2406 }
0x1e09   : > { %3270 = vmatprep.subr.bf16.mxu0 %v3912_v36 }
0x1e0a   : > { %v3519_v34 = vpop.eup %3518 }
0x1e0b   : > { %v2309_v13 = vmul.f32 %v3519_v34, %v2301_v17 }
0x1e0d   : > { %v2312_v37 = vpack.c.bf16 %v2309_v13, %v2309_v13  ;;  %2952 = vst.msk [vmem:[%s4659_s12 + $0x4] sm:$0xf] %vm962_vm2, %v2309_v13  ;;  %s3917_s12 = smov [#allocation17]  }
0x1e0f   : > { %3259 = vmatmul.mubr.msk.bf16.vlgmr.msra.gmra.mrb[44].mxu0 %vm992_vm4, %v2312_v37 }
0x1e10   : > { %3271 = vmatpush3.bf16.msra.mxu0 %v4406_v4  ;;  %3274 = vmatprep.mubr.msk.bf16.mxu0 %vm3913_vm1, %v3912_v36 }
0x1e11   : > { %3272 = vmatprep.subr.bf16.mxu0 %v3912_v36 }
0x1e14   : > { %3273 = vmatpush3.bf16.msra.mxu0 %v4410_v6 }
0x1e15   : > { %3286 = vmatprep.subr.bf16.mxu0 %v3912_v36 }
0x1e17   : > { %3275 = vmatmul.mubr.msk.bf16.vlgmr.msra.gmra.mrb[48].mxu0 %vm553_vm0, %v2407_v60 }
0x1e18   : > { %3287 = vmatpush3.bf16.msra.mxu0 %v4463_v19  ;;  %3294 = vmatprep.mubr.msk.bf16.mxu0 %vm3913_vm1, %v3912_v36 }
0x1e19   : > { %3288 = vmatprep.subr.bf16.mxu0 %v3912_v36 }
0x1e1c   : > { %3289 = vmatpush3.bf16.msra.mxu0 %v4466_v20 }
0x1e1d   : > { %3290 = vmatprep.subr.bf16.mxu0 %v3912_v36 }
0x1e20   : > { %3291 = vmatpush3.bf16.msra.mxu0 %v4474_v25 }
0x1e21   : > { %3292 = vmatprep.subr.bf16.mxu0 %v3912_v36 }
0x1e24   : > { %3293 = vmatpush3.bf16.msra.mxu0 %v4489_v31 }
0x1eda   : > { %v2231_v4 = vpop.f32.mrb[40].mxu0 }
0x1edb   : > { %v3248_v6 = vpop.f32.mrb[41].mxu0 }
0x1edc   : > { %v2234_v38 = vpop.f32.mrb[42].mxu0 }
0x1edd   : > { %v3249_v11 = vpop.f32.mrb[43].mxu0 }
0x1ee2   : > { %v2350_v19 = vpop.f32.mrb[44].mxu0 }
0x1ee3   : > { %v2357_v18 = vrot.slane %v2350_v19, 4  ;;  %v3260_v39 = vpop.f32.mrb[45].mxu0 }
0x1ee4   : > { %v2353_v40 = vpop.f32.mrb[46].mxu0 }
0x1ee5   : > { %v2359_v41 = vsel %vm1159_vm5, %v2231_v4, %v2357_v18  ;;  %v3261_v43 = vpop.f32.mrb[47].mxu0 }
0x1ee6   : > { %v2360_v20 = vpack.c.bf16 %v2359_v41, %v2359_v41 }
0x1ee8   : > { %3267 = vmatmul.mubr.msk.bf16.vlgmr.msra.gmra.mrb[60].mxu1 %vm553_vm0, %v2360_v20 }
0x1ee9   : > { %3279 = vmatpush3.bf16.msra.mxu1 %v4455_v8  ;;  %3282 = vmatprep.mubr.msk.bf16.mxu1 %vm3913_vm1, %v3912_v36 }
0x1eea   : > { %v2445_v25 = vpop.f32.mrb[48].mxu0  ;;  %3280 = vmatprep.subr.bf16.mxu1 %v3912_v36 }
0x1eeb   : > { %v2446_v31 = vadd.f32 %v4432_v26, %v2445_v25  ;;  %v3276_v44 = vpop.f32.mrb[49].mxu0 }
0x1eec   : > { %v2448_v47 = vpop.f32.mrb[50].mxu0 }
0x1eed   : > { %2459 = vrot.lane.b32.xlu0 %v2446_v31, %s4872_s21  ;;  %v3277_v46 = vpop.f32.mrb[51].mxu0  ;;  %3281 = vmatpush3.bf16.msra.mxu1 %v4458_v12 }
0x1f5f   : > { %v2460_v59 = vpop.permute.xlu0 %2459 }
0x1fbb   : > { %v2398_v48 = vpop.f32.mrb[60].mxu1 }
0x1fbc   : > { %v2399_v49 = vadd.f32 %v4438_v32, %v2398_v48  ;;  %v3268_v51 = vpop.f32.mrb[61].mxu1 }
0x1fbd   : > { %v2401_v8 = vpop.f32.mrb[62].mxu1 }
0x1fbe   : > { %v2451_v53 = vadd.f32 %v2446_v31, %v2399_v49  ;;  %v3269_v54 = vpop.f32.mrb[63].mxu1 }
0x1fc0   : > { %v2956_v55 = vmul.f32 -1.442695, %v2451_v53 }
0x1fc2   : > { %3520 = vpow2.f32 %v2956_v55 }
0x1fcc   : > { %v3521_v57 = vpop.eup %3520 }
0x1fcd   : > { %v2455_v36 = vadd.f32 1.0, %v3521_v57 }
0x1fcf   : > { %3522 = vrcp.f32 %v2455_v36 }
0x1fd9   : > { %v3523_v26 = vpop.eup %3522 }
0x1fda   : > { %v2462_v61 = vmul.f32 %v3523_v26, %v2460_v59  ;;  %v2469_v32 = vsub.f32 1.0, %v3523_v26  ;;  %v2475_v0 = vmul.f32 %v3523_v26, %v4615_v45 }
0x1fdc   : > { %2464 = vrot.lane.b32.xlu1 %v2462_v61, %s4872_s21 }
0x204e   : > { %v2465_v58 = vpop.permute.xlu1 %2464 }
0x204f   : > { %v2467_v62 = vadd.f32 %v2465_v58, %v2399_v49 }
0x2051   : > { %3524 = vtanh.f32 %v2467_v62 }
0x205b   : > { %v3525_v12 = vpop.eup %3524 }
0x205c   : > { %2471 = vrot.lane.b32.xlu0 %v3525_v12, %s4870_s1 }
0x20ce   : > { %v2472_v63 = vpop.permute.xlu0 %2471 }
0x20cf   : > { %v2474_v1 = vmul.f32 %v2472_v63, %v2469_v32 }
0x20d1   : > { %v4700_v7 = vadd.f32 %v2475_v0, %v2474_v1 }
0x20d3   : > { %2478 = vrot.lane.b32.xlu1 %v4700_v7, %s4870_s1 }
0x2145   : > { %v2479_v2 = vpop.permute.xlu1 %2478 }
0x2146   : > { %v2481_v5 = vsel %vm553_vm0, %v2479_v2, 0.0 }
0x2147   : > { %2482 = vadd.xlane.f32.xlu0 %v2481_v5 }
0x21d4   : > { %v2483_v52 = vpop.xlane.xlu0 %2482 }
0x21d5   : > { %v2484_v14 = vmul.f32 0.03125, %v2483_v52 }
0x21d7   : > { %v2485_v10 = vsub.f32 %v4700_v7, %v2484_v14 }
0x21d9   : > { %v2486_v15 = vmul.f32 %v2485_v10, %v2485_v10 }
0x21db   : > { %2488 = vrot.lane.b32.xlu1 %v2486_v15, %s4870_s1 }
0x224d   : > { %v2489_v3 = vpop.permute.xlu1 %2488 }
0x224e   : > { %v2491_v45 = vsel %vm553_vm0, %v2489_v3, 0.0 }
0x224f   : > { %2492 = vadd.xlane.f32.xlu1 %v2491_v45 }
0x22dc   : > { %v2493_v35 = vpop.xlane.xlu1 %2492 }
0x22dd   : > { %v2494_v56 = vmul.f32 0.03125, %v2493_v35 }
0x22df   : > { %v2495_v16 = vadd.f32 1e-05, %v2494_v56 }
0x22e1   : > { %3526 = vrsqrt.f32 %v2495_v16 }
0x22eb   : > { %v3527_v17 = vpop.eup %3526 }
0x22ec   : > { %v2497_v21 = vmul.f32 %v3527_v17, %v2485_v10 }
0x22ee   : > { %v2498_v23 = vmul.f32 %v2497_v21, %v4469_v22 }
0x22f0   : > { %v2499_v27 = vadd.f32 %v2498_v23, %v4471_v24 }
0x22f2   : > { %v2500_v28 = vpack.c.bf16 %v2499_v27, %v2499_v27 }
0x22f4   : > { %2502 = vrot.lane.b32.xlu0 %v2500_v28, %s4870_s1  ;;  %s3756_s1 = scalar_lea.vmem %s4716_s23, 128 }
0x22f5   : > { %p3757_p5 = scmp.ne.s32.totalorder %s4716_s23, %s3756_s1 }
0x22f7   : > { %p3758_p4 = pnand %p3757_p5, %p4904_p7 }
0x22f9   : > { %p3759_p1 = pneg %p3758_p4 }
0x2366   : > { %v2503_v29 = vpop.permute.xlu0 %2502 }
0x2367   : > { %3283 = vmatmul.mubr.msk.bf16.vlgmr.msra.gmra.mrb[64].mxu1 %vm553_vm0, %v2503_v29 }
0x243a   : > { %v2541_v30 = vpop.f32.mrb[64].mxu1 }
0x243b   : > { %v2542_v9 = vadd.f32 %v4493_v33, %v2541_v30  ;;  %v3284_v42 = vpop.f32.mrb[65].mxu1 }
0x243c   : > { %v2544_v34 = vpop.f32.mrb[66].mxu1 }
0x243d   : > { %v2547_v13 = vmax.f32 %v2542_v9, 0.0  ;;  %v3285_v37 = vpop.f32.mrb[67].mxu1 }
0x243f   : > { %v2548_v22 = vpack.c.bf16 %v2547_v13, %v2547_v13 }
0x2441   : > { %3295 = vmatmul.mubr.msk.bf16.vlgmr.msra.gmra.mrb[52].mxu0 %vm1439_vm6, %v2548_v22 }
0x2514   : > { %v2586_v24 = vpop.f32.mrb[52].mxu0 }
0x2515   : > { %2593 = vrot.lane.b32.xlu1 %v2586_v24, %s4871_s30  ;;  %v3296_v60 = vpop.f32.mrb[53].mxu0  ;;  %s3760_s30 = sshll.u32 %s3917_s12, 4  ;;  %s3761_s30 = int_to_ptr.vmem [resolvable:$false] %s3760_s30 }
0x2516   : > { %v2589_v4 = vpop.f32.mrb[54].mxu0  ;;  %s3762_s21 = scalar_lea.vmem %s3761_s30, 256  ;;  %p3763_p3 = scmp.lt.s32.totalorder %s4716_s23, %s3761_s30 }
0x2517   : > { %v3297_v6 = vpop.f32.mrb[55].mxu0  ;;  %p3764_p8 = scmp.lt.s32.totalorder %s3762_s21, %s3756_s1 }
0x2519   : > { %p3765_p6 = por %p3764_p8, %p3763_p3 }
0x251b   : > { %p3766_p0 = pnand %p3765_p6, %p3759_p1 }
0x251d   : > { %3769 = shalt.err (!%p3766_p0)
}
0x251e   : > { %s3770_s28 = scalar_lea.hbm %s4725_s20, 128  ;;  %s3774_s12 = scalar_lea.hbm %s4857_s9, 256 }
0x251f   : > { %p3771_p2 = scmp.ne.s32.totalorder %s4725_s20, %s3770_s28  ;;  %p3775_p12 = scmp.lt.u32.totalorder %s4725_s20, %s4857_s9 }
0x2520   : > { %p3776_p11 = scmp.lt.u32.totalorder %s3774_s12, %s3770_s28  ;;  %p3778_p5 = scmp.lt.u32.totalorder %s3770_s28, %s4725_s20 }
0x2521   : > { %p3772_p9 = pnand %p3771_p2, %p4904_p7 }
0x2522   : > { %p3777_p13 = por %p3776_p11, %p3775_p12 }
0x2523   : > { %p3773_p10 = pneg %p3772_p9 }
0x2524   : > { %p3779_p4 = por %p3778_p5, %p3777_p13 }
0x2526   : > { %p3780_p1 = pnand %p3779_p4, %p3773_p10 }
0x2528   : > { %3783 = shalt.err (!%p3780_p1)
}
0x2529   : > { %s3918_s21 = smov 4   ;;  %s4905_s1 = smov 64  }
0x252a   : > { %3331 = dma.vmem_to_hbm [thread:$0]  (%p4904_p7), %s4716_s23, 128, %s4725_s20, %s4727_s17, %s4905_s1, %s4905_s1, %s3918_s21  }
0x252b   : > { %s3299_s26 = smul.u32 192, %s3998_s19  ;;  %s2664_s3 = sshll.u32 %s4394_s25, 4  ;;  %s4761_s3 = int_to_ptr.vmem [resolvable:$true] %s2664_s3 }
0x252c   : > { %s3784_s30 = scalar_lea.vmem %s4761_s3, 192  ;;  %s3919_s0 = smov [#allocation19]  }
0x252d   : > { %s4759_s12 = scalar_lea.hbm %s4858_s10, %s3299_s26  ;;  %p3785_p3 = scmp.ne.s32.totalorder %s4761_s3, %s3784_s30 }
0x252e   : > { %s3788_s2 = sshll.u32 %s3919_s0, 4  ;;  %s3789_s2 = int_to_ptr.vmem [resolvable:$false] %s3788_s2 }
0x252f   : > { %p3786_p8 = pnand %p3785_p3, %p4904_p7  ;;  %s3790_s23 = scalar_lea.vmem %s3789_s2, 384 }
0x2530   : > { %p3791_p0 = scmp.lt.s32.totalorder %s4761_s3, %s3789_s2  ;;  %p3792_p2 = scmp.lt.s32.totalorder %s3790_s23, %s3784_s30 }
0x2531   : > { %p3787_p6 = pneg %p3786_p8 }
0x2532   : > { %p3793_p9 = por %p3792_p2, %p3791_p0 }
0x2534   : > { %p3794_p10 = pnand %p3793_p9, %p3787_p6 }
0x2536   : > { %3797 = shalt.err (!%p3794_p10)
}
0x2537   : > { %s3798_s25 = scalar_lea.hbm %s4759_s12, 192  ;;  %s3802_s0 = scalar_lea.hbm %s4858_s10, 384 }
0x2538   : > { %p3799_p12 = scmp.ne.s32.totalorder %s4759_s12, %s3798_s25  ;;  %p3803_p5 = scmp.lt.u32.totalorder %s4759_s12, %s4858_s10 }
0x2539   : > { %p3804_p4 = scmp.lt.u32.totalorder %s3802_s0, %s3798_s25  ;;  %p3806_p3 = scmp.lt.u32.totalorder %s3798_s25, %s4759_s12 }
0x253a   : > { %p3800_p11 = pnand %p3799_p12, %p4904_p7 }
0x253b   : > { %p3805_p1 = por %p3804_p4, %p3803_p5 }
0x253c   : > { %p3801_p13 = pneg %p3800_p11 }
0x253d   : > { %p3807_p8 = por %p3806_p3, %p3805_p1 }
0x253f   : > { %p3808_p6 = pnand %p3807_p8, %p3801_p13 }
0x2541   : > { %3811 = shalt.err (!%p3808_p6)
}
0x2542   : > { %s3920_s28 = smov 2   ;;  %s4906_s30 = smov 32   ;;  %vm2602_vm7 = vcmask 257024   ;;  %vm2605_vm8 = vcmask 261124  }
0x2543   : > { %3332 = dma.vmem_to_hbm [thread:$0]  (%p4904_p7), %s4761_s3, 192, %s4759_s12, %s4727_s17, %s4906_s30, %s4906_s30, %s3920_s28  }
0x2544   : > { %s4907_s23 = smov 96   ;;  %s4908_s25 = sshll.u32 %s4267_s27, 3 }
0x2545   : > { %s482_s20 = scalar_lea.vmem [#allocation16], %s4908_s25  ;;  %s4909_s0 = sshll.u32 %s3998_s19, 7 }
0x2546   : > { %s2631_s26 = sshll.u32 %s482_s20, 4  ;;  %s4799_s17 = scalar_lea.hbm %s4856_s8, %s4909_s0  ;;  %s4792_s26 = int_to_ptr.vmem [resolvable:$true] %s2631_s26 }
0x2547   : > { %s2608_s3 = scalar_lea.sflag [#allocation4], %s4267_s27  ;;  %s3812_s12 = scalar_lea.vmem %s4792_s26, 128 }
0x2548   : > { %p3813_p0 = scmp.ne.s32.totalorder %s4792_s26, %s3812_s12  ;;  %s3921_s28 = smov [#allocation16]  }
0x2549   : > { %s3816_s30 = sshll.u32 %s3921_s28, 4  ;;  %s3817_s30 = int_to_ptr.vmem [resolvable:$false] %s3816_s30 }
0x254a   : > { %p3814_p2 = pnand %p3813_p0, %p4904_p7  ;;  %s3818_s19 = scalar_lea.vmem %s3817_s30, 256 }
0x254b   : > { %p3819_p10 = scmp.lt.s32.totalorder %s4792_s26, %s3817_s30  ;;  %p3820_p12 = scmp.lt.s32.totalorder %s3818_s19, %s3812_s12 }
0x254c   : > { %p3815_p9 = pneg %p3814_p2 }
0x254d   : > { %p3821_p11 = por %p3820_p12, %p3819_p10 }
0x254f   : > { %p3822_p13 = pnand %p3821_p11, %p3815_p9 }
0x2587   : > { %v2594_v33 = vpop.permute.xlu1 %2593 }
0x2588   : > { %v2596_v38 = vadd.f32 %v2594_v33, %v4700_v7 }
0x258a   : > { %v2597_v11 = vadd.f32 %v2596_v38, %v4503_v50 }
0x258c   : > { %2599 = vrot.lane.b32.xlu0 %v2597_v11, %s4907_s23 }
0x25fe   : > { %v2600_v19 = vpop.permute.xlu0 %2599 }
0x25ff   : > { %2603 = vst.msk [vmem:[%s482_s20] sm:$0xf] %vm2602_vm7, %v2600_v19 }
0x2600   : > { %2959 = vst.msk [vmem:[%s482_s20] sm:$0xf0] %vm2605_vm8, %v2600_v19 }
0x2601   : > { %3825 = shalt.err (!%p3822_p13)
}
0x2602   : > { %s3826_s23 = scalar_lea.hbm %s4799_s17, 128  ;;  %s3830_s0 = scalar_lea.hbm %s4856_s8, 256 }
0x2603   : > { %p3827_p5 = scmp.ne.s32.totalorder %s4799_s17, %s3826_s23  ;;  %p3831_p3 = scmp.lt.u32.totalorder %s4799_s17, %s4856_s8 }
0x2604   : > { %p3832_p8 = scmp.lt.u32.totalorder %s3830_s0, %s3826_s23  ;;  %p3834_p0 = scmp.lt.u32.totalorder %s3826_s23, %s4799_s17 }
0x2605   : > { %p3828_p4 = pnand %p3827_p5, %p4904_p7 }
0x2606   : > { %p3833_p6 = por %p3832_p8, %p3831_p3 }
0x2607   : > { %p3829_p1 = pneg %p3828_p4 }
0x2608   : > { %p3835_p2 = por %p3834_p0, %p3833_p6 }
0x260a   : > { %p3836_p9 = pnand %p3835_p2, %p3829_p1 }
0x260c   : > { %3839 = shalt.err (!%p3836_p9)
}
0x260d   : > { %3330 = dma.vmem_to_hbm [thread:$0]  (%p4904_p7), %s4792_s26, 128, %s4799_s17, %s2608_s3, %s4905_s1, %s4905_s1, %s3918_s21  }
0x260e PF: > { %s2679_s12 = sand.u32 1, %s3886_s13   ;;  %p4910_p10 = scmp.ne.s32.totalorder %s4890_s18, 0 }
0x260f   : > { %p4911_p12 = scmp.ge.s32.totalorder %s3898_s16, 2  ;;  %s2680_s28 = scalar_lea.sflag [#allocation4], %s2679_s12 }
0x2611   : > { %p3363_p11 = pnand %p4911_p12, %p4910_p10 }
0x2613   : > { %3877 = dma.done.wait (!%p3363_p11), %s2680_s28, 128  }
0x2614   : > { %3879 = vsyncadd (!%p3363_p11), %s2680_s28, 4294967168  ;;  %s4912_s24 = sadd.s32 4294967294, %s3898_s16  }
0x2615   : > { %s2688_s30 = sand.u32 1, %s4912_s24  }
0x2616   : > { %s2689_s19 = scalar_lea.sflag [#allocation18], %s2688_s30 }
0x2617   : > { %3881 = dma.done.wait (!%p3363_p11), %s2689_s19, 320  }
0x2618   : > { %3883 = vsyncadd (!%p3363_p11), %s2689_s19, 4294966976  ;;  %p31_p7 = scmp.ge.s32.totalorder %s4189_s11, 4   ;;  %s4913_s13 = smov %s3890_s14 }
0x2619   : > { %s4914_s14 = smov %s3894_s15  ;;  %s4915_s15 = smov %s4201_s22 }
0x261a   : > { %s4916_s16 = smov %s4189_s11  ;;  %33 = sbr.rel (!%p31_p7) target bundleno = 16 (0x10), region = 166 }
0x2621   :  { %2703 = vsyncpa [#allocation3], 1 }
0x2622   :  { %2705 = vsyncpa [#allocation3 + $0x1], 1 }
0x2623   :  { %2706 = vsyncpa [#allocation6], 1 }
0x2624   :  { %2707 = vsyncpa [#allocation9], 1 }
0x2625   :  { %2708 = vsyncpa [#allocation12], 1 }
0x2626   :  { %2709 = vsyncpa [#allocation15], 1 }
0x2627   :  { %2710 = vsyncpa [#allocation4], 1 }
0x2628   :  { %2712 = vsyncpa [#allocation4 + $0x1], 1 }
0x2629   :  { %2713 = vsyncpa [#allocation18], 1 }
0x262a   :  { %2715 = vsyncpa [#allocation18 + $0x1], 1 }

// kernel: tpu_custom_call.1
= control target key start
LH: loop header
LB: loop body
LE: loop exit
PB: predicated region body
PF: predicated region fallthrough
CT: control target
= control target key end

     0   :  { %s4848_s0 = inlined_call_operand.hbm [shape: f32[4,16,32], index: 0, kind: input, shape index: {}]   ;;  %s4849_s1 = inlined_call_operand.hbm [shape: f32[8,32], index: 1, kind: input, shape index: {}]   ;;  %s4850_s2 = inlined_call_operand.hbm [shape: f32[13,96], index: 2, kind: input, shape index: {}]   ;;  %s4851_s3 = inlined_call_operand.hbm [shape: bf16[2,32,32], index: 3, kind: input, shape index: {}]   ;;  %s4852_s4 = inlined_call_operand.hbm [shape: bf16[32,32], index: 4, kind: input, shape index: {}]   ;;  %s4853_s5 = inlined_call_operand.hbm [shape: bf16[2,32,96], index: 5, kind: input, shape index: {}]   ;;  %s4854_s6 = inlined_call_operand.hbm [shape: bf16[32,64], index: 6, kind: input, shape index: {}]   ;;  %s4855_s7 = inlined_call_operand.hbm [shape: bf16[64,32], index: 7, kind: input, shape index: {}]   ;;  %s4856_s8 = inlined_call_operand.hbm [shape: f32[4,4,32], index: 8, kind: output, shape index: {0}]   ;;  %s4857_s9 = inlined_call_operand.hbm [shape: f32[4,1,4,16], index: 9, kind: output, shape index: {1}]   ;;  %s4858_s10 = inlined_call_operand.hbm [shape: bf16[4,3,1,4,16], index: 10, kind: output, shape index: {2}]  }
   0x1   :  { %4875 = sst [smem:[#allocation27_spill]] %s4848_s0 }
   0x2   :  { %4876 = sst [smem:[#allocation28_spill]] %s4849_s1 }
   0x3   :  { %4877 = sst [smem:[#allocation29_spill]] %s4850_s2 }
   0x4   :  { %4878 = sst [smem:[#allocation30_spill]] %s4851_s3 }
   0x5   :  { %16 = vsyncpa [#allocation3], 0 }
   0x6   :  { %18 = vsyncpa [#allocation3 + $0x1], 0 }
   0x7   :  { %19 = vsyncpa [#allocation6], 0 }
   0x8   :  { %20 = vsyncpa [#allocation9], 0 }
   0x9   :  { %21 = vsyncpa [#allocation12], 0 }
   0xa   :  { %22 = vsyncpa [#allocation15], 0 }
   0xb   :  { %23 = vsyncpa [#allocation4], 0 }
   0xc   :  { %25 = vsyncpa [#allocation4 + $0x1], 0 }
   0xd   :  { %26 = vsyncpa [#allocation18], 0 }
   0xe   :  { %28 = vsyncpa [#allocation18 + $0x1], 0  ;;  %s3977_s13 = smov 0   ;;  %s3979_s14 = smov 0  }
   0xf   :  { %s3981_s15 = smov 0   ;;  %s3983_s16 = smov 0  }
  0x10 LB: > { %s3900_s17 = smov [#allocation5]   ;;  %s3998_s19 = sadd.s32 4294967295, %s3898_s16   ;;  %s3898_s16 = sphi %s3983_s16, %s4916_s16   ;;  %s3894_s15 = sphi %s3981_s15, %s4915_s15   ;;  %s3890_s14 = sphi %s3979_s14, %s4914_s14   ;;  %s3886_s13 = sphi %s3977_s13, %s4913_s13  }
  0x11   : > { %s303_s18 = sshll.u32 %s3900_s17, 4  ;;  %p2866_p0 = scmp.ge.s32.totalorder %s3898_s16, 1  ;;  %s304_s18 = int_to_ptr.vmem [resolvable:$true] %s303_s18 }
  0x12   : > { %p4859_p1 = scmp.eq.s32.totalorder %s3998_s19, 0  ;;  %p290_p2 = scmp.lt.s32.totalorder %s3898_s16, 3 }
  0x13   : > { %s3901_s21 = smov [#allocation8]   ;;  %s3902_s24 = smov [#allocation11]  }
  0x14   : > { %p4003_p3 = pnand %p2866_p0, %p290_p2  ;;  %s326_s22 = sshll.u32 %s3901_s21, 4  ;;  %s4010_s22 = int_to_ptr.vmem [resolvable:$true] %s326_s22 }
  0x15   : > { %s352_s25 = sshll.u32 %s3902_s24, 4  ;;  %s4881_s1 = sld [smem:[#allocation28_spill]]  ;;  %s4018_s25 = int_to_ptr.vmem [resolvable:$true] %s352_s25 }
  0x16   : > { %s4879_s20 = scalar_select %p4003_p3, 1, 0 }
  0x17   : > { %p3336_p5 = pneg %p4003_p3 }
  0x19   : > { %p4014_p6 = pnand %p3336_p5, %p4859_p1 }
  0x1b   : > { %s3530_s28 = scalar_lea.hbm %s4881_s1, 128  ;;  %p4028_p8 = pneg %p4014_p6 }
  0x1c   : > { %p3531_p7 = scmp.ne.s32.totalorder %s4881_s1, %s3530_s28  ;;  %p3537_p11 = scmp.lt.u32.totalorder %s3530_s28, %s4881_s1 }
  0x1e   : > { %p3533_p9 = pnand %p4028_p8, %p3531_p7 }
  0x20   : > { %p3534_p10 = pneg %p3533_p9 }
  0x22   : > { %p3539_p12 = pnand %p3537_p11, %p3534_p10 }
  0x24   : > { %3542 = shalt.err (!%p3539_p12)
}
  0x25   : > { %s3543_s21 = scalar_lea.vmem %s304_s18, 128  ;;  %p3551_p5 = scmp.lt.s32.totalorder %s304_s18, %s304_s18 }
  0x26   : > { %p3544_p13 = scmp.ne.s32.totalorder %s304_s18, %s3543_s21  ;;  %p3552_p4 = scmp.lt.s32.totalorder %s3543_s21, %s3543_s21 }
  0x28   : > { %p3546_p0 = pnand %p3544_p13, %p4028_p8  ;;  %p3553_p1 = por %p3552_p4, %p3551_p5 }
  0x2a   : > { %p3547_p2 = pneg %p3546_p0 }
  0x2c   : > { %p3554_p3 = pnand %p3553_p1, %p3547_p2 }
  0x2e   : > { %3557 = shalt.err (!%p3554_p3)
}
  0x2f   : > { %3339 = dma.hbm_to_vmem [thread:$0]  (!%p4014_p6), %s4881_s1, 128, %s304_s18, [#allocation6]  }
  0x30   : > { %s4883_s3 = sld [smem:[#allocation30_spill]] }
  0x36   : > { %s3558_s29 = scalar_lea.hbm %s4883_s3, 512 }
  0x37   : > { %p3559_p7 = scmp.ne.s32.totalorder %s4883_s3, %s3558_s29  ;;  %p3565_p1 = scmp.lt.u32.totalorder %s3558_s29, %s4883_s3 }
  0x39   : > { %p3561_p9 = pnand %p3559_p7, %p4028_p8 }
  0x3b   : > { %p3562_p4 = pneg %p3561_p9 }
  0x3d   : > { %p3567_p3 = pnand %p3565_p1, %p3562_p4 }
  0x3f   : > { %3570 = shalt.err (!%p3567_p3)
}
  0x40   : > { %s3571_s18 = scalar_lea.vmem %s4010_s22, 512  ;;  %p3579_p13 = scmp.lt.s32.totalorder %s4010_s22, %s4010_s22 }
  0x41   : > { %p3572_p10 = scmp.ne.s32.totalorder %s4010_s22, %s3571_s18  ;;  %p3580_p0 = scmp.lt.s32.totalorder %s3571_s18, %s3571_s18 }
  0x43   : > { %p3574_p11 = pnand %p3572_p10, %p4028_p8  ;;  %p3581_p2 = por %p3580_p0, %p3579_p13 }
  0x45   : > { %p3575_p12 = pneg %p3574_p11 }
  0x47   : > { %p3582_p5 = pnand %p3581_p2, %p3575_p12 }
  0x49   : > { %3585 = shalt.err (!%p3582_p5)
}
  0x4a   : > { %s4861_s24 = smov 64   ;;  %s4863_s26 = smov 4  }
  0x4b   : > { %3345 = dma.hbm_to_vmem [thread:$0]  (!%p4014_p6), %s4883_s3, 512, %s4010_s22, [#allocation9], %s4861_s24, %s4861_s24, %s4863_s26  }
  0x4c   : > { %s3586_s12 = scalar_lea.hbm %s4853_s5, 512 }
  0x4d   : > { %p3587_p7 = scmp.ne.s32.totalorder %s4853_s5, %s3586_s12  ;;  %p3593_p1 = scmp.lt.u32.totalorder %s3586_s12, %s4853_s5 }
  0x4f   : > { %p3589_p9 = pnand %p3587_p7, %p4028_p8 }
  0x51   : > { %p3590_p4 = pneg %p3589_p9 }
  0x53   : > { %p3595_p3 = pnand %p3593_p1, %p3590_p4 }
  0x55   : > { %3598 = shalt.err (!%p3595_p3)
}
  0x56   : > { %s3599_s22 = scalar_lea.vmem %s4018_s25, 512  ;;  %p3607_p13 = scmp.lt.s32.totalorder %s4018_s25, %s4018_s25 }
  0x57   : > { %p3600_p10 = scmp.ne.s32.totalorder %s4018_s25, %s3599_s22  ;;  %p3608_p0 = scmp.lt.s32.totalorder %s3599_s22, %s3599_s22 }
  0x59   : > { %p3602_p11 = pnand %p3600_p10, %p4028_p8  ;;  %p3609_p2 = por %p3608_p0, %p3607_p13 }
  0x5b   : > { %p3603_p12 = pneg %p3602_p11 }
  0x5d   : > { %p3610_p5 = pnand %p3609_p2, %p3603_p12 }
  0x5f   : > { %3613 = shalt.err (!%p3610_p5)
}
  0x60   : > { %3351 = dma.hbm_to_vmem [thread:$0]  (!%p4014_p6), %s4853_s5, 512, %s4018_s25, [#allocation12], %s4861_s24, %s4861_s24, %s4863_s26  }
  0x61   : > { %s3905_s28 = smov [#allocation7]   ;;  %s4884_s2 = sld [smem:[#allocation29_spill]] }
  0x62   : > { %s313_s29 = sshll.u32 %s3905_s28, 4  ;;  %s314_s29 = int_to_ptr.vmem [resolvable:$true] %s313_s29 }
  0x67   : > { %s3614_s17 = scalar_lea.hbm %s4884_s2, 256 }
  0x68   : > { %p3615_p7 = scmp.ne.s32.totalorder %s4884_s2, %s3614_s17  ;;  %p3621_p1 = scmp.lt.u32.totalorder %s3614_s17, %s4884_s2 }
  0x6a   : > { %p3617_p9 = pnand %p3615_p7, %p4028_p8 }
  0x6c   : > { %p3618_p4 = pneg %p3617_p9 }
  0x6e   : > { %p3623_p3 = pnand %p3621_p1, %p3618_p4 }
  0x70   : > { %3626 = shalt.err (!%p3623_p3)
}
  0x71   : > { %s3627_s25 = scalar_lea.vmem %s314_s29, 256  ;;  %p3635_p13 = scmp.lt.s32.totalorder %s314_s29, %s314_s29 }
  0x72   : > { %p3628_p10 = scmp.ne.s32.totalorder %s314_s29, %s3627_s25  ;;  %p3636_p0 = scmp.lt.s32.totalorder %s3627_s25, %s3627_s25 }
  0x74   : > { %p3630_p11 = pnand %p3628_p10, %p4028_p8  ;;  %p3637_p2 = por %p3636_p0, %p3635_p13 }
  0x76   : > { %p3631_p12 = pneg %p3630_p11 }
  0x78   : > { %p3638_p5 = pnand %p3637_p2, %p3631_p12 }
  0x7a   : > { %3641 = shalt.err (!%p3638_p5)
}
  0x7b   : > { %s4865_s1 = smov 128   ;;  %s4866_s27 = smov 8  }
  0x7c   : > { %3342 = dma.hbm_to_vmem [thread:$0]  (!%p4014_p6), %s4884_s2, 256, %s314_s29, [#allocation6], %s4865_s1, %s4865_s1, %s4866_s27  }
  0x7d   : > { %s3908_s30 = smov [#allocation10]   ;;  %s3909_s17 = smov [#allocation13]  }
  0x7e   : > { %s339_s12 = sshll.u32 %s3908_s30, 4  ;;  %s365_s21 = sshll.u32 %s3909_s17, 4  ;;  %s340_s12 = int_to_ptr.vmem [resolvable:$true] %s339_s12  ;;  %s4117_s21 = int_to_ptr.vmem [resolvable:$true] %s365_s21 }
  0x7f   : > { %s3642_s25 = scalar_lea.hbm %s4852_s4, 256 }
  0x80   : > { %p3643_p7 = scmp.ne.s32.totalorder %s4852_s4, %s3642_s25  ;;  %p3649_p1 = scmp.lt.u32.totalorder %s3642_s25, %s4852_s4 }
  0x82   : > { %p3645_p9 = pnand %p3643_p7, %p4028_p8 }
  0x84   : > { %p3646_p4 = pneg %p3645_p9 }
  0x86   : > { %p3651_p3 = pnand %p3649_p1, %p3646_p4 }
  0x88   : > { %3654 = shalt.err (!%p3651_p3)
}
  0x89   : > { %s3655_s28 = scalar_lea.vmem %s340_s12, 256  ;;  %p3663_p13 = scmp.lt.s32.totalorder %s340_s12, %s340_s12 }
  0x8a   : > { %p3656_p10 = scmp.ne.s32.totalorder %s340_s12, %s3655_s28  ;;  %p3664_p0 = scmp.lt.s32.totalorder %s3655_s28, %s3655_s28 }
  0x8c   : > { %p3658_p11 = pnand %p3656_p10, %p4028_p8  ;;  %p3665_p2 = por %p3664_p0, %p3663_p13 }
  0x8e   : > { %p3659_p12 = pneg %p3658_p11 }
  0x90   : > { %p3666_p5 = pnand %p3665_p2, %p3659_p12 }
  0x92   : > { %3669 = shalt.err (!%p3666_p5)
}
  0x93   : > { %s4885_s24 = smov 4   ;;  %s4886_s26 = smov 64  }
  0x94   : > { %3348 = dma.hbm_to_vmem [thread:$0]  (!%p4014_p6), %s4852_s4, 256, %s340_s12, [#allocation9], %s4886_s26, %s4886_s26, %s4885_s24  }
  0x95   : > { %s3670_s25 = scalar_lea.hbm %s4854_s6, 256 }
  0x96   : > { %p3671_p7 = scmp.ne.s32.totalorder %s4854_s6, %s3670_s25  ;;  %p3677_p1 = scmp.lt.u32.totalorder %s3670_s25, %s4854_s6 }
  0x98   : > { %p3673_p9 = pnand %p3671_p7, %p4028_p8 }
  0x9a   : > { %p3674_p4 = pneg %p3673_p9 }
  0x9c   : > { %p3679_p3 = pnand %p3677_p1, %p3674_p4 }
  0x9e   : > { %3682 = shalt.err (!%p3679_p3)
}
  0x9f   : > { %s3683_s12 = scalar_lea.vmem %s4117_s21, 256  ;;  %p3691_p13 = scmp.lt.s32.totalorder %s4117_s21, %s4117_s21 }
  0xa0   : > { %p3684_p10 = scmp.ne.s32.totalorder %s4117_s21, %s3683_s12  ;;  %p3692_p0 = scmp.lt.s32.totalorder %s3683_s12, %s3683_s12 }
  0xa2   : > { %p3686_p11 = pnand %p3684_p10, %p4028_p8  ;;  %p3693_p2 = por %p3692_p0, %p3691_p13 }
  0xa4   : > { %p3687_p12 = pneg %p3686_p11 }
  0xa6   : > { %p3694_p5 = pnand %p3693_p2, %p3687_p12 }
  0xa8   : > { %3697 = shalt.err (!%p3694_p5)
}
  0xa9   : > { %3354 = dma.hbm_to_vmem [thread:$0]  (!%p4014_p6), %s4854_s6, 256, %s4117_s21, [#allocation12], %s4886_s26, %s4886_s26, %s4885_s24  }
  0xaa   : > { %s3910_s17 = smov [#allocation14]   ;;  %s3698_s3 = scalar_lea.hbm %s4855_s7, 512 }
  0xab   : > { %s378_s18 = sshll.u32 %s3910_s17, 4  ;;  %p3699_p7 = scmp.ne.s32.totalorder %s4855_s7, %s3698_s3  ;;  %s379_s18 = int_to_ptr.vmem [resolvable:$true] %s378_s18 }
  0xac   : > { %p3705_p1 = scmp.lt.u32.totalorder %s3698_s3, %s4855_s7 }
  0xad   : > { %p3701_p9 = pnand %p3699_p7, %p4028_p8 }
  0xaf   : > { %p3702_p4 = pneg %p3701_p9 }
  0xb1   : > { %p3707_p3 = pnand %p3705_p1, %p3702_p4 }
  0xb3   : > { %3710 = shalt.err (!%p3707_p3)
}
  0xb4   : > { %s3711_s21 = scalar_lea.vmem %s379_s18, 512  ;;  %p3719_p13 = scmp.lt.s32.totalorder %s379_s18, %s379_s18 }
  0xb5   : > { %p3712_p10 = scmp.ne.s32.totalorder %s379_s18, %s3711_s21  ;;  %p3720_p0 = scmp.lt.s32.totalorder %s3711_s21, %s3711_s21 }
  0xb7   : > { %p3714_p11 = pnand %p3712_p10, %p4028_p8  ;;  %p3721_p2 = por %p3720_p0, %p3719_p13 }
  0xb9   : > { %p3715_p12 = pneg %p3714_p11 }
  0xbb   : > { %p3722_p5 = pnand %p3721_p2, %p3715_p12 }
  0xbd   : > { %3725 = shalt.err (!%p3722_p5)
}
  0xbe   : > { %3357 = dma.hbm_to_vmem [thread:$0]  (!%p4014_p6), %s4855_s7, 512, %s379_s18, [#allocation15], %s4886_s26, %s4886_s26, %s4885_s24  }
  0xbf   : > { %s4867_s23 = sadd.s32 4294967294, %s3898_s16   ;;  %s4189_s11 = sadd.s32 1, %s3898_s16  }
  0xc0   : > { %s41_s30 = sadd.s32 1, %s3894_s15  ;;  %s38_s17 = ssub.s32 %s3898_s16, %s4189_s11 }
  0xc1   : > { %p48_p8 = scmp.ne.s32.totalorder %s3894_s15, %s3890_s14  ;;  %p39_p7 = scmp.eq.s32.totalorder %s38_s17, 0 }
  0xc2   : > { %p49_p9 = scmp.eq.s32.totalorder %s3898_s16, 0  ;;  %p54_p4 = scmp.ne.s32.totalorder %s3890_s14, %s3886_s13 }
  0xc3   : > { %p225_p1 = scmp.eq.s32.totalorder %s3998_s19, 1  ;;  %p4887_p10 = scmp.eq.s32.totalorder %s3998_s19, 0 }
  0xc4   : > { %s4201_s22 = scalar_select %p39_p7, %s3894_s15, %s41_s30  }
  0xc5   : > { %p50_p3 = por %p49_p9, %p48_p8  ;;  %p4205_p11 = por %p4887_p10, %p54_p4 }
  0xc6   : > { %p4209_p6 = por %p225_p1, %p48_p8  ;;  %p231_p12 = scmp.eq.s32.totalorder %s4867_s23, 1 }
  0xc7   : > { %p3379_p13 = scmp.lt.s32.totalorder %s3898_s16, 2  ;;  %s392_s26 = sand.u32 1, %s3894_s15  }
  0xc8   : > { %s4889_s24 = scalar_select %p4209_p6, 1, 0 }
  0xc9   : > { %p4217_p0 = por %p231_p12, %p54_p4  ;;  %s2875_s3 = sshll.u32 %s392_s26, 5 }
  0xca   : > { %s2972_s29 = sshll.u32 %s3898_s16, 9  ;;  %s4891_s0 = sld [smem:[#allocation27_spill]] }
  0xcb   : > { %s4890_s18 = scalar_select %p4217_p0, 1, 0 }
  0xcc   : > { %s396_s27 = scalar_lea.vmem [#allocation2], %s2875_s3  ;;  %p4227_p2 = pnand %p3379_p13, %p50_p3 }
  0xcd   : > { %s404_s1 = sshll.u32 %s396_s27, 4  ;;  %s4233_s17 = scalar_lea.sflag [#allocation3], %s392_s26  ;;  %s4231_s1 = int_to_ptr.vmem [resolvable:$true] %s404_s1 }
  0xce   : > { %p3728_p8 = pneg %p4227_p2 }
  0xd0   : > { %s4225_s21 = scalar_lea.hbm %s4891_s0, %s2972_s29  ;;  %s3731_s28 = scalar_lea.hbm %s4891_s0, 1024 }
  0xd1   : > { %s3726_s23 = scalar_lea.hbm %s4225_s21, 512  ;;  %p3732_p4 = scmp.lt.u32.totalorder %s4225_s21, %s4891_s0 }
  0xd2   : > { %p3727_p5 = scmp.ne.s32.totalorder %s4225_s21, %s3726_s23  ;;  %p3733_p1 = scmp.lt.u32.totalorder %s3731_s28, %s3726_s23 }
  0xd3   : > { %p3735_p10 = scmp.lt.u32.totalorder %s3726_s23, %s4225_s21 }
  0xd4   : > { %p3729_p7 = pnand %p3728_p8, %p3727_p5  ;;  %p3734_p3 = por %p3733_p1, %p3732_p4 }
  0xd6   : > { %p3730_p9 = pneg %p3729_p7  ;;  %p3736_p12 = por %p3735_p10, %p3734_p3 }
  0xd8   : > { %p3737_p13 = pnand %p3736_p12, %p3730_p9 }
  0xda   : > { %3740 = shalt.err (!%p3737_p13)
}
  0xdb   : > { %s3741_s26 = scalar_lea.vmem %s4231_s1, 512  ;;  %s3911_s3 = smov [#allocation2]  }
  0xdc   : > { %p3742_p5 = scmp.ne.s32.totalorder %s4231_s1, %s3741_s26  ;;  %s3746_s29 = sshll.u32 %s3911_s3, 4  ;;  %s3747_s29 = int_to_ptr.vmem [resolvable:$false] %s3746_s29 }
  0xdd   : > { %s3748_s12 = scalar_lea.vmem %s3747_s29, 1024  ;;  %p3749_p6 = scmp.lt.s32.totalorder %s4231_s1, %s3747_s29 }
  0xde   : > { %p3744_p7 = pnand %p3742_p5, %p3728_p8  ;;  %p3750_p4 = scmp.lt.s32.totalorder %s3748_s12, %s3741_s26 }
  0xe0   : > { %p3745_p0 = pneg %p3744_p7  ;;  %p3751_p1 = por %p3750_p4, %p3749_p6 }
  0xe2   : > { %p3752_p3 = pnand %p3751_p1, %p3745_p0 }
  0xe4   : > { %3755 = shalt.err (!%p3752_p3)
}
  0xe5   : > { %s4893_s23 = smov 8   ;;  %s4894_s28 = smov 128  }
  0xe6   : > { %3361 = dma.hbm_to_vmem [thread:$0]  (!%p4227_p2), %s4225_s21, 512, %s4231_s1, %s4233_s17, %s4894_s28, %s4894_s28, %s4893_s23  }
  0xe7   : > { %p4895_p8 = scmp.ne.s32.totalorder %s4879_s20, 0 }
  0xe8   : > { %s4267_s27 = sand.u32 (!%p4895_p8), 1, %s3890_s14  }
  0xe9   : > { %416 = sbr.rel (%p4895_p8) target bundleno = 9742 (0x260e), region = 52  ;;  %s2880_s26 = sshll.u32 (!%p4895_p8), %s4267_s27, 5 }
  0xea   : > { %s419_s3 = scalar_lea.sflag (!%p4895_p8), [#allocation3], %s4267_s27  ;;  %s422_s29 = scalar_lea.vmem (!%p4895_p8), [#allocation2], %s2880_s26 }
  0xf0   : > { %3857 = dma.done.wait (%p4205_p11), %s419_s3, 512  }
  0xf1   : > { %3859 = vsyncadd (%p4205_p11), %s419_s3, 4294966784  ;;  %p4896_p6 = scmp.eq.s32.totalorder %s3998_s19, 0 }
  0xf3   : > { %3861 = dma.done.wait (%p4896_p6), [#allocation6], 384   ;;  %p4897_p0 = pmov %p4896_p6 }
  0xf5   : > { %3863 = vsyncadd (%p4897_p0), [#allocation6], 4294966912  ;;  %p4898_p2 = pmov %p4897_p0 }
  0xf6   : > { %p4899_p9 = pmov %p4897_p0 }
  0xf7   : > { %3865 = dma.done.wait (%p4898_p2), [#allocation9], 768  }
  0xf8   : > { %3867 = vsyncadd (%p4899_p9), [#allocation9], 4294966528  ;;  %p4900_p10 = pmov %p4897_p0 }
  0xf9   : > { %p4901_p12 = pmov %p4897_p0 }
  0xfa   : > { %3869 = dma.done.wait (%p4900_p10), [#allocation12], 768  }
  0xfb   : > { %3871 = vsyncadd (%p4901_p12), [#allocation12], 4294966528  ;;  %p4902_p11 = pmov %p4897_p0 }
  0xfc   : > { %p4903_p13 = pmov %p4897_p0 }
  0xfd   : > { %3873 = dma.done.wait (%p4902_p11), [#allocation15], 512  }
  0xfe   : > { %3875 = vsyncadd (%p4903_p13), [#allocation15], 4294966784  ;;  %vm553_vm0 = vcmask 261120   ;;  %v549_v0 = vld [vmem:[%s422_s29] sm:$0xff]  ;;  %v551_v1 = vld [vmem:[%s422_s29 + $0x10] sm:$0xff]  ;;  %v3912_v36 = vmov 0.0  }
  0xff   : > { %v550_v2 = vld [vmem:[%s422_s29 + $0x8] sm:$0xff]  ;;  %v554_v3 = vsel %vm553_vm0, %v549_v0, 0.0  ;;  %v560_v4 = vsel %vm553_vm0, %v551_v1, 0.0  ;;  %v552_v6 = vld [vmem:[%s422_s29 + $0x18] sm:$0xff]  ;;  %v4294_v7 = vld [vmem:[#allocation5] sm:$0xff]  ;;  %3062 = vmatprep.subr.bf16.mxu1 %v3912_v36  ;;  %3078 = vmatprep.subr.bf16.mxu0 %v3912_v36  ;;  %vm3913_vm1 = vmmov 0  }
 0x100   : > { %v557_v5 = vsel %vm553_vm0, %v550_v2, 0.0  ;;  %555 = vadd.xlane.f32.xlu0 %v554_v3  ;;  %561 = vadd.xlane.f32.xlu1 %v560_v4  ;;  %v563_v8 = vsel %vm553_vm0, %v552_v6, 0.0  ;;  %v832_v9 = vsel %vm553_vm0, %v4294_v7, 0.0  ;;  %v3438_v35 = vld [vmem:[#allocation8] sm:$0xff]   ;;  %v3439_v37 = vld [vmem:[#allocation8 + $0x8] sm:$0xff]   ;;  %vm962_vm2 = vcmask 125952  }
 0x101   : > { %3063 = vmatpush3.bf16.msra.mxu1 %v3438_v35  ;;  %3079 = vmatpush3.bf16.msra.mxu0 %v3438_v35  ;;  %v2890_v55 = vld [vmem:[#allocation7] ss:$0 sm:$0xff]  ;;  %v2891_v61 = vld [vmem:[#allocation7 + $0x1] ss:$0 sm:$0xff]  ;;  %s3298_s20 = smul.u32 12, %s4267_s27  ;;  %vm984_vm3 = vcmask 123904  }
 0x102   : > { %3064 = vmatprep.subr.bf16.mxu1 %v3912_v36  ;;  %3080 = vmatprep.subr.bf16.mxu0 %v3912_v36  ;;  %vm992_vm4 = vcmask 130048   ;;  %vm1159_vm5 = vcmask 1043456   ;;  %s4872_s21 = smov 64   ;;  %s4870_s1 = smov 96   ;;  %vm1439_vm6 = vcmask 523264  }
 0x103   : > { %3066 = vmatprep.mubr.msk.bf16.mxu1 %vm3913_vm1, %v3912_v36  ;;  %3082 = vmatprep.mubr.msk.bf16.mxu0 %vm3913_vm1, %v3912_v36  ;;  %s4394_s25 = scalar_lea.vmem [#allocation19], %s3298_s20  ;;  %s4871_s30 = smov 32  }
 0x104   : > { %558 = vadd.xlane.f32.xlu0 %v557_v5  ;;  %564 = vadd.xlane.f32.xlu1 %v563_v8  ;;  %v3440_v5 = vld [vmem:[#allocation8 + $0x10] sm:$0xff]   ;;  %s4869_s17 = sshll.u32 %s4267_s27, 3  ;;  %s2612_s28 = sand.u32 1, %s3998_s19  }
 0x105   : > { %3065 = vmatpush3.bf16.msra.mxu1 %v3439_v37  ;;  %3081 = vmatpush3.bf16.msra.mxu0 %v3439_v37  ;;  %v2896_v37 = vld [vmem:[#allocation7 + $0x7] ss:$0 sm:$0xff]  ;;  %s4659_s12 = scalar_lea.vmem [#allocation17], %s4869_s17  ;;  %s4874_s26 = sshll.u32 %s3998_s19, 7 }
 0x106   : > { %3070 = vmatprep.subr.bf16.mxu1 %v3912_v36  ;;  %3094 = vmatprep.subr.bf16.mxu0 %v3912_v36  ;;  %s2647_s23 = sshll.u32 %s4659_s12, 4  ;;  %s4725_s20 = scalar_lea.hbm %s4857_s9, %s4874_s26  ;;  %s4716_s23 = int_to_ptr.vmem [resolvable:$true] %s2647_s23 }
 0x107   : > { %s4727_s17 = scalar_lea.sflag [#allocation18], %s2612_s28  ;;  %p4904_p7 = scmp.ne.s32.totalorder %s4889_s24, 0 }
 0x108   : > { %833 = vadd.xlane.f32.xlu0 %v832_v9 }
 0x18d   : > { %v556_v10 = vpop.xlane.xlu0 %555  ;;  %v562_v11 = vpop.xlane.xlu1 %561 }
 0x18e   : > { %v567_v12 = vmul.f32 0.03125, %v556_v10  ;;  %v569_v13 = vmul.f32 0.03125, %v562_v11  ;;  %v4330_v10 = vld [vmem:[#allocation7 + $0x2] ss:$0 sm:$0xff] }
 0x190   : > { %v4299_v14 = vsub.f32 %v549_v0, %v567_v12  ;;  %v4301_v15 = vsub.f32 %v551_v1, %v569_v13  ;;  %v4333_v13 = vld [vmem:[#allocation10] sm:$0xff]  }
 0x191   : > { %v559_v16 = vpop.xlane.xlu0 %558  ;;  %v565_v17 = vpop.xlane.xlu1 %564 }
 0x192   : > { %v568_v18 = vmul.f32 0.03125, %v559_v16  ;;  %v570_v19 = vmul.f32 0.03125, %v565_v17  ;;  %v575_v20 = vmul.f32 %v4299_v14, %v4299_v14  ;;  %v577_v21 = vmul.f32 %v4301_v15, %v4301_v15  ;;  %v4339_v17 = vld [vmem:[#allocation7 + $0x3] ss:$0 sm:$0xff] }
 0x194   : > { %v572_v22 = vsub.f32 %v550_v2, %v568_v18  ;;  %v4307_v23 = vsub.f32 %v552_v6, %v570_v19  ;;  %v579_v24 = vsel %vm553_vm0, %v575_v20, 0.0  ;;  %v585_v27 = vsel %vm553_vm0, %v577_v21, 0.0  ;;  %v4343_v18 = vld [vmem:[#allocation10 + $0x8] sm:$0xff]   ;;  %v2892_v21 = vld [vmem:[#allocation7 + $0x6] ss:$0 sm:$0xff] }
 0x195   : > { %580 = vadd.xlane.f32.xlu1 %v579_v24  ;;  %v834_v25 = vpop.xlane.xlu0 %833 }
 0x196   : > { %v835_v26 = vmul.f32 0.03125, %v834_v25  ;;  %v576_v28 = vmul.f32 %v572_v22, %v572_v22  ;;  %v578_v29 = vmul.f32 %v4307_v23, %v4307_v23 }
 0x198   : > { %v836_v30 = vsub.f32 %v4294_v7, %v835_v26  ;;  %v582_v31 = vsel %vm553_vm0, %v576_v28, 0.0  ;;  %v588_v32 = vsel %vm553_vm0, %v578_v29, 0.0 }
 0x199   : > { %586 = vadd.xlane.f32.xlu1 %v585_v27  ;;  %583 = vadd.xlane.f32.xlu0 %v582_v31 }
 0x19a   : > { %v837_v33 = vmul.f32 %v836_v30, %v836_v30 }
 0x19c   : > { %v838_v34 = vsel %vm553_vm0, %v837_v33, 0.0 }
 0x19d   : > { %589 = vadd.xlane.f32.xlu0 %v588_v32  ;;  %839 = vadd.xlane.f32.xlu1 %v838_v34 }
 0x222   : > { %v581_v38 = vpop.xlane.xlu1 %580 }
 0x223   : > { %v591_v39 = vmul.f32 0.03125, %v581_v38 }
 0x225   : > { %v595_v40 = vadd.f32 1e-05, %v591_v39 }
 0x226   : > { %v587_v41 = vpop.xlane.xlu1 %586  ;;  %v584_v42 = vpop.xlane.xlu0 %583 }
 0x227   : > { %3454 = vrsqrt.f32 %v595_v40  ;;  %v593_v43 = vmul.f32 0.03125, %v587_v41  ;;  %v592_v44 = vmul.f32 0.03125, %v584_v42  ;;  %v4368_v42 = vld [vmem:[#allocation7 + $0x8] ss:$0 sm:$0xff] }
 0x229   : > { %v597_v45 = vadd.f32 1e-05, %v593_v43  ;;  %v596_v46 = vadd.f32 1e-05, %v592_v44 }
 0x22a   : > { %v840_v47 = vpop.xlane.xlu1 %839  ;;  %v590_v48 = vpop.xlane.xlu0 %589 }
 0x22b   : > { %3456 = vrsqrt.f32 %v597_v45  ;;  %v841_v49 = vmul.f32 0.03125, %v840_v47  ;;  %v594_v50 = vmul.f32 0.03125, %v590_v48 }
 0x22c   : > { %3458 = vrsqrt.f32 %v596_v46 }
 0x22d   : > { %v842_v51 = vadd.f32 1e-05, %v841_v49  ;;  %v598_v52 = vadd.f32 1e-05, %v594_v50 }
 0x22f   : > { %3460 = vrsqrt.f32 %v842_v51 }
 0x230   : > { %3462 = vrsqrt.f32 %v598_v52 }
 0x231   : > { %v3455_v53 = vpop.eup %3454 }
 0x232   : > { %v603_v54 = vmul.f32 %v3455_v53, %v4299_v14  ;;  %v3442_v14 = vld [vmem:[#allocation8 + $0x18] sm:$0xff]  }
 0x234   : > { %v611_v60 = vmul.f32 %v2890_v55, %v603_v54 }
 0x235   : > { %v3457_v56 = vpop.eup %3456 }
 0x236   : > { %v3459_v57 = vpop.eup %3458  ;;  %v605_v58 = vmul.f32 %v3457_v56, %v4301_v15  ;;  %v619_v2 = vadd.f32 %v2891_v61, %v611_v60 }
 0x237   : > { %v604_v59 = vmul.f32 %v3459_v57, %v572_v22 }
 0x238   : > { %v613_v4 = vmul.f32 %v2890_v55, %v605_v58 }
 0x239   : > { %v3461_v62 = vpop.eup %3460  ;;  %v612_v63 = vmul.f32 %v2890_v55, %v604_v59 }
 0x23a   : > { %v3463_v0 = vpop.eup %3462  ;;  %v844_v6 = vmul.f32 %v3461_v62, %v836_v30  ;;  %v621_v11 = vadd.f32 %v2891_v61, %v613_v4 }
 0x23b   : > { %v606_v1 = vmul.f32 %v3463_v0, %v4307_v23  ;;  %v620_v3 = vadd.f32 %v2891_v61, %v612_v63 }
 0x23c   : > { %v849_v16 = vmul.f32 %v4330_v10, %v844_v6 }
 0x23d   : > { %v623_v8 = vpack.c.bf16 %v620_v3, %v619_v2  ;;  %v614_v9 = vmul.f32 %v2890_v55, %v606_v1 }
 0x23e   : > { %v854_v19 = vadd.f32 %v4339_v17, %v849_v16 }
 0x23f   : > { %3067 = vmatmul.mubr.msk.bf16.vlgmr.msra.gmra.mrb[0].mxu1 %vm553_vm0, %v623_v8  ;;  %v622_v12 = vadd.f32 %v2891_v61, %v614_v9 }
 0x240   : > { %3071 = vmatpush3.bf16.msra.mxu1 %v3440_v5  ;;  %3074 = vmatprep.mubr.msk.bf16.mxu1 %vm3913_vm1, %v3912_v36  ;;  %v855_v20 = vpack.c.bf16 %v854_v19, %v854_v19 }
 0x241   : > { %3072 = vmatprep.subr.bf16.mxu1 %v3912_v36  ;;  %v743_v15 = vpack.c.bf16 %v622_v12, %v621_v11 }
 0x243   : > { %3083 = vmatmul.mubr.msk.bf16.vlgmr.msra.gmra.mrb[0].mxu0 %vm553_vm0, %v743_v15 }
 0x244   : > { %3095 = vmatpush3.bf16.msra.mxu0 %v4333_v13  ;;  %3073 = vmatpush3.bf16.msra.mxu1 %v3442_v14 }
 0x245   : > { %3096 = vmatprep.subr.bf16.mxu0 %v3912_v36  ;;  %3086 = vmatprep.subr.bf16.mxu1 %v3912_v36 }
 0x246   : > { %3098 = vmatprep.mubr.msk.bf16.mxu0 %vm3913_vm1, %v3912_v36 }
 0x247   : > { %3075 = vmatmul.mubr.msk.bf16.vlgmr.msra.gmra.mrb[4].mxu1 %vm553_vm0, %v623_v8 }
 0x248   : > { %3097 = vmatpush3.bf16.msra.mxu0 %v4343_v18  ;;  %3087 = vmatpush3.bf16.msra.mxu1 %v3440_v5 }
 0x249   : > { %3088 = vmatprep.subr.bf16.mxu1 %v3912_v36  ;;  %3090 = vmatprep.mubr.msk.bf16.mxu1 %vm3913_vm1, %v3912_v36 }
 0x24a   : > { %3108 = vmatprep.subr.bf16.mxu0 %v3912_v36 }
 0x24b   : > { %3099 = vmatmul.mubr.msk.bf16.vlgmr.msra.gmra.mrb[4].mxu0 %vm553_vm0, %v855_v20 }
 0x24c   : > { %3089 = vmatpush3.bf16.msra.mxu1 %v3442_v14  ;;  %3110 = vmatprep.mubr.msk.bf16.mxu0 %vm3913_vm1, %v3912_v36 }
 0x24d   : > { %3102 = vmatprep.subr.bf16.mxu1 %v3912_v36 }
 0x24f   : > { %3091 = vmatmul.mubr.msk.bf16.vlgmr.msra.gmra.mrb[8].mxu1 %vm553_vm0, %v743_v15 }
 0x250   : > { %3104 = vmatprep.mubr.msk.bf16.mxu1 %vm3913_vm1, %v3912_v36 }
 0x312   : > { %v677_v22 = vpop.f32.mrb[0].mxu1 }
 0x313   : > { %v3068_v23 = vpop.f32.mrb[1].mxu1  ;;  %v678_v25 = vadd.f32 %v2892_v21, %v677_v22 }
 0x314   : > { %v680_v24 = vpop.f32.mrb[2].mxu1 }
 0x315   : > { %v681_v26 = vadd.f32 %v2892_v21, %v680_v24  ;;  %v3069_v27 = vpop.f32.mrb[3].mxu1 }
 0x316   : > { %v781_v28 = vpop.f32.mrb[0].mxu0 }
 0x317   : > { %v684_v29 = vpack.c.bf16 %v681_v26, %v678_v25  ;;  %v3084_v30 = vpop.f32.mrb[1].mxu0  ;;  %v782_v32 = vadd.f32 %v2892_v21, %v781_v28 }
 0x318   : > { %v784_v31 = vpop.f32.mrb[2].mxu0 }
 0x319   : > { %v785_v33 = vadd.f32 %v2892_v21, %v784_v31  ;;  %v3085_v34 = vpop.f32.mrb[3].mxu0  ;;  %v4364_v35 = vsel %vm553_vm0, %v684_v29, 0 }
 0x31a   : > { %v735_v38 = vpop.f32.mrb[4].mxu1  ;;  %3103 = vmatpush3.bf16.xpose.msra.mxu1 %v4364_v35 }
 0x31b   : > { %v788_v39 = vpack.c.bf16 %v785_v33, %v782_v32  ;;  %v3076_v40 = vpop.f32.mrb[5].mxu1  ;;  %3114 = vmatprep.subr.bf16.mxu1 %v3912_v36  ;;  %v736_v43 = vadd.f32 %v2896_v37, %v735_v38 }
 0x31c   : > { %v738_v41 = vpop.f32.mrb[6].mxu1 }
 0x31d   : > { %v739_v44 = vadd.f32 %v2896_v37, %v738_v41  ;;  %v3077_v45 = vpop.f32.mrb[7].mxu1  ;;  %v4377_v56 = vsel %vm553_vm0, %v788_v39, 0 }
 0x31e   : > { %v909_v46 = vpop.f32.mrb[4].mxu0 }
 0x31f   : > { %v4370_v47 = vpack.c.bf16 %v739_v44, %v736_v43  ;;  %v910_v48 = vadd.f32 %v4368_v42, %v909_v46  ;;  %v3100_v49 = vpop.f32.mrb[5].mxu0 }
 0x320   : > { %v912_v50 = vpop.f32.mrb[6].mxu0 }
 0x321   : > { %v915_v51 = vpack.c.bf16 %v910_v48, %v910_v48  ;;  %v3101_v52 = vpop.f32.mrb[7].mxu0  ;;  %3109 = vmatpush3.bf16.msra.mxu0 %v4370_v47 }
 0x322   : > { %v823_v53 = vpop.f32.mrb[8].mxu1  ;;  %3120 = vmatprep.subr.bf16.mxu0 %v3912_v36 }
 0x323   : > { %v824_v54 = vadd.f32 %v2896_v37, %v823_v53  ;;  %v3092_v55 = vpop.f32.mrb[9].mxu1  ;;  %3105 = vmatmul.mubr.msk.bf16.vlgmr.msra.gmra.mrb[12].mxu1 %vm553_vm0, %v915_v51  ;;  %v1037_v61 = vrot.slane %v915_v51, 2 }
 0x324   : > { %3115 = vmatpush3.bf16.xpose.msra.mxu1 %v4377_v56  ;;  %v826_v57 = vpop.f32.mrb[10].mxu1  ;;  %3116 = vmatprep.mubr.msk.bf16.mxu1 %vm3913_vm1, %v3912_v36 }
 0x325   : > { %v827_v58 = vadd.f32 %v2896_v37, %v826_v57  ;;  %v3093_v59 = vpop.f32.mrb[11].mxu1  ;;  %3126 = vmatprep.subr.bf16.mxu1 %v3912_v36 }
 0x327   : > { %v4383_v60 = vpack.c.bf16 %v827_v58, %v824_v54 }
 0x32b   : > { %3117 = vmatmul.mubr.msk.bf16.vlgmr.msra.gmra.mrb[16].mxu1 %vm553_vm0, %v1037_v61 }
 0x32c   : > { %3130 = vmatprep.mubr.msk.bf16.mxu1 %vm3913_vm1, %v3912_v36 }
 0x3f6   : > { %v956_v62 = vpop.f32.mrb[12].mxu1 }
 0x3f7   : > { %v963_v63 = vsel %vm962_vm2, %v956_v62, -inf  ;;  %v3106_v0 = vpop.f32.mrb[13].mxu1 }
 0x3f8   : > { %v964_v1 = vrot.slane %v963_v63, 4  ;;  %v959_v2 = vpop.f32.mrb[14].mxu1 }
 0x3f9   : > { %v3107_v3 = vpop.f32.mrb[15].mxu1 }
 0x3fa   : > { %v965_v4 = vmax.f32 %v963_v63, %v964_v1 }
 0x3fc   : > { %v966_v5 = vrot.slane %v965_v4, 2 }
 0x3fe   : > { %v967_v6 = vmax.f32 %v965_v4, %v966_v5  ;;  %v1078_v8 = vpop.f32.mrb[16].mxu1  ;;  %v4406_v4 = vld [vmem:[#allocation11 + $0x10] sm:$0xff]  }
 0x3ff   : > { %v1084_v9 = vsel %vm962_vm2, %v1078_v8, -inf  ;;  %v3118_v11 = vpop.f32.mrb[17].mxu1 }
 0x400   : > { %v968_v12 = vrot.slane %v967_v6, 1  ;;  %v1085_v14 = vrot.slane %v1084_v9, 4  ;;  %v1081_v15 = vpop.f32.mrb[18].mxu1  ;;  %v4426_v11 = vld [vmem:[#allocation11 + $0x8] sm:$0xff]  }
 0x401   : > { %v3119_v16 = vpop.f32.mrb[19].mxu1 }
 0x402   : > { %v969_v19 = vmax.f32 %v967_v6, %v968_v12  ;;  %v1086_v20 = vmax.f32 %v1084_v9, %v1085_v14  ;;  %v4410_v6 = vld [vmem:[#allocation11 + $0x18] sm:$0xff]   ;;  %v4422_v9 = vld [vmem:[#allocation11] sm:$0xff]  }
 0x403   : > { %3127 = vmatpush3.bf16.msra.mxu1 %v4422_v9 }
 0x404   : > { %v970_v21 = vsub.f32 %v956_v62, %v969_v19  ;;  %v1087_v22 = vrot.slane %v1086_v20, 2  ;;  %3128 = vmatprep.subr.bf16.mxu1 %v3912_v36 }
 0x406   : > { %v971_v23 = vmul.f32 1.442695, %v970_v21  ;;  %v1088_v24 = vmax.f32 %v1086_v20, %v1087_v22 }
 0x407   : > { %3129 = vmatpush3.bf16.msra.mxu1 %v4426_v11 }
 0x408   : > { %3464 = vpow2.f32 %v971_v23  ;;  %v1089_v25 = vrot.slane %v1088_v24, 1  ;;  %3142 = vmatprep.subr.bf16.mxu1 %v3912_v36 }
 0x40a   : > { %v1090_v26 = vmax.f32 %v1088_v24, %v1089_v25 }
 0x40c   : > { %v1091_v27 = vsub.f32 %v1078_v8, %v1090_v26  ;;  %v1221_v8 = vpack.c.bf16 %v4294_v7, %v4294_v7  ;;  %v4432_v26 = vld [vmem:[#allocation7 + $0xa] ss:$0 sm:$0xff] }
 0x40e   : > { %v1092_v28 = vmul.f32 1.442695, %v1091_v27 }
 0x410   : > { %3466 = vpow2.f32 %v1092_v28 }
 0x412   : > { %v3465_v29 = vpop.eup %3464 }
 0x413   : > { %v973_v30 = vsel %vm962_vm2, %v3465_v29, 0.0 }
 0x414   : > { %v974_v31 = vrot.slane %v973_v30, 4 }
 0x416   : > { %v975_v32 = vadd.f32 %v974_v31, %v973_v30 }
 0x418   : > { %v976_v33 = vrot.slane %v975_v32, 2 }
 0x41a   : > { %v3467_v34 = vpop.eup %3466  ;;  %v977_v37 = vadd.f32 %v976_v33, %v975_v32  ;;  %v4438_v32 = vld [vmem:[#allocation7 + $0x9] ss:$0 sm:$0xff] }
 0x41b   : > { %v1094_v38 = vsel %vm962_vm2, %v3467_v34, 0.0 }
 0x41c   : > { %v978_v39 = vrot.slane %v977_v37, 1  ;;  %v1095_v40 = vrot.slane %v1094_v38, 4 }
 0x41e   : > { %v1096_v41 = vadd.f32 %v1095_v40, %v1094_v38  ;;  %v979_v43 = vadd.f32 %v978_v39, %v977_v37 }
 0x420   : > { %v1097_v44 = vrot.slane %v1096_v41, 2  ;;  %3468 = vrcp.f32 %v979_v43 }
 0x422   : > { %v1098_v45 = vadd.f32 %v1097_v44, %v1096_v41 }
 0x424   : > { %v1099_v46 = vrot.slane %v1098_v45, 1 }
 0x426   : > { %v1100_v48 = vadd.f32 %v1099_v46, %v1098_v45 }
 0x428   : > { %3470 = vrcp.f32 %v1100_v48 }
 0x42a   : > { %v3469_v49 = vpop.eup %3468 }
 0x42b   : > { %v981_v50 = vmul.f32 %v3469_v49, %v3465_v29 }
 0x42d   : > { %v982_v51 = vadd.f32 1e-08, %v981_v50 }
 0x42f   : > { %v986_v52 = vsel %vm962_vm2, %v982_v51, 0.0  ;;  %v983_v53 = vpack.c.bf16 %v982_v51, %v982_v51 }
 0x430   : > { %987 = vadd.xlane.f32.xlu0 %v986_v52 }
 0x431   : > { %985 = vst.msk [vmem:[%s4394_s25] sm:$0x3] %vm984_vm3, %v983_v53 }
 0x432   : > { %v3471_v54 = vpop.eup %3470 }
 0x433   : > { %v1102_v55 = vmul.f32 %v3471_v54, %v3467_v34 }
 0x435   : > { %v1103_v57 = vadd.f32 1e-08, %v1102_v55 }
 0x437   : > { %v1107_v58 = vsel %vm962_vm2, %v1103_v57, 0.0  ;;  %v1104_v59 = vpack.c.bf16 %v1103_v57, %v1103_v57 }
 0x438   : > { %1108 = vadd.xlane.f32.xlu1 %v1107_v58 }
 0x439   : > { %2911 = vst.msk [vmem:[%s4394_s25 + $0x6] sm:$0x3] %vm984_vm3, %v1104_v59 }
 0x4bd   : > { %v988_v61 = vpop.xlane.xlu0 %987 }
 0x4be   : > { %3472 = vrcp.f32 %v988_v61 }
 0x4c5   : > { %v1109_v62 = vpop.xlane.xlu1 %1108 }
 0x4c6   : > { %3474 = vrcp.f32 %v1109_v62 }
 0x4c8   : > { %v3473_v63 = vpop.eup %3472 }
 0x4c9   : > { %v990_v0 = vmul.f32 %v3473_v63, %v982_v51 }
 0x4cb   : > { %v991_v1 = vpack.c.bf16 %v990_v0, %v990_v0 }
 0x4cd   : > { %3111 = vmatmul.mubr.msk.bf16.vlgmr.msra.gmra.mrb[8].mxu0 %vm992_vm4, %v991_v1 }
 0x4ce   : > { %3121 = vmatpush3.bf16.msra.mxu0 %v4383_v60  ;;  %3122 = vmatprep.mubr.msk.bf16.mxu0 %vm3913_vm1, %v3912_v36 }
 0x4cf   : > { %3134 = vmatprep.subr.bf16.mxu0 %v3912_v36 }
 0x4d0   : > { %v3475_v2 = vpop.eup %3474 }
 0x4d1   : > { %v1111_v3 = vmul.f32 %v3475_v2, %v1103_v57 }
 0x4d3   : > { %v1112_v5 = vpack.c.bf16 %v1111_v3, %v1111_v3 }
 0x4d5   : > { %3123 = vmatmul.mubr.msk.bf16.vlgmr.msra.gmra.mrb[12].mxu0 %vm992_vm4, %v1112_v5  ;;  %v2922_v5 = vld [vmem:[#allocation7 + $0x4] ss:$0 sm:$0xff] }
 0x4d6   : > { %3135 = vmatpush3.bf16.msra.mxu0 %v4406_v4  ;;  %3138 = vmatprep.mubr.msk.bf16.mxu0 %vm3913_vm1, %v3912_v36 }
 0x4d7   : > { %3136 = vmatprep.subr.bf16.mxu0 %v3912_v36 }
 0x4da   : > { %3137 = vmatpush3.bf16.msra.mxu0 %v4410_v6 }
 0x4db   : > { %3150 = vmatprep.subr.bf16.mxu0 %v3912_v36 }
 0x4dd   : > { %3139 = vmatmul.mubr.msk.bf16.vlgmr.msra.gmra.mrb[16].mxu0 %vm553_vm0, %v1221_v8  ;;  %v4455_v8 = vld [vmem:[#allocation13] sm:$0xff]  }
 0x4de   : > { %3158 = vmatprep.mubr.msk.bf16.mxu0 %vm3913_vm1, %v3912_v36 }
 0x5a0   : > { %v1030_v12 = vpop.f32.mrb[8].mxu0 }
 0x5a1   : > { %v3112_v14 = vpop.f32.mrb[9].mxu0 }
 0x5a2   : > { %v1033_v15 = vpop.f32.mrb[10].mxu0 }
 0x5a3   : > { %v3113_v16 = vpop.f32.mrb[11].mxu0 }
 0x5a8   : > { %v1150_v19 = vpop.f32.mrb[12].mxu0 }
 0x5a9   : > { %v1157_v20 = vrot.slane %v1150_v19, 4  ;;  %v3124_v21 = vpop.f32.mrb[13].mxu0  ;;  %v4463_v19 = vld [vmem:[#allocation14] sm:$0xff]  }
 0x5aa   : > { %v1153_v22 = vpop.f32.mrb[14].mxu0  ;;  %3151 = vmatpush3.bf16.msra.mxu0 %v4463_v19 }
 0x5ab   : > { %v1160_v23 = vsel %vm1159_vm5, %v1030_v12, %v1157_v20  ;;  %v3125_v24 = vpop.f32.mrb[15].mxu0  ;;  %v4458_v12 = vld [vmem:[#allocation13 + $0x8] sm:$0xff]   ;;  %v4466_v20 = vld [vmem:[#allocation14 + $0x8] sm:$0xff]   ;;  %3152 = vmatprep.subr.bf16.mxu0 %v3912_v36 }
 0x5ac   : > { %v1161_v25 = vpack.c.bf16 %v1160_v23, %v1160_v23 }
 0x5ae   : > { %3131 = vmatmul.mubr.msk.bf16.vlgmr.msra.gmra.mrb[20].mxu1 %vm553_vm0, %v1161_v25  ;;  %3153 = vmatpush3.bf16.msra.mxu0 %v4466_v20  ;;  %v4474_v25 = vld [vmem:[#allocation14 + $0x10] sm:$0xff]  }
 0x5af   : > { %3146 = vmatprep.mubr.msk.bf16.mxu1 %vm3913_vm1, %v3912_v36  ;;  %3143 = vmatpush3.bf16.msra.mxu1 %v4455_v8 }
 0x5b0   : > { %v1275_v27 = vpop.f32.mrb[16].mxu0  ;;  %3144 = vmatprep.subr.bf16.mxu1 %v3912_v36  ;;  %3154 = vmatprep.subr.bf16.mxu0 %v3912_v36 }
 0x5b1   : > { %v1276_v28 = vadd.f32 %v4432_v26, %v1275_v27  ;;  %v3140_v29 = vpop.f32.mrb[17].mxu0 }
 0x5b2   : > { %v1278_v30 = vpop.f32.mrb[18].mxu0  ;;  %3155 = vmatpush3.bf16.msra.mxu0 %v4474_v25 }
 0x5b3   : > { %v3141_v31 = vpop.f32.mrb[19].mxu0  ;;  %1289 = vrot.lane.b32.xlu0 %v1276_v28, %s4872_s21  ;;  %3145 = vmatpush3.bf16.msra.mxu1 %v4458_v12 }
 0x5b4   : > { %3162 = vmatprep.subr.bf16.mxu1 %v3912_v36  ;;  %3156 = vmatprep.subr.bf16.mxu0 %v3912_v36  ;;  %v4489_v31 = vld [vmem:[#allocation14 + $0x18] sm:$0xff]  }
 0x5b6   : > { %3157 = vmatpush3.bf16.msra.mxu0 %v4489_v31 }
 0x5b7   : > { %3176 = vmatprep.subr.bf16.mxu0 %v3912_v36 }
 0x625   : > { %v1290_v45 = vpop.permute.xlu0 %1289 }
 0x681   : > { %v1215_v33 = vpop.f32.mrb[20].mxu1 }
 0x682   : > { %v1216_v34 = vadd.f32 %v4438_v32, %v1215_v33  ;;  %v3132_v37 = vpop.f32.mrb[21].mxu1  ;;  %v4493_v33 = vld [vmem:[#allocation7 + $0xb] ss:$0 sm:$0xff] }
 0x683   : > { %v1218_v38 = vpop.f32.mrb[22].mxu1 }
 0x684   : > { %v1281_v39 = vadd.f32 %v1276_v28, %v1216_v34  ;;  %v3133_v40 = vpop.f32.mrb[23].mxu1 }
 0x686   : > { %v2921_v41 = vmul.f32 -1.442695, %v1281_v39 }
 0x688   : > { %3476 = vpow2.f32 %v2921_v41 }
 0x692   : > { %v3477_v43 = vpop.eup %3476 }
 0x693   : > { %v1285_v44 = vadd.f32 1.0, %v3477_v43  ;;  %v2933_v43 = vld [vmem:[#allocation7 + $0xc] ss:$0 sm:$0xff] }
 0x695   : > { %3478 = vrcp.f32 %v1285_v44 }
 0x69f   : > { %v3479_v46 = vpop.eup %3478 }
 0x6a0   : > { %v1292_v48 = vmul.f32 %v3479_v46, %v1290_v45  ;;  %v1299_v53 = vsub.f32 1.0, %v3479_v46 }
 0x6a2   : > { %1294 = vrot.lane.b32.xlu1 %v1292_v48, %s4872_s21 }
 0x714   : > { %v1295_v49 = vpop.permute.xlu1 %1294 }
 0x715   : > { %v1297_v50 = vadd.f32 %v1295_v49, %v1216_v34 }
 0x717   : > { %3480 = vtanh.f32 %v1297_v50 }
 0x721   : > { %v3481_v51 = vpop.eup %3480 }
 0x722   : > { %1301 = vrot.lane.b32.xlu1 %v3481_v51, %s4870_s1 }
 0x726   : > { %1306 = vrot.lane.b32.xlu1 %v4294_v7, %s4871_s30  ;;  %v2923_v7 = vld [vmem:[#allocation7 + $0x5] ss:$0 sm:$0xff] }
 0x794   : > { %v1302_v52 = vpop.permute.xlu1 %1301 }
 0x795   : > { %v1304_v55 = vmul.f32 %v1302_v52, %v1299_v53 }
 0x798   : > { %v1307_v54 = vpop.permute.xlu1 %1306 }
 0x799   : > { %v1309_v57 = vmul.f32 %v3479_v46, %v1307_v54 }
 0x79b   : > { %v4445_v58 = vadd.f32 %v1309_v57, %v1304_v55 }
 0x79d   : > { %1312 = vrot.lane.b32.xlu0 %v4445_v58, %s4870_s1 }
 0x80f   : > { %v1313_v59 = vpop.permute.xlu0 %1312 }
 0x810   : > { %v1315_v61 = vsel %vm553_vm0, %v1313_v59, 0.0 }
 0x811   : > { %1316 = vadd.xlane.f32.xlu1 %v1315_v61 }
 0x822   : > { %1346 = vrot.lane.b32.xlu1 %v2923_v7, %s4871_s30 }
 0x89e   : > { %v1317_v62 = vpop.xlane.xlu1 %1316 }
 0x89f   : > { %v1318_v63 = vmul.f32 0.03125, %v1317_v62 }
 0x8a1   : > { %v1319_v0 = vsub.f32 %v4445_v58, %v1318_v63 }
 0x8a2   : > { %v4471_v24 = vpop.permute.xlu1 %1346 }
 0x8a3   : > { %v1320_v1 = vmul.f32 %v1319_v0, %v1319_v0 }
 0x8a5   : > { %1322 = vrot.lane.b32.xlu0 %v1320_v1, %s4870_s1 }
 0x917   : > { %v1323_v2 = vpop.permute.xlu0 %1322 }
 0x918   : > { %v1325_v3 = vsel %vm553_vm0, %v1323_v2, 0.0 }
 0x919   : > { %1326 = vadd.xlane.f32.xlu0 %v1325_v3 }
 0x92f   : > { %1337 = vrot.lane.b32.xlu0 %v2922_v5, %s4871_s30 }
 0x933   : > { %1493 = vrot.lane.b32.xlu0 %v2933_v43, %s4871_s30 }
 0x9a6   : > { %v1327_v14 = vpop.xlane.xlu0 %1326 }
 0x9a7   : > { %v1328_v15 = vmul.f32 0.03125, %v1327_v14 }
 0x9a9   : > { %v1329_v16 = vadd.f32 1e-05, %v1328_v15 }
 0x9aa   : > { %v4469_v22 = vpop.permute.xlu0 %1337 }
 0x9ab   : > { %3482 = vrsqrt.f32 %v1329_v16 }
 0x9ae   : > { %v4503_v50 = vpop.permute.xlu0 %1493 }
 0x9b5   : > { %v3483_v21 = vpop.eup %3482 }
 0x9b6   : > { %v1331_v23 = vmul.f32 %v3483_v21, %v1319_v0 }
 0x9b8   : > { %v1340_v27 = vmul.f32 %v4469_v22, %v1331_v23 }
 0x9ba   : > { %v1349_v28 = vadd.f32 %v4471_v24, %v1340_v27 }
 0x9bc   : > { %v1350_v29 = vpack.c.bf16 %v1349_v28, %v1349_v28 }
 0x9be   : > { %1356 = vrot.lane.b32.xlu1 %v1350_v29, %s4870_s1 }
 0xa30   : > { %v1357_v30 = vpop.permute.xlu1 %1356 }
 0xa31   : > { %3147 = vmatmul.mubr.msk.bf16.vlgmr.msra.gmra.mrb[24].mxu1 %vm553_vm0, %v1357_v30 }
 0xa32   : > { %3163 = vmatpush3.bf16.msra.mxu1 %v4333_v13  ;;  %3166 = vmatprep.mubr.msk.bf16.mxu1 %vm3913_vm1, %v3912_v36 }
 0xa33   : > { %3164 = vmatprep.subr.bf16.mxu1 %v3912_v36 }
 0xa36   : > { %3165 = vmatpush3.bf16.msra.mxu1 %v4343_v18 }
 0xa37   : > { %3170 = vmatprep.subr.bf16.mxu1 %v3912_v36 }
 0xb04   : > { %v1407_v34 = vpop.f32.mrb[24].mxu1 }
 0xb05   : > { %v1408_v13 = vadd.f32 %v4493_v33, %v1407_v34  ;;  %v3148_v37 = vpop.f32.mrb[25].mxu1 }
 0xb06   : > { %v1410_v38 = vpop.f32.mrb[26].mxu1 }
 0xb07   : > { %v1413_v39 = vmax.f32 %v1408_v13, 0.0  ;;  %v3149_v40 = vpop.f32.mrb[27].mxu1 }
 0xb09   : > { %v1414_v41 = vpack.c.bf16 %v1413_v39, %v1413_v39 }
 0xb0b   : > { %3159 = vmatmul.mubr.msk.bf16.vlgmr.msra.gmra.mrb[20].mxu0 %vm1439_vm6, %v1414_v41 }
 0xb0c   : > { %3177 = vmatpush3.bf16.msra.mxu0 %v4370_v47  ;;  %3178 = vmatprep.mubr.msk.bf16.mxu0 %vm3913_vm1, %v3912_v36 }
 0xb0d   : > { %3188 = vmatprep.subr.bf16.mxu0 %v3912_v36 }
 0xbde   : > { %v1477_v44 = vpop.f32.mrb[20].mxu0 }
 0xbdf   : > { %1484 = vrot.lane.b32.xlu1 %v1477_v44, %s4871_s30  ;;  %v3160_v45 = vpop.f32.mrb[21].mxu0 }
 0xbe0   : > { %v1480_v46 = vpop.f32.mrb[22].mxu0 }
 0xbe1   : > { %v3161_v48 = vpop.f32.mrb[23].mxu0 }
 0xc51   : > { %v1485_v49 = vpop.permute.xlu1 %1484 }
 0xc52   : > { %v1487_v51 = vadd.f32 %v1485_v49, %v4445_v58 }
 0xc54   : > { %v4507_v52 = vadd.f32 %v4503_v50, %v1487_v51 }
 0xc56   : > { %1498 = vrot.lane.b32.xlu1 %v4507_v52, %s4870_s1 }
 0xcc8   : > { %v1499_v53 = vpop.permute.xlu1 %1498 }
 0xcc9   : > { %v1501_v54 = vsel %vm553_vm0, %v1499_v53, 0.0 }
 0xcca   : > { %1502 = vadd.xlane.f32.xlu0 %v1501_v54 }
 0xce0   : > { %1519 = vrot.lane.b32.xlu0 %v4330_v10, %s4871_s30 }
 0xd57   : > { %v1503_v55 = vpop.xlane.xlu0 %1502 }
 0xd58   : > { %v1504_v57 = vmul.f32 0.03125, %v1503_v55 }
 0xd5a   : > { %v1505_v59 = vsub.f32 %v4507_v52, %v1504_v57 }
 0xd5b   : > { %v4519_v10 = vpop.permute.xlu0 %1519 }
 0xd5c   : > { %v1506_v61 = vmul.f32 %v1505_v59, %v1505_v59 }
 0xd5e   : > { %1508 = vrot.lane.b32.xlu1 %v1506_v61, %s4870_s1 }
 0xdd0   : > { %v1509_v58 = vpop.permute.xlu1 %1508 }
 0xdd1   : > { %v1511_v62 = vsel %vm553_vm0, %v1509_v58, 0.0 }
 0xdd2   : > { %1512 = vadd.xlane.f32.xlu1 %v1511_v62 }
 0xde3   : > { %1524 = vrot.lane.b32.xlu1 %v4339_v17, %s4871_s30 }
 0xe5f   : > { %v1513_v63 = vpop.xlane.xlu1 %1512 }
 0xe60   : > { %v1514_v0 = vmul.f32 0.03125, %v1513_v63 }
 0xe62   : > { %v1515_v1 = vadd.f32 1e-05, %v1514_v0 }
 0xe63   : > { %v4521_v3 = vpop.permute.xlu1 %1524 }
 0xe64   : > { %3484 = vrsqrt.f32 %v1515_v1 }
 0xe6e   : > { %v3485_v7 = vpop.eup %3484 }
 0xe6f   : > { %v1517_v2 = vmul.f32 %v3485_v7, %v1505_v59 }
 0xe71   : > { %v1522_v5 = vmul.f32 %v4519_v10, %v1517_v2 }
 0xe73   : > { %v1527_v14 = vadd.f32 %v4521_v3, %v1522_v5 }
 0xe75   : > { %v1528_v15 = vpack.c.bf16 %v1527_v14, %v1527_v14 }
 0xe77   : > { %1530 = vrot.lane.b32.xlu0 %v1528_v15, %s4870_s1 }
 0xee9   : > { %v1531_v16 = vpop.permute.xlu0 %1530 }
 0xeea   : > { %3167 = vmatmul.mubr.msk.bf16.vlgmr.msra.gmra.mrb[28].mxu1 %vm553_vm0, %v1531_v16 }
 0xeeb   : > { %3171 = vmatpush3.bf16.xpose.msra.mxu1 %v4364_v35  ;;  %3172 = vmatprep.mubr.msk.bf16.mxu1 %vm3913_vm1, %v3912_v36 }
 0xeec   : > { %3182 = vmatprep.subr.bf16.mxu1 %v3912_v36 }
 0xfbd   : > { %v1569_v17 = vpop.f32.mrb[28].mxu1 }
 0xfbe   : > { %v1570_v21 = vadd.f32 %v4368_v42, %v1569_v17  ;;  %v3168_v23 = vpop.f32.mrb[29].mxu1 }
 0xfbf   : > { %v1572_v27 = vpop.f32.mrb[30].mxu1 }
 0xfc0   : > { %v1575_v28 = vpack.c.bf16 %v1570_v21, %v1570_v21  ;;  %v3169_v29 = vpop.f32.mrb[31].mxu1 }
 0xfc2   : > { %3173 = vmatmul.mubr.msk.bf16.vlgmr.msra.gmra.mrb[32].mxu1 %vm553_vm0, %v1575_v28  ;;  %v1692_v30 = vrot.slane %v1575_v28, 2 }
 0xfc3   : > { %3183 = vmatpush3.bf16.xpose.msra.mxu1 %v4377_v56  ;;  %3184 = vmatprep.mubr.msk.bf16.mxu1 %vm3913_vm1, %v3912_v36 }
 0xfc4   : > { %3194 = vmatprep.subr.bf16.mxu1 %v3912_v36 }
 0xfca   : > { %3185 = vmatmul.mubr.msk.bf16.vlgmr.msra.gmra.mrb[36].mxu1 %vm553_vm0, %v1692_v30 }
 0xfcb   : > { %3195 = vmatpush3.bf16.msra.mxu1 %v4422_v9  ;;  %3198 = vmatprep.mubr.msk.bf16.mxu1 %vm3913_vm1, %v3912_v36 }
 0xfcc   : > { %3196 = vmatprep.subr.bf16.mxu1 %v3912_v36 }
 0xfcf   : > { %3197 = vmatpush3.bf16.msra.mxu1 %v4426_v11 }
 0xfd0   : > { %3210 = vmatprep.subr.bf16.mxu1 %v3912_v36 }
0x1095   : > { %v1613_v42 = vpop.f32.mrb[32].mxu1 }
0x1096   : > { %v1619_v34 = vsel %vm962_vm2, %v1613_v42, -inf  ;;  %v3174_v13 = vpop.f32.mrb[33].mxu1 }
0x1097   : > { %v1620_v37 = vrot.slane %v1619_v34, 4  ;;  %v1616_v38 = vpop.f32.mrb[34].mxu1 }
0x1098   : > { %v3175_v39 = vpop.f32.mrb[35].mxu1 }
0x1099   : > { %v1621_v40 = vmax.f32 %v1619_v34, %v1620_v37 }
0x109b   : > { %v1622_v41 = vrot.slane %v1621_v40, 2 }
0x109d   : > { %v1623_v43 = vmax.f32 %v1621_v40, %v1622_v41  ;;  %v1730_v44 = vpop.f32.mrb[36].mxu1 }
0x109e   : > { %v1736_v45 = vsel %vm962_vm2, %v1730_v44, -inf  ;;  %v3186_v46 = vpop.f32.mrb[37].mxu1 }
0x109f   : > { %v1624_v48 = vrot.slane %v1623_v43, 1  ;;  %v1737_v49 = vrot.slane %v1736_v45, 4  ;;  %v1733_v51 = vpop.f32.mrb[38].mxu1 }
0x10a0   : > { %v3187_v53 = vpop.f32.mrb[39].mxu1 }
0x10a1   : > { %v1625_v54 = vmax.f32 %v1623_v43, %v1624_v48  ;;  %v1738_v55 = vmax.f32 %v1736_v45, %v1737_v49  ;;  %v1856_v49 = vpack.c.bf16 %v4507_v52, %v4507_v52 }
0x10a3   : > { %v1626_v57 = vsub.f32 %v1613_v42, %v1625_v54  ;;  %v1739_v59 = vrot.slane %v1738_v55, 2 }
0x10a5   : > { %v1627_v61 = vmul.f32 1.442695, %v1626_v57  ;;  %v1740_v58 = vmax.f32 %v1738_v55, %v1739_v59 }
0x10a7   : > { %3486 = vpow2.f32 %v1627_v61  ;;  %v1741_v62 = vrot.slane %v1740_v58, 1 }
0x10a9   : > { %v1742_v63 = vmax.f32 %v1740_v58, %v1741_v62 }
0x10ab   : > { %v1743_v0 = vsub.f32 %v1730_v44, %v1742_v63 }
0x10ad   : > { %v1744_v1 = vmul.f32 1.442695, %v1743_v0 }
0x10af   : > { %3488 = vpow2.f32 %v1744_v1 }
0x10b1   : > { %v3487_v7 = vpop.eup %3486 }
0x10b2   : > { %v1629_v2 = vsel %vm962_vm2, %v3487_v7, 0.0 }
0x10b3   : > { %v1630_v5 = vrot.slane %v1629_v2, 4 }
0x10b5   : > { %v1631_v14 = vadd.f32 %v1630_v5, %v1629_v2 }
0x10b7   : > { %v1632_v15 = vrot.slane %v1631_v14, 2 }
0x10b9   : > { %v3489_v16 = vpop.eup %3488  ;;  %v1633_v17 = vadd.f32 %v1632_v15, %v1631_v14 }
0x10ba   : > { %v1746_v21 = vsel %vm962_vm2, %v3489_v16, 0.0 }
0x10bb   : > { %v1634_v23 = vrot.slane %v1633_v17, 1  ;;  %v1747_v27 = vrot.slane %v1746_v21, 4 }
0x10bd   : > { %v1748_v28 = vadd.f32 %v1747_v27, %v1746_v21  ;;  %v1635_v29 = vadd.f32 %v1634_v23, %v1633_v17 }
0x10bf   : > { %v1749_v30 = vrot.slane %v1748_v28, 2  ;;  %3490 = vrcp.f32 %v1635_v29 }
0x10c1   : > { %v1750_v42 = vadd.f32 %v1749_v30, %v1748_v28 }
0x10c3   : > { %v1751_v34 = vrot.slane %v1750_v42, 1 }
0x10c5   : > { %v1752_v13 = vadd.f32 %v1751_v34, %v1750_v42 }
0x10c7   : > { %3492 = vrcp.f32 %v1752_v13 }
0x10c9   : > { %v3491_v37 = vpop.eup %3490 }
0x10ca   : > { %v1637_v38 = vmul.f32 %v3491_v37, %v3487_v7 }
0x10cc   : > { %v1638_v39 = vadd.f32 1e-08, %v1637_v38 }
0x10ce   : > { %v1642_v40 = vsel %vm962_vm2, %v1638_v39, 0.0  ;;  %v1639_v41 = vpack.c.bf16 %v1638_v39, %v1638_v39 }
0x10cf   : > { %1643 = vadd.xlane.f32.xlu0 %v1642_v40 }
0x10d0   : > { %2936 = vst.msk [vmem:[%s4394_s25 + $0x2] sm:$0x3] %vm984_vm3, %v1639_v41 }
0x10d1   : > { %v3493_v43 = vpop.eup %3492 }
0x10d2   : > { %v1754_v44 = vmul.f32 %v3493_v43, %v3489_v16 }
0x10d4   : > { %v1755_v45 = vadd.f32 1e-08, %v1754_v44 }
0x10d6   : > { %v1759_v46 = vsel %vm962_vm2, %v1755_v45, 0.0  ;;  %v1756_v48 = vpack.c.bf16 %v1755_v45, %v1755_v45 }
0x10d7   : > { %1760 = vadd.xlane.f32.xlu1 %v1759_v46 }
0x10d8   : > { %2939 = vst.msk [vmem:[%s4394_s25 + $0x8] sm:$0x3] %vm984_vm3, %v1756_v48 }
0x10e5   : > { %1858 = vrot.lane.b32.xlu0 %v1856_v49, %s4870_s1 }
0x115c   : > { %v1644_v51 = vpop.xlane.xlu0 %1643 }
0x115d   : > { %3494 = vrcp.f32 %v1644_v51 }
0x1160   : > { %v1859_v62 = vpop.permute.xlu0 %1858 }
0x1164   : > { %v1761_v53 = vpop.xlane.xlu1 %1760 }
0x1165   : > { %3496 = vrcp.f32 %v1761_v53 }
0x1167   : > { %v3495_v54 = vpop.eup %3494 }
0x1168   : > { %v1646_v55 = vmul.f32 %v3495_v54, %v1638_v39 }
0x116a   : > { %v1647_v57 = vpack.c.bf16 %v1646_v55, %v1646_v55 }
0x116c   : > { %3179 = vmatmul.mubr.msk.bf16.vlgmr.msra.gmra.mrb[24].mxu0 %vm992_vm4, %v1647_v57 }
0x116d   : > { %3189 = vmatpush3.bf16.msra.mxu0 %v4383_v60  ;;  %3190 = vmatprep.mubr.msk.bf16.mxu0 %vm3913_vm1, %v3912_v36 }
0x116e   : > { %3202 = vmatprep.subr.bf16.mxu0 %v3912_v36 }
0x116f   : > { %v3497_v59 = vpop.eup %3496 }
0x1170   : > { %v1763_v61 = vmul.f32 %v3497_v59, %v1755_v45 }
0x1172   : > { %v1764_v58 = vpack.c.bf16 %v1763_v61, %v1763_v61 }
0x1174   : > { %3191 = vmatmul.mubr.msk.bf16.vlgmr.msra.gmra.mrb[28].mxu0 %vm992_vm4, %v1764_v58 }
0x1175   : > { %3203 = vmatpush3.bf16.msra.mxu0 %v4406_v4  ;;  %3206 = vmatprep.mubr.msk.bf16.mxu0 %vm3913_vm1, %v3912_v36 }
0x1176   : > { %3204 = vmatprep.subr.bf16.mxu0 %v3912_v36 }
0x1179   : > { %3205 = vmatpush3.bf16.msra.mxu0 %v4410_v6 }
0x117a   : > { %3218 = vmatprep.subr.bf16.mxu0 %v3912_v36 }
0x117c   : > { %3207 = vmatmul.mubr.msk.bf16.vlgmr.msra.gmra.mrb[32].mxu0 %vm553_vm0, %v1859_v62 }
0x117d   : > { %3219 = vmatpush3.bf16.msra.mxu0 %v4463_v19  ;;  %3226 = vmatprep.mubr.msk.bf16.mxu0 %vm3913_vm1, %v3912_v36 }
0x117e   : > { %3220 = vmatprep.subr.bf16.mxu0 %v3912_v36 }
0x1181   : > { %3221 = vmatpush3.bf16.msra.mxu0 %v4466_v20 }
0x1182   : > { %3222 = vmatprep.subr.bf16.mxu0 %v3912_v36 }
0x1185   : > { %3223 = vmatpush3.bf16.msra.mxu0 %v4474_v25 }
0x1186   : > { %3224 = vmatprep.subr.bf16.mxu0 %v3912_v36 }
0x1189   : > { %3225 = vmatpush3.bf16.msra.mxu0 %v4489_v31 }
0x118a   : > { %3244 = vmatprep.subr.bf16.mxu0 %v3912_v36 }
0x123f   : > { %v1685_v63 = vpop.f32.mrb[24].mxu0 }
0x1240   : > { %v3180_v0 = vpop.f32.mrb[25].mxu0 }
0x1241   : > { %v1688_v1 = vpop.f32.mrb[26].mxu0 }
0x1242   : > { %v3181_v7 = vpop.f32.mrb[27].mxu0 }
0x1247   : > { %v1802_v2 = vpop.f32.mrb[28].mxu0 }
0x1248   : > { %v1809_v5 = vrot.slane %v1802_v2, 4  ;;  %v3192_v14 = vpop.f32.mrb[29].mxu0 }
0x1249   : > { %v1805_v15 = vpop.f32.mrb[30].mxu0 }
0x124a   : > { %v1811_v16 = vsel %vm1159_vm5, %v1685_v63, %v1809_v5  ;;  %v3193_v17 = vpop.f32.mrb[31].mxu0 }
0x124b   : > { %v1812_v21 = vpack.c.bf16 %v1811_v16, %v1811_v16 }
0x124d   : > { %3199 = vmatmul.mubr.msk.bf16.vlgmr.msra.gmra.mrb[40].mxu1 %vm553_vm0, %v1812_v21 }
0x124e   : > { %3211 = vmatpush3.bf16.msra.mxu1 %v4455_v8  ;;  %3214 = vmatprep.mubr.msk.bf16.mxu1 %vm3913_vm1, %v3912_v36 }
0x124f   : > { %v1897_v23 = vpop.f32.mrb[32].mxu0  ;;  %3212 = vmatprep.subr.bf16.mxu1 %v3912_v36 }
0x1250   : > { %v1898_v27 = vadd.f32 %v4432_v26, %v1897_v23  ;;  %v3208_v28 = vpop.f32.mrb[33].mxu0 }
0x1251   : > { %v1900_v29 = vpop.f32.mrb[34].mxu0  ;;  %v3528_v28 = vld [vmem:[#allocation10] sm:$0xff]  }
0x1252   : > { %1911 = vrot.lane.b32.xlu1 %v1898_v27, %s4872_s21  ;;  %v3209_v30 = vpop.f32.mrb[35].mxu0  ;;  %3213 = vmatpush3.bf16.msra.mxu1 %v4458_v12 }
0x1253   : > { %3230 = vmatprep.subr.bf16.mxu1 %v3912_v36 }
0x12c4   : > { %v1912_v45 = vpop.permute.xlu1 %1911 }
0x1320   : > { %v1850_v42 = vpop.f32.mrb[40].mxu1 }
0x1321   : > { %v1851_v34 = vadd.f32 %v4438_v32, %v1850_v42  ;;  %v3200_v13 = vpop.f32.mrb[41].mxu1 }
0x1322   : > { %v1853_v37 = vpop.f32.mrb[42].mxu1 }
0x1323   : > { %v1903_v38 = vadd.f32 %v1898_v27, %v1851_v34  ;;  %v3201_v39 = vpop.f32.mrb[43].mxu1 }
0x1325   : > { %v2943_v40 = vmul.f32 -1.442695, %v1903_v38 }
0x1327   : > { %3498 = vpow2.f32 %v2943_v40 }
0x1331   : > { %v3499_v41 = vpop.eup %3498 }
0x1332   : > { %v1907_v43 = vadd.f32 1.0, %v3499_v41 }
0x1334   : > { %3500 = vrcp.f32 %v1907_v43 }
0x133e   : > { %v3501_v44 = vpop.eup %3500 }
0x133f   : > { %v1914_v46 = vmul.f32 %v3501_v44, %v1912_v45  ;;  %v1921_v53 = vsub.f32 1.0, %v3501_v44  ;;  %v1927_v55 = vmul.f32 %v3501_v44, %v4507_v52 }
0x1341   : > { %1916 = vrot.lane.b32.xlu0 %v1914_v46, %s4872_s21 }
0x13b3   : > { %v1917_v48 = vpop.permute.xlu0 %1916 }
0x13b4   : > { %v1919_v49 = vadd.f32 %v1917_v48, %v1851_v34 }
0x13b6   : > { %3502 = vtanh.f32 %v1919_v49 }
0x13c0   : > { %v3503_v51 = vpop.eup %3502 }
0x13c1   : > { %1923 = vrot.lane.b32.xlu1 %v3503_v51, %s4870_s1 }
0x1433   : > { %v1924_v54 = vpop.permute.xlu1 %1923 }
0x1434   : > { %v1926_v57 = vmul.f32 %v1924_v54, %v1921_v53 }
0x1436   : > { %v1928_v59 = vadd.f32 %v1927_v55, %v1926_v57 }
0x1438   : > { %1930 = vrot.lane.b32.xlu0 %v1928_v59, %s4870_s1 }
0x14aa   : > { %v1931_v61 = vpop.permute.xlu0 %1930 }
0x14ab   : > { %v1933_v58 = vsel %vm553_vm0, %v1931_v61, 0.0 }
0x14ac   : > { %1934 = vadd.xlane.f32.xlu1 %v1933_v58 }
0x1539   : > { %v1935_v62 = vpop.xlane.xlu1 %1934 }
0x153a   : > { %v1936_v63 = vmul.f32 0.03125, %v1935_v62 }
0x153c   : > { %v1937_v0 = vsub.f32 %v1928_v59, %v1936_v63 }
0x153e   : > { %v1938_v1 = vmul.f32 %v1937_v0, %v1937_v0 }
0x1540   : > { %1940 = vrot.lane.b32.xlu0 %v1938_v1, %s4870_s1 }
0x15b2   : > { %v1941_v7 = vpop.permute.xlu0 %1940 }
0x15b3   : > { %v1943_v2 = vsel %vm553_vm0, %v1941_v7, 0.0 }
0x15b4   : > { %1944 = vadd.xlane.f32.xlu0 %v1943_v2 }
0x1641   : > { %v1945_v5 = vpop.xlane.xlu0 %1944 }
0x1642   : > { %v1946_v52 = vmul.f32 0.03125, %v1945_v5  ;;  %v3529_v5 = vld [vmem:[#allocation7 + $0x8] ss:$0 sm:$0xff] }
0x1644   : > { %v1947_v14 = vadd.f32 1e-05, %v1946_v52 }
0x1646   : > { %3504 = vrsqrt.f32 %v1947_v14 }
0x1650   : > { %v3505_v15 = vpop.eup %3504 }
0x1651   : > { %v1949_v16 = vmul.f32 %v3505_v15, %v1937_v0 }
0x1653   : > { %v1950_v17 = vmul.f32 %v1949_v16, %v4469_v22 }
0x1655   : > { %v1951_v21 = vadd.f32 %v1950_v17, %v4471_v24 }
0x1657   : > { %v1952_v23 = vpack.c.bf16 %v1951_v21, %v1951_v21 }
0x1659   : > { %1954 = vrot.lane.b32.xlu0 %v1952_v23, %s4870_s1 }
0x16cb   : > { %v1955_v27 = vpop.permute.xlu0 %1954 }
0x16cc   : > { %3215 = vmatmul.mubr.msk.bf16.vlgmr.msra.gmra.mrb[44].mxu1 %vm553_vm0, %v1955_v27 }
0x16cd   : > { %3231 = vmatpush3.bf16.msra.mxu1 %v3528_v28  ;;  %3234 = vmatprep.mubr.msk.bf16.mxu1 %vm3913_vm1, %v3912_v36 }
0x16ce   : > { %3232 = vmatprep.subr.bf16.mxu1 %v3912_v36 }
0x16d1   : > { %3233 = vmatpush3.bf16.msra.mxu1 %v4343_v18 }
0x16d2   : > { %3238 = vmatprep.subr.bf16.mxu1 %v3912_v36 }
0x179f   : > { %v1993_v29 = vpop.f32.mrb[44].mxu1 }
0x17a0   : > { %v1994_v30 = vadd.f32 %v4493_v33, %v1993_v29  ;;  %v3216_v42 = vpop.f32.mrb[45].mxu1 }
0x17a1   : > { %v1996_v34 = vpop.f32.mrb[46].mxu1 }
0x17a2   : > { %v1999_v13 = vmax.f32 %v1994_v30, 0.0  ;;  %v3217_v37 = vpop.f32.mrb[47].mxu1 }
0x17a4   : > { %v2000_v38 = vpack.c.bf16 %v1999_v13, %v1999_v13 }
0x17a6   : > { %3227 = vmatmul.mubr.msk.bf16.vlgmr.msra.gmra.mrb[36].mxu0 %vm1439_vm6, %v2000_v38 }
0x17a7   : > { %3245 = vmatpush3.bf16.msra.mxu0 %v4370_v47  ;;  %3246 = vmatprep.mubr.msk.bf16.mxu0 %vm3913_vm1, %v3912_v36 }
0x17a8   : > { %3256 = vmatprep.subr.bf16.mxu0 %v3912_v36 }
0x1879   : > { %v2038_v18 = vpop.f32.mrb[36].mxu0 }
0x187a   : > { %2045 = vrot.lane.b32.xlu1 %v2038_v18, %s4871_s30  ;;  %v3228_v39 = vpop.f32.mrb[37].mxu0 }
0x187b   : > { %v2041_v40 = vpop.f32.mrb[38].mxu0 }
0x187c   : > { %v3229_v41 = vpop.f32.mrb[39].mxu0 }
0x18ec   : > { %v2046_v43 = vpop.permute.xlu1 %2045 }
0x18ed   : > { %v2048_v44 = vadd.f32 %v2046_v43, %v1928_v59 }
0x18ef   : > { %v4615_v45 = vadd.f32 %v2048_v44, %v4503_v50 }
0x18f1   : > { %2051 = vrot.lane.b32.xlu1 %v4615_v45, %s4870_s1 }
0x1963   : > { %v2052_v47 = vpop.permute.xlu1 %2051 }
0x1964   : > { %v2054_v46 = vsel %vm553_vm0, %v2052_v47, 0.0 }
0x1965   : > { %2055 = vadd.xlane.f32.xlu1 %v2054_v46 }
0x19f2   : > { %v2056_v48 = vpop.xlane.xlu1 %2055 }
0x19f3   : > { %v2057_v49 = vmul.f32 0.03125, %v2056_v48 }
0x19f5   : > { %v2058_v51 = vsub.f32 %v4615_v45, %v2057_v49 }
0x19f7   : > { %v2059_v53 = vmul.f32 %v2058_v51, %v2058_v51 }
0x19f9   : > { %2061 = vrot.lane.b32.xlu0 %v2059_v53, %s4870_s1 }
0x1a6b   : > { %v2062_v54 = vpop.permute.xlu0 %2061 }
0x1a6c   : > { %v2064_v55 = vsel %vm553_vm0, %v2062_v54, 0.0 }
0x1a6d   : > { %2065 = vadd.xlane.f32.xlu0 %v2064_v55 }
0x1afa   : > { %v2066_v57 = vpop.xlane.xlu0 %2065 }
0x1afb   : > { %v2067_v59 = vmul.f32 0.03125, %v2066_v57 }
0x1afd   : > { %v2068_v61 = vadd.f32 1e-05, %v2067_v59 }
0x1aff   : > { %3506 = vrsqrt.f32 %v2068_v61 }
0x1b09   : > { %v3507_v58 = vpop.eup %3506 }
0x1b0a   : > { %v2070_v62 = vmul.f32 %v3507_v58, %v2058_v51 }
0x1b0c   : > { %v2071_v63 = vmul.f32 %v2070_v62, %v4519_v10 }
0x1b0e   : > { %v2072_v0 = vadd.f32 %v2071_v63, %v4521_v3 }
0x1b10   : > { %v2073_v1 = vpack.c.bf16 %v2072_v0, %v2072_v0 }
0x1b12   : > { %2075 = vrot.lane.b32.xlu0 %v2073_v1, %s4870_s1 }
0x1b84   : > { %v2076_v7 = vpop.permute.xlu0 %2075 }
0x1b85   : > { %3235 = vmatmul.mubr.msk.bf16.vlgmr.msra.gmra.mrb[48].mxu1 %vm553_vm0, %v2076_v7 }
0x1b86   : > { %3239 = vmatpush3.bf16.xpose.msra.mxu1 %v4364_v35  ;;  %3240 = vmatprep.mubr.msk.bf16.mxu1 %vm3913_vm1, %v3912_v36 }
0x1b87   : > { %3250 = vmatprep.subr.bf16.mxu1 %v3912_v36 }
0x1c58   : > { %v2114_v2 = vpop.f32.mrb[48].mxu1 }
0x1c59   : > { %v2115_v52 = vadd.f32 %v3529_v5, %v2114_v2  ;;  %v3236_v14 = vpop.f32.mrb[49].mxu1 }
0x1c5a   : > { %v2117_v10 = vpop.f32.mrb[50].mxu1 }
0x1c5b   : > { %v2120_v15 = vpack.c.bf16 %v2115_v52, %v2115_v52  ;;  %v3237_v3 = vpop.f32.mrb[51].mxu1 }
0x1c5d   : > { %3241 = vmatmul.mubr.msk.bf16.vlgmr.msra.gmra.mrb[52].mxu1 %vm553_vm0, %v2120_v15  ;;  %v2238_v35 = vrot.slane %v2120_v15, 2 }
0x1c5e   : > { %3251 = vmatpush3.bf16.xpose.msra.mxu1 %v4377_v56  ;;  %3252 = vmatprep.mubr.msk.bf16.mxu1 %vm3913_vm1, %v3912_v36 }
0x1c5f   : > { %3262 = vmatprep.subr.bf16.mxu1 %v3912_v36 }
0x1c65   : > { %3253 = vmatmul.mubr.msk.bf16.vlgmr.msra.gmra.mrb[56].mxu1 %vm553_vm0, %v2238_v35 }
0x1c66   : > { %3263 = vmatpush3.bf16.msra.mxu1 %v4422_v9  ;;  %3266 = vmatprep.mubr.msk.bf16.mxu1 %vm3913_vm1, %v3912_v36 }
0x1c67   : > { %3264 = vmatprep.subr.bf16.mxu1 %v3912_v36 }
0x1c6a   : > { %3265 = vmatpush3.bf16.msra.mxu1 %v4426_v11 }
0x1c6b   : > { %3278 = vmatprep.subr.bf16.mxu1 %v3912_v36 }
0x1d30   : > { %v2158_v56 = vpop.f32.mrb[52].mxu1 }
0x1d31   : > { %v2164_v16 = vsel %vm962_vm2, %v2158_v56, -inf  ;;  %v3242_v17 = vpop.f32.mrb[53].mxu1 }
0x1d32   : > { %v2165_v21 = vrot.slane %v2164_v16, 4  ;;  %v2161_v23 = vpop.f32.mrb[54].mxu1 }
0x1d33   : > { %v3243_v27 = vpop.f32.mrb[55].mxu1 }
0x1d34   : > { %v2166_v28 = vmax.f32 %v2164_v16, %v2165_v21  ;;  %v2404_v27 = vpack.c.bf16 %v4615_v45, %v4615_v45 }
0x1d36   : > { %v2167_v29 = vrot.slane %v2166_v28, 2 }
0x1d38   : > { %v2168_v30 = vmax.f32 %v2166_v28, %v2167_v29  ;;  %v2276_v9 = vpop.f32.mrb[56].mxu1 }
0x1d39   : > { %v2282_v42 = vsel %vm962_vm2, %v2276_v9, -inf  ;;  %v3254_v34 = vpop.f32.mrb[57].mxu1 }
0x1d3a   : > { %v2169_v13 = vrot.slane %v2168_v30, 1  ;;  %v2283_v37 = vrot.slane %v2282_v42, 4  ;;  %v2279_v38 = vpop.f32.mrb[58].mxu1 }
0x1d3b   : > { %v3255_v11 = vpop.f32.mrb[59].mxu1 }
0x1d3c   : > { %v2170_v18 = vmax.f32 %v2168_v30, %v2169_v13  ;;  %v2284_v39 = vmax.f32 %v2282_v42, %v2283_v37 }
0x1d3e   : > { %v2171_v40 = vsub.f32 %v2158_v56, %v2170_v18  ;;  %v2285_v41 = vrot.slane %v2284_v39, 2 }
0x1d40   : > { %v2172_v43 = vmul.f32 1.442695, %v2171_v40  ;;  %v2286_v44 = vmax.f32 %v2284_v39, %v2285_v41 }
0x1d42   : > { %3508 = vpow2.f32 %v2172_v43  ;;  %v2287_v47 = vrot.slane %v2286_v44, 1 }
0x1d44   : > { %v2288_v46 = vmax.f32 %v2286_v44, %v2287_v47 }
0x1d46   : > { %v2289_v48 = vsub.f32 %v2276_v9, %v2288_v46 }
0x1d48   : > { %v2290_v49 = vmul.f32 1.442695, %v2289_v48 }
0x1d4a   : > { %3510 = vpow2.f32 %v2290_v49 }
0x1d4c   : > { %v3509_v51 = vpop.eup %3508 }
0x1d4d   : > { %v2174_v53 = vsel %vm962_vm2, %v3509_v51, 0.0 }
0x1d4e   : > { %v2175_v54 = vrot.slane %v2174_v53, 4 }
0x1d50   : > { %v2176_v55 = vadd.f32 %v2175_v54, %v2174_v53 }
0x1d52   : > { %v2177_v57 = vrot.slane %v2176_v55, 2 }
0x1d54   : > { %v3511_v59 = vpop.eup %3510  ;;  %v2178_v61 = vadd.f32 %v2177_v57, %v2176_v55 }
0x1d55   : > { %v2292_v58 = vsel %vm962_vm2, %v3511_v59, 0.0 }
0x1d56   : > { %v2179_v62 = vrot.slane %v2178_v61, 1  ;;  %v2293_v63 = vrot.slane %v2292_v58, 4 }
0x1d58   : > { %v2294_v0 = vadd.f32 %v2293_v63, %v2292_v58  ;;  %v2180_v1 = vadd.f32 %v2179_v62, %v2178_v61 }
0x1d5a   : > { %v2295_v7 = vrot.slane %v2294_v0, 2  ;;  %3512 = vrcp.f32 %v2180_v1 }
0x1d5c   : > { %v2296_v2 = vadd.f32 %v2295_v7, %v2294_v0 }
0x1d5e   : > { %v2297_v5 = vrot.slane %v2296_v2, 1 }
0x1d60   : > { %v2298_v52 = vadd.f32 %v2297_v5, %v2296_v2 }
0x1d62   : > { %3514 = vrcp.f32 %v2298_v52 }
0x1d64   : > { %v3513_v14 = vpop.eup %3512 }
0x1d65   : > { %v2182_v10 = vmul.f32 %v3513_v14, %v3509_v51 }
0x1d67   : > { %v2183_v15 = vadd.f32 1e-08, %v2182_v10 }
0x1d69   : > { %v2187_v3 = vsel %vm962_vm2, %v2183_v15, 0.0  ;;  %v2184_v35 = vpack.c.bf16 %v2183_v15, %v2183_v15 }
0x1d6a   : > { %2188 = vadd.xlane.f32.xlu1 %v2187_v3 }
0x1d6b   : > { %2948 = vst.msk [vmem:[%s4394_s25 + $0x4] sm:$0x3] %vm984_vm3, %v2184_v35 }
0x1d6c   : > { %v3515_v56 = vpop.eup %3514 }
0x1d6d   : > { %v2300_v16 = vmul.f32 %v3515_v56, %v3511_v59 }
0x1d6f   : > { %v2301_v17 = vadd.f32 1e-08, %v2300_v16 }
0x1d71   : > { %v2305_v21 = vsel %vm962_vm2, %v2301_v17, 0.0  ;;  %v2302_v23 = vpack.c.bf16 %v2301_v17, %v2301_v17 }
0x1d72   : > { %2306 = vadd.xlane.f32.xlu1 %v2305_v21 }
0x1d73   : > { %2951 = vst.msk [vmem:[%s4394_s25 + $0xa] sm:$0x3] %vm984_vm3, %v2302_v23 }
0x1d83   : > { %2406 = vrot.lane.b32.xlu1 %v2404_v27, %s4870_s1 }
0x1df7   : > { %v2189_v28 = vpop.xlane.xlu1 %2188 }
0x1df8   : > { %3516 = vrcp.f32 %v2189_v28 }
0x1dff   : > { %v2307_v29 = vpop.xlane.xlu1 %2306 }
0x1e00   : > { %3518 = vrcp.f32 %v2307_v29 }
0x1e02   : > { %v3517_v30 = vpop.eup %3516 }
0x1e03   : > { %v2191_v9 = vmul.f32 %v3517_v30, %v2183_v15 }
0x1e05   : > { %v2193_v42 = vpack.c.bf16 %v2191_v9, %v2191_v9  ;;  %2192 = vst.msk [vmem:[%s4659_s12] sm:$0xf] %vm962_vm2, %v2191_v9 }
0x1e07   : > { %3247 = vmatmul.mubr.msk.bf16.vlgmr.msra.gmra.mrb[40].mxu0 %vm992_vm4, %v2193_v42 }
0x1e08   : > { %3257 = vmatpush3.bf16.msra.mxu0 %v4383_v60  ;;  %3258 = vmatprep.mubr.msk.bf16.mxu0 %vm3913_vm1, %v3912_v36  ;;  %v2407_v60 = vpop.permute.xlu1 %2406 }
0x1e09   : > { %3270 = vmatprep.subr.bf16.mxu0 %v3912_v36 }
0x1e0a   : > { %v3519_v34 = vpop.eup %3518 }
0x1e0b   : > { %v2309_v13 = vmul.f32 %v3519_v34, %v2301_v17 }
0x1e0d   : > { %v2312_v37 = vpack.c.bf16 %v2309_v13, %v2309_v13  ;;  %2952 = vst.msk [vmem:[%s4659_s12 + $0x4] sm:$0xf] %vm962_vm2, %v2309_v13  ;;  %s3917_s12 = smov [#allocation17]  }
0x1e0f   : > { %3259 = vmatmul.mubr.msk.bf16.vlgmr.msra.gmra.mrb[44].mxu0 %vm992_vm4, %v2312_v37 }
0x1e10   : > { %3271 = vmatpush3.bf16.msra.mxu0 %v4406_v4  ;;  %3274 = vmatprep.mubr.msk.bf16.mxu0 %vm3913_vm1, %v3912_v36 }
0x1e11   : > { %3272 = vmatprep.subr.bf16.mxu0 %v3912_v36 }
0x1e14   : > { %3273 = vmatpush3.bf16.msra.mxu0 %v4410_v6 }
0x1e15   : > { %3286 = vmatprep.subr.bf16.mxu0 %v3912_v36 }
0x1e17   : > { %3275 = vmatmul.mubr.msk.bf16.vlgmr.msra.gmra.mrb[48].mxu0 %vm553_vm0, %v2407_v60 }
0x1e18   : > { %3287 = vmatpush3.bf16.msra.mxu0 %v4463_v19  ;;  %3294 = vmatprep.mubr.msk.bf16.mxu0 %vm3913_vm1, %v3912_v36 }
0x1e19   : > { %3288 = vmatprep.subr.bf16.mxu0 %v3912_v36 }
0x1e1c   : > { %3289 = vmatpush3.bf16.msra.mxu0 %v4466_v20 }
0x1e1d   : > { %3290 = vmatprep.subr.bf16.mxu0 %v3912_v36 }
0x1e20   : > { %3291 = vmatpush3.bf16.msra.mxu0 %v4474_v25 }
0x1e21   : > { %3292 = vmatprep.subr.bf16.mxu0 %v3912_v36 }
0x1e24   : > { %3293 = vmatpush3.bf16.msra.mxu0 %v4489_v31 }
0x1eda   : > { %v2231_v4 = vpop.f32.mrb[40].mxu0 }
0x1edb   : > { %v3248_v6 = vpop.f32.mrb[41].mxu0 }
0x1edc   : > { %v2234_v38 = vpop.f32.mrb[42].mxu0 }
0x1edd   : > { %v3249_v11 = vpop.f32.mrb[43].mxu0 }
0x1ee2   : > { %v2350_v19 = vpop.f32.mrb[44].mxu0 }
0x1ee3   : > { %v2357_v18 = vrot.slane %v2350_v19, 4  ;;  %v3260_v39 = vpop.f32.mrb[45].mxu0 }
0x1ee4   : > { %v2353_v40 = vpop.f32.mrb[46].mxu0 }
0x1ee5   : > { %v2359_v41 = vsel %vm1159_vm5, %v2231_v4, %v2357_v18  ;;  %v3261_v43 = vpop.f32.mrb[47].mxu0 }
0x1ee6   : > { %v2360_v20 = vpack.c.bf16 %v2359_v41, %v2359_v41 }
0x1ee8   : > { %3267 = vmatmul.mubr.msk.bf16.vlgmr.msra.gmra.mrb[60].mxu1 %vm553_vm0, %v2360_v20 }
0x1ee9   : > { %3279 = vmatpush3.bf16.msra.mxu1 %v4455_v8  ;;  %3282 = vmatprep.mubr.msk.bf16.mxu1 %vm3913_vm1, %v3912_v36 }
0x1eea   : > { %v2445_v25 = vpop.f32.mrb[48].mxu0  ;;  %3280 = vmatprep.subr.bf16.mxu1 %v3912_v36 }
0x1eeb   : > { %v2446_v31 = vadd.f32 %v4432_v26, %v2445_v25  ;;  %v3276_v44 = vpop.f32.mrb[49].mxu0 }
0x1eec   : > { %v2448_v47 = vpop.f32.mrb[50].mxu0 }
0x1eed   : > { %2459 = vrot.lane.b32.xlu0 %v2446_v31, %s4872_s21  ;;  %v3277_v46 = vpop.f32.mrb[51].mxu0  ;;  %3281 = vmatpush3.bf16.msra.mxu1 %v4458_v12 }
0x1f5f   : > { %v2460_v59 = vpop.permute.xlu0 %2459 }
0x1fbb   : > { %v2398_v48 = vpop.f32.mrb[60].mxu1 }
0x1fbc   : > { %v2399_v49 = vadd.f32 %v4438_v32, %v2398_v48  ;;  %v3268_v51 = vpop.f32.mrb[61].mxu1 }
0x1fbd   : > { %v2401_v8 = vpop.f32.mrb[62].mxu1 }
0x1fbe   : > { %v2451_v53 = vadd.f32 %v2446_v31, %v2399_v49  ;;  %v3269_v54 = vpop.f32.mrb[63].mxu1 }
0x1fc0   : > { %v2956_v55 = vmul.f32 -1.442695, %v2451_v53 }
0x1fc2   : > { %3520 = vpow2.f32 %v2956_v55 }
0x1fcc   : > { %v3521_v57 = vpop.eup %3520 }
0x1fcd   : > { %v2455_v36 = vadd.f32 1.0, %v3521_v57 }
0x1fcf   : > { %3522 = vrcp.f32 %v2455_v36 }
0x1fd9   : > { %v3523_v26 = vpop.eup %3522 }
0x1fda   : > { %v2462_v61 = vmul.f32 %v3523_v26, %v2460_v59  ;;  %v2469_v32 = vsub.f32 1.0, %v3523_v26  ;;  %v2475_v0 = vmul.f32 %v3523_v26, %v4615_v45 }
0x1fdc   : > { %2464 = vrot.lane.b32.xlu1 %v2462_v61, %s4872_s21 }
0x204e   : > { %v2465_v58 = vpop.permute.xlu1 %2464 }
0x204f   : > { %v2467_v62 = vadd.f32 %v2465_v58, %v2399_v49 }
0x2051   : > { %3524 = vtanh.f32 %v2467_v62 }
0x205b   : > { %v3525_v12 = vpop.eup %3524 }
0x205c   : > { %2471 = vrot.lane.b32.xlu0 %v3525_v12, %s4870_s1 }
0x20ce   : > { %v2472_v63 = vpop.permute.xlu0 %2471 }
0x20cf   : > { %v2474_v1 = vmul.f32 %v2472_v63, %v2469_v32 }
0x20d1   : > { %v4700_v7 = vadd.f32 %v2475_v0, %v2474_v1 }
0x20d3   : > { %2478 = vrot.lane.b32.xlu1 %v4700_v7, %s4870_s1 }
0x2145   : > { %v2479_v2 = vpop.permute.xlu1 %2478 }
0x2146   : > { %v2481_v5 = vsel %vm553_vm0, %v2479_v2, 0.0 }
0x2147   : > { %2482 = vadd.xlane.f32.xlu0 %v2481_v5 }
0x21d4   : > { %v2483_v52 = vpop.xlane.xlu0 %2482 }
0x21d5   : > { %v2484_v14 = vmul.f32 0.03125, %v2483_v52 }
0x21d7   : > { %v2485_v10 = vsub.f32 %v4700_v7, %v2484_v14 }
0x21d9   : > { %v2486_v15 = vmul.f32 %v2485_v10, %v2485_v10 }
0x21db   : > { %2488 = vrot.lane.b32.xlu1 %v2486_v15, %s4870_s1 }
0x224d   : > { %v2489_v3 = vpop.permute.xlu1 %2488 }
0x224e   : > { %v2491_v45 = vsel %vm553_vm0, %v2489_v3, 0.0 }
0x224f   : > { %2492 = vadd.xlane.f32.xlu1 %v2491_v45 }
0x22dc   : > { %v2493_v35 = vpop.xlane.xlu1 %2492 }
0x22dd   : > { %v2494_v56 = vmul.f32 0.03125, %v2493_v35 }
0x22df   : > { %v2495_v16 = vadd.f32 1e-05, %v2494_v56 }
0x22e1   : > { %3526 = vrsqrt.f32 %v2495_v16 }
0x22eb   : > { %v3527_v17 = vpop.eup %3526 }
0x22ec   : > { %v2497_v21 = vmul.f32 %v3527_v17, %v2485_v10 }
0x22ee   : > { %v2498_v23 = vmul.f32 %v2497_v21, %v4469_v22 }
0x22f0   : > { %v2499_v27 = vadd.f32 %v2498_v23, %v4471_v24 }
0x22f2   : > { %v2500_v28 = vpack.c.bf16 %v2499_v27, %v2499_v27 }
0x22f4   : > { %2502 = vrot.lane.b32.xlu0 %v2500_v28, %s4870_s1  ;;  %s3756_s1 = scalar_lea.vmem %s4716_s23, 128 }
0x22f5   : > { %p3757_p5 = scmp.ne.s32.totalorder %s4716_s23, %s3756_s1 }
0x22f7   : > { %p3758_p4 = pnand %p3757_p5, %p4904_p7 }
0x22f9   : > { %p3759_p1 = pneg %p3758_p4 }
0x2366   : > { %v2503_v29 = vpop.permute.xlu0 %2502 }
0x2367   : > { %3283 = vmatmul.mubr.msk.bf16.vlgmr.msra.gmra.mrb[64].mxu1 %vm553_vm0, %v2503_v29 }
0x243a   : > { %v2541_v30 = vpop.f32.mrb[64].mxu1 }
0x243b   : > { %v2542_v9 = vadd.f32 %v4493_v33, %v2541_v30  ;;  %v3284_v42 = vpop.f32.mrb[65].mxu1 }
0x243c   : > { %v2544_v34 = vpop.f32.mrb[66].mxu1 }
0x243d   : > { %v2547_v13 = vmax.f32 %v2542_v9, 0.0  ;;  %v3285_v37 = vpop.f32.mrb[67].mxu1 }
0x243f   : > { %v2548_v22 = vpack.c.bf16 %v2547_v13, %v2547_v13 }
0x2441   : > { %3295 = vmatmul.mubr.msk.bf16.vlgmr.msra.gmra.mrb[52].mxu0 %vm1439_vm6, %v2548_v22 }
0x2514   : > { %v2586_v24 = vpop.f32.mrb[52].mxu0 }
0x2515   : > { %2593 = vrot.lane.b32.xlu1 %v2586_v24, %s4871_s30  ;;  %v3296_v60 = vpop.f32.mrb[53].mxu0  ;;  %s3760_s30 = sshll.u32 %s3917_s12, 4  ;;  %s3761_s30 = int_to_ptr.vmem [resolvable:$false] %s3760_s30 }
0x2516   : > { %v2589_v4 = vpop.f32.mrb[54].mxu0  ;;  %s3762_s21 = scalar_lea.vmem %s3761_s30, 256  ;;  %p3763_p3 = scmp.lt.s32.totalorder %s4716_s23, %s3761_s30 }
0x2517   : > { %v3297_v6 = vpop.f32.mrb[55].mxu0  ;;  %p3764_p8 = scmp.lt.s32.totalorder %s3762_s21, %s3756_s1 }
0x2519   : > { %p3765_p6 = por %p3764_p8, %p3763_p3 }
0x251b   : > { %p3766_p0 = pnand %p3765_p6, %p3759_p1 }
0x251d   : > { %3769 = shalt.err (!%p3766_p0)
}
0x251e   : > { %s3770_s28 = scalar_lea.hbm %s4725_s20, 128  ;;  %s3774_s12 = scalar_lea.hbm %s4857_s9, 256 }
0x251f   : > { %p3771_p2 = scmp.ne.s32.totalorder %s4725_s20, %s3770_s28  ;;  %p3775_p12 = scmp.lt.u32.totalorder %s4725_s20, %s4857_s9 }
0x2520   : > { %p3776_p11 = scmp.lt.u32.totalorder %s3774_s12, %s3770_s28  ;;  %p3778_p5 = scmp.lt.u32.totalorder %s3770_s28, %s4725_s20 }
0x2521   : > { %p3772_p9 = pnand %p3771_p2, %p4904_p7 }
0x2522   : > { %p3777_p13 = por %p3776_p11, %p3775_p12 }
0x2523   : > { %p3773_p10 = pneg %p3772_p9 }
0x2524   : > { %p3779_p4 = por %p3778_p5, %p3777_p13 }
0x2526   : > { %p3780_p1 = pnand %p3779_p4, %p3773_p10 }
0x2528   : > { %3783 = shalt.err (!%p3780_p1)
}
0x2529   : > { %s3918_s21 = smov 4   ;;  %s4905_s1 = smov 64  }
0x252a   : > { %3331 = dma.vmem_to_hbm [thread:$0]  (%p4904_p7), %s4716_s23, 128, %s4725_s20, %s4727_s17, %s4905_s1, %s4905_s1, %s3918_s21  }
0x252b   : > { %s3299_s26 = smul.u32 192, %s3998_s19  ;;  %s2664_s3 = sshll.u32 %s4394_s25, 4  ;;  %s4761_s3 = int_to_ptr.vmem [resolvable:$true] %s2664_s3 }
0x252c   : > { %s3784_s30 = scalar_lea.vmem %s4761_s3, 192  ;;  %s3919_s0 = smov [#allocation19]  }
0x252d   : > { %s4759_s12 = scalar_lea.hbm %s4858_s10, %s3299_s26  ;;  %p3785_p3 = scmp.ne.s32.totalorder %s4761_s3, %s3784_s30 }
0x252e   : > { %s3788_s2 = sshll.u32 %s3919_s0, 4  ;;  %s3789_s2 = int_to_ptr.vmem [resolvable:$false] %s3788_s2 }
0x252f   : > { %p3786_p8 = pnand %p3785_p3, %p4904_p7  ;;  %s3790_s23 = scalar_lea.vmem %s3789_s2, 384 }
0x2530   : > { %p3791_p0 = scmp.lt.s32.totalorder %s4761_s3, %s3789_s2  ;;  %p3792_p2 = scmp.lt.s32.totalorder %s3790_s23, %s3784_s30 }
0x2531   : > { %p3787_p6 = pneg %p3786_p8 }
0x2532   : > { %p3793_p9 = por %p3792_p2, %p3791_p0 }
0x2534   : > { %p3794_p10 = pnand %p3793_p9, %p3787_p6 }
0x2536   : > { %3797 = shalt.err (!%p3794_p10)
}
0x2537   : > { %s3798_s25 = scalar_lea.hbm %s4759_s12, 192  ;;  %s3802_s0 = scalar_lea.hbm %s4858_s10, 384 }
0x2538   : > { %p3799_p12 = scmp.ne.s32.totalorder %s4759_s12, %s3798_s25  ;;  %p3803_p5 = scmp.lt.u32.totalorder %s4759_s12, %s4858_s10 }
0x2539   : > { %p3804_p4 = scmp.lt.u32.totalorder %s3802_s0, %s3798_s25  ;;  %p3806_p3 = scmp.lt.u32.totalorder %s3798_s25, %s4759_s12 }
0x253a   : > { %p3800_p11 = pnand %p3799_p12, %p4904_p7 }
0x253b   : > { %p3805_p1 = por %p3804_p4, %p3803_p5 }
0x253c   : > { %p3801_p13 = pneg %p3800_p11 }
0x253d   : > { %p3807_p8 = por %p3806_p3, %p3805_p1 }
0x253f   : > { %p3808_p6 = pnand %p3807_p8, %p3801_p13 }
0x2541   : > { %3811 = shalt.err (!%p3808_p6)
}
0x2542   : > { %s3920_s28 = smov 2   ;;  %s4906_s30 = smov 32   ;;  %vm2602_vm7 = vcmask 257024   ;;  %vm2605_vm8 = vcmask 261124  }
0x2543   : > { %3332 = dma.vmem_to_hbm [thread:$0]  (%p4904_p7), %s4761_s3, 192, %s4759_s12, %s4727_s17, %s4906_s30, %s4906_s30, %s3920_s28  }
0x2544   : > { %s4907_s23 = smov 96   ;;  %s4908_s25 = sshll.u32 %s4267_s27, 3 }
0x2545   : > { %s482_s20 = scalar_lea.vmem [#allocation16], %s4908_s25  ;;  %s4909_s0 = sshll.u32 %s3998_s19, 7 }
0x2546   : > { %s2631_s26 = sshll.u32 %s482_s20, 4  ;;  %s4799_s17 = scalar_lea.hbm %s4856_s8, %s4909_s0  ;;  %s4792_s26 = int_to_ptr.vmem [resolvable:$true] %s2631_s26 }
0x2547   : > { %s2608_s3 = scalar_lea.sflag [#allocation4], %s4267_s27  ;;  %s3812_s12 = scalar_lea.vmem %s4792_s26, 128 }
0x2548   : > { %p3813_p0 = scmp.ne.s32.totalorder %s4792_s26, %s3812_s12  ;;  %s3921_s28 = smov [#allocation16]  }
0x2549   : > { %s3816_s30 = sshll.u32 %s3921_s28, 4  ;;  %s3817_s30 = int_to_ptr.vmem [resolvable:$false] %s3816_s30 }
0x254a   : > { %p3814_p2 = pnand %p3813_p0, %p4904_p7  ;;  %s3818_s19 = scalar_lea.vmem %s3817_s30, 256 }
0x254b   : > { %p3819_p10 = scmp.lt.s32.totalorder %s4792_s26, %s3817_s30  ;;  %p3820_p12 = scmp.lt.s32.totalorder %s3818_s19, %s3812_s12 }
0x254c   : > { %p3815_p9 = pneg %p3814_p2 }
0x254d   : > { %p3821_p11 = por %p3820_p12, %p3819_p10 }
0x254f   : > { %p3822_p13 = pnand %p3821_p11, %p3815_p9 }
0x2587   : > { %v2594_v33 = vpop.permute.xlu1 %2593 }
0x2588   : > { %v2596_v38 = vadd.f32 %v2594_v33, %v4700_v7 }
0x258a   : > { %v2597_v11 = vadd.f32 %v2596_v38, %v4503_v50 }
0x258c   : > { %2599 = vrot.lane.b32.xlu0 %v2597_v11, %s4907_s23 }
0x25fe   : > { %v2600_v19 = vpop.permute.xlu0 %2599 }
0x25ff   : > { %2603 = vst.msk [vmem:[%s482_s20] sm:$0xf] %vm2602_vm7, %v2600_v19 }
0x2600   : > { %2959 = vst.msk [vmem:[%s482_s20] sm:$0xf0] %vm2605_vm8, %v2600_v19 }
0x2601   : > { %3825 = shalt.err (!%p3822_p13)
}
0x2602   : > { %s3826_s23 = scalar_lea.hbm %s4799_s17, 128  ;;  %s3830_s0 = scalar_lea.hbm %s4856_s8, 256 }
0x2603   : > { %p3827_p5 = scmp.ne.s32.totalorder %s4799_s17, %s3826_s23  ;;  %p3831_p3 = scmp.lt.u32.totalorder %s4799_s17, %s4856_s8 }
0x2604   : > { %p3832_p8 = scmp.lt.u32.totalorder %s3830_s0, %s3826_s23  ;;  %p3834_p0 = scmp.lt.u32.totalorder %s3826_s23, %s4799_s17 }
0x2605   : > { %p3828_p4 = pnand %p3827_p5, %p4904_p7 }
0x2606   : > { %p3833_p6 = por %p3832_p8, %p3831_p3 }
0x2607   : > { %p3829_p1 = pneg %p3828_p4 }
0x2608   : > { %p3835_p2 = por %p3834_p0, %p3833_p6 }
0x260a   : > { %p3836_p9 = pnand %p3835_p2, %p3829_p1 }
0x260c   : > { %3839 = shalt.err (!%p3836_p9)
}
0x260d   : > { %3330 = dma.vmem_to_hbm [thread:$0]  (%p4904_p7), %s4792_s26, 128, %s4799_s17, %s2608_s3, %s4905_s1, %s4905_s1, %s3918_s21  }
0x260e PF: > { %s2679_s12 = sand.u32 1, %s3886_s13   ;;  %p4910_p10 = scmp.ne.s32.totalorder %s4890_s18, 0 }
0x260f   : > { %p4911_p12 = scmp.ge.s32.totalorder %s3898_s16, 2  ;;  %s2680_s28 = scalar_lea.sflag [#allocation4], %s2679_s12 }
0x2611   : > { %p3363_p11 = pnand %p4911_p12, %p4910_p10 }
0x2613   : > { %3877 = dma.done.wait (!%p3363_p11), %s2680_s28, 128  }
0x2614   : > { %3879 = vsyncadd (!%p3363_p11), %s2680_s28, 4294967168  ;;  %s4912_s24 = sadd.s32 4294967294, %s3898_s16  }
0x2615   : > { %s2688_s30 = sand.u32 1, %s4912_s24  }
0x2616   : > { %s2689_s19 = scalar_lea.sflag [#allocation18], %s2688_s30 }
0x2617   : > { %3881 = dma.done.wait (!%p3363_p11), %s2689_s19, 320  }
0x2618   : > { %3883 = vsyncadd (!%p3363_p11), %s2689_s19, 4294966976  ;;  %p31_p7 = scmp.ge.s32.totalorder %s4189_s11, 4   ;;  %s4913_s13 = smov %s3890_s14 }
0x2619   : > { %s4914_s14 = smov %s3894_s15  ;;  %s4915_s15 = smov %s4201_s22 }
0x261a   : > { %s4916_s16 = smov %s4189_s11  ;;  %33 = sbr.rel (!%p31_p7) target bundleno = 16 (0x10), region = 166 }
0x2621   :  { %2703 = vsyncpa [#allocation3], 1 }
0x2622   :  { %2705 = vsyncpa [#allocation3 + $0x1], 1 }
0x2623   :  { %2706 = vsyncpa [#allocation6], 1 }
0x2624   :  { %2707 = vsyncpa [#allocation9], 1 }
0x2625   :  { %2708 = vsyncpa [#allocation12], 1 }
0x2626   :  { %2709 = vsyncpa [#allocation15], 1 }
0x2627   :  { %2710 = vsyncpa [#allocation4], 1 }
0x2628   :  { %2712 = vsyncpa [#allocation4 + $0x1], 1 }
0x2629   :  { %2713 = vsyncpa [#allocation18], 1 }
0x262a   :  { %2715 = vsyncpa [#allocation18 + $0x1], 1 }

</bundles_post_ra>
